<compile_context>
chip_gen: v5e
topology: v5e:2x2
jax: 0.10.0
libtpu: 0.0.40
codegen_flags: <defaults>
</compile_context>

<pallas_src>
import functools

import numpy as np
import jax
import jax.numpy as jnp
from jax.experimental import pallas as pl
from jax.experimental.pallas import tpu as pltpu

_HI = jax.lax.Precision.HIGHEST


# ----------------------------------------------------------------------------
# Constant-matrix builders (run once at parameter-prep time, outside the kernel)
# ----------------------------------------------------------------------------
def _tap_placement(n_in, n_out, stride):
    """P[d, i, o] = 1 iff i == stride*o + d - 1 and 0 <= i < n_in (k=3, pad=1)."""
    P = np.zeros((3, n_in, n_out), np.float32)
    for d in range(3):
        for o in range(n_out):
            i = stride * o + d - 1
            if 0 <= i < n_in:
                P[d, i, o] = 1.0
    return P


def _pool1d(n_in):
    """1-D avg-pool (k=3, s=2, p=1, count_include_pad=True) matrix (n_out, n_in)."""
    n_out = (n_in - 1) // 2 + 1
    M = np.zeros((n_out, n_in), np.float32)
    for o in range(n_out):
        for d in range(3):
            i = 2 * o + d - 1
            if 0 <= i < n_in:
                M[o, i] = 1.0 / 3.0
    return M


def _bilinear1d(n_in, scale):
    """1-D bilinear interp matrix matching F.interpolate(align_corners=False)."""
    n_out = n_in * scale
    L = np.zeros((n_out, n_in), np.float32)
    for o in range(n_out):
        src = max((o + 0.5) / scale - 0.5, 0.0)
        i0 = min(int(np.floor(src)), n_in - 1)
        lam = src - i0
        i1 = min(i0 + 1, n_in - 1)
        L[o, i0] += 1.0 - lam
        L[o, i1] += lam
    return L


def _pad_to(a, rows, cols):
    out = np.zeros((rows, cols), np.float32)
    out[: a.shape[0], : a.shape[1]] = a
    return out


def _sem_pad_rows(hs):
    """Padded rows per semantic image: multiple of 8 with >= 1 zero pad row."""
    return ((hs + 8) // 8) * 8


# ----------------------------------------------------------------------------
# Weight-dependent right-multiply (W*C direction) matrix builders
# ----------------------------------------------------------------------------
def _dense_B(w_oihw, w_in, w_out, stride):
    """Dense 3x3 conv, torch (Co,Ci,3,3) -> per-dy banded (w_in*Ci, w_out*Co)."""
    w4 = jnp.transpose(w_oihw, (2, 3, 1, 0))                    # (dy, dx, Ci, Co)
    Ci, Co = w4.shape[2], w4.shape[3]
    P = _tap_placement(w_in, w_out, stride)
    B = jnp.einsum('xiw,yxcd->yicwd', P, w4, precision=_HI)
    return B.reshape(3, w_in * Ci, w_out * Co)


def _lane_expand(m_oi, C):
    """1-D spatial matrix (n_out, n_in) -> right-multiply (n_in*C, n_out*C)."""
    m = np.asarray(m_oi, np.float32)
    B = np.einsum('oi,ce->icoe', m, np.eye(C, dtype=np.float32))
    return B.reshape(m.shape[1] * C, m.shape[0] * C)


def _bias_row(b, w_out):
    return jnp.tile(b, (w_out,)).reshape(1, -1).astype(jnp.float32)


def _compose_dw_pw(dw_w, dw_b, pw_w, pw_b):
    """(depthwise 3x3, bias) followed by (pointwise 1x1, bias) -> dense 3x3, bias."""
    W_pw = pw_w[:, :, 0, 0]                                     # (Co, Ci)
    w_eff = jnp.einsum('oc,ckl->ockl', W_pw, dw_w[:, 0])        # (Co, Ci, 3, 3)
    b_eff = jnp.dot(W_pw, dw_b, precision=_HI) + pw_b
    return w_eff, b_eff


# ----------------------------------------------------------------------------
# Deterministic parameter construction (BN folded, RepConvN branches fused)
# ----------------------------------------------------------------------------
def _bn_fold(w, gamma, beta, mean, var, eps=1e-5):
    scale = gamma / jnp.sqrt(var + eps)
    return w * scale[:, None, None, None], beta - mean * scale


def _bn_params(key, c):
    k = jax.random.split(key, 4)
    gamma = 1.0 + 0.1 * jax.random.normal(k[0], (c,), jnp.float32)
    beta = 0.1 * jax.random.normal(k[1], (c,), jnp.float32)
    mean = 0.1 * jax.random.normal(k[2], (c,), jnp.float32)
    var = 1.0 + 0.1 * jax.random.uniform(k[3], (c,), jnp.float32)
    return gamma, beta, mean, var


def init_repconvn(key, c_in, c_out, groups=1):
    """RepConvN = (conv3x3+BN) + (conv1x1+BN); fused into one 3x3 conv + bias."""
    k = jax.random.split(key, 4)
    cpg = c_in // groups
    w3 = 0.1 * jax.random.normal(k[0], (c_out, cpg, 3, 3), jnp.float32)
    w1 = 0.1 * jax.random.normal(k[1], (c_out, cpg, 1, 1), jnp.float32)
    w3f, b3f = _bn_fold(w3, *_bn_params(k[2], c_out))
    w1f, b1f = _bn_fold(w1, *_bn_params(k[3], c_out))
    w1_pad = jnp.zeros_like(w3f).at[:, :, 1, 1].set(w1f[:, :, 0, 0])
    return w3f + w1_pad, b3f + b1f


def init_convnormact(key, c_in, c_out):
    """ConvNormAct = conv1x1 + BN (+ReLU at call site); BN folded."""
    k = jax.random.split(key, 2)
    w = 0.1 * jax.random.normal(k[0], (c_out, c_in, 1, 1), jnp.float32)
    return _bn_fold(w, *_bn_params(k[1], c_out))


def make_params(key, C):
    k = jax.random.split(key, 7)
    p = {}
    p["db_dw_w"], p["db_dw_b"] = init_repconvn(k[0], C, C, groups=C)
    p["db_pw_w"], p["db_pw_b"] = init_convnormact(k[1], C, C)
    p["db_conv2_w"], p["db_conv2_b"] = init_repconvn(k[2], C, C)
    p["sb_dw_w"], p["sb_dw_b"] = init_repconvn(k[3], C, C, groups=C)
    p["sb_pw_w"], p["sb_pw_b"] = init_convnormact(k[4], C, C)
    p["sb_conv_w"], p["sb_conv_b"] = init_repconvn(k[5], C, C)
    p["proj_w"], p["proj_b"] = init_repconvn(k[6], C, C)
    return p


# ----------------------------------------------------------------------------
# Operand preparation: compose stages offline (f32), cast MXU operands to bf16
# ----------------------------------------------------------------------------
def prepare_operands(p, H, W, Hs, Ws, C, imgs_per_step):
    B = imgs_per_step
    hsp = _sem_pad_rows(Hs)
    Hc2 = (H - 1) // 2 + 1
    Wc2 = (W - 1) // 2 + 1
    WC, WsC = W * C, Ws * C
    bf16 = jnp.bfloat16
    ops = {}

    # ---- detail main path: dw3x3 -> pw1x1 composed into ONE dense 3x3 ----
    w_dm, b_dm = _compose_dw_pw(p["db_dw_w"], p["db_dw_b"], p["db_pw_w"], p["db_pw_b"])
    b_main = _dense_B(w_dm, W, W, 1)                           # (3, WC, WC)

    # ---- detail aux path: conv3x3/s2 composed (along W) with the 3x3/s2 avg-pool
    b_c2 = _dense_B(p["db_conv2_w"], W, Wc2, 2)                # (3, WC, Wc2*C)
    p_w = _lane_expand(_pool1d(Wc2), C)                        # (Wc2*C, WsC)
    b_small = jnp.einsum('ykn,nm->ykm', b_c2, p_w, precision=_HI)   # (3, WC, WsC)

    ops["b_det_cat"] = jnp.concatenate(
        [b_main[0], b_main[1], b_main[2], b_small[0], b_small[1], b_small[2]],
        axis=1).astype(bf16)                                   # (WC, 3*WC + 3*WsC)
    ops["bias_main"] = _bias_row(b_dm, W)                      # (1, WC) f32

    # H direction of the aux path: stride-2 row-select composed with the H avg-pool,
    # zero-padded to hsp rows per image, block-diagonal over the B images of a step.
    a_c2 = np.transpose(_tap_placement(H, Hc2, 2), (0, 2, 1))  # (3, Hc2, H)
    p_h = _pool1d(Hc2)                                         # (Hs, Hc2)
    l_img = np.einsum('oi,yih->yoh', p_h, a_c2)                # (3, Hs, H)
    l_bd = np.zeros((3, hsp * B, H * B), np.float32)
    for b in range(B):
        l_bd[:, b * hsp:b * hsp + Hs, b * H:(b + 1) * H] = l_img
    ops["l_small"] = jnp.asarray(l_bd).astype(bf16)            # (3, hsp*B, H*B)

    # Pooled conv2 bias (count_include_pad makes it row/col dependent); pad rows zero.
    c2_row = np.tile(np.asarray(p["db_conv2_b"], np.float32), Wc2)[None, :]  # (1, Wc2*C)
    small_row = c2_row @ p_w                                                  # (1, WsC)
    rowsum = p_h.sum(axis=1)                                                  # (Hs,)
    bias_small = np.zeros((hsp * B, WsC), np.float32)
    for b in range(B):
        bias_small[b * hsp:b * hsp + Hs, :] = rowsum[:, None] * small_row
    ops["bias_small"] = jnp.asarray(bias_small)                               # (hsp*B, WsC)

    # ---- semantic branch: gate conv3x3 and composed dw->pw conv, concatenated ----
    b_g = _dense_B(p["sb_conv_w"], Ws, Ws, 1)                  # (3, WsC, WsC)
    w_sm, b_sm = _compose_dw_pw(p["sb_dw_w"], p["sb_dw_b"], p["sb_pw_w"], p["sb_pw_b"])
    b_m = _dense_B(w_sm, Ws, Ws, 1)                            # (3, WsC, WsC)
    ops["b_sem_cat"] = jnp.concatenate(
        [b_g[0], b_g[1], b_g[2], b_m[0], b_m[1], b_m[2]], axis=1).astype(bf16)
    ops["bias_g"] = _bias_row(p["sb_conv_b"], Ws)              # (1, WsC) f32
    ops["bias_m"] = _bias_row(b_sm, Ws)                        # (1, WsC) f32

    # ---- fused x4 bilinear upsample for the (gate, main) pair ----
    u_h = _pad_to(_bilinear1d(Hs, 4), H, hsp)                  # (H, hsp), zero pad cols
    u_h_bd = np.zeros((H * B, hsp * B), np.float32)
    for b in range(B):
        u_h_bd[b * H:(b + 1) * H, b * hsp:(b + 1) * hsp] = u_h
    ops["u_h"] = jnp.asarray(u_h_bd).astype(bf16)              # (H*B, hsp*B)
    u_w = _lane_expand(_bilinear1d(Ws, 4), C)                  # (WsC, WC)
    u_w2 = np.zeros((2 * WsC, 2 * WC), np.float32)
    u_w2[:WsC, :WC] = u_w
    u_w2[WsC:, WC:] = u_w
    ops["u_w2"] = jnp.asarray(u_w2).astype(bf16)               # (2*WsC, 2*WC)

    # ---- projection conv3x3 (+SiLU in-kernel) ----
    b_p = _dense_B(p["proj_w"], W, W, 1)
    ops["b_proj_cat"] = jnp.concatenate([b_p[0], b_p[1], b_p[2]], axis=1).astype(bf16)
    ops["bias_proj"] = _bias_row(p["proj_b"], W)               # (1, WC) f32
    return ops


# ----------------------------------------------------------------------------
# The single fused Pallas kernel
# ----------------------------------------------------------------------------
_W_NAMES = ("b_det_cat", "bias_main", "l_small", "bias_small",
            "b_sem_cat", "bias_g", "bias_m",
            "u_h", "u_w2", "b_proj_cat", "bias_proj")


def _bga_kernel(db_ref, sb_ref, *refs, H):
    w = dict(zip(_W_NAMES, refs))
    out_ref, dbout_ref = refs[len(_W_NAMES):]
    f32, bf16 = jnp.float32, jnp.bfloat16

    Md, WC = db_ref.shape          # (B*H, W*C)
    Ms, WsC = sb_ref.shape         # (B*hsp, Ws*C)

    def mm(a, b):                  # bf16 x bf16 -> f32 accumulate (MXU)
        return jnp.dot(a, b, preferred_element_type=f32)

    # Image-boundary keep masks for the full-res rows: the rolls below wrap across
    # image boundaries inside the batched block, so the dy=0/dy=2 taps must be
    # zeroed on the first/last row of every image.
    row = jax.lax.broadcasted_iota(jnp.int32, (Md, 1), 0)
    keep_top = (row % H != 0).astype(f32)
    keep_bot = (row % H != H - 1).astype(f32)

    def conv_rows(y0, y1, y2, bias, keep_t=None, keep_b=None):
        """sum_dy rowshift_{dy-1}(y_dy) + bias; row shifts on the XLU via roll."""
        down = pltpu.roll(y0, 1, axis=0)                       # out[o] <- y0[o-1]
        up = pltpu.roll(y2, y2.shape[0] - 1, axis=0)           # out[o] <- y2[o+1]
        if keep_t is not None:
            down = down * keep_t
            up = up * keep_b
        return down + y1 + up + bias

    D = db_ref[...]                                            # (Md, WC)  bf16
    S = sb_ref[...]                                            # (Ms, WsC) bf16 (pad rows 0)

    # ---- detail branch: ONE wide MXU push (main dw+pw conv and conv2+pool aux) ----
    P = mm(D, w["b_det_cat"][...])                             # (Md, 3*WC + 3*WsC) f32
    db_main = jnp.maximum(
        conv_rows(P[:, 0:WC], P[:, WC:2 * WC], P[:, 2 * WC:3 * WC],
                  w["bias_main"][...], keep_top, keep_bot), 0.0)   # (Md, WC)

    off = 3 * WC
    db_small = w["bias_small"][...]                            # (Ms, WsC) f32, pad rows 0
    for dy in range(3):
        t = P[:, off + dy * WsC: off + (dy + 1) * WsC].astype(bf16)
        db_small = db_small + mm(w["l_small"][dy], t)          # H-direction conv2+pool

    # ---- semantic branch: ONE wide MXU push (gate conv + composed dw+pw conv).
    #      No boundary masks: per-image zero pad rows of S supply the zero taps. ----
    Q = mm(S, w["b_sem_cat"][...])                             # (Ms, 6*WsC) f32
    g = jax.nn.sigmoid(
        conv_rows(Q[:, 0:WsC], Q[:, WsC:2 * WsC], Q[:, 2 * WsC:3 * WsC],
                  w["bias_g"][...]))
    m = jnp.maximum(
        conv_rows(Q[:, 3 * WsC:4 * WsC], Q[:, 4 * WsC:5 * WsC], Q[:, 5 * WsC:6 * WsC],
                  w["bias_m"][...]), 0.0)
    m = jax.nn.sigmoid(m) * db_small                           # pad rows stay exactly 0

    # ---- fused x4 bilinear upsample of (g, m): one W matmul + one H matmul ----
    gm = jnp.concatenate([g.astype(bf16), m.astype(bf16)], axis=1)   # (Ms, 2*WsC)
    up = mm(w["u_h"][...], mm(gm, w["u_w2"][...]).astype(bf16))      # (Md, 2*WC)
    g_up = up[:, :WC]
    m_up = up[:, WC:]

    # ---- combine + projection conv (SiLU) ----
    db_out = db_main * g_up
    R = mm((db_out + m_up).astype(bf16), w["b_proj_cat"][...])       # (Md, 3*WC)
    o = conv_rows(R[:, 0:WC], R[:, WC:2 * WC], R[:, 2 * WC:3 * WC],
                  w["bias_proj"][...], keep_top, keep_bot)
    o = o * jax.nn.sigmoid(o)

    out_ref[...] = o.astype(out_ref.dtype)
    dbout_ref[...] = db_out.astype(dbout_ref.dtype)


def bga_pallas(operands, db, sb, imgs_per_step=1):
    """Fused forward of BilateralGuidedAggregation.  db/sb are NHWC float32."""
    N, H, W, C = db.shape
    _, Hs, Ws, _ = sb.shape
    assert Hs * 4 == H and Ws * 4 == W
    assert (W * C) % 128 == 0 and (Ws * C) % 128 == 0
    B = imgs_per_step
    assert N % B == 0, "imgs_per_step must divide the batch"
    assert (B * H) % 8 == 0
    hsp = _sem_pad_rows(Hs)
    G = N // B
    Md, Ms = B * H, B * hsp
    WC, WsC = W * C, Ws * C
    assert operands["u_h"].shape == (Md, Ms), "operands built for a different batching"

    # Lane-dense (rows, W*C) layout, B images stacked along the sublane axis; bf16 in.
    db2 = db.reshape(G, Md, WC).astype(jnp.bfloat16)
    sb2 = jnp.pad(sb.reshape(N, Hs, WsC), ((0, 0), (0, hsp - Hs), (0, 0)))
    sb2 = sb2.reshape(G, Ms, WsC).astype(jnp.bfloat16)

    weights = [operands[k] for k in _W_NAMES]

    def _const_spec(a):
        return pl.BlockSpec(a.shape, lambda n, _k=a.ndim: (0,) * _k)

    kernel = functools.partial(_bga_kernel, H=H)
    out2, dbout2 = pl.pallas_call(
        kernel,
        grid=(G,),
        in_specs=[pl.BlockSpec((None, Md, WC), lambda n: (n, 0, 0)),
                  pl.BlockSpec((None, Ms, WsC), lambda n: (n, 0, 0))]
                 + [_const_spec(a) for a in weights],
        out_specs=[pl.BlockSpec((None, Md, WC), lambda n: (n, 0, 0)),
                   pl.BlockSpec((None, Md, WC), lambda n: (n, 0, 0))],
        out_shape=[jax.ShapeDtypeStruct((G, Md, WC), jnp.float32),
                   jax.ShapeDtypeStruct((G, Md, WC), jnp.float32)],
        compiler_params=pltpu.CompilerParams(
            dimension_semantics=("parallel",),
            vmem_limit_bytes=32 * 1024 * 1024),
    )(db2, sb2, *weights)
    return out2.reshape(N, H, W, C), dbout2.reshape(N, H, W, C)


def _pick_imgs_per_step(n_imgs, h, max_rows=256):
    """Largest per-step image count that divides N, keeps the sublane tile <=
    max_rows, and (when possible) leaves >=2 grid steps for v7x's two TCs."""
    divs = [b for b in range(1, n_imgs + 1) if n_imgs % b == 0 and b * h <= max_rows]
    multi = [b for b in divs if n_imgs // b >= 2]
    return max(multi) if multi else max(divs)


# ----------------------------------------------------------------------------
# Pure-JAX reference (same folded params) for an in-script correctness check
# ----------------------------------------------------------------------------
def _ref_dense3x3(x, w_oihw, b, stride):
    w4 = jnp.transpose(w_oihw, (2, 3, 1, 0))
    N, H, W, _ = x.shape
    Ho = (H - 1) // stride + 1
    Wo = (W - 1) // stride + 1
    xp = jnp.pad(x, ((0, 0), (1, 1), (1, 1), (0, 0)))
    acc = jnp.zeros((N, Ho, Wo, w_oihw.shape[0]), jnp.float32)
    for dy in range(3):
        for dx in range(3):
            patch = xp[:, dy::stride, dx::stride, :][:, :Ho, :Wo, :]
            acc = acc + jnp.einsum('nhwc,cd->nhwd', patch, w4[dy, dx], precision=_HI)
    return acc + b


def _ref_depthwise3x3(x, w_c133, b):
    w3 = jnp.transpose(w_c133[:, 0, :, :], (1, 2, 0))
    N, H, W, C = x.shape
    xp = jnp.pad(x, ((0, 0), (1, 1), (1, 1), (0, 0)))
    acc = jnp.zeros_like(x)
    for dy in range(3):
        for dx in range(3):
            acc = acc + xp[:, dy:dy + H, dx:dx + W, :] * w3[dy, dx]
    return acc + b


def _ref_pointwise(x, w_oi11, b):
    wmat = w_oi11.reshape(w_oi11.shape[0], w_oi11.shape[1]).T
    return jnp.einsum('nhwc,cd->nhwd', x, wmat, precision=_HI) + b


def _ref_avgpool3x3s2(x):
    N, H, W, C = x.shape
    Ho = (H - 1) // 2 + 1
    Wo = (W - 1) // 2 + 1
    xp = jnp.pad(x, ((0, 0), (1, 1), (1, 1), (0, 0)))
    acc = jnp.zeros((N, Ho, Wo, C), jnp.float32)
    for dy in range(3):
        for dx in range(3):
            acc = acc + xp[:, dy::2, dx::2, :][:, :Ho, :Wo, :]
    return acc / 9.0


def _ref_upsample4(x):
    _, H, W, _ = x.shape
    lh = jnp.asarray(_bilinear1d(H, 4))
    lw = jnp.asarray(_bilinear1d(W, 4))
    y = jnp.einsum('oh,nhwc->nowc', lh, x, precision=_HI)
    return jnp.einsum('pw,nowc->nopc', lw, y, precision=_HI)


def bga_reference(p, db, sb):
    db_ = _ref_avgpool3x3s2(_ref_dense3x3(db, p["db_conv2_w"], p["db_conv2_b"], 2))
    dbm = _ref_depthwise3x3(db, p["db_dw_w"], p["db_dw_b"])
    dbm = jnp.maximum(_ref_pointwise(dbm, p["db_pw_w"], p["db_pw_b"]), 0.0)
    sbg = jax.nn.sigmoid(_ref_dense3x3(sb, p["sb_conv_w"], p["sb_conv_b"], 1))
    sbg = _ref_upsample4(sbg)
    sbm = _ref_depthwise3x3(sb, p["sb_dw_w"], p["sb_dw_b"])
    sbm = jnp.maximum(_ref_pointwise(sbm, p["sb_pw_w"], p["sb_pw_b"]), 0.0)
    sbm = _ref_upsample4(jax.nn.sigmoid(sbm) * db_)
    db_out = dbm * sbg
    o = _ref_dense3x3(db_out + sbm, p["proj_w"], p["proj_b"], 1)
    return o * jax.nn.sigmoid(o), db_out


# ----------------------------------------------------------------------------
if __name__ == "__main__":
    N, C, H, W = 2, 32, 16, 16            # db (2,16,16,32), sb (2,4,4,32) in NHWC
    key = jax.random.PRNGKey(0)
    k_db, k_sb, k_par = jax.random.split(key, 3)
    db = jax.random.normal(k_db, (N, H, W, C), jnp.float32)
    sb = jax.random.normal(k_sb, (N, H // 4, W // 4, C), jnp.float32)

    params = make_params(k_par, C)
    B = _pick_imgs_per_step(N, H)
    operands = prepare_operands(params, H, W, H // 4, W // 4, C, B)

    fwd = jax.jit(functools.partial(bga_pallas, imgs_per_step=B))
    out, db_out = fwd(operands, db, sb)
    jax.block_until_ready((out, db_out))

    assert out.shape == (N, H, W, C) and db_out.shape == (N, H, W, C)
    assert bool(jnp.all(jnp.isfinite(out))) and bool(jnp.all(jnp.isfinite(db_out)))

    ref_out, ref_db_out = bga_reference(params, db, sb)
    # bf16 MXU operands with f32 accumulation: relaxed tolerance vs f32-HIGHEST ref.
    np.testing.assert_allclose(np.asarray(out), np.asarray(ref_out), rtol=8e-2, atol=8e-2)
    np.testing.assert_allclose(np.asarray(db_out), np.asarray(ref_db_out), rtol=8e-2, atol=8e-2)

    print("KERNEL_OK")
</pallas_src>

<mosaic_0001>
module attributes {stable_mosaic.version = 11 : i64} {
  func.func @_bga_kernel(%arg0: i32, %arg1: memref<1x16x512xbf16, #tpu.memory_space<vmem>>, %arg2: memref<1x8x128xbf16, #tpu.memory_space<vmem>>, %arg3: memref<512x1920xbf16, #tpu.memory_space<vmem>>, %arg4: memref<1x512xf32, #tpu.memory_space<vmem>>, %arg5: memref<3x8x16xbf16, #tpu.memory_space<vmem>>, %arg6: memref<8x128xf32, #tpu.memory_space<vmem>>, %arg7: memref<128x768xbf16, #tpu.memory_space<vmem>>, %arg8: memref<1x128xf32, #tpu.memory_space<vmem>>, %arg9: memref<1x128xf32, #tpu.memory_space<vmem>>, %arg10: memref<16x8xbf16, #tpu.memory_space<vmem>>, %arg11: memref<256x1024xbf16, #tpu.memory_space<vmem>>, %arg12: memref<512x1536xbf16, #tpu.memory_space<vmem>>, %arg13: memref<1x512xf32, #tpu.memory_space<vmem>>, %arg14: memref<1x16x512xf32, #tpu.memory_space<vmem>>, %arg15: memref<1x16x512xf32, #tpu.memory_space<vmem>>) attributes {dimension_semantics = [#tpu.dimension_semantics<parallel>], iteration_bounds = array<i64: 2>, scalar_prefetch = 0 : i64, scratch_operands = 0 : i64, tpu.core_type = #tpu.core_type<tc>, window_params = [{transform_indices = @transform_0, window_bounds = array<i64: 1, 16, 512>}, {transform_indices = @transform_1, window_bounds = array<i64: 1, 8, 128>}, {pipeline_mode = #tpu.pipeline_mode<synchronous>, transform_indices = @transform_2, window_bounds = array<i64: 512, 1920>}, {pipeline_mode = #tpu.pipeline_mode<synchronous>, transform_indices = @transform_3, window_bounds = array<i64: 1, 512>}, {pipeline_mode = #tpu.pipeline_mode<synchronous>, transform_indices = @transform_4, window_bounds = array<i64: 3, 8, 16>}, {pipeline_mode = #tpu.pipeline_mode<synchronous>, transform_indices = @transform_5, window_bounds = array<i64: 8, 128>}, {pipeline_mode = #tpu.pipeline_mode<synchronous>, transform_indices = @transform_6, window_bounds = array<i64: 128, 768>}, {pipeline_mode = #tpu.pipeline_mode<synchronous>, transform_indices = @transform_7, window_bounds = array<i64: 1, 128>}, {pipeline_mode = #tpu.pipeline_mode<synchronous>, transform_indices = @transform_8, window_bounds = array<i64: 1, 128>}, {pipeline_mode = #tpu.pipeline_mode<synchronous>, transform_indices = @transform_9, window_bounds = array<i64: 16, 8>}, {pipeline_mode = #tpu.pipeline_mode<synchronous>, transform_indices = @transform_10, window_bounds = array<i64: 256, 1024>}, {pipeline_mode = #tpu.pipeline_mode<synchronous>, transform_indices = @transform_11, window_bounds = array<i64: 512, 1536>}, {pipeline_mode = #tpu.pipeline_mode<synchronous>, transform_indices = @transform_12, window_bounds = array<i64: 1, 512>}, {transform_indices = @transform_13, window_bounds = array<i64: 1, 16, 512>}, {transform_indices = @transform_14, window_bounds = array<i64: 1, 16, 512>}]} {
    %0 = tpu.iota {dimensions = array<i32: 0>} : vector<16x1xi32>
    %c16_i32 = arith.constant 16 : i32
    %c0_i32 = arith.constant 0 : i32
    %1 = arith.cmpi eq, %c16_i32, %c0_i32 : i32
    %c1_i32 = arith.constant 1 : i32
    %2 = arith.select %1, %c1_i32, %c16_i32 : i32
    %3 = vector.broadcast %2 : i32 to vector<16x1xi32>
    %4 = arith.remsi %0, %3 : vector<16x1xi32>
    %c0_i32_0 = arith.constant 0 : i32
    %5 = vector.broadcast %c0_i32_0 : i32 to vector<16x1xi32>
    %6 = arith.cmpi ne, %4, %5 : vector<16x1xi32>
    %c0_i32_1 = arith.constant 0 : i32
    %7 = vector.broadcast %c0_i32_1 : i32 to vector<16x1xi32>
    %8 = arith.cmpi slt, %4, %7 : vector<16x1xi32>
    %c0_i32_2 = arith.constant 0 : i32
    %9 = arith.cmpi slt, %2, %c0_i32_2 : i32
    %10 = vector.broadcast %9 : i1 to vector<16x1xi1>
    %11 = vector.broadcast %10 : vector<16x1xi1> to vector<16x1xi1>
    %12 = arith.xori %8, %11 : vector<16x1xi1>
    %13 = arith.andi %12, %6 : vector<16x1xi1>
    %14 = vector.broadcast %2 : i32 to vector<16x1xi32>
    %15 = arith.addi %4, %14 : vector<16x1xi32>
    %16 = arith.select %13, %15, %4 : vector<16x1xi1>, vector<16x1xi32>
    %c0_i32_3 = arith.constant 0 : i32
    %17 = vector.broadcast %c0_i32_3 : i32 to vector<16x1xi32>
    %18 = arith.cmpi ne, %16, %17 : vector<16x1xi32>
    %19 = arith.extui %18 : vector<16x1xi1> to vector<16x1xi32>
    %20 = arith.sitofp %19 : vector<16x1xi32> to vector<16x1xf32>
    %c16_i32_4 = arith.constant 16 : i32
    %c0_i32_5 = arith.constant 0 : i32
    %21 = arith.cmpi eq, %c16_i32_4, %c0_i32_5 : i32
    %c1_i32_6 = arith.constant 1 : i32
    %22 = arith.select %21, %c1_i32_6, %c16_i32_4 : i32
    %23 = vector.broadcast %22 : i32 to vector<16x1xi32>
    %24 = arith.remsi %0, %23 : vector<16x1xi32>
    %c0_i32_7 = arith.constant 0 : i32
    %25 = vector.broadcast %c0_i32_7 : i32 to vector<16x1xi32>
    %26 = arith.cmpi ne, %24, %25 : vector<16x1xi32>
    %c0_i32_8 = arith.constant 0 : i32
    %27 = vector.broadcast %c0_i32_8 : i32 to vector<16x1xi32>
    %28 = arith.cmpi slt, %24, %27 : vector<16x1xi32>
    %c0_i32_9 = arith.constant 0 : i32
    %29 = arith.cmpi slt, %22, %c0_i32_9 : i32
    %30 = vector.broadcast %29 : i1 to vector<16x1xi1>
    %31 = vector.broadcast %30 : vector<16x1xi1> to vector<16x1xi1>
    %32 = arith.xori %28, %31 : vector<16x1xi1>
    %33 = arith.andi %32, %26 : vector<16x1xi1>
    %34 = vector.broadcast %22 : i32 to vector<16x1xi32>
    %35 = arith.addi %24, %34 : vector<16x1xi32>
    %36 = arith.select %33, %35, %24 : vector<16x1xi1>, vector<16x1xi32>
    %c15_i32 = arith.constant 15 : i32
    %37 = vector.broadcast %c15_i32 : i32 to vector<16x1xi32>
    %38 = arith.cmpi ne, %36, %37 : vector<16x1xi32>
    %39 = arith.extui %38 : vector<16x1xi1> to vector<16x1xi32>
    %40 = arith.sitofp %39 : vector<16x1xi32> to vector<16x1xf32>
    %c0 = arith.constant 0 : index
    %c0_10 = arith.constant 0 : index
    %c0_11 = arith.constant 0 : index
    %41 = vector.load %arg1[%c0, %c0_10, %c0_11] : memref<1x16x512xbf16, #tpu.memory_space<vmem>>, vector<1x16x512xbf16>
    %42 = vector.shape_cast %41 : vector<1x16x512xbf16> to vector<16x512xbf16>
    %c0_12 = arith.constant 0 : index
    %c0_13 = arith.constant 0 : index
    %c0_14 = arith.constant 0 : index
    %43 = vector.load %arg2[%c0_12, %c0_13, %c0_14] : memref<1x8x128xbf16, #tpu.memory_space<vmem>>, vector<1x8x128xbf16>
    %44 = vector.shape_cast %43 : vector<1x8x128xbf16> to vector<8x128xbf16>
    %c0_15 = arith.constant 0 : index
    %c0_16 = arith.constant 0 : index
    %45 = vector.load %arg3[%c0_15, %c0_16] : memref<512x1920xbf16, #tpu.memory_space<vmem>>, vector<512x1920xbf16>
    %cst = arith.constant dense<0.000000e+00> : vector<16x1920xf32>
    %46 = tpu.matmul %42, %45, %cst {dimension_numbers = #tpu.dot_dimension_numbers<[1], [0], [0], [1], [0, 0, 1, 1], [], []>} : vector<16x512xbf16>, vector<512x1920xbf16>, vector<16x1920xf32> -> vector<16x1920xf32>
    %47 = vector.extract_strided_slice %46 {offsets = [0, 0], sizes = [16, 512], strides = [1, 1]} : vector<16x1920xf32> to vector<16x512xf32>
    %48 = vector.extract_strided_slice %46 {offsets = [0, 512], sizes = [16, 512], strides = [1, 1]} : vector<16x1920xf32> to vector<16x512xf32>
    %49 = vector.extract_strided_slice %46 {offsets = [0, 1024], sizes = [16, 512], strides = [1, 1]} : vector<16x1920xf32> to vector<16x512xf32>
    %c0_17 = arith.constant 0 : index
    %c0_18 = arith.constant 0 : index
    %50 = vector.load %arg4[%c0_17, %c0_18] : memref<1x512xf32, #tpu.memory_space<vmem>>, vector<1x512xf32>
    %c1_i32_19 = arith.constant 1 : i32
    %51 = tpu.dynamic_rotate %47 by %c1_i32_19 dim 0 : vector<16x512xf32>, i32 -> vector<16x512xf32>
    %c15_i32_20 = arith.constant 15 : i32
    %52 = tpu.dynamic_rotate %49 by %c15_i32_20 dim 0 : vector<16x512xf32>, i32 -> vector<16x512xf32>
    %53 = vector.broadcast %20 : vector<16x1xf32> to vector<16x512xf32>
    %54 = arith.mulf %51, %53 : vector<16x512xf32>
    %55 = vector.broadcast %40 : vector<16x1xf32> to vector<16x512xf32>
    %56 = arith.mulf %52, %55 : vector<16x512xf32>
    %57 = arith.addf %54, %48 : vector<16x512xf32>
    %58 = arith.addf %57, %56 : vector<16x512xf32>
    %59 = vector.broadcast %50 : vector<1x512xf32> to vector<16x512xf32>
    %60 = arith.addf %58, %59 : vector<16x512xf32>
    %cst_21 = arith.constant 0.000000e+00 : f32
    %61 = vector.broadcast %cst_21 : f32 to vector<16x512xf32>
    %62 = arith.maximumf %60, %61 : vector<16x512xf32>
    %c0_22 = arith.constant 0 : index
    %c0_23 = arith.constant 0 : index
    %63 = vector.load %arg6[%c0_22, %c0_23] : memref<8x128xf32, #tpu.memory_space<vmem>>, vector<8x128xf32>
    %64 = vector.extract_strided_slice %46 {offsets = [0, 1536], sizes = [16, 128], strides = [1, 1]} : vector<16x1920xf32> to vector<16x128xf32>
    %65 = arith.truncf %64 : vector<16x128xf32> to vector<16x128xbf16>
    %c0_24 = arith.constant 0 : index
    %c0_25 = arith.constant 0 : index
    %c0_26 = arith.constant 0 : index
    %66 = vector.load %arg5[%c0_24, %c0_25, %c0_26] : memref<3x8x16xbf16, #tpu.memory_space<vmem>>, vector<1x8x16xbf16>
    %67 = vector.shape_cast %66 : vector<1x8x16xbf16> to vector<8x16xbf16>
    %cst_27 = arith.constant dense<0.000000e+00> : vector<8x128xf32>
    %68 = tpu.matmul %67, %65, %cst_27 {dimension_numbers = #tpu.dot_dimension_numbers<[1], [0], [0], [1], [0, 0, 1, 1], [], []>} : vector<8x16xbf16>, vector<16x128xbf16>, vector<8x128xf32> -> vector<8x128xf32>
    %69 = arith.addf %63, %68 : vector<8x128xf32>
    %70 = vector.extract_strided_slice %46 {offsets = [0, 1664], sizes = [16, 128], strides = [1, 1]} : vector<16x1920xf32> to vector<16x128xf32>
    %71 = arith.truncf %70 : vector<16x128xf32> to vector<16x128xbf16>
    %c1 = arith.constant 1 : index
    %c0_28 = arith.constant 0 : index
    %c0_29 = arith.constant 0 : index
    %72 = vector.load %arg5[%c1, %c0_28, %c0_29] : memref<3x8x16xbf16, #tpu.memory_space<vmem>>, vector<1x8x16xbf16>
    %73 = vector.shape_cast %72 : vector<1x8x16xbf16> to vector<8x16xbf16>
    %cst_30 = arith.constant dense<0.000000e+00> : vector<8x128xf32>
    %74 = tpu.matmul %73, %71, %cst_30 {dimension_numbers = #tpu.dot_dimension_numbers<[1], [0], [0], [1], [0, 0, 1, 1], [], []>} : vector<8x16xbf16>, vector<16x128xbf16>, vector<8x128xf32> -> vector<8x128xf32>
    %75 = arith.addf %69, %74 : vector<8x128xf32>
    %76 = vector.extract_strided_slice %46 {offsets = [0, 1792], sizes = [16, 128], strides = [1, 1]} : vector<16x1920xf32> to vector<16x128xf32>
    %77 = arith.truncf %76 : vector<16x128xf32> to vector<16x128xbf16>
    %c2 = arith.constant 2 : index
    %c0_31 = arith.constant 0 : index
    %c0_32 = arith.constant 0 : index
    %78 = vector.load %arg5[%c2, %c0_31, %c0_32] : memref<3x8x16xbf16, #tpu.memory_space<vmem>>, vector<1x8x16xbf16>
    %79 = vector.shape_cast %78 : vector<1x8x16xbf16> to vector<8x16xbf16>
    %cst_33 = arith.constant dense<0.000000e+00> : vector<8x128xf32>
    %80 = tpu.matmul %79, %77, %cst_33 {dimension_numbers = #tpu.dot_dimension_numbers<[1], [0], [0], [1], [0, 0, 1, 1], [], []>} : vector<8x16xbf16>, vector<16x128xbf16>, vector<8x128xf32> -> vector<8x128xf32>
    %81 = arith.addf %75, %80 : vector<8x128xf32>
    %c0_34 = arith.constant 0 : index
    %c0_35 = arith.constant 0 : index
    %82 = vector.load %arg7[%c0_34, %c0_35] : memref<128x768xbf16, #tpu.memory_space<vmem>>, vector<128x768xbf16>
    %cst_36 = arith.constant dense<0.000000e+00> : vector<8x768xf32>
    %83 = tpu.matmul %44, %82, %cst_36 {dimension_numbers = #tpu.dot_dimension_numbers<[1], [0], [0], [1], [0, 0, 1, 1], [], []>} : vector<8x128xbf16>, vector<128x768xbf16>, vector<8x768xf32> -> vector<8x768xf32>
    %84 = vector.extract_strided_slice %83 {offsets = [0, 0], sizes = [8, 128], strides = [1, 1]} : vector<8x768xf32> to vector<8x128xf32>
    %85 = vector.extract_strided_slice %83 {offsets = [0, 128], sizes = [8, 128], strides = [1, 1]} : vector<8x768xf32> to vector<8x128xf32>
    %86 = vector.extract_strided_slice %83 {offsets = [0, 256], sizes = [8, 128], strides = [1, 1]} : vector<8x768xf32> to vector<8x128xf32>
    %c0_37 = arith.constant 0 : index
    %c0_38 = arith.constant 0 : index
    %87 = vector.load %arg8[%c0_37, %c0_38] : memref<1x128xf32, #tpu.memory_space<vmem>>, vector<1x128xf32>
    %c1_i32_39 = arith.constant 1 : i32
    %88 = tpu.dynamic_rotate %84 by %c1_i32_39 dim 0 : vector<8x128xf32>, i32 -> vector<8x128xf32>
    %c7_i32 = arith.constant 7 : i32
    %89 = tpu.dynamic_rotate %86 by %c7_i32 dim 0 : vector<8x128xf32>, i32 -> vector<8x128xf32>
    %90 = arith.addf %88, %85 : vector<8x128xf32>
    %91 = arith.addf %90, %89 : vector<8x128xf32>
    %92 = vector.broadcast %87 : vector<1x128xf32> to vector<8x128xf32>
    %93 = arith.addf %91, %92 : vector<8x128xf32>
    %94 = arith.negf %93 : vector<8x128xf32>
    %95 = math.exp %94 : vector<8x128xf32>
    %cst_40 = arith.constant 1.000000e+00 : f32
    %96 = vector.broadcast %cst_40 : f32 to vector<8x128xf32>
    %97 = arith.addf %96, %95 : vector<8x128xf32>
    %98 = arith.divf %96, %97 : vector<8x128xf32>
    %99 = vector.extract_strided_slice %83 {offsets = [0, 384], sizes = [8, 128], strides = [1, 1]} : vector<8x768xf32> to vector<8x128xf32>
    %100 = vector.extract_strided_slice %83 {offsets = [0, 512], sizes = [8, 128], strides = [1, 1]} : vector<8x768xf32> to vector<8x128xf32>
    %101 = vector.extract_strided_slice %83 {offsets = [0, 640], sizes = [8, 128], strides = [1, 1]} : vector<8x768xf32> to vector<8x128xf32>
    %c0_41 = arith.constant 0 : index
    %c0_42 = arith.constant 0 : index
    %102 = vector.load %arg9[%c0_41, %c0_42] : memref<1x128xf32, #tpu.memory_space<vmem>>, vector<1x128xf32>
    %c1_i32_43 = arith.constant 1 : i32
    %103 = tpu.dynamic_rotate %99 by %c1_i32_43 dim 0 : vector<8x128xf32>, i32 -> vector<8x128xf32>
    %c7_i32_44 = arith.constant 7 : i32
    %104 = tpu.dynamic_rotate %101 by %c7_i32_44 dim 0 : vector<8x128xf32>, i32 -> vector<8x128xf32>
    %105 = arith.addf %103, %100 : vector<8x128xf32>
    %106 = arith.addf %105, %104 : vector<8x128xf32>
    %107 = vector.broadcast %102 : vector<1x128xf32> to vector<8x128xf32>
    %108 = arith.addf %106, %107 : vector<8x128xf32>
    %cst_45 = arith.constant 0.000000e+00 : f32
    %109 = vector.broadcast %cst_45 : f32 to vector<8x128xf32>
    %110 = arith.maximumf %108, %109 : vector<8x128xf32>
    %111 = arith.negf %110 : vector<8x128xf32>
    %112 = math.exp %111 : vector<8x128xf32>
    %cst_46 = arith.constant 1.000000e+00 : f32
    %113 = vector.broadcast %cst_46 : f32 to vector<8x128xf32>
    %114 = arith.addf %113, %112 : vector<8x128xf32>
    %115 = arith.divf %113, %114 : vector<8x128xf32>
    %116 = arith.mulf %115, %81 : vector<8x128xf32>
    %117 = arith.truncf %98 : vector<8x128xf32> to vector<8x128xbf16>
    %118 = arith.truncf %116 : vector<8x128xf32> to vector<8x128xbf16>
    %119 = tpu.concatenate %117, %118 in 1 : vector<8x128xbf16>, vector<8x128xbf16> -> vector<8x256xbf16>
    %c0_47 = arith.constant 0 : index
    %c0_48 = arith.constant 0 : index
    %120 = vector.load %arg10[%c0_47, %c0_48] : memref<16x8xbf16, #tpu.memory_space<vmem>>, vector<16x8xbf16>
    %c0_49 = arith.constant 0 : index
    %c0_50 = arith.constant 0 : index
    %121 = vector.load %arg11[%c0_49, %c0_50] : memref<256x1024xbf16, #tpu.memory_space<vmem>>, vector<256x1024xbf16>
    %cst_51 = arith.constant dense<0.000000e+00> : vector<8x1024xf32>
    %122 = tpu.matmul %119, %121, %cst_51 {dimension_numbers = #tpu.dot_dimension_numbers<[1], [0], [0], [1], [0, 0, 1, 1], [], []>} : vector<8x256xbf16>, vector<256x1024xbf16>, vector<8x1024xf32> -> vector<8x1024xf32>
    %123 = arith.truncf %122 : vector<8x1024xf32> to vector<8x1024xbf16>
    %cst_52 = arith.constant dense<0.000000e+00> : vector<16x1024xf32>
    %124 = tpu.matmul %120, %123, %cst_52 {dimension_numbers = #tpu.dot_dimension_numbers<[1], [0], [0], [1], [0, 0, 1, 1], [], []>} : vector<16x8xbf16>, vector<8x1024xbf16>, vector<16x1024xf32> -> vector<16x1024xf32>
    %125 = vector.extract_strided_slice %124 {offsets = [0, 0], sizes = [16, 512], strides = [1, 1]} : vector<16x1024xf32> to vector<16x512xf32>
    %126 = vector.extract_strided_slice %124 {offsets = [0, 512], sizes = [16, 512], strides = [1, 1]} : vector<16x1024xf32> to vector<16x512xf32>
    %127 = arith.mulf %62, %125 : vector<16x512xf32>
    %128 = arith.addf %127, %126 : vector<16x512xf32>
    %129 = arith.truncf %128 : vector<16x512xf32> to vector<16x512xbf16>
    %c0_53 = arith.constant 0 : index
    %c0_54 = arith.constant 0 : index
    %130 = vector.load %arg12[%c0_53, %c0_54] : memref<512x1536xbf16, #tpu.memory_space<vmem>>, vector<512x1536xbf16>
    %cst_55 = arith.constant dense<0.000000e+00> : vector<16x1536xf32>
    %131 = tpu.matmul %129, %130, %cst_55 {dimension_numbers = #tpu.dot_dimension_numbers<[1], [0], [0], [1], [0, 0, 1, 1], [], []>} : vector<16x512xbf16>, vector<512x1536xbf16>, vector<16x1536xf32> -> vector<16x1536xf32>
    %132 = vector.extract_strided_slice %131 {offsets = [0, 0], sizes = [16, 512], strides = [1, 1]} : vector<16x1536xf32> to vector<16x512xf32>
    %133 = vector.extract_strided_slice %131 {offsets = [0, 512], sizes = [16, 512], strides = [1, 1]} : vector<16x1536xf32> to vector<16x512xf32>
    %134 = vector.extract_strided_slice %131 {offsets = [0, 1024], sizes = [16, 512], strides = [1, 1]} : vector<16x1536xf32> to vector<16x512xf32>
    %c0_56 = arith.constant 0 : index
    %c0_57 = arith.constant 0 : index
    %135 = vector.load %arg13[%c0_56, %c0_57] : memref<1x512xf32, #tpu.memory_space<vmem>>, vector<1x512xf32>
    %c1_i32_58 = arith.constant 1 : i32
    %136 = tpu.dynamic_rotate %132 by %c1_i32_58 dim 0 : vector<16x512xf32>, i32 -> vector<16x512xf32>
    %c15_i32_59 = arith.constant 15 : i32
    %137 = tpu.dynamic_rotate %134 by %c15_i32_59 dim 0 : vector<16x512xf32>, i32 -> vector<16x512xf32>
    %138 = vector.broadcast %20 : vector<16x1xf32> to vector<16x512xf32>
    %139 = arith.mulf %136, %138 : vector<16x512xf32>
    %140 = vector.broadcast %40 : vector<16x1xf32> to vector<16x512xf32>
    %141 = arith.mulf %137, %140 : vector<16x512xf32>
    %142 = arith.addf %139, %133 : vector<16x512xf32>
    %143 = arith.addf %142, %141 : vector<16x512xf32>
    %144 = vector.broadcast %135 : vector<1x512xf32> to vector<16x512xf32>
    %145 = arith.addf %143, %144 : vector<16x512xf32>
    %146 = arith.negf %145 : vector<16x512xf32>
    %147 = math.exp %146 : vector<16x512xf32>
    %cst_60 = arith.constant 1.000000e+00 : f32
    %148 = vector.broadcast %cst_60 : f32 to vector<16x512xf32>
    %149 = arith.addf %148, %147 : vector<16x512xf32>
    %150 = arith.divf %148, %149 : vector<16x512xf32>
    %151 = arith.mulf %145, %150 : vector<16x512xf32>
    %c0_61 = arith.constant 0 : index
    %c0_62 = arith.constant 0 : index
    %c0_63 = arith.constant 0 : index
    %152 = vector.load %arg14[%c0_61, %c0_62, %c0_63] : memref<1x16x512xf32, #tpu.memory_space<vmem>>, vector<1x16x512xf32>
    %153 = vector.shape_cast %152 : vector<1x16x512xf32> to vector<16x512xf32>
    %154 = vector.shape_cast %151 : vector<16x512xf32> to vector<1x16x512xf32>
    tpu.vector_store %arg14[%c0_61, %c0_62, %c0_63], %154 {strides = array<i32>} : memref<1x16x512xf32, #tpu.memory_space<vmem>>, vector<1x16x512xf32>,
    %c0_64 = arith.constant 0 : index
    %c0_65 = arith.constant 0 : index
    %c0_66 = arith.constant 0 : index
    %155 = vector.load %arg15[%c0_64, %c0_65, %c0_66] : memref<1x16x512xf32, #tpu.memory_space<vmem>>, vector<1x16x512xf32>
    %156 = vector.shape_cast %155 : vector<1x16x512xf32> to vector<16x512xf32>
    %157 = vector.shape_cast %127 : vector<16x512xf32> to vector<1x16x512xf32>
    tpu.vector_store %arg15[%c0_64, %c0_65, %c0_66], %157 {strides = array<i32>} : memref<1x16x512xf32, #tpu.memory_space<vmem>>, vector<1x16x512xf32>,
    return
  }
  func.func @transform_0(%arg0: i32) -> (i32, i32, i32) {
    %c0_i32 = arith.constant 0 : i32
    %c0_i32_0 = arith.constant 0 : i32
    %c0_i32_1 = arith.constant 0 : i32
    return %arg0, %c0_i32, %c0_i32_0 : i32, i32, i32
  }
  func.func @transform_1(%arg0: i32) -> (i32, i32, i32) {
    %c0_i32 = arith.constant 0 : i32
    %c0_i32_0 = arith.constant 0 : i32
    %c0_i32_1 = arith.constant 0 : i32
    return %arg0, %c0_i32, %c0_i32_0 : i32, i32, i32
  }
  func.func @transform_2(%arg0: i32) -> (i32, i32) {
    %c0_i32 = arith.constant 0 : i32
    %c0_i32_0 = arith.constant 0 : i32
    %c0_i32_1 = arith.constant 0 : i32
    return %c0_i32, %c0_i32_0 : i32, i32
  }
  func.func @transform_3(%arg0: i32) -> (i32, i32) {
    %c0_i32 = arith.constant 0 : i32
    %c0_i32_0 = arith.constant 0 : i32
    %c0_i32_1 = arith.constant 0 : i32
    return %c0_i32, %c0_i32_0 : i32, i32
  }
  func.func @transform_4(%arg0: i32) -> (i32, i32, i32) {
    %c0_i32 = arith.constant 0 : i32
    %c0_i32_0 = arith.constant 0 : i32
    %c0_i32_1 = arith.constant 0 : i32
    %c0_i32_2 = arith.constant 0 : i32
    return %c0_i32, %c0_i32_0, %c0_i32_1 : i32, i32, i32
  }
  func.func @transform_5(%arg0: i32) -> (i32, i32) {
    %c0_i32 = arith.constant 0 : i32
    %c0_i32_0 = arith.constant 0 : i32
    %c0_i32_1 = arith.constant 0 : i32
    return %c0_i32, %c0_i32_0 : i32, i32
  }
  func.func @transform_6(%arg0: i32) -> (i32, i32) {
    %c0_i32 = arith.constant 0 : i32
    %c0_i32_0 = arith.constant 0 : i32
    %c0_i32_1 = arith.constant 0 : i32
    return %c0_i32, %c0_i32_0 : i32, i32
  }
  func.func @transform_7(%arg0: i32) -> (i32, i32) {
    %c0_i32 = arith.constant 0 : i32
    %c0_i32_0 = arith.constant 0 : i32
    %c0_i32_1 = arith.constant 0 : i32
    return %c0_i32, %c0_i32_0 : i32, i32
  }
  func.func @transform_8(%arg0: i32) -> (i32, i32) {
    %c0_i32 = arith.constant 0 : i32
    %c0_i32_0 = arith.constant 0 : i32
    %c0_i32_1 = arith.constant 0 : i32
    return %c0_i32, %c0_i32_0 : i32, i32
  }
  func.func @transform_9(%arg0: i32) -> (i32, i32) {
    %c0_i32 = arith.constant 0 : i32
    %c0_i32_0 = arith.constant 0 : i32
    %c0_i32_1 = arith.constant 0 : i32
    return %c0_i32, %c0_i32_0 : i32, i32
  }
  func.func @transform_10(%arg0: i32) -> (i32, i32) {
    %c0_i32 = arith.constant 0 : i32
    %c0_i32_0 = arith.constant 0 : i32
    %c0_i32_1 = arith.constant 0 : i32
    return %c0_i32, %c0_i32_0 : i32, i32
  }
  func.func @transform_11(%arg0: i32) -> (i32, i32) {
    %c0_i32 = arith.constant 0 : i32
    %c0_i32_0 = arith.constant 0 : i32
    %c0_i32_1 = arith.constant 0 : i32
    return %c0_i32, %c0_i32_0 : i32, i32
  }
  func.func @transform_12(%arg0: i32) -> (i32, i32) {
    %c0_i32 = arith.constant 0 : i32
    %c0_i32_0 = arith.constant 0 : i32
    %c0_i32_1 = arith.constant 0 : i32
    return %c0_i32, %c0_i32_0 : i32, i32
  }
  func.func @transform_13(%arg0: i32) -> (i32, i32, i32) {
    %c0_i32 = arith.constant 0 : i32
    %c0_i32_0 = arith.constant 0 : i32
    %c0_i32_1 = arith.constant 0 : i32
    return %arg0, %c0_i32, %c0_i32_0 : i32, i32, i32
  }
  func.func @transform_14(%arg0: i32) -> (i32, i32, i32) {
    %c0_i32 = arith.constant 0 : i32
    %c0_i32_0 = arith.constant 0 : i32
    %c0_i32_1 = arith.constant 0 : i32
    return %arg0, %c0_i32, %c0_i32_0 : i32, i32, i32
  }
}

</mosaic_0001>

<bundles_post_ra>
// kernel: bga_pallas.1
= control target key start
LH: loop header
LB: loop body
LE: loop exit
PB: predicated region body
PF: predicated region fallthrough
CT: control target
= control target key end

     0   :  { %s16375_s0 = inlined_call_operand.vmem [shape: bf16[2,16,512], index: 0, kind: input, shape index: {}]   ;;  %s16376_s1 = inlined_call_operand.vmem [shape: bf16[2,8,128], index: 1, kind: input, shape index: {}]   ;;  %s16377_s2 = inlined_call_operand.hbm [shape: bf16[512,1920], index: 2, kind: input, shape index: {}]   ;;  %s16378_s3 = inlined_call_operand.hbm [shape: f32[1,512], index: 3, kind: input, shape index: {}]   ;;  %s16379_s4 = inlined_call_operand.hbm [shape: bf16[3,8,16], index: 4, kind: input, shape index: {}]   ;;  %s16380_s5 = inlined_call_operand.hbm [shape: f32[8,128], index: 5, kind: input, shape index: {}]   ;;  %s16381_s6 = inlined_call_operand.hbm [shape: bf16[128,768], index: 6, kind: input, shape index: {}]   ;;  %s16382_s7 = inlined_call_operand.hbm [shape: f32[1,128], index: 7, kind: input, shape index: {}]   ;;  %s16383_s8 = inlined_call_operand.hbm [shape: f32[1,128], index: 8, kind: input, shape index: {}]   ;;  %s16384_s9 = inlined_call_operand.vmem [shape: bf16[16,8], index: 9, kind: input, shape index: {}]   ;;  %s16385_s10 = inlined_call_operand.hbm [shape: bf16[256,1024], index: 10, kind: input, shape index: {}]   ;;  %s16386_s11 = inlined_call_operand.hbm [shape: bf16[512,1536], index: 11, kind: input, shape index: {}]   ;;  %s16387_s12 = inlined_call_operand.hbm [shape: f32[1,512], index: 12, kind: input, shape index: {}]   ;;  %s16388_s13 = inlined_call_operand.vmem [shape: f32[2,16,512], index: 13, kind: output, shape index: {0}]   ;;  %s16389_s14 = inlined_call_operand.vmem [shape: f32[2,16,512], index: 14, kind: output, shape index: {1}]  }
   0x1   :  { %16401 = sst [smem:[#allocation25_spill]] %s16377_s2 }
   0x2   :  { %16402 = sst [smem:[#allocation26_spill]] %s16378_s3 }
   0x3   :  { %16403 = sst [smem:[#allocation27_spill]] %s16380_s5 }
   0x4   :  { %20 = vsyncpa [#allocation3], 0 }
   0x5   :  { %21 = vsyncpa [#allocation5], 0 }
   0x6   :  { %22 = vsyncpa [#allocation8], 0 }
   0x7   :  { %23 = vsyncpa [#allocation11], 0 }
   0x8   :  { %24 = vsyncpa [#allocation14], 0 }
   0x9   :  { %25 = vsyncpa [#allocation17], 0  ;;  %s15541_s29 = smov 0  }
   0xa LB: > { %s16404_s3 = sld [smem:[#allocation26_spill]]  ;;  %s15550_s17 = sadd.s32 4294967295, %s15443_s29   ;;  %s15443_s29 = sphi %s15541_s29, %s31_s29  }
   0xb   : > { %p9668_p0 = scmp.ge.s32.totalorder %s15443_s29, 1  ;;  %p371_p1 = scmp.lt.s32.totalorder %s15443_s29, 3 }
   0xc   : > { %p15022_p2 = scmp.eq.s32.totalorder %s15550_s17, 0  ;;  %s15445_s19 = smov [#allocation4]  }
   0xd   : > { %p15555_p3 = pnand %p9668_p0, %p371_p1  ;;  %s399_s20 = sshll.u32 %s15445_s19, 4  ;;  %s400_s20 = int_to_ptr.vmem [resolvable:$true] %s399_s20 }
   0xe   : > { %s16406_s5 = sld [smem:[#allocation27_spill]]  ;;  %s449_s26 = sshll.u32 %s16382_s7, 4  ;;  %s450_s26 = int_to_ptr.hbm [resolvable:$true] %s449_s26 }
   0xf   : > { %p14991_p4 = pneg %p15555_p3  ;;  %s15446_s28 = smov [#allocation7]  }
  0x10   : > { %s397_s16 = sshll.u32 %s16404_s3, 4  ;;  %s425_s30 = sshll.u32 %s15446_s28, 4  ;;  %s398_s16 = int_to_ptr.hbm [resolvable:$true] %s397_s16  ;;  %s426_s30 = int_to_ptr.vmem [resolvable:$true] %s425_s30 }
  0x11   : > { %p15569_p5 = pnand %p15022_p2, %p14991_p4  ;;  %s15447_s15 = smov [#allocation10]  }
  0x12   : > { %s451_s19 = sshll.u32 %s15447_s15, 4  ;;  %s475_s24 = sshll.u32 %s16385_s10, 4  ;;  %s452_s19 = int_to_ptr.vmem [resolvable:$true] %s451_s19  ;;  %s476_s24 = int_to_ptr.hbm [resolvable:$true] %s475_s24 }
  0x13   : > { %14997 = dma.hbm_to_vmem [thread:$0]  (!%p15569_p5), %s398_s16, 64, %s400_s20, [#allocation5]  }
  0x14   : > { %s423_s23 = sshll.u32 %s16406_s5, 4  ;;  %s15448_s25 = smov [#allocation13]   ;;  %s424_s23 = int_to_ptr.hbm [resolvable:$true] %s423_s23 }
  0x15   : > { %15003 = dma.hbm_to_vmem [thread:$0]  (!%p15569_p5), %s424_s23, 128, %s426_s30, [#allocation8]  }
  0x16   : > { %15009 = dma.hbm_to_vmem [thread:$0]  (!%p15569_p5), %s450_s26, 16, %s452_s19, [#allocation11]  }
  0x17   : > { %s477_s28 = sshll.u32 %s15448_s25, 4  ;;  %s16408_s2 = sld [smem:[#allocation25_spill]]  ;;  %s478_s28 = int_to_ptr.vmem [resolvable:$true] %s477_s28 }
  0x18   : > { %s15449_s20 = smov 512   ;;  %s15450_s23 = smov 32  }
  0x19   : > { %15015 = dma.hbm_to_vmem [thread:$0]  (!%p15569_p5), %s476_s24, 16384, %s478_s28, [#allocation14], %s15449_s20, %s15449_s20, %s15450_s23  }
  0x1a   : > { %s15451_s30 = smov [#allocation2]   ;;  %s15452_s21 = smov 960  }
  0x1b   : > { %s384_s15 = sshll.u32 %s15451_s30, 4  ;;  %s15453_s22 = smov 60   ;;  %s385_s15 = int_to_ptr.vmem [resolvable:$true] %s384_s15 }
  0x1c   : > { %s408_s25 = sshll.u32 %s16379_s4, 4  ;;  %s15454_s3 = smov [#allocation6]   ;;  %s409_s25 = int_to_ptr.hbm [resolvable:$true] %s408_s25 }
  0x1d   : > { %s382_s16 = sshll.u32 %s16408_s2, 4  ;;  %s410_s5 = sshll.u32 %s15454_s3, 4  ;;  %s383_s16 = int_to_ptr.hbm [resolvable:$true] %s382_s16  ;;  %s411_s5 = int_to_ptr.vmem [resolvable:$true] %s410_s5 }
  0x1e   : > { %14994 = dma.hbm_to_vmem [thread:$0]  (!%p15569_p5), %s383_s16, 61440, %s385_s15, [#allocation3], %s15452_s21, %s15452_s21, %s15453_s22  }
  0x1f   : > { %s434_s28 = sshll.u32 %s16381_s6, 4  ;;  %s15455_s20 = smov 64   ;;  %s435_s28 = int_to_ptr.hbm [resolvable:$true] %s434_s28 }
  0x20   : > { %s15456_s23 = smov 4   ;;  %s15457_s16 = smov [#allocation9]  }
  0x21   : > { %15000 = dma.hbm_to_vmem [thread:$0]  (!%p15569_p5), %s409_s25, 192, %s411_s5, [#allocation5], %s15455_s20, %s15455_s20, %s15456_s23  }
  0x22   : > { %s436_s30 = sshll.u32 %s15457_s16, 4  ;;  %s15458_s15 = smov 384   ;;  %s437_s30 = int_to_ptr.vmem [resolvable:$true] %s436_s30 }
  0x23   : > { %s15459_s21 = smov 24   ;;  %s461_s19 = sshll.u32 %s16383_s8, 4  ;;  %s462_s19 = int_to_ptr.hbm [resolvable:$true] %s461_s19 }
  0x24   : > { %15006 = dma.hbm_to_vmem [thread:$0]  (!%p15569_p5), %s435_s28, 6144, %s437_s30, [#allocation8], %s15458_s15, %s15458_s15, %s15459_s21  }
  0x25   : > { %s15460_s2 = smov [#allocation12]   ;;  %s489_s5 = sshll.u32 %s16386_s11, 4  ;;  %s490_s5 = int_to_ptr.hbm [resolvable:$true] %s489_s5 }
  0x26   : > { %s463_s3 = sshll.u32 %s15460_s2, 4  ;;  %s15461_s20 = smov [#allocation15]   ;;  %s464_s3 = int_to_ptr.vmem [resolvable:$true] %s463_s3 }
  0x27   : > { %15012 = dma.hbm_to_vmem [thread:$0]  (!%p15569_p5), %s462_s19, 16, %s464_s3, [#allocation11]  }
  0x28   : > { %s491_s23 = sshll.u32 %s15461_s20, 4  ;;  %s15462_s28 = smov 768   ;;  %s492_s23 = int_to_ptr.vmem [resolvable:$true] %s491_s23 }
  0x29   : > { %s15463_s16 = smov 48   ;;  %s504_s21 = sshll.u32 %s16387_s12, 4  ;;  %s505_s21 = int_to_ptr.hbm [resolvable:$true] %s504_s21 }
  0x2a   : > { %15018 = dma.hbm_to_vmem [thread:$0]  (!%p15569_p5), %s490_s5, 49152, %s492_s23, [#allocation14], %s15462_s28, %s15462_s28, %s15463_s16  }
  0x2b   : > { %s15464_s22 = smov [#allocation16]   ;;  %534 = sbr.rel (%p15555_p3) target bundleno = 1743 (0x6cf), region = 72 }
  0x2c   : > { %s506_s26 = sshll.u32 %s15464_s22, 4  ;;  %s507_s26 = int_to_ptr.vmem [resolvable:$true] %s506_s26 }
  0x2d   : > { %15021 = dma.hbm_to_vmem [thread:$0]  (!%p15569_p5), %s505_s21, 64, %s507_s26, [#allocation17]  }
  0x30   : > { %15418 = dma.done.wait (%p15022_p2), [#allocation3], 61440  }
  0x31   : > { %15420 = vsyncadd (%p15022_p2), [#allocation3], 4294905856 }
  0x32   : > { %15422 = dma.done.wait (%p15022_p2), [#allocation5], 256  }
  0x33   : > { %15424 = vsyncadd (%p15022_p2), [#allocation5], 4294967040 }
  0x34   : > { %15426 = dma.done.wait (%p15022_p2), [#allocation8], 6272  }
  0x35   : > { %15428 = vsyncadd (%p15022_p2), [#allocation8], 4294961024 }
  0x36   : > { %15430 = dma.done.wait (%p15022_p2), [#allocation11], 32  }
  0x37   : > { %15432 = vsyncadd (%p15022_p2), [#allocation11], 4294967264 }
  0x38   : > { %15434 = dma.done.wait (%p15022_p2), [#allocation14], 65536  }
  0x39   : > { %15436 = vsyncadd (%p15022_p2), [#allocation14], 4294901760 }
  0x3a   : > { %15438 = dma.done.wait (%p15022_p2), [#allocation17], 64  }
  0x3b   : > { %15440 = vsyncadd (%p15022_p2), [#allocation17], 4294967232  ;;  %v10138_v0 = vld [vmem:[#allocation2 + $0x348] sm:$0xf]  ;;  %v14022_v1 = vld [vmem:[#allocation2 + $0x380] sm:$0xf0] }
  0x3c   : > { %v10618_v2 = vld [vmem:[#allocation2 + $0x708] sm:$0xf]  ;;  %v10139_v3 = vor.u32 %v14022_v1, %v10138_v0  ;;  %v14142_v4 = vld [vmem:[#allocation2 + $0x740] sm:$0xf0]  ;;  %v10078_v11 = vld [vmem:[#allocation2 + $0x2d0] sm:$0xf] }
  0x3d   : > { %v11098_v5 = vld [vmem:[#allocation2 + $0xac8] sm:$0xf]  ;;  %v14262_v6 = vld [vmem:[#allocation2 + $0xb00] sm:$0xf0]  ;;  %v10619_v7 = vor.u32 %v14142_v4, %v10618_v2  ;;  %v14007_v13 = vld [vmem:[#allocation2 + $0x308] sm:$0xf0] }
  0x3e   : > { %v11099_v8 = vor.u32 %v14262_v6, %v11098_v5  ;;  %v11578_v9 = vld [vmem:[#allocation2 + $0xe88] sm:$0xf]  ;;  %v14382_v10 = vld [vmem:[#allocation2 + $0xec0] sm:$0xf0]  ;;  %3663 = vmatpush.bf16.msra.mxu0 %v10139_v3  ;;  %v10558_v14 = vld [vmem:[#allocation2 + $0x690] sm:$0xf]  ;;  %v10079_v16 = vor.u32 %v14007_v13, %v10078_v11 }
  0x3f   : > { %v11579_v12 = vor.u32 %v14382_v10, %v11578_v9  ;;  %v14127_v15 = vld [vmem:[#allocation2 + $0x6c8] sm:$0xf0]  ;;  %3677 = vmatpush.bf16.msra.mxu1 %v10619_v7  ;;  %v11038_v18 = vld [vmem:[#allocation2 + $0xa50] sm:$0xf]  ;;  %v10018_v23 = vld [vmem:[#allocation2 + $0x258] sm:$0xf] }
  0x40   : > { %3691 = vmatpush.bf16.msra.mxu2 %v11099_v8  ;;  %v10559_v17 = vor.u32 %v14127_v15, %v10558_v14  ;;  %v14247_v19 = vld [vmem:[#allocation2 + $0xa88] sm:$0xf0]  ;;  %v11518_v20 = vld [vmem:[#allocation2 + $0xe10] sm:$0xf]  ;;  %v13992_v24 = vld [vmem:[#allocation2 + $0x290] sm:$0xf0] }
  0x41   : > { %3705 = vmatpush.bf16.msra.mxu3 %v11579_v12  ;;  %v11039_v21 = vor.u32 %v14247_v19, %v11038_v18  ;;  %v14367_v22 = vld [vmem:[#allocation2 + $0xe48] sm:$0xf0]  ;;  %v10498_v26 = vld [vmem:[#allocation2 + $0x618] sm:$0xf]  ;;  %v14112_v27 = vld [vmem:[#allocation2 + $0x650] sm:$0xf0]  ;;  %v10019_v29 = vor.u32 %v13992_v24, %v10018_v23 }
  0x42   : > { %v11519_v25 = vor.u32 %v14367_v22, %v11518_v20  ;;  %v10978_v28 = vld [vmem:[#allocation2 + $0x9d8] sm:$0xf]  ;;  %3664 = vmatpush.bf16.msra.mxu0 %v10079_v16  ;;  %v14232_v30 = vld [vmem:[#allocation2 + $0xa10] sm:$0xf0]  ;;  %v10499_v33 = vor.u32 %v14112_v27, %v10498_v26  ;;  %v9958_v35 = vld [vmem:[#allocation2 + $0x1e0] sm:$0xf] }
  0x43   : > { %v11458_v31 = vld [vmem:[#allocation2 + $0xd98] sm:$0xf]  ;;  %v14352_v32 = vld [vmem:[#allocation2 + $0xdd0] sm:$0xf0]  ;;  %3678 = vmatpush.bf16.msra.mxu1 %v10559_v17  ;;  %v10979_v34 = vor.u32 %v14232_v30, %v10978_v28  ;;  %v13977_v36 = vld [vmem:[#allocation2 + $0x218] sm:$0xf0] }
  0x44   : > { %3692 = vmatpush.bf16.msra.mxu2 %v11039_v21  ;;  %v10438_v37 = vld [vmem:[#allocation2 + $0x5a0] sm:$0xf]  ;;  %v11459_v38 = vor.u32 %v14352_v32, %v11458_v31  ;;  %v14097_v39 = vld [vmem:[#allocation2 + $0x5d8] sm:$0xf0]  ;;  %v9959_v44 = vor.u32 %v13977_v36, %v9958_v35  ;;  %v9898_v47 = vld [vmem:[#allocation2 + $0x168] sm:$0xf] }
  0x45   : > { %3706 = vmatpush.bf16.msra.mxu3 %v11519_v25  ;;  %v10918_v40 = vld [vmem:[#allocation2 + $0x960] sm:$0xf]  ;;  %v14217_v41 = vld [vmem:[#allocation2 + $0x998] sm:$0xf0]  ;;  %v10439_v45 = vor.u32 %v14097_v39, %v10438_v37  ;;  %v13962_v48 = vld [vmem:[#allocation2 + $0x1a0] sm:$0xf0] }
  0x46   : > { %v11398_v42 = vld [vmem:[#allocation2 + $0xd20] sm:$0xf]  ;;  %v14337_v43 = vld [vmem:[#allocation2 + $0xd58] sm:$0xf0]  ;;  %3665 = vmatpush.bf16.msra.mxu0 %v10019_v29  ;;  %v10919_v46 = vor.u32 %v14217_v41, %v10918_v40  ;;  %v10378_v49 = vld [vmem:[#allocation2 + $0x528] sm:$0xf]  ;;  %v9899_v56 = vor.u32 %v13962_v48, %v9898_v47 }
  0x47   : > { %3679 = vmatpush.bf16.msra.mxu1 %v10499_v33  ;;  %v11399_v50 = vor.u32 %v14337_v43, %v11398_v42  ;;  %v14082_v51 = vld [vmem:[#allocation2 + $0x560] sm:$0xf0]  ;;  %v10858_v52 = vld [vmem:[#allocation2 + $0x8e8] sm:$0xf]  ;;  %v9838_v59 = vld [vmem:[#allocation2 + $0xf0] sm:$0xf] }
  0x48   : > { %3693 = vmatpush.bf16.msra.mxu2 %v10979_v34  ;;  %v14202_v53 = vld [vmem:[#allocation2 + $0x920] sm:$0xf0]  ;;  %v11338_v54 = vld [vmem:[#allocation2 + $0xca8] sm:$0xf]  ;;  %v10379_v57 = vor.u32 %v14082_v51, %v10378_v49  ;;  %v13947_v60 = vld [vmem:[#allocation2 + $0x128] sm:$0xf0] }
  0x49   : > { %3707 = vmatpush.bf16.msra.mxu3 %v11459_v38  ;;  %v14322_v55 = vld [vmem:[#allocation2 + $0xce0] sm:$0xf0]  ;;  %v10859_v58 = vor.u32 %v14202_v53, %v10858_v52  ;;  %v10318_v61 = vld [vmem:[#allocation2 + $0x4b0] sm:$0xf]  ;;  %v14067_v63 = vld [vmem:[#allocation2 + $0x4e8] sm:$0xf0]  ;;  %v9839_v4 = vor.u32 %v13947_v60, %v9838_v59 }
  0x4a   : > { %3666 = vmatpush.bf16.msra.mxu0 %v9959_v44  ;;  %v11339_v62 = vor.u32 %v14322_v55, %v11338_v54  ;;  %v10798_v0 = vld [vmem:[#allocation2 + $0x870] sm:$0xf]  ;;  %v14187_v1 = vld [vmem:[#allocation2 + $0x8a8] sm:$0xf0]  ;;  %p635_p6 = scmp.lt.s32.totalorder %s15550_s17, 1  ;;  %v10319_v5 = vor.u32 %v14067_v63, %v10318_v61  ;;  %vm4598_vm4 = vcmask 130048  }
  0x4b   : > { %3680 = vmatpush.bf16.msra.mxu1 %v10439_v45  ;;  %v11278_v2 = vld [vmem:[#allocation2 + $0xc30] sm:$0xf]  ;;  %v14307_v3 = vld [vmem:[#allocation2 + $0xc68] sm:$0xf0]  ;;  %v10799_v6 = vor.u32 %v14187_v1, %v10798_v0  ;;  %v9778_v7 = vld [vmem:[#allocation2 + $0x78] sm:$0xf] }
  0x4c   : > { %3694 = vmatpush.bf16.msra.mxu2 %v10919_v46  ;;  %v13932_v8 = vld [vmem:[#allocation2 + $0xb0] sm:$0xf0]  ;;  %v10258_v9 = vld [vmem:[#allocation2 + $0x438] sm:$0xf]  ;;  %v11279_v10 = vor.u32 %v14307_v3, %v11278_v2  ;;  %v9718_v17 = vld [vmem:[#allocation2] sm:$0xf] }
  0x4d   : > { %3708 = vmatpush.bf16.msra.mxu3 %v11399_v50  ;;  %v14052_v11 = vld [vmem:[#allocation2 + $0x470] sm:$0xf0]  ;;  %v10738_v12 = vld [vmem:[#allocation2 + $0x7f8] sm:$0xf]  ;;  %v9779_v16 = vor.u32 %v13932_v8, %v9778_v7  ;;  %v13917_v18 = vld [vmem:[#allocation2 + $0x38] sm:$0xf0] }
  0x4e   : > { %3667 = vmatpush.bf16.msra.mxu0 %v9899_v56  ;;  %v14172_v13 = vld [vmem:[#allocation2 + $0x830] sm:$0xf0]  ;;  %v11218_v14 = vld [vmem:[#allocation2 + $0xbb8] sm:$0xf]  ;;  %s16427_s17 = smov (!%p635_p6, %s15550_s17), 1  ;;  %v10259_v19 = vor.u32 %v14052_v11, %v10258_v9  ;;  %v9719_v31 = vor.u32 %v13917_v18, %v9718_v17  ;;  %vm6077_vm13 = vcmask 1043456  }
  0x4f   : > { %3681 = vmatpush.bf16.msra.mxu1 %v10379_v57  ;;  %v14292_v15 = vld [vmem:[#allocation2 + $0xbf0] sm:$0xf0]  ;;  %v10739_v20 = vor.u32 %v14172_v13, %v10738_v12  ;;  %v10198_v21 = vld [vmem:[#allocation2 + $0x3c0] sm:$0xf]  ;;  %v14037_v22 = vld [vmem:[#allocation2 + $0x3f8] sm:$0xf0] }
  0x50   : > { %3695 = vmatpush.bf16.msra.mxu2 %v10859_v58  ;;  %v10678_v23 = vld [vmem:[#allocation2 + $0x780] sm:$0xf]  ;;  %v11219_v24 = vor.u32 %v14292_v15, %v11218_v14  ;;  %v14157_v25 = vld [vmem:[#allocation2 + $0x7b8] sm:$0xf0]  ;;  %v14015_v28 = vld [vmem:[#allocation2 + $0x34c] sm:$0xf]  ;;  %v10199_v35 = vor.u32 %v14037_v22, %v10198_v21 }
  0x51   : > { %3709 = vmatpush.bf16.msra.mxu3 %v11339_v62  ;;  %v11158_v26 = vld [vmem:[#allocation2 + $0xb40] sm:$0xf]  ;;  %v14277_v27 = vld [vmem:[#allocation2 + $0xb78] sm:$0xf0]  ;;  %v10140_v29 = vld [vmem:[#allocation2 + $0x384] sm:$0xf0]  ;;  %v10679_v36 = vor.u32 %v14157_v25, %v10678_v23 }
  0x52   : > { %3668 = vmatpush.bf16.msra.mxu0 %v9839_v4  ;;  %v14135_v30 = vld [vmem:[#allocation2 + $0x70c] sm:$0xf]  ;;  %v10620_v32 = vld [vmem:[#allocation2 + $0x744] sm:$0xf0]  ;;  %v11159_v39 = vor.u32 %v14277_v27, %v11158_v26  ;;  %v10143_v40 = vor.u32 %v14015_v28, %v10140_v29  ;;  %s13903_s18 = sshll.u32 %s16427_s17, 5  ;;  %s9693_s3 = sshll.u32 %s16427_s17, 2 }
  0x53   : > { %3682 = vmatpush.bf16.msra.mxu1 %v10319_v5  ;;  %v14255_v33 = vld [vmem:[#allocation2 + $0xacc] sm:$0xf]  ;;  %v11100_v34 = vld [vmem:[#allocation2 + $0xb04] sm:$0xf0]  ;;  %v10623_v41 = vor.u32 %v14135_v30, %v10620_v32  ;;  %v14000_v43 = vld [vmem:[#allocation2 + $0x2d4] sm:$0xf]  ;;  %s15650_s2 = scalar_lea.vmem %s16375_s0, %s13903_s18  ;;  %s643_s5 = scalar_lea.vmem %s16376_s1, %s9693_s3 }
  0x54   : > { %3696 = vmatpush.bf16.msra.mxu2 %v10799_v6  ;;  %v14375_v37 = vld [vmem:[#allocation2 + $0xe8c] sm:$0xf]  ;;  %v11580_v38 = vld [vmem:[#allocation2 + $0xec4] sm:$0xf0]  ;;  %v11103_v42 = vor.u32 %v14255_v33, %v11100_v34  ;;  %v10080_v44 = vld [vmem:[#allocation2 + $0x30c] sm:$0xf0] }
  0x55   : > { %3710 = vmatpush.bf16.msra.mxu3 %v11279_v10  ;;  %v14120_v45 = vld [vmem:[#allocation2 + $0x694] sm:$0xf]  ;;  %v11583_v46 = vor.u32 %v14375_v37, %v11580_v38  ;;  %v10560_v47 = vld [vmem:[#allocation2 + $0x6cc] sm:$0xf0]  ;;  %v10083_v52 = vor.u32 %v14000_v43, %v10080_v44  ;;  %v13985_v55 = vld [vmem:[#allocation2 + $0x25c] sm:$0xf] }
  0x56   : > { %3669 = vmatpush.bf16.msra.mxu0 %v9779_v16  ;;  %v14240_v48 = vld [vmem:[#allocation2 + $0xa54] sm:$0xf]  ;;  %v11040_v49 = vld [vmem:[#allocation2 + $0xa8c] sm:$0xf0]  ;;  %v10563_v53 = vor.u32 %v14120_v45, %v10560_v47  ;;  %v10020_v56 = vld [vmem:[#allocation2 + $0x294] sm:$0xf0] }
  0x57   : > { %3683 = vmatpush.bf16.msra.mxu1 %v10259_v19  ;;  %v14360_v50 = vld [vmem:[#allocation2 + $0xe14] sm:$0xf]  ;;  %v11520_v51 = vld [vmem:[#allocation2 + $0xe4c] sm:$0xf0]  ;;  %v11043_v54 = vor.u32 %v14240_v48, %v11040_v49  ;;  %v14105_v57 = vld [vmem:[#allocation2 + $0x61c] sm:$0xf]  ;;  %v10023_v1 = vor.u32 %v13985_v55, %v10020_v56 }
  0x58   : > { %3697 = vmatpush.bf16.msra.mxu2 %v10739_v20  ;;  %v11523_v58 = vor.u32 %v14360_v50, %v11520_v51  ;;  %v10500_v59 = vld [vmem:[#allocation2 + $0x654] sm:$0xf0]  ;;  %v14225_v60 = vld [vmem:[#allocation2 + $0x9dc] sm:$0xf]  ;;  %v13970_v0 = vld [vmem:[#allocation2 + $0x1e4] sm:$0xf] }
  0x59   : > { %3711 = vmatpush.bf16.msra.mxu3 %v11219_v24  ;;  %v10980_v61 = vld [vmem:[#allocation2 + $0xa14] sm:$0xf0]  ;;  %v14345_v62 = vld [vmem:[#allocation2 + $0xd9c] sm:$0xf]  ;;  %v9960_v2 = vld [vmem:[#allocation2 + $0x21c] sm:$0xf0]  ;;  %v10503_v5 = vor.u32 %v14105_v57, %v10500_v59 }
  0x5a   : > { %3670 = vmatpush.bf16.msra.mxu0 %v9719_v31  ;;  %v11460_v63 = vld [vmem:[#allocation2 + $0xdd4] sm:$0xf0]  ;;  %v9710_v3 = vld [vmem:[%s15650_s2 + $0x8] sm:$0xf]  ;;  %v10983_v6 = vor.u32 %v14225_v60, %v10980_v61  ;;  %v14090_v7 = vld [vmem:[#allocation2 + $0x5a4] sm:$0xf]  ;;  %v9963_v19 = vor.u32 %v13970_v0, %v9960_v2 }
  0x5b   : > { %3684 = vmatpush.bf16.msra.mxu1 %v10199_v35  ;;  %v13909_v4 = vld [vmem:[%s15650_s2 + $0x14] sm:$0xf0]  ;;  %v13907_v9 = vld [vmem:[%s15650_s2 + $0xc] sm:$0xf]  ;;  %v9712_v10 = vld [vmem:[%s15650_s2 + $0x18] sm:$0xf0]  ;;  %v11463_v11 = vor.u32 %v14345_v62, %v11460_v63 }
  0x5c   : > { %3698 = vmatpush.bf16.msra.mxu2 %v10679_v36  ;;  %v15654_v8 = vor.u32 %v13909_v4, %v9710_v3  ;;  %v10440_v12 = vld [vmem:[#allocation2 + $0x5dc] sm:$0xf0]  ;;  %v14210_v13 = vld [vmem:[#allocation2 + $0x964] sm:$0xf]  ;;  %v15658_v15 = vor.u32 %v13907_v9, %v9712_v10  ;;  %v13955_v18 = vld [vmem:[#allocation2 + $0x16c] sm:$0xf] }
  0x5d   : > { %3712 = vmatpush.bf16.msra.mxu3 %v11159_v39  ;;  %v10920_v14 = vld [vmem:[#allocation2 + $0x99c] sm:$0xf0]  ;;  %v14330_v16 = vld [vmem:[#allocation2 + $0xd24] sm:$0xf]  ;;  %v9900_v20 = vld [vmem:[#allocation2 + $0x1a4] sm:$0xf0]  ;;  %v10443_v23 = vor.u32 %v14090_v7, %v10440_v12 }
  0x5e   : > { %3719 = vmatpush.bf16.msrb.mxu0 %v10143_v40  ;;  %v11400_v17 = vld [vmem:[#allocation2 + $0xd5c] sm:$0xf0]  ;;  %v13908_v22 = vld [vmem:[%s15650_s2 + $0xc] sm:$0xf0]  ;;  %v10923_v24 = vor.u32 %v14210_v13, %v10920_v14  ;;  %v14075_v25 = vld [vmem:[#allocation2 + $0x52c] sm:$0xf]  ;;  %v9903_v36 = vor.u32 %v13955_v18, %v9900_v20 }
  0x5f   : > { %3733 = vmatpush.bf16.msrb.mxu1 %v10623_v41  ;;  %3699 = vmatmul.bf16.vlgmr.msra.gmra.mxu2 %v15654_v8  ;;  %v9702_v21 = vld [vmem:[%s15650_s2] sm:$0xf]  ;;  %v13906_v27 = vld [vmem:[%s15650_s2 + $0x4] sm:$0xf]  ;;  %v9704_v28 = vld [vmem:[%s15650_s2 + $0x10] sm:$0xf0]  ;;  %v11403_v29 = vor.u32 %v14330_v16, %v11400_v17 }
  0x60   : > { %3747 = vmatpush.bf16.msrb.mxu2 %v11103_v42  ;;  %3713 = vmatmul.bf16.vlgmr.msra.gmra.mxu3 %v15658_v15  ;;  %v15664_v26 = vor.u32 %v13908_v22, %v9702_v21  ;;  %v10380_v30 = vld [vmem:[#allocation2 + $0x564] sm:$0xf0]  ;;  %v14195_v31 = vld [vmem:[#allocation2 + $0x8ec] sm:$0xf]  ;;  %v15668_v33 = vor.u32 %v13906_v27, %v9704_v28  ;;  %v13940_v39 = vld [vmem:[#allocation2 + $0xf4] sm:$0xf] }
  0x61   : > { %3761 = vmatpush.bf16.msrb.mxu3 %v11583_v46  ;;  %v10860_v32 = vld [vmem:[#allocation2 + $0x924] sm:$0xf0]  ;;  %v14315_v34 = vld [vmem:[#allocation2 + $0xcac] sm:$0xf]  ;;  %v10383_v37 = vor.u32 %v14075_v25, %v10380_v30  ;;  %v9840_v40 = vld [vmem:[#allocation2 + $0x12c] sm:$0xf0] }
  0x62   : > { %3720 = vmatpush.bf16.msrb.mxu0 %v10083_v52  ;;  %v11340_v35 = vld [vmem:[#allocation2 + $0xce4] sm:$0xf0]  ;;  %3685 = vmatmul.bf16.vlgmr.msra.gmra.mxu1 %v15668_v33  ;;  %v10863_v38 = vor.u32 %v14195_v31, %v10860_v32  ;;  %v14060_v41 = vld [vmem:[#allocation2 + $0x4b4] sm:$0xf]  ;;  %v10320_v43 = vld [vmem:[#allocation2 + $0x4ec] sm:$0xf0]  ;;  %v9843_v48 = vor.u32 %v13940_v39, %v9840_v40 }
  0x63   : > { %3734 = vmatpush.bf16.msrb.mxu1 %v10563_v53  ;;  %3671 = vmatmul.bf16.vlgmr.msra.gmra.mxu0 %v15664_v26  ;;  %v11343_v42 = vor.u32 %v14315_v34, %v11340_v35  ;;  %v14180_v44 = vld [vmem:[#allocation2 + $0x874] sm:$0xf]  ;;  %v10800_v45 = vld [vmem:[#allocation2 + $0x8ac] sm:$0xf0]  ;;  %v10323_v49 = vor.u32 %v14060_v41, %v10320_v43  ;;  %v13925_v51 = vld [vmem:[#allocation2 + $0x7c] sm:$0xf] }
  0x64   : > { %3748 = vmatpush.bf16.msrb.mxu2 %v11043_v54  ;;  %v14300_v46 = vld [vmem:[#allocation2 + $0xc34] sm:$0xf]  ;;  %v11280_v47 = vld [vmem:[#allocation2 + $0xc6c] sm:$0xf0]  ;;  %v10803_v50 = vor.u32 %v14180_v44, %v10800_v45  ;;  %v9780_v52 = vld [vmem:[#allocation2 + $0xb4] sm:$0xf0] }
  0x65   : > { %3762 = vmatpush.bf16.msrb.mxu3 %v11523_v58  ;;  %v14045_v53 = vld [vmem:[#allocation2 + $0x43c] sm:$0xf]  ;;  %v11283_v54 = vor.u32 %v14300_v46, %v11280_v47  ;;  %v10260_v55 = vld [vmem:[#allocation2 + $0x474] sm:$0xf0]  ;;  %v9783_v60 = vor.u32 %v13925_v51, %v9780_v52  ;;  %v13910_v61 = vld [vmem:[#allocation2 + $0x4] sm:$0xf] }
  0x66   : > { %3721 = vmatpush.bf16.msrb.mxu0 %v10023_v1  ;;  %v14165_v56 = vld [vmem:[#allocation2 + $0x7fc] sm:$0xf]  ;;  %v10740_v57 = vld [vmem:[#allocation2 + $0x834] sm:$0xf0]  ;;  %v9720_v62 = vld [vmem:[#allocation2 + $0x3c] sm:$0xf0]  ;;  %v10263_v63 = vor.u32 %v14045_v53, %v10260_v55 }
  0x67   : > { %3735 = vmatpush.bf16.msrb.mxu1 %v10503_v5  ;;  %v14285_v58 = vld [vmem:[#allocation2 + $0xbbc] sm:$0xf]  ;;  %v11220_v59 = vld [vmem:[#allocation2 + $0xbf4] sm:$0xf0]  ;;  %v10743_v0 = vor.u32 %v14165_v56, %v10740_v57  ;;  %v14030_v1 = vld [vmem:[#allocation2 + $0x3c4] sm:$0xf]  ;;  %v9723_v12 = vor.u32 %v13910_v61, %v9720_v62 }
  0x68   : > { %3749 = vmatpush.bf16.msrb.mxu2 %v10983_v6  ;;  %v10200_v2 = vld [vmem:[#allocation2 + $0x3fc] sm:$0xf0]  ;;  %v14150_v3 = vld [vmem:[#allocation2 + $0x784] sm:$0xf]  ;;  %v11223_v4 = vor.u32 %v14285_v58, %v11220_v59  ;;  %v10146_v9 = vld [vmem:[#allocation2 + $0x350] sm:$0xf] }
  0x69   : > { %3763 = vmatpush.bf16.msrb.mxu3 %v11463_v11  ;;  %v10680_v5 = vld [vmem:[#allocation2 + $0x7bc] sm:$0xf0]  ;;  %v14270_v6 = vld [vmem:[#allocation2 + $0xb44] sm:$0xf]  ;;  %v14023_v10 = vld [vmem:[#allocation2 + $0x388] sm:$0xf0]  ;;  %v10203_v17 = vor.u32 %v14030_v1, %v10200_v2 }
  0x6a   : > { %3722 = vmatpush.bf16.msrb.mxu0 %v9963_v19  ;;  %v11160_v7 = vld [vmem:[#allocation2 + $0xb7c] sm:$0xf0]  ;;  %v10626_v11 = vld [vmem:[#allocation2 + $0x710] sm:$0xf]  ;;  %v14143_v13 = vld [vmem:[#allocation2 + $0x748] sm:$0xf0]  ;;  %v10683_v18 = vor.u32 %v14150_v3, %v10680_v5  ;;  %v10147_v22 = vor.u32 %v14023_v10, %v10146_v9 }
  0x6b   : > { %3736 = vmatpush.bf16.msrb.mxu1 %v10443_v23  ;;  %v11106_v14 = vld [vmem:[#allocation2 + $0xad0] sm:$0xf]  ;;  %v14263_v16 = vld [vmem:[#allocation2 + $0xb08] sm:$0xf0]  ;;  %v11163_v21 = vor.u32 %v14270_v6, %v11160_v7  ;;  %v10627_v23 = vor.u32 %v14143_v13, %v10626_v11  ;;  %v10086_v25 = vld [vmem:[#allocation2 + $0x2d8] sm:$0xf] }
  0x6c   : > { %3750 = vmatpush.bf16.msrb.mxu2 %v10923_v24  ;;  %v11586_v19 = vld [vmem:[#allocation2 + $0xe90] sm:$0xf]  ;;  %v14383_v20 = vld [vmem:[#allocation2 + $0xec8] sm:$0xf0]  ;;  %v11107_v24 = vor.u32 %v14263_v16, %v11106_v14  ;;  %v14008_v27 = vld [vmem:[#allocation2 + $0x310] sm:$0xf0] }
  0x6d   : > { %3764 = vmatpush.bf16.msrb.mxu3 %v11403_v29  ;;  %v10566_v28 = vld [vmem:[#allocation2 + $0x698] sm:$0xf]  ;;  %v11587_v29 = vor.u32 %v14383_v20, %v11586_v19  ;;  %v14128_v30 = vld [vmem:[#allocation2 + $0x6d0] sm:$0xf0]  ;;  %v10026_v39 = vld [vmem:[#allocation2 + $0x260] sm:$0xf] }
  0x6e   : > { %3723 = vmatpush.bf16.msrb.mxu0 %v9903_v36  ;;  %v11046_v31 = vld [vmem:[#allocation2 + $0xa58] sm:$0xf]  ;;  %v14248_v32 = vld [vmem:[#allocation2 + $0xa90] sm:$0xf0]  ;;  %v10087_v36 = vor.u32 %v14008_v27, %v10086_v25  ;;  %v13993_v40 = vld [vmem:[#allocation2 + $0x298] sm:$0xf0] }
  0x6f   : > { %3737 = vmatpush.bf16.msrb.mxu1 %v10383_v37  ;;  %v11526_v34 = vld [vmem:[#allocation2 + $0xe18] sm:$0xf]  ;;  %v14368_v35 = vld [vmem:[#allocation2 + $0xe50] sm:$0xf0]  ;;  %v10567_v37 = vor.u32 %v14128_v30, %v10566_v28  ;;  %v10506_v41 = vld [vmem:[#allocation2 + $0x620] sm:$0xf] }
  0x70   : > { %3751 = vmatpush.bf16.msrb.mxu2 %v10863_v38  ;;  %v11047_v38 = vor.u32 %v14248_v32, %v11046_v31  ;;  %v14113_v43 = vld [vmem:[#allocation2 + $0x658] sm:$0xf0]  ;;  %v10986_v44 = vld [vmem:[#allocation2 + $0x9e0] sm:$0xf]  ;;  %v9966_v51 = vld [vmem:[#allocation2 + $0x1e8] sm:$0xf] }
  0x71   : > { %3765 = vmatpush.bf16.msrb.mxu3 %v11343_v42  ;;  %v11527_v42 = vor.u32 %v14368_v35, %v11526_v34  ;;  %v14233_v45 = vld [vmem:[#allocation2 + $0xa18] sm:$0xf0]  ;;  %v11466_v46 = vld [vmem:[#allocation2 + $0xda0] sm:$0xf]  ;;  %v13978_v52 = vld [vmem:[#allocation2 + $0x220] sm:$0xf0] }
  0x72   : > { %3724 = vmatpush.bf16.msrb.mxu0 %v9843_v48  ;;  %v14353_v47 = vld [vmem:[#allocation2 + $0xdd8] sm:$0xf0]  ;;  %v10027_v48 = vor.u32 %v13993_v40, %v10026_v39  ;;  %v10446_v53 = vld [vmem:[#allocation2 + $0x5a8] sm:$0xf]  ;;  %v14098_v55 = vld [vmem:[#allocation2 + $0x5e0] sm:$0xf0] }
  0x73   : > { %3738 = vmatpush.bf16.msrb.mxu1 %v10323_v49  ;;  %v10507_v49 = vor.u32 %v14113_v43, %v10506_v41  ;;  %v10926_v56 = vld [vmem:[#allocation2 + $0x968] sm:$0xf]  ;;  %v14218_v57 = vld [vmem:[#allocation2 + $0x9a0] sm:$0xf0]  ;;  %v10447_v61 = vor.u32 %v14098_v55, %v10446_v53  ;;  %v10386_v1 = vld [vmem:[#allocation2 + $0x530] sm:$0xf] }
  0x74   : > { %3752 = vmatpush.bf16.msrb.mxu2 %v10803_v50  ;;  %v10987_v50 = vor.u32 %v14233_v45, %v10986_v44  ;;  %v11406_v58 = vld [vmem:[#allocation2 + $0xd28] sm:$0xf]  ;;  %v14338_v59 = vld [vmem:[#allocation2 + $0xd60] sm:$0xf0]  ;;  %v10927_v62 = vor.u32 %v14218_v57, %v10926_v56  ;;  %v14083_v3 = vld [vmem:[#allocation2 + $0x568] sm:$0xf0] }
  0x75   : > { %3766 = vmatpush.bf16.msrb.mxu3 %v11283_v54  ;;  %v11467_v54 = vor.u32 %v14353_v47, %v11466_v46  ;;  %v11407_v2 = vor.u32 %v14338_v59, %v11406_v58  ;;  %v14203_v5 = vld [vmem:[#allocation2 + $0x928] sm:$0xf0]  ;;  %v11346_v6 = vld [vmem:[#allocation2 + $0xcb0] sm:$0xf]  ;;  %v10387_v10 = vor.u32 %v14083_v3, %v10386_v1  ;;  %v13948_v13 = vld [vmem:[#allocation2 + $0x130] sm:$0xf0] }
  0x76   : > { %3725 = vmatpush.bf16.msrb.mxu0 %v9783_v60  ;;  %v9967_v60 = vor.u32 %v13978_v52, %v9966_v51  ;;  %v14323_v7 = vld [vmem:[#allocation2 + $0xce8] sm:$0xf0]  ;;  %v10326_v14 = vld [vmem:[#allocation2 + $0x4b8] sm:$0xf]  ;;  %v14188_v19 = vld [vmem:[#allocation2 + $0x8b0] sm:$0xf0] }
  0x77   : > { %3739 = vmatpush.bf16.msrb.mxu1 %v10263_v63  ;;  %v9906_v63 = vld [vmem:[#allocation2 + $0x170] sm:$0xf]  ;;  %v11347_v16 = vor.u32 %v14323_v7, %v11346_v6  ;;  %v11286_v20 = vld [vmem:[#allocation2 + $0xc38] sm:$0xf]  ;;  %v9786_v25 = vld [vmem:[#allocation2 + $0x80] sm:$0xf] }
  0x78   : > { %3753 = vmatpush.bf16.msrb.mxu2 %v10743_v0  ;;  %v13963_v0 = vld [vmem:[#allocation2 + $0x1a8] sm:$0xf0]  ;;  %v13933_v27 = vld [vmem:[#allocation2 + $0xb8] sm:$0xf0]  ;;  %v10266_v28 = vld [vmem:[#allocation2 + $0x440] sm:$0xf] }
  0x79   : > { %3767 = vmatpush.bf16.msrb.mxu3 %v11223_v4  ;;  %v10866_v4 = vld [vmem:[#allocation2 + $0x8f0] sm:$0xf]  ;;  %v9907_v9 = vor.u32 %v13963_v0, %v9906_v63  ;;  %v14053_v30 = vld [vmem:[#allocation2 + $0x478] sm:$0xf0]  ;;  %v10746_v31 = vld [vmem:[#allocation2 + $0x800] sm:$0xf] }
  0x7a   : > { %3726 = vmatpush.bf16.msrb.mxu0 %v9723_v12  ;;  %v10867_v11 = vor.u32 %v14203_v5, %v10866_v4  ;;  %v9846_v12 = vld [vmem:[#allocation2 + $0xf8] sm:$0xf]  ;;  %v14173_v32 = vld [vmem:[#allocation2 + $0x838] sm:$0xf0]  ;;  %v11226_v34 = vld [vmem:[#allocation2 + $0xbc0] sm:$0xf]  ;;  %v10267_v39 = vor.u32 %v14053_v30, %v10266_v28 }
  0x7b   : > { %3740 = vmatpush.bf16.msrb.mxu1 %v10203_v17  ;;  %v14068_v17 = vld [vmem:[#allocation2 + $0x4f0] sm:$0xf0]  ;;  %v14293_v35 = vld [vmem:[#allocation2 + $0xbf8] sm:$0xf0]  ;;  %v10747_v40 = vor.u32 %v14173_v32, %v10746_v31  ;;  %v10206_v41 = vld [vmem:[#allocation2 + $0x3c8] sm:$0xf] }
  0x7c   : > { %3754 = vmatpush.bf16.msrb.mxu2 %v10683_v18  ;;  %v10806_v18 = vld [vmem:[#allocation2 + $0x878] sm:$0xf]  ;;  %v10686_v43 = vld [vmem:[#allocation2 + $0x788] sm:$0xf]  ;;  %v11227_v44 = vor.u32 %v14293_v35, %v11226_v34  ;;  %v14158_v45 = vld [vmem:[#allocation2 + $0x7c0] sm:$0xf0] }
  0x7d   : > { %3768 = vmatpush.bf16.msrb.mxu3 %v11163_v21  ;;  %3727 = vmatmul.bf16.vlgmr.msrb.gmra.mxu0 %v15664_v26  ;;  %v14308_v21 = vld [vmem:[#allocation2 + $0xc70] sm:$0xf0]  ;;  %v11166_v46 = vld [vmem:[#allocation2 + $0xb48] sm:$0xf]  ;;  %v14278_v47 = vld [vmem:[#allocation2 + $0xb80] sm:$0xf0]  ;;  %v10687_v56 = vor.u32 %v14158_v45, %v10686_v43 }
  0x7e   : > { %3775 = vmatpush.bf16.msra.mxu0 %v10147_v22  ;;  %3741 = vmatmul.bf16.vlgmr.msrb.gmra.mxu1 %v15668_v33  ;;  %v9847_v22 = vor.u32 %v13948_v13, %v9846_v12  ;;  %v10628_v52 = vld [vmem:[#allocation2 + $0x74c] sm:$0xf0]  ;;  %v14256_v53 = vld [vmem:[#allocation2 + $0xad4] sm:$0xf]  ;;  %v11167_v59 = vor.u32 %v14278_v47, %v11166_v46  ;;  %v14001_v63 = vld [vmem:[#allocation2 + $0x2dc] sm:$0xf] }
  0x7f   : > { %3789 = vmatpush.bf16.msra.mxu1 %v10627_v23  ;;  %3755 = vmatmul.bf16.vlgmr.msrb.gmra.mxu2 %v15654_v8  ;;  %v10327_v23 = vor.u32 %v14068_v17, %v10326_v14  ;;  %v14376_v57 = vld [vmem:[#allocation2 + $0xe94] sm:$0xf]  ;;  %v11588_v58 = vld [vmem:[#allocation2 + $0xecc] sm:$0xf0]  ;;  %v10088_v0 = vld [vmem:[#allocation2 + $0x314] sm:$0xf0] }
  0x80   : > { %3803 = vmatpush.bf16.msra.mxu2 %v11107_v24  ;;  %3769 = vmatmul.bf16.vlgmr.msrb.gmra.mxu3 %v15658_v15  ;;  %v10807_v24 = vor.u32 %v14188_v19, %v10806_v18  ;;  %v14121_v1 = vld [vmem:[#allocation2 + $0x69c] sm:$0xf]  ;;  %v10568_v3 = vld [vmem:[#allocation2 + $0x6d4] sm:$0xf0]  ;;  %v13986_v12 = vld [vmem:[#allocation2 + $0x264] sm:$0xf] }
  0x81   : > { %3817 = vmatpush.bf16.msra.mxu3 %v11587_v29  ;;  %v11287_v29 = vor.u32 %v14308_v21, %v11286_v20  ;;  %v14241_v4 = vld [vmem:[#allocation2 + $0xa5c] sm:$0xf]  ;;  %v11048_v5 = vld [vmem:[#allocation2 + $0xa94] sm:$0xf0]  ;;  %v10028_v13 = vld [vmem:[#allocation2 + $0x29c] sm:$0xf0] }
  0x82   : > { %3776 = vmatpush.bf16.msra.mxu0 %v10087_v36  ;;  %v9787_v36 = vor.u32 %v13933_v27, %v9786_v25  ;;  %v14361_v6 = vld [vmem:[#allocation2 + $0xe1c] sm:$0xf]  ;;  %v11528_v7 = vld [vmem:[#allocation2 + $0xe54] sm:$0xf0]  ;;  %v14106_v14 = vld [vmem:[#allocation2 + $0x624] sm:$0xf] }
  0x83   : > { %3790 = vmatpush.bf16.msra.mxu1 %v10567_v37  ;;  %v9726_v37 = vld [vmem:[#allocation2 + $0x8] sm:$0xf]  ;;  %v10508_v17 = vld [vmem:[#allocation2 + $0x65c] sm:$0xf0]  ;;  %v14226_v18 = vld [vmem:[#allocation2 + $0x9e4] sm:$0xf] }
  0x84   : > { %3804 = vmatpush.bf16.msra.mxu2 %v11047_v38  ;;  %v13918_v38 = vld [vmem:[#allocation2 + $0x40] sm:$0xf0]  ;;  %v10988_v19 = vld [vmem:[#allocation2 + $0xa1c] sm:$0xf0]  ;;  %v13971_v25 = vld [vmem:[#allocation2 + $0x1ec] sm:$0xf] }
  0x85   : > { %3818 = vmatpush.bf16.msra.mxu3 %v11527_v42  ;;  %v14038_v42 = vld [vmem:[#allocation2 + $0x400] sm:$0xf0]  ;;  %v9727_v51 = vor.u32 %v13918_v38, %v9726_v37  ;;  %v11468_v21 = vld [vmem:[#allocation2 + $0xddc] sm:$0xf0]  ;;  %v9968_v27 = vld [vmem:[#allocation2 + $0x224] sm:$0xf0] }
  0x86   : > { %3777 = vmatpush.bf16.msra.mxu0 %v10027_v48  ;;  %v14016_v48 = vld [vmem:[#allocation2 + $0x354] sm:$0xf]  ;;  %v10207_v55 = vor.u32 %v14038_v42, %v10206_v41  ;;  %v14346_v20 = vld [vmem:[#allocation2 + $0xda4] sm:$0xf]  ;;  %v14091_v28 = vld [vmem:[#allocation2 + $0x5ac] sm:$0xf] }
  0x87   : > { %3791 = vmatpush.bf16.msra.mxu1 %v10507_v49  ;;  %v10148_v49 = vld [vmem:[#allocation2 + $0x38c] sm:$0xf0]  ;;  %v10448_v30 = vld [vmem:[#allocation2 + $0x5e4] sm:$0xf0]  ;;  %v14211_v31 = vld [vmem:[#allocation2 + $0x96c] sm:$0xf] }
  0x88   : > { %3805 = vmatpush.bf16.msra.mxu2 %v10987_v50  ;;  %v14136_v50 = vld [vmem:[#allocation2 + $0x714] sm:$0xf]  ;;  %v10928_v32 = vld [vmem:[#allocation2 + $0x9a4] sm:$0xf0]  ;;  %v14331_v34 = vld [vmem:[#allocation2 + $0xd2c] sm:$0xf]  ;;  %v10451_v37 = vor.u32 %v14091_v28, %v10448_v30 }
  0x89   : > { %3819 = vmatpush.bf16.msra.mxu3 %v11467_v54  ;;  %v11108_v54 = vld [vmem:[#allocation2 + $0xb0c] sm:$0xf0]  ;;  %v11408_v35 = vld [vmem:[#allocation2 + $0xd64] sm:$0xf0]  ;;  %v10931_v38 = vor.u32 %v14211_v31, %v10928_v32  ;;  %v14076_v41 = vld [vmem:[#allocation2 + $0x534] sm:$0xf] }
  0x8a   : > { %3778 = vmatpush.bf16.msra.mxu0 %v9967_v60  ;;  %v10151_v60 = vor.u32 %v14016_v48, %v10148_v49  ;;  %v11411_v42 = vor.u32 %v14331_v34, %v11408_v35  ;;  %v10388_v43 = vld [vmem:[#allocation2 + $0x56c] sm:$0xf0]  ;;  %v14316_v46 = vld [vmem:[#allocation2 + $0xcb4] sm:$0xf]  ;;  %v11114_v28 = vld [vmem:[#allocation2 + $0xad8] sm:$0xf] }
  0x8b   : > { %3792 = vmatpush.bf16.msra.mxu1 %v10447_v61  ;;  %v10631_v61 = vor.u32 %v14136_v50, %v10628_v52  ;;  %v10868_v45 = vld [vmem:[#allocation2 + $0x92c] sm:$0xf0]  ;;  %v10391_v49 = vor.u32 %v14076_v41, %v10388_v43  ;;  %v9848_v52 = vld [vmem:[#allocation2 + $0x134] sm:$0xf0]  ;;  %v14384_v34 = vld [vmem:[#allocation2 + $0xed0] sm:$0xf0] }
  0x8c   : > { %3806 = vmatpush.bf16.msra.mxu2 %v10927_v62  ;;  %v11111_v62 = vor.u32 %v14256_v53, %v11108_v54  ;;  %v11348_v47 = vld [vmem:[#allocation2 + $0xcec] sm:$0xf0]  ;;  %v14061_v53 = vld [vmem:[#allocation2 + $0x4bc] sm:$0xf]  ;;  %v11594_v32 = vld [vmem:[#allocation2 + $0xe98] sm:$0xf] }
  0x8d   : > { %3820 = vmatpush.bf16.msra.mxu3 %v11407_v2  ;;  %v11591_v2 = vor.u32 %v14376_v57, %v11588_v58  ;;  %v11351_v54 = vor.u32 %v14316_v46, %v11348_v47  ;;  %v10808_v57 = vld [vmem:[#allocation2 + $0x8b4] sm:$0xf0]  ;;  %v14301_v58 = vld [vmem:[#allocation2 + $0xc3c] sm:$0xf]  ;;  %v10574_v41 = vld [vmem:[#allocation2 + $0x6a0] sm:$0xf] }
  0x8e   : > { %3779 = vmatpush.bf16.msra.mxu0 %v9907_v9  ;;  %v10091_v9 = vor.u32 %v14001_v63, %v10088_v0  ;;  %v13926_v63 = vld [vmem:[#allocation2 + $0x84] sm:$0xf]  ;;  %v9788_v0 = vld [vmem:[#allocation2 + $0xbc] sm:$0xf0]  ;;  %v14129_v43 = vld [vmem:[#allocation2 + $0x6d8] sm:$0xf0] }
  0x8f   : > { %3793 = vmatpush.bf16.msra.mxu1 %v10387_v10  ;;  %v10571_v10 = vor.u32 %v14121_v1, %v10568_v3  ;;  %v14046_v1 = vld [vmem:[#allocation2 + $0x444] sm:$0xf]  ;;  %v10268_v3 = vld [vmem:[#allocation2 + $0x47c] sm:$0xf0]  ;;  %v14369_v47 = vld [vmem:[#allocation2 + $0xe58] sm:$0xf0] }
  0x90   : > { %3807 = vmatpush.bf16.msra.mxu2 %v10867_v11  ;;  %v11051_v11 = vor.u32 %v14241_v4, %v11048_v5  ;;  %v14166_v4 = vld [vmem:[#allocation2 + $0x804] sm:$0xf]  ;;  %v10748_v5 = vld [vmem:[#allocation2 + $0x83c] sm:$0xf0]  ;;  %vm6073_vm14 = vcmask 64512   ;;  %s13904_s28 = sshll.u32 %s16427_s17, 6 }
  0x91   : > { %3821 = vmatpush.bf16.msra.mxu3 %v11347_v16  ;;  %v11531_v16 = vor.u32 %v14361_v6, %v11528_v7  ;;  %v14286_v6 = vld [vmem:[#allocation2 + $0xbc4] sm:$0xf]  ;;  %v11228_v7 = vld [vmem:[#allocation2 + $0xbfc] sm:$0xf0]  ;;  %s16075_s15 = scalar_lea.vmem %s16389_s14, %s13904_s28  ;;  %s16325_s26 = scalar_lea.vmem %s16388_s13, %s13904_s28 }
  0x92   : > { %3780 = vmatpush.bf16.msra.mxu0 %v9847_v22  ;;  %v10031_v22 = vor.u32 %v13986_v12, %v10028_v13  ;;  %v10271_v12 = vor.u32 %v14046_v1, %v10268_v3  ;;  %v10751_v13 = vor.u32 %v14166_v4, %v10748_v5  ;;  %v11534_v46 = vld [vmem:[#allocation2 + $0xe20] sm:$0xf]  ;;  %v10454_v1 = vld [vmem:[#allocation2 + $0x5b0] sm:$0xf]  ;;  %v14099_v3 = vld [vmem:[#allocation2 + $0x5e8] sm:$0xf0] }
  0x93   : > { %3794 = vmatpush.bf16.msra.mxu1 %v10327_v23  ;;  %v10511_v23 = vor.u32 %v14106_v14, %v10508_v17  ;;  %v14031_v14 = vld [vmem:[#allocation2 + $0x3cc] sm:$0xf]  ;;  %v10934_v4 = vld [vmem:[#allocation2 + $0x970] sm:$0xf] }
  0x94   : > { %3808 = vmatpush.bf16.msra.mxu2 %v10807_v24  ;;  %v10991_v24 = vor.u32 %v14226_v18, %v10988_v19  ;;  %v14151_v17 = vld [vmem:[#allocation2 + $0x78c] sm:$0xf]  ;;  %v11231_v18 = vor.u32 %v14286_v6, %v11228_v7  ;;  %v10688_v19 = vld [vmem:[#allocation2 + $0x7c4] sm:$0xf0]  ;;  %v11414_v6 = vld [vmem:[#allocation2 + $0xd30] sm:$0xf] }
  0x95   : > { %3822 = vmatpush.bf16.msra.mxu3 %v11287_v29  ;;  %v11471_v29 = vor.u32 %v14346_v20, %v11468_v21  ;;  %v14271_v20 = vld [vmem:[#allocation2 + $0xb4c] sm:$0xf]  ;;  %v11168_v21 = vld [vmem:[#allocation2 + $0xb84] sm:$0xf0]  ;;  %v10691_v31 = vor.u32 %v14151_v17, %v10688_v19  ;;  %v14084_v17 = vld [vmem:[#allocation2 + $0x570] sm:$0xf0] }
  0x96   : > { %3781 = vmatpush.bf16.msra.mxu0 %v9787_v36  ;;  %v9971_v36 = vor.u32 %v13971_v25, %v9968_v27  ;;  %v14144_v27 = vld [vmem:[#allocation2 + $0x750] sm:$0xf0]  ;;  %v11171_v35 = vor.u32 %v14271_v20, %v11168_v21  ;;  %v14219_v5 = vld [vmem:[#allocation2 + $0x9a8] sm:$0xf0]  ;;  %v11354_v20 = vld [vmem:[#allocation2 + $0xcb8] sm:$0xf] }
  0x97   : > { %3795 = vmatpush.bf16.msra.mxu1 %v10267_v39  ;;  %v13956_v39 = vld [vmem:[#allocation2 + $0x174] sm:$0xf]  ;;  %v14339_v7 = vld [vmem:[#allocation2 + $0xd68] sm:$0xf0] }
  0x98   : > { %3809 = vmatpush.bf16.msra.mxu2 %v10747_v40  ;;  %v9908_v40 = vld [vmem:[#allocation2 + $0x1ac] sm:$0xf0]  ;;  %v14204_v19 = vld [vmem:[#allocation2 + $0x930] sm:$0xf0] }
  0x99   : > { %3823 = vmatpush.bf16.msra.mxu3 %v11227_v44  ;;  %v14196_v44 = vld [vmem:[#allocation2 + $0x8f4] sm:$0xf]  ;;  %v9911_v48 = vor.u32 %v13956_v39, %v9908_v40  ;;  %v10094_v39 = vld [vmem:[#allocation2 + $0x2e0] sm:$0xf]  ;;  %v14009_v40 = vld [vmem:[#allocation2 + $0x318] sm:$0xf0] }
  0x9a   : > { %3782 = vmatpush.bf16.msra.mxu0 %v9727_v51  ;;  %v10871_v50 = vor.u32 %v14196_v44, %v10868_v45  ;;  %v13941_v51 = vld [vmem:[#allocation2 + $0xfc] sm:$0xf]  ;;  %v11054_v44 = vld [vmem:[#allocation2 + $0xa60] sm:$0xf]  ;;  %v14324_v21 = vld [vmem:[#allocation2 + $0xcf0] sm:$0xf0] }
  0x9b   : > { %3796 = vmatpush.bf16.msra.mxu1 %v10207_v55  ;;  %v10328_v55 = vld [vmem:[#allocation2 + $0x4f4] sm:$0xf0]  ;;  %v14249_v45 = vld [vmem:[#allocation2 + $0xa98] sm:$0xf0] }
  0x9c   : > { %3810 = vmatpush.bf16.msra.mxu2 %v10687_v56  ;;  %v14181_v56 = vld [vmem:[#allocation2 + $0x87c] sm:$0xf] }
  0x9d   : > { %3824 = vmatpush.bf16.msra.mxu3 %v11167_v59  ;;  %3783 = vmatmul.bf16.vlgmr.msra.gmra.mxu0 %v15664_v26  ;;  %v11288_v59 = vld [vmem:[#allocation2 + $0xc74] sm:$0xf0] }
  0x9e   : > { %3831 = vmatpush.bf16.msrb.mxu0 %v10151_v60  ;;  %3797 = vmatmul.bf16.vlgmr.msra.gmra.mxu1 %v15668_v33  ;;  %v9851_v60 = vor.u32 %v13941_v51, %v9848_v52  ;;  %v10034_v51 = vld [vmem:[#allocation2 + $0x268] sm:$0xf]  ;;  %v13994_v52 = vld [vmem:[#allocation2 + $0x2a0] sm:$0xf0] }
  0x9f   : > { %3845 = vmatpush.bf16.msrb.mxu1 %v10631_v61  ;;  %3811 = vmatmul.bf16.vlgmr.msra.gmra.mxu2 %v15654_v8  ;;  %v10331_v61 = vor.u32 %v14061_v53, %v10328_v55  ;;  %v10514_v53 = vld [vmem:[#allocation2 + $0x628] sm:$0xf]  ;;  %v14114_v55 = vld [vmem:[#allocation2 + $0x660] sm:$0xf0] }
  0xa0   : > { %3859 = vmatpush.bf16.msrb.mxu2 %v11111_v62  ;;  %3825 = vmatmul.bf16.vlgmr.msra.gmra.mxu3 %v15658_v15  ;;  %v10811_v62 = vor.u32 %v14181_v56, %v10808_v57  ;;  %v10994_v56 = vld [vmem:[#allocation2 + $0x9e8] sm:$0xf]  ;;  %v14234_v57 = vld [vmem:[#allocation2 + $0xa20] sm:$0xf0] }
  0xa1   : > { %3873 = vmatpush.bf16.msrb.mxu3 %v11591_v2  ;;  %v11291_v2 = vor.u32 %v14301_v58, %v11288_v59  ;;  %v11474_v58 = vld [vmem:[#allocation2 + $0xda8] sm:$0xf]  ;;  %v14354_v59 = vld [vmem:[#allocation2 + $0xde0] sm:$0xf0] }
  0xa2   : > { %3832 = vmatpush.bf16.msrb.mxu0 %v10091_v9  ;;  %v9791_v9 = vor.u32 %v13926_v63, %v9788_v0  ;;  %v9974_v63 = vld [vmem:[#allocation2 + $0x1f0] sm:$0xf]  ;;  %v13979_v0 = vld [vmem:[#allocation2 + $0x228] sm:$0xf0] }
  0xa3   : > { %3846 = vmatpush.bf16.msrb.mxu1 %v10571_v10  ;;  %v13911_v10 = vld [vmem:[#allocation2 + $0xc] sm:$0xf] }
  0xa4   : > { %3860 = vmatpush.bf16.msrb.mxu2 %v11051_v11  ;;  %v9728_v11 = vld [vmem:[#allocation2 + $0x44] sm:$0xf0] }
  0xa5   : > { %3874 = vmatpush.bf16.msrb.mxu3 %v11531_v16  ;;  %v10208_v16 = vld [vmem:[#allocation2 + $0x404] sm:$0xf0]  ;;  %v9731_v25 = vor.u32 %v13911_v10, %v9728_v11  ;;  %v10455_v10 = vor.u32 %v14099_v3, %v10454_v1  ;;  %v10935_v11 = vor.u32 %v14219_v5, %v10934_v4  ;;  %v14257_v1 = vld [vmem:[#allocation2 + $0xadc] sm:$0xf] }
  0xa6   : > { %3833 = vmatpush.bf16.msrb.mxu0 %v10031_v22  ;;  %v10154_v22 = vld [vmem:[#allocation2 + $0x358] sm:$0xf]  ;;  %v10211_v30 = vor.u32 %v14031_v14, %v10208_v16  ;;  %v11415_v16 = vor.u32 %v14339_v7, %v11414_v6  ;;  %v14377_v5 = vld [vmem:[#allocation2 + $0xe9c] sm:$0xf] }
  0xa7   : > { %3847 = vmatpush.bf16.msrb.mxu1 %v10511_v23  ;;  %v14024_v23 = vld [vmem:[#allocation2 + $0x390] sm:$0xf0]  ;;  %v10394_v14 = vld [vmem:[#allocation2 + $0x538] sm:$0xf] }
  0xa8   : > { %3861 = vmatpush.bf16.msrb.mxu2 %v10991_v24  ;;  %v10634_v24 = vld [vmem:[#allocation2 + $0x718] sm:$0xf] }
  0xa9   : > { %3875 = vmatpush.bf16.msrb.mxu3 %v11471_v29  ;;  %v14264_v29 = vld [vmem:[#allocation2 + $0xb10] sm:$0xf0]  ;;  %v11596_v6 = vld [vmem:[#allocation2 + $0xed4] sm:$0xf0] }
  0xaa   : > { %3834 = vmatpush.bf16.msrb.mxu0 %v9971_v36  ;;  %v10155_v36 = vor.u32 %v14024_v23, %v10154_v22  ;;  %v10395_v23 = vor.u32 %v14084_v17, %v10394_v14  ;;  %v14122_v14 = vld [vmem:[#allocation2 + $0x6a4] sm:$0xf]  ;;  %v10576_v17 = vld [vmem:[#allocation2 + $0x6dc] sm:$0xf0] }
  0xab   : > { %3848 = vmatpush.bf16.msrb.mxu1 %v10451_v37  ;;  %v10635_v37 = vor.u32 %v14144_v27, %v10634_v24  ;;  %v13949_v27 = vld [vmem:[#allocation2 + $0x138] sm:$0xf0] }
  0xac   : > { %3862 = vmatpush.bf16.msrb.mxu2 %v10931_v38  ;;  %v11115_v38 = vor.u32 %v14264_v29, %v11114_v28  ;;  %v10334_v28 = vld [vmem:[#allocation2 + $0x4c0] sm:$0xf]  ;;  %v11355_v29 = vor.u32 %v14324_v21, %v11354_v20  ;;  %v14362_v20 = vld [vmem:[#allocation2 + $0xe24] sm:$0xf] }
  0xad   : > { %3876 = vmatpush.bf16.msrb.mxu3 %v11411_v42  ;;  %v11595_v42 = vor.u32 %v14384_v34, %v11594_v32  ;;  %v14189_v32 = vld [vmem:[#allocation2 + $0x8b8] sm:$0xf0]  ;;  %v11294_v34 = vld [vmem:[#allocation2 + $0xc40] sm:$0xf] }
  0xae   : > { %3835 = vmatpush.bf16.msrb.mxu0 %v9911_v48  ;;  %v10095_v48 = vor.u32 %v14009_v40, %v10094_v39  ;;  %v9794_v39 = vld [vmem:[#allocation2 + $0x88] sm:$0xf]  ;;  %v13934_v40 = vld [vmem:[#allocation2 + $0xc0] sm:$0xf0]  ;;  %v11536_v21 = vld [vmem:[#allocation2 + $0xe5c] sm:$0xf0] }
  0xaf   : > { %3849 = vmatpush.bf16.msrb.mxu1 %v10391_v49  ;;  %v10575_v49 = vor.u32 %v14129_v43, %v10574_v41  ;;  %v10274_v41 = vld [vmem:[#allocation2 + $0x448] sm:$0xf]  ;;  %v14054_v43 = vld [vmem:[#allocation2 + $0x480] sm:$0xf0] }
  0xb0   : > { %3863 = vmatpush.bf16.msrb.mxu2 %v10871_v50  ;;  %v11055_v50 = vor.u32 %v14249_v45, %v11054_v44  ;;  %v10754_v44 = vld [vmem:[#allocation2 + $0x808] sm:$0xf]  ;;  %v14174_v45 = vld [vmem:[#allocation2 + $0x840] sm:$0xf0] }
  0xb1   : > { %3877 = vmatpush.bf16.msrb.mxu3 %v11351_v54  ;;  %v11535_v54 = vor.u32 %v14369_v47, %v11534_v46  ;;  %v11234_v46 = vld [vmem:[#allocation2 + $0xbc8] sm:$0xf]  ;;  %v14294_v47 = vld [vmem:[#allocation2 + $0xc00] sm:$0xf0] }
  0xb2   : > { %3836 = vmatpush.bf16.msrb.mxu0 %v9851_v60  ;;  %v10035_v60 = vor.u32 %v13994_v52, %v10034_v51  ;;  %v10275_v51 = vor.u32 %v14054_v43, %v10274_v41  ;;  %v10755_v52 = vor.u32 %v14174_v45, %v10754_v44  ;;  %v14092_v41 = vld [vmem:[#allocation2 + $0x5b4] sm:$0xf]  ;;  %v10456_v43 = vld [vmem:[#allocation2 + $0x5ec] sm:$0xf0] }
  0xb3   : > { %3850 = vmatpush.bf16.msrb.mxu1 %v10331_v61  ;;  %v10515_v61 = vor.u32 %v14114_v55, %v10514_v53  ;;  %v10214_v53 = vld [vmem:[#allocation2 + $0x3d0] sm:$0xf]  ;;  %v14212_v44 = vld [vmem:[#allocation2 + $0x974] sm:$0xf] }
  0xb4   : > { %3864 = vmatpush.bf16.msrb.mxu2 %v10811_v62  ;;  %v10995_v62 = vor.u32 %v14234_v57, %v10994_v56  ;;  %v10694_v55 = vld [vmem:[#allocation2 + $0x790] sm:$0xf]  ;;  %v11235_v56 = vor.u32 %v14294_v47, %v11234_v46  ;;  %v14159_v57 = vld [vmem:[#allocation2 + $0x7c8] sm:$0xf0]  ;;  %v14332_v46 = vld [vmem:[#allocation2 + $0xd34] sm:$0xf] }
  0xb5   : > { %3878 = vmatpush.bf16.msrb.mxu3 %v11291_v2  ;;  %v11475_v2 = vor.u32 %v14354_v59, %v11474_v58  ;;  %v11174_v58 = vld [vmem:[#allocation2 + $0xb50] sm:$0xf]  ;;  %v14279_v59 = vld [vmem:[#allocation2 + $0xb88] sm:$0xf0]  ;;  %v10695_v4 = vor.u32 %v14159_v57, %v10694_v55  ;;  %v10396_v55 = vld [vmem:[#allocation2 + $0x574] sm:$0xf0] }
  0xb6   : > { %3837 = vmatpush.bf16.msrb.mxu0 %v9791_v9  ;;  %v9975_v9 = vor.u32 %v13979_v0, %v9974_v63  ;;  %v10636_v0 = vld [vmem:[#allocation2 + $0x754] sm:$0xf0]  ;;  %v11175_v7 = vor.u32 %v14279_v59, %v11174_v58  ;;  %v10936_v45 = vld [vmem:[#allocation2 + $0x9ac] sm:$0xf0]  ;;  %v14317_v58 = vld [vmem:[#allocation2 + $0xcbc] sm:$0xf] }
  0xb7   : > { %3851 = vmatpush.bf16.msrb.mxu1 %v10271_v12  ;;  %v9914_v12 = vld [vmem:[#allocation2 + $0x178] sm:$0xf]  ;;  %v11416_v47 = vld [vmem:[#allocation2 + $0xd6c] sm:$0xf0] }
  0xb8   : > { %3865 = vmatpush.bf16.msrb.mxu2 %v10751_v13  ;;  %v13964_v13 = vld [vmem:[#allocation2 + $0x1b0] sm:$0xf0]  ;;  %v10876_v57 = vld [vmem:[#allocation2 + $0x934] sm:$0xf0] }
  0xb9   : > { %3879 = vmatpush.bf16.msrb.mxu3 %v11231_v18  ;;  %v10874_v18 = vld [vmem:[#allocation2 + $0x8f8] sm:$0xf]  ;;  %v9915_v22 = vor.u32 %v13964_v13, %v9914_v12  ;;  %v14002_v12 = vld [vmem:[#allocation2 + $0x2e4] sm:$0xf]  ;;  %v10096_v13 = vld [vmem:[#allocation2 + $0x31c] sm:$0xf0] }
  0xba   : > { %3838 = vmatpush.bf16.msrb.mxu0 %v9731_v25  ;;  %v10875_v24 = vor.u32 %v14204_v19, %v10874_v18  ;;  %v9854_v25 = vld [vmem:[#allocation2 + $0x100] sm:$0xf]  ;;  %v14242_v18 = vld [vmem:[#allocation2 + $0xa64] sm:$0xf]  ;;  %v11356_v59 = vld [vmem:[#allocation2 + $0xcf4] sm:$0xf0] }
  0xbb   : > { %3852 = vmatpush.bf16.msrb.mxu1 %v10211_v30  ;;  %v14069_v30 = vld [vmem:[#allocation2 + $0x4f8] sm:$0xf0]  ;;  %v11056_v19 = vld [vmem:[#allocation2 + $0xa9c] sm:$0xf0] }
  0xbc   : > { %3866 = vmatpush.bf16.msrb.mxu2 %v10691_v31  ;;  %v10814_v31 = vld [vmem:[#allocation2 + $0x880] sm:$0xf] }
  0xbd   : > { %3880 = vmatpush.bf16.msrb.mxu3 %v11171_v35  ;;  %3839 = vmatmul.bf16.vlgmr.msrb.gmra.mxu0 %v15664_v26  ;;  %v14309_v35 = vld [vmem:[#allocation2 + $0xc78] sm:$0xf0] }
  0xbe   : > { %3887 = vmatpush.bf16.msra.mxu0 %v10155_v36  ;;  %3853 = vmatmul.bf16.vlgmr.msrb.gmra.mxu1 %v15668_v33  ;;  %v9855_v36 = vor.u32 %v13949_v27, %v9854_v25  ;;  %v13987_v25 = vld [vmem:[#allocation2 + $0x26c] sm:$0xf]  ;;  %v10036_v27 = vld [vmem:[#allocation2 + $0x2a4] sm:$0xf0] }
  0xbf   : > { %3901 = vmatpush.bf16.msra.mxu1 %v10635_v37  ;;  %3867 = vmatmul.bf16.vlgmr.msrb.gmra.mxu2 %v15654_v8  ;;  %v10335_v37 = vor.u32 %v14069_v30, %v10334_v28  ;;  %v14107_v28 = vld [vmem:[#allocation2 + $0x62c] sm:$0xf]  ;;  %v10516_v30 = vld [vmem:[#allocation2 + $0x664] sm:$0xf0] }
  0xc0   : > { %3915 = vmatpush.bf16.msra.mxu2 %v11115_v38  ;;  %3881 = vmatmul.bf16.vlgmr.msrb.gmra.mxu3 %v15658_v15  ;;  %v10815_v38 = vor.u32 %v14189_v32, %v10814_v31  ;;  %v14227_v31 = vld [vmem:[#allocation2 + $0x9ec] sm:$0xf]  ;;  %v10996_v32 = vld [vmem:[#allocation2 + $0xa24] sm:$0xf0] }
  0xc1   : > { %3929 = vmatpush.bf16.msra.mxu3 %v11595_v42  ;;  %v11295_v42 = vor.u32 %v14309_v35, %v11294_v34  ;;  %v14347_v34 = vld [vmem:[#allocation2 + $0xdac] sm:$0xf]  ;;  %v11476_v35 = vld [vmem:[#allocation2 + $0xde4] sm:$0xf0] }
  0xc2   : > { %3888 = vmatpush.bf16.msra.mxu0 %v10095_v48  ;;  %v9795_v48 = vor.u32 %v13934_v40, %v9794_v39  ;;  %v13972_v39 = vld [vmem:[#allocation2 + $0x1f4] sm:$0xf]  ;;  %v9976_v40 = vld [vmem:[#allocation2 + $0x22c] sm:$0xf0] }
  0xc3   : > { %3902 = vmatpush.bf16.msra.mxu1 %v10575_v49  ;;  %v9734_v49 = vld [vmem:[#allocation2 + $0x10] sm:$0xf] }
  0xc4   : > { %3916 = vmatpush.bf16.msra.mxu2 %v11055_v50  ;;  %v13919_v50 = vld [vmem:[#allocation2 + $0x48] sm:$0xf0] }
  0xc5   : > { %3930 = vmatpush.bf16.msra.mxu3 %v11535_v54  ;;  %v14039_v54 = vld [vmem:[#allocation2 + $0x408] sm:$0xf0]  ;;  %v9735_v63 = vor.u32 %v13919_v50, %v9734_v49  ;;  %v10459_v49 = vor.u32 %v14092_v41, %v10456_v43  ;;  %v10939_v50 = vor.u32 %v14212_v44, %v10936_v45  ;;  %v11176_v41 = vld [vmem:[#allocation2 + $0xb8c] sm:$0xf0]  ;;  %v10162_v43 = vld [vmem:[#allocation2 + $0x360] sm:$0xf] }
  0xc6   : > { %3889 = vmatpush.bf16.msra.mxu0 %v10035_v60  ;;  %v14017_v60 = vld [vmem:[#allocation2 + $0x35c] sm:$0xf]  ;;  %v10215_v3 = vor.u32 %v14039_v54, %v10214_v53  ;;  %v11419_v54 = vor.u32 %v14332_v46, %v11416_v47  ;;  %v10642_v45 = vld [vmem:[#allocation2 + $0x720] sm:$0xf] }
  0xc7   : > { %3903 = vmatpush.bf16.msra.mxu1 %v10515_v61  ;;  %v10156_v61 = vld [vmem:[#allocation2 + $0x394] sm:$0xf0]  ;;  %v14077_v53 = vld [vmem:[#allocation2 + $0x53c] sm:$0xf] }
  0xc8   : > { %3917 = vmatpush.bf16.msra.mxu2 %v10995_v62  ;;  %v14137_v62 = vld [vmem:[#allocation2 + $0x71c] sm:$0xf] }
  0xc9   : > { %3931 = vmatpush.bf16.msra.mxu3 %v11475_v2  ;;  %v11116_v2 = vld [vmem:[#allocation2 + $0xb14] sm:$0xf0]  ;;  %v14025_v44 = vld [vmem:[#allocation2 + $0x398] sm:$0xf0] }
  0xca   : > { %3890 = vmatpush.bf16.msra.mxu0 %v9975_v9  ;;  %v10159_v9 = vor.u32 %v14017_v60, %v10156_v61  ;;  %v10399_v61 = vor.u32 %v14077_v53, %v10396_v55  ;;  %v14145_v47 = vld [vmem:[#allocation2 + $0x758] sm:$0xf0]  ;;  %v10163_v55 = vor.u32 %v14025_v44, %v10162_v43 }
  0xcb   : > { %3904 = vmatpush.bf16.msra.mxu1 %v10455_v10  ;;  %v10639_v10 = vor.u32 %v14137_v62, %v10636_v0  ;;  %v9856_v0 = vld [vmem:[#allocation2 + $0x13c] sm:$0xf0]  ;;  %v14385_v53 = vld [vmem:[#allocation2 + $0xed8] sm:$0xf0] }
  0xcc   : > { %3918 = vmatpush.bf16.msra.mxu2 %v10935_v11  ;;  %v11119_v11 = vor.u32 %v14257_v1, %v11116_v2  ;;  %v14062_v1 = vld [vmem:[#allocation2 + $0x4c4] sm:$0xf]  ;;  %v11359_v2 = vor.u32 %v14317_v58, %v11356_v59  ;;  %v10102_v58 = vld [vmem:[#allocation2 + $0x2e8] sm:$0xf] }
  0xcd   : > { %3932 = vmatpush.bf16.msra.mxu3 %v11415_v16  ;;  %v11599_v16 = vor.u32 %v14377_v5, %v11596_v6  ;;  %v10816_v5 = vld [vmem:[#allocation2 + $0x8bc] sm:$0xf0]  ;;  %v14302_v6 = vld [vmem:[#allocation2 + $0xc44] sm:$0xf] }
  0xce   : > { %3891 = vmatpush.bf16.msra.mxu0 %v9915_v22  ;;  %v10099_v22 = vor.u32 %v14002_v12, %v10096_v13  ;;  %v13927_v12 = vld [vmem:[#allocation2 + $0x8c] sm:$0xf]  ;;  %v9796_v13 = vld [vmem:[#allocation2 + $0xc4] sm:$0xf0]  ;;  %v14010_v59 = vld [vmem:[#allocation2 + $0x320] sm:$0xf0] }
  0xcf   : > { %3905 = vmatpush.bf16.msra.mxu1 %v10395_v23  ;;  %v10579_v23 = vor.u32 %v14122_v14, %v10576_v17  ;;  %v14047_v14 = vld [vmem:[#allocation2 + $0x44c] sm:$0xf] }
  0xd0   : > { %3919 = vmatpush.bf16.msra.mxu2 %v10875_v24  ;;  %v11059_v24 = vor.u32 %v14242_v18, %v11056_v19  ;;  %v10276_v19 = vld [vmem:[#allocation2 + $0x484] sm:$0xf0] }
  0xd1   : > { %3933 = vmatpush.bf16.msra.mxu3 %v11355_v29  ;;  %v11539_v29 = vor.u32 %v14362_v20, %v11536_v21  ;;  %v14167_v20 = vld [vmem:[#allocation2 + $0x80c] sm:$0xf]  ;;  %v10756_v21 = vld [vmem:[#allocation2 + $0x844] sm:$0xf0] }
  0xd2   : > { %3892 = vmatpush.bf16.msra.mxu0 %v9855_v36  ;;  %v10039_v36 = vor.u32 %v13987_v25, %v10036_v27  ;;  %v9799_v27 = vor.u32 %v13927_v12, %v9796_v13  ;;  %v14115_v13 = vld [vmem:[#allocation2 + $0x668] sm:$0xf0] }
  0xd3   : > { %3906 = vmatpush.bf16.msra.mxu1 %v10335_v37  ;;  %v10519_v37 = vor.u32 %v14107_v28, %v10516_v30  ;;  %v13912_v28 = vld [vmem:[#allocation2 + $0x14] sm:$0xf] }
  0xd4   : > { %3920 = vmatpush.bf16.msra.mxu2 %v10815_v38  ;;  %v10999_v38 = vor.u32 %v14227_v31, %v10996_v32  ;;  %v10279_v31 = vor.u32 %v14047_v14, %v10276_v19  ;;  %v10759_v32 = vor.u32 %v14167_v20, %v10756_v21  ;;  %v11002_v14 = vld [vmem:[#allocation2 + $0x9f0] sm:$0xf] }
  0xd5   : > { %3934 = vmatpush.bf16.msra.mxu3 %v11295_v42  ;;  %v11479_v42 = vor.u32 %v14347_v34, %v11476_v35  ;;  %v14032_v34 = vld [vmem:[#allocation2 + $0x3d4] sm:$0xf]  ;;  %v10216_v35 = vld [vmem:[#allocation2 + $0x40c] sm:$0xf0] }
  0xd6   : > { %3893 = vmatpush.bf16.msra.mxu0 %v9795_v48  ;;  %v9979_v48 = vor.u32 %v13972_v39, %v9976_v40  ;;  %v10696_v39 = vld [vmem:[#allocation2 + $0x7cc] sm:$0xf0]  ;;  %v14272_v40 = vld [vmem:[#allocation2 + $0xb54] sm:$0xf] }
  0xd7   : > { %3907 = vmatpush.bf16.msra.mxu1 %v10275_v51  ;;  %v13957_v51 = vld [vmem:[#allocation2 + $0x17c] sm:$0xf] }
  0xd8   : > { %3921 = vmatpush.bf16.msra.mxu2 %v10755_v52  ;;  %v9916_v52 = vld [vmem:[#allocation2 + $0x1b4] sm:$0xf0] }
  0xd9   : > { %3935 = vmatpush.bf16.msra.mxu3 %v11235_v56  ;;  %v14197_v56 = vld [vmem:[#allocation2 + $0x8fc] sm:$0xf]  ;;  %v9919_v60 = vor.u32 %v13957_v51, %v9916_v52  ;;  %v11602_v52 = vld [vmem:[#allocation2 + $0xea0] sm:$0xf] }
  0xda   : > { %3894 = vmatpush.bf16.msra.mxu0 %v9735_v63  ;;  %v10879_v62 = vor.u32 %v14197_v56, %v10876_v57  ;;  %v13942_v63 = vld [vmem:[#allocation2 + $0x104] sm:$0xf]  ;;  %v10643_v56 = vor.u32 %v14145_v47, %v10642_v45  ;;  %v14085_v45 = vld [vmem:[#allocation2 + $0x578] sm:$0xf0] }
  0xdb   : > { %3908 = vmatpush.bf16.msra.mxu1 %v10215_v3  ;;  %v10336_v3 = vld [vmem:[#allocation2 + $0x4fc] sm:$0xf0]  ;;  %v14205_v47 = vld [vmem:[#allocation2 + $0x938] sm:$0xf0] }
  0xdc   : > { %3922 = vmatpush.bf16.msra.mxu2 %v10695_v4  ;;  %v14182_v4 = vld [vmem:[#allocation2 + $0x884] sm:$0xf] }
  0xdd   : > { %3936 = vmatpush.bf16.msra.mxu3 %v11175_v7  ;;  %3895 = vmatmul.bf16.vlgmr.msra.gmra.mxu0 %v15664_v26  ;;  %v11296_v7 = vld [vmem:[#allocation2 + $0xc7c] sm:$0xf0] }
  0xde   : > { %3943 = vmatpush.bf16.msrb.mxu0 %v10159_v9  ;;  %3909 = vmatmul.bf16.vlgmr.msra.gmra.mxu1 %v15668_v33  ;;  %v9859_v9 = vor.u32 %v13942_v63, %v9856_v0  ;;  %v11299_v18 = vor.u32 %v14302_v6, %v11296_v7  ;;  %v11062_v63 = vld [vmem:[#allocation2 + $0xa68] sm:$0xf]  ;;  %v14250_v0 = vld [vmem:[#allocation2 + $0xaa0] sm:$0xf0]  ;;  %v10042_v6 = vld [vmem:[#allocation2 + $0x270] sm:$0xf] }
  0xdf   : > { %3957 = vmatpush.bf16.msrb.mxu1 %v10639_v10  ;;  %3923 = vmatmul.bf16.vlgmr.msra.gmra.mxu2 %v15654_v8  ;;  %v10339_v10 = vor.u32 %v14062_v1, %v10336_v3  ;;  %v3686_v17 = vpop.f32.mrf.mxu1  ;;  %v11542_v1 = vld [vmem:[#allocation2 + $0xe28] sm:$0xf]  ;;  %v10103_v3 = vor.u32 %v14010_v59, %v10102_v58  ;;  %v13995_v7 = vld [vmem:[#allocation2 + $0x2a8] sm:$0xf0]  ;;  %v14070_v59 = vld [vmem:[#allocation2 + $0x500] sm:$0xf0] }
  0xe0   : > { %3971 = vmatpush.bf16.msrb.mxu2 %v11119_v11  ;;  %3937 = vmatmul.bf16.vlgmr.msra.gmra.mxu3 %v15658_v15  ;;  %v10819_v11 = vor.u32 %v14182_v4, %v10816_v5  ;;  %v11063_v5 = vor.u32 %v14250_v0, %v11062_v63  ;;  %v10043_v19 = vor.u32 %v13995_v7, %v10042_v6  ;;  %v11302_v63 = vld [vmem:[#allocation2 + $0xc48] sm:$0xf]  ;;  %v14310_v0 = vld [vmem:[#allocation2 + $0xc80] sm:$0xf0]  ;;  %v9802_v6 = vld [vmem:[#allocation2 + $0x90] sm:$0xf] }
  0xe1   : > { %3985 = vmatpush.bf16.msrb.mxu3 %v11599_v16  ;;  %v3672_v16 = vpop.f32.mrf.mxu0  ;;  %v13935_v7 = vld [vmem:[#allocation2 + $0xc8] sm:$0xf0] }
  0xe2   : > { %3944 = vmatpush.bf16.msrb.mxu0 %v10099_v22  ;;  %v3687_v22 = vadd.f32 %v3686_v17, %v3672_v16  ;;  %v3700_v25 = vpop.f32.mrf.mxu2  ;;  %v14235_v16 = vld [vmem:[#allocation2 + $0xa28] sm:$0xf0]  ;;  %v11482_v17 = vld [vmem:[#allocation2 + $0xdb0] sm:$0xf] }
  0xe3   : > { %3958 = vmatpush.bf16.msrb.mxu1 %v10579_v23  ;;  %v14287_v23 = vld [vmem:[#allocation2 + $0xbcc] sm:$0xf]  ;;  %v11003_v21 = vor.u32 %v14235_v16, %v11002_v14  ;;  %v10762_v14 = vld [vmem:[#allocation2 + $0x810] sm:$0xf] }
  0xe4   : > { %3972 = vmatpush.bf16.msrb.mxu2 %v11059_v24  ;;  %v11236_v24 = vld [vmem:[#allocation2 + $0xc04] sm:$0xf0]  ;;  %v3701_v30 = vadd.f32 %v3700_v25, %v3687_v22  ;;  %v9982_v22 = vld [vmem:[#allocation2 + $0x1f8] sm:$0xf]  ;;  %v14175_v16 = vld [vmem:[#allocation2 + $0x848] sm:$0xf0] }
  0xe5   : > { %3986 = vmatpush.bf16.msrb.mxu3 %v11539_v29  ;;  %v9736_v29 = vld [vmem:[#allocation2 + $0x4c] sm:$0xf0] }
  0xe6   : > { %3945 = vmatpush.bf16.msrb.mxu0 %v10039_v36  ;;  %v14152_v36 = vld [vmem:[#allocation2 + $0x794] sm:$0xf]  ;;  %v9739_v46 = vor.u32 %v13912_v28, %v9736_v29  ;;  %v10942_v29 = vld [vmem:[#allocation2 + $0x978] sm:$0xf] }
  0xe7   : > { %3959 = vmatpush.bf16.msrb.mxu1 %v10519_v37  ;;  %v3714_v37 = vpop.f32.mrf.mxu3  ;;  %v10699_v51 = vor.u32 %v14152_v36, %v10696_v39  ;;  %v14100_v28 = vld [vmem:[#allocation2 + $0x5f0] sm:$0xf0]  ;;  %v13965_v39 = vld [vmem:[#allocation2 + $0x1b8] sm:$0xf0] }
  0xe8   : > { %3973 = vmatpush.bf16.msrb.mxu2 %v10999_v38  ;;  %v11239_v38 = vor.u32 %v14287_v23, %v11236_v24  ;;  %v13980_v23 = vld [vmem:[#allocation2 + $0x230] sm:$0xf0]  ;;  %v10462_v24 = vld [vmem:[#allocation2 + $0x5b8] sm:$0xf] }
  0xe9   : > { %3987 = vmatpush.bf16.msrb.mxu3 %v11479_v42  ;;  %v15688_v42 = vadd.f32 %v3714_v37, %v3701_v30  ;;  %v14220_v30 = vld [vmem:[#allocation2 + $0x9b0] sm:$0xf0]  ;;  %v10463_v36 = vor.u32 %v14100_v28, %v10462_v24  ;;  %v10222_v24 = vld [vmem:[#allocation2 + $0x3d8] sm:$0xf] }
  0xea   : > { %3946 = vmatpush.bf16.msrb.mxu0 %v9979_v48  ;;  %v11122_v48 = vld [vmem:[#allocation2 + $0xae0] sm:$0xf]  ;;  %v15698_v25 = vpop.f32.mrf.mxu2  ;;  %v10943_v37 = vor.u32 %v14220_v30, %v10942_v29  ;;  %v10702_v28 = vld [vmem:[#allocation2 + $0x798] sm:$0xf]  ;;  %v14160_v30 = vld [vmem:[#allocation2 + $0x7d0] sm:$0xf0] }
  0xeb   : > { %3960 = vmatpush.bf16.msrb.mxu1 %v10459_v49  ;;  %v14265_v49 = vld [vmem:[#allocation2 + $0xb18] sm:$0xf0] }
  0xec   : > { %3974 = vmatpush.bf16.msrb.mxu2 %v10939_v50  ;;  %v10219_v50 = vor.u32 %v14032_v34, %v10216_v35  ;;  %v11123_v57 = vor.u32 %v14265_v49, %v11122_v48  ;;  %v9983_v35 = vor.u32 %v13980_v23, %v9982_v22  ;;  %v11362_v49 = vld [vmem:[#allocation2 + $0xcc0] sm:$0xf]  ;;  %v10763_v23 = vor.u32 %v14175_v16, %v10762_v14 }
  0xed   : > { %3988 = vmatpush.bf16.msrb.mxu3 %v11419_v54  ;;  %v11179_v54 = vor.u32 %v14272_v40, %v11176_v41  ;;  %v10402_v40 = vld [vmem:[#allocation2 + $0x540] sm:$0xf] }
  0xee   : > { %3947 = vmatpush.bf16.msrb.mxu0 %v9919_v60  ;;  %v10582_v60 = vld [vmem:[#allocation2 + $0x6a8] sm:$0xf] }
  0xef   : > { %3961 = vmatpush.bf16.msrb.mxu1 %v10399_v61  ;;  %v11603_v61 = vor.u32 %v14385_v53, %v11602_v52  ;;  %v15700_v34 = vpop.f32.mrf.mxu3  ;;  %v10403_v52 = vor.u32 %v14085_v45, %v10402_v40  ;;  %v14258_v40 = vld [vmem:[#allocation2 + $0xae4] sm:$0xf] }
  0xf0   : > { %3975 = vmatpush.bf16.msrb.mxu2 %v10879_v62  ;;  %v14130_v62 = vld [vmem:[#allocation2 + $0x6e0] sm:$0xf0] }
  0xf1   : > { %3989 = vmatpush.bf16.msrb.mxu3 %v11359_v2  ;;  %v14370_v2 = vld [vmem:[#allocation2 + $0xe60] sm:$0xf0]  ;;  %v10583_v4 = vor.u32 %v14130_v62, %v10582_v60  ;;  %v10822_v60 = vld [vmem:[#allocation2 + $0x888] sm:$0xf] }
  0xf2   : > { %3948 = vmatpush.bf16.msrb.mxu0 %v9859_v9  ;;  %v10522_v9 = vld [vmem:[#allocation2 + $0x630] sm:$0xf]  ;;  %v11543_v12 = vor.u32 %v14370_v2, %v11542_v1  ;;  %v14378_v45 = vld [vmem:[#allocation2 + $0xea4] sm:$0xf] }
  0xf3   : > { %3962 = vmatpush.bf16.msrb.mxu1 %v10339_v10  ;;  %v15690_v10 = vpop.f32.mrf.mxu0  ;;  %v10523_v20 = vor.u32 %v14115_v13, %v10522_v9  ;;  %v10282_v9 = vld [vmem:[#allocation2 + $0x450] sm:$0xf]  ;;  %v14055_v13 = vld [vmem:[#allocation2 + $0x488] sm:$0xf0] }
  0xf4   : > { %3976 = vmatpush.bf16.msrb.mxu2 %v10819_v11  ;;  %v15692_v11 = vpop.f32.mrf.mxu1  ;;  %v10283_v22 = vor.u32 %v14055_v13, %v10282_v9  ;;  %v11004_v9 = vld [vmem:[#allocation2 + $0xa2c] sm:$0xf0] }
  0xf5   : > { %3990 = vmatpush.bf16.msrb.mxu3 %v11299_v18  ;;  %v14355_v18 = vld [vmem:[#allocation2 + $0xde8] sm:$0xf0]  ;;  %v11484_v13 = vld [vmem:[#allocation2 + $0xdec] sm:$0xf0] }
  0xf6   : > { %3949 = vmatpush.bf16.msrb.mxu0 %v9799_v27  ;;  %v11483_v27 = vor.u32 %v14355_v18, %v11482_v17  ;;  %v11242_v17 = vld [vmem:[#allocation2 + $0xbd0] sm:$0xf]  ;;  %v14295_v18 = vld [vmem:[#allocation2 + $0xc08] sm:$0xf0] }
  0xf7   : > { %3963 = vmatpush.bf16.msrb.mxu1 %v10279_v31  ;;  %v11422_v31 = vld [vmem:[#allocation2 + $0xd38] sm:$0xf]  ;;  %v11243_v29 = vor.u32 %v14295_v18, %v11242_v17  ;;  %v13973_v18 = vld [vmem:[#allocation2 + $0x1fc] sm:$0xf] }
  0xf8   : > { %3977 = vmatpush.bf16.msrb.mxu2 %v10759_v32  ;;  %v14340_v32 = vld [vmem:[#allocation2 + $0xd70] sm:$0xf0] }
  0xf9   : > { %3991 = vmatpush.bf16.msrb.mxu3 %v11239_v38  ;;  %v9922_v38 = vld [vmem:[#allocation2 + $0x180] sm:$0xf]  ;;  %v11423_v44 = vor.u32 %v14340_v32, %v11422_v31  ;;  %v11182_v31 = vld [vmem:[#allocation2 + $0xb58] sm:$0xf]  ;;  %v14280_v32 = vld [vmem:[#allocation2 + $0xb90] sm:$0xf0] }
  0xfa   : > { %3950 = vmatpush.bf16.msrb.mxu0 %v9739_v46  ;;  %v10882_v46 = vld [vmem:[#allocation2 + $0x900] sm:$0xf] }
  0xfb   : > { %3964 = vmatpush.bf16.msrb.mxu1 %v10219_v50  ;;  %v3728_v41 = vpop.f32.mrf.mxu0  ;;  %v14325_v50 = vld [vmem:[#allocation2 + $0xcf8] sm:$0xf0]  ;;  %v10883_v53 = vor.u32 %v14205_v47, %v10882_v46  ;;  %v11604_v46 = vld [vmem:[#allocation2 + $0xedc] sm:$0xf0]  ;;  %v11183_v47 = vor.u32 %v14280_v32, %v11182_v31 }
  0xfc   : > { %3978 = vmatpush.bf16.msrb.mxu2 %v10699_v51  ;;  %v3742_v43 = vpop.f32.mrf.mxu1  ;;  %v9923_v51 = vor.u32 %v13965_v39, %v9922_v38  ;;  %v11363_v58 = vor.u32 %v14325_v50, %v11362_v49  ;;  %v10644_v39 = vld [vmem:[#allocation2 + $0x75c] sm:$0xf0] }
  0xfd   : > { %3992 = vmatpush.bf16.msrb.mxu3 %v11179_v54  ;;  %3951 = vmatmul.bf16.vlgmr.msrb.gmra.mxu0 %v15664_v26  ;;  %v3743_v48 = vadd.f32 %v3742_v43, %v3728_v41  ;;  %v9862_v54 = vld [vmem:[#allocation2 + $0x108] sm:$0xf]  ;;  %v11124_v41 = vld [vmem:[#allocation2 + $0xb1c] sm:$0xf0] }
  0xfe   : > { %3999 = vmatpush.bf16.msra.mxu0 %v10163_v55  ;;  %3965 = vmatmul.bf16.vlgmr.msrb.gmra.mxu1 %v15668_v33  ;;  %v13950_v55 = vld [vmem:[#allocation2 + $0x140] sm:$0xf0]  ;;  %v11127_v50 = vor.u32 %v14258_v40, %v11124_v41 }
  0xff   : > { %4013 = vmatpush.bf16.msra.mxu1 %v10643_v56  ;;  %3979 = vmatmul.bf16.vlgmr.msrb.gmra.mxu2 %v15654_v8  ;;  %v10342_v56 = vld [vmem:[#allocation2 + $0x4c8] sm:$0xf]  ;;  %v9863_v2 = vor.u32 %v13950_v55, %v9862_v54  ;;  %v11607_v54 = vor.u32 %v14378_v45, %v11604_v46  ;;  %v10884_v45 = vld [vmem:[#allocation2 + $0x93c] sm:$0xf0] }
 0x100   : > { %4027 = vmatpush.bf16.msra.mxu2 %v11123_v57  ;;  %3993 = vmatmul.bf16.vlgmr.msrb.gmra.mxu3 %v15658_v15  ;;  %v10584_v55 = vld [vmem:[#allocation2 + $0x6e4] sm:$0xf0] }
 0x101   : > { %4041 = vmatpush.bf16.msra.mxu3 %v11603_v61  ;;  %v14190_v61 = vld [vmem:[#allocation2 + $0x8c0] sm:$0xf0] }
 0x102   : > { %4000 = vmatpush.bf16.msra.mxu0 %v10103_v3  ;;  %v3756_v57 = vpop.f32.mrf.mxu2 }
 0x103   : > { %4014 = vmatpush.bf16.msra.mxu1 %v10583_v4  ;;  %v3757_v62 = vadd.f32 %v3756_v57, %v3743_v48  ;;  %v3770_v1 = vpop.f32.mrf.mxu3  ;;  %v10343_v4 = vor.u32 %v14070_v59, %v10342_v56  ;;  %v14243_v56 = vld [vmem:[#allocation2 + $0xa6c] sm:$0xf]  ;;  %v11064_v57 = vld [vmem:[#allocation2 + $0xaa4] sm:$0xf0] }
 0x104   : > { %4028 = vmatpush.bf16.msra.mxu2 %v11063_v5  ;;  %v10823_v5 = vor.u32 %v14190_v61, %v10822_v60  ;;  %v11544_v59 = vld [vmem:[#allocation2 + $0xe64] sm:$0xf0] }
 0x105   : > { %4042 = vmatpush.bf16.msra.mxu3 %v11543_v12  ;;  %v15702_v3 = vadd.f32 %v3770_v1, %v3757_v62  ;;  %v11303_v12 = vor.u32 %v14310_v0, %v11302_v63  ;;  %v11067_v62 = vor.u32 %v14243_v56, %v11064_v57  ;;  %v13988_v63 = vld [vmem:[#allocation2 + $0x274] sm:$0xf]  ;;  %v10044_v0 = vld [vmem:[#allocation2 + $0x2ac] sm:$0xf0]  ;;  %v10344_v57 = vld [vmem:[#allocation2 + $0x504] sm:$0xf0] }
 0x106   : > { %4001 = vmatpush.bf16.msra.mxu0 %v10043_v19  ;;  %v9803_v19 = vor.u32 %v13935_v7, %v9802_v6  ;;  %v14108_v1 = vld [vmem:[#allocation2 + $0x634] sm:$0xf]  ;;  %v10524_v6 = vld [vmem:[#allocation2 + $0x66c] sm:$0xf0]  ;;  %v10047_v14 = vor.u32 %v13988_v63, %v10044_v0 }
 0x107   : > { %4015 = vmatpush.bf16.msra.mxu1 %v10523_v20  ;;  %v9742_v20 = vld [vmem:[#allocation2 + $0x18] sm:$0xf]  ;;  %v14228_v7 = vld [vmem:[#allocation2 + $0x9f4] sm:$0xf]  ;;  %v10527_v16 = vor.u32 %v14108_v1, %v10524_v6 }
 0x108   : > { %4029 = vmatpush.bf16.msra.mxu2 %v11003_v21  ;;  %v13920_v21 = vld [vmem:[#allocation2 + $0x50] sm:$0xf0]  ;;  %v11007_v17 = vor.u32 %v14228_v7, %v11004_v9  ;;  %v9804_v9 = vld [vmem:[#allocation2 + $0xcc] sm:$0xf0] }
 0x109   : > { %4043 = vmatpush.bf16.msra.mxu3 %v11483_v27  ;;  %v14040_v27 = vld [vmem:[#allocation2 + $0x410] sm:$0xf0]  ;;  %v9743_v38 = vor.u32 %v13920_v21, %v9742_v20  ;;  %v14093_v20 = vld [vmem:[#allocation2 + $0x5bc] sm:$0xf] }
 0x10a   : > { %4002 = vmatpush.bf16.msra.mxu0 %v9983_v35  ;;  %v14018_v35 = vld [vmem:[#allocation2 + $0x364] sm:$0xf]  ;;  %v10223_v43 = vor.u32 %v14040_v27, %v10222_v24  ;;  %v15712_v21 = vpop.f32.mrf.mxu2  ;;  %v14213_v24 = vld [vmem:[#allocation2 + $0x97c] sm:$0xf]  ;;  %v10944_v27 = vld [vmem:[#allocation2 + $0x9b4] sm:$0xf0] }
 0x10b   : > { %4016 = vmatpush.bf16.msra.mxu1 %v10463_v36  ;;  %v10164_v36 = vld [vmem:[#allocation2 + $0x39c] sm:$0xf0]  ;;  %v13928_v7 = vld [vmem:[#allocation2 + $0x94] sm:$0xf] }
 0x10c   : > { %4030 = vmatpush.bf16.msra.mxu2 %v10943_v37  ;;  %v14138_v37 = vld [vmem:[#allocation2 + $0x724] sm:$0xf]  ;;  %v10167_v48 = vor.u32 %v14018_v35, %v10164_v36  ;;  %v10947_v35 = vor.u32 %v14213_v24, %v10944_v27 }
 0x10d   : > { %4044 = vmatpush.bf16.msra.mxu3 %v11423_v44  ;;  %v10703_v44 = vor.u32 %v14160_v30, %v10702_v28  ;;  %v10647_v49 = vor.u32 %v14138_v37, %v10644_v39  ;;  %v14333_v28 = vld [vmem:[#allocation2 + $0xd3c] sm:$0xf]  ;;  %v15714_v30 = vpop.f32.mrf.mxu3  ;;  %v13958_v36 = vld [vmem:[#allocation2 + $0x184] sm:$0xf]  ;;  %v9924_v37 = vld [vmem:[#allocation2 + $0x1bc] sm:$0xf0] }
 0x10e   : > { %4003 = vmatpush.bf16.msra.mxu0 %v9923_v51  ;;  %v14003_v51 = vld [vmem:[#allocation2 + $0x2ec] sm:$0xf] }
 0x10f   : > { %4017 = vmatpush.bf16.msra.mxu1 %v10403_v52  ;;  %v10104_v52 = vld [vmem:[#allocation2 + $0x324] sm:$0xf0] }
 0x110   : > { %4031 = vmatpush.bf16.msra.mxu2 %v10883_v53  ;;  %v14123_v53 = vld [vmem:[#allocation2 + $0x6ac] sm:$0xf]  ;;  %v10107_v60 = vor.u32 %v14003_v51, %v10104_v52 }
 0x111   : > { %4045 = vmatpush.bf16.msra.mxu3 %v11363_v58  ;;  %v14363_v58 = vld [vmem:[#allocation2 + $0xe2c] sm:$0xf]  ;;  %v10587_v61 = vor.u32 %v14123_v53, %v10584_v55  ;;  %v9864_v53 = vld [vmem:[#allocation2 + $0x144] sm:$0xf0] }
 0x112   : > { %4004 = vmatpush.bf16.msra.mxu0 %v9863_v2  ;;  %v15704_v2 = vpop.f32.mrf.mxu0  ;;  %v13943_v52 = vld [vmem:[#allocation2 + $0x10c] sm:$0xf] }
 0x113   : > { %4018 = vmatpush.bf16.msra.mxu1 %v10343_v4  ;;  %v15706_v4 = vpop.f32.mrf.mxu1  ;;  %v9867_v0 = vor.u32 %v13943_v52, %v9864_v53 }
 0x114   : > { %4032 = vmatpush.bf16.msra.mxu2 %v10823_v5  ;;  %v11547_v5 = vor.u32 %v14363_v58, %v11544_v59  ;;  %v14183_v58 = vld [vmem:[#allocation2 + $0x88c] sm:$0xf]  ;;  %v10824_v59 = vld [vmem:[#allocation2 + $0x8c4] sm:$0xf0] }
 0x115   : > { %4046 = vmatpush.bf16.msra.mxu3 %v11303_v12  ;;  %v14348_v12 = vld [vmem:[#allocation2 + $0xdb4] sm:$0xf]  ;;  %v10827_v6 = vor.u32 %v14183_v58, %v10824_v59  ;;  %v14131_v58 = vld [vmem:[#allocation2 + $0x6e8] sm:$0xf0]  ;;  %v11070_v59 = vld [vmem:[#allocation2 + $0xa70] sm:$0xf] }
 0x116   : > { %4005 = vmatpush.bf16.msra.mxu0 %v9803_v19  ;;  %v9984_v19 = vld [vmem:[#allocation2 + $0x234] sm:$0xf0] }
 0x117   : > { %4019 = vmatpush.bf16.msra.mxu1 %v10283_v22  ;;  %v11487_v22 = vor.u32 %v14348_v12, %v11484_v13  ;;  %v9987_v31 = vor.u32 %v13973_v18, %v9984_v19  ;;  %v14048_v12 = vld [vmem:[#allocation2 + $0x454] sm:$0xf]  ;;  %v11244_v19 = vld [vmem:[#allocation2 + $0xc0c] sm:$0xf0] }
 0x118   : > { %4033 = vmatpush.bf16.msra.mxu2 %v10763_v23  ;;  %v10464_v23 = vld [vmem:[#allocation2 + $0x5f4] sm:$0xf0]  ;;  %v14288_v18 = vld [vmem:[#allocation2 + $0xbd4] sm:$0xf] }
 0x119   : > { %4047 = vmatpush.bf16.msra.mxu3 %v11243_v29  ;;  %v11424_v29 = vld [vmem:[#allocation2 + $0xd74] sm:$0xf0]  ;;  %v10467_v32 = vor.u32 %v14093_v20, %v10464_v23  ;;  %v9807_v20 = vor.u32 %v13928_v7, %v9804_v9  ;;  %v13996_v7 = vld [vmem:[#allocation2 + $0x2b0] sm:$0xf0] }
 0x11a   : > { %4006 = vmatpush.bf16.msra.mxu0 %v9743_v38  ;;  %v14078_v38 = vld [vmem:[#allocation2 + $0x544] sm:$0xf]  ;;  %v3784_v39 = vpop.f32.mrf.mxu0  ;;  %v11427_v41 = vor.u32 %v14333_v28, %v11424_v29  ;;  %v9744_v23 = vld [vmem:[#allocation2 + $0x54] sm:$0xf0]  ;;  %v14033_v28 = vld [vmem:[#allocation2 + $0x3dc] sm:$0xf] }
 0x11b   : > { %4020 = vmatpush.bf16.msra.mxu1 %v10223_v43  ;;  %v3798_v40 = vpop.f32.mrf.mxu1  ;;  %v10404_v43 = vld [vmem:[#allocation2 + $0x57c] sm:$0xf0]  ;;  %v10224_v29 = vld [vmem:[#allocation2 + $0x414] sm:$0xf0] }
 0x11c   : > { %4034 = vmatpush.bf16.msra.mxu2 %v10703_v44  ;;  %v14198_v44 = vld [vmem:[#allocation2 + $0x904] sm:$0xf]  ;;  %v3799_v46 = vadd.f32 %v3798_v40, %v3784_v39  ;;  %v10650_v40 = vld [vmem:[#allocation2 + $0x728] sm:$0xf]  ;;  %v10530_v9 = vld [vmem:[#allocation2 + $0x638] sm:$0xf] }
 0x11d   : > { %4048 = vmatpush.bf16.msra.mxu3 %v11183_v47  ;;  %4007 = vmatmul.bf16.vlgmr.msra.gmra.mxu0 %v15664_v26  ;;  %v14318_v47 = vld [vmem:[#allocation2 + $0xcc4] sm:$0xf]  ;;  %v10887_v51 = vor.u32 %v14198_v44, %v10884_v45  ;;  %v11130_v44 = vld [vmem:[#allocation2 + $0xae8] sm:$0xf] }
 0x11e   : > { %4055 = vmatpush.bf16.msrb.mxu0 %v10167_v48  ;;  %4021 = vmatmul.bf16.vlgmr.msra.gmra.mxu1 %v15668_v33  ;;  %v11364_v48 = vld [vmem:[#allocation2 + $0xcfc] sm:$0xf0]  ;;  %v14026_v39 = vld [vmem:[#allocation2 + $0x3a0] sm:$0xf0] }
 0x11f   : > { %4069 = vmatpush.bf16.msrb.mxu1 %v10647_v49  ;;  %4035 = vmatmul.bf16.vlgmr.msra.gmra.mxu2 %v15654_v8  ;;  %v9927_v49 = vor.u32 %v13958_v36, %v9924_v37  ;;  %v11367_v56 = vor.u32 %v14318_v47, %v11364_v48  ;;  %v14273_v36 = vld [vmem:[#allocation2 + $0xb5c] sm:$0xf]  ;;  %v11184_v37 = vld [vmem:[#allocation2 + $0xb94] sm:$0xf0]  ;;  %v14266_v45 = vld [vmem:[#allocation2 + $0xb20] sm:$0xf0] }
 0x120   : > { %4083 = vmatpush.bf16.msrb.mxu2 %v11127_v50  ;;  %4049 = vmatmul.bf16.vlgmr.msra.gmra.mxu3 %v15658_v15  ;;  %v10407_v50 = vor.u32 %v14078_v38, %v10404_v43  ;;  %v10170_v38 = vld [vmem:[#allocation2 + $0x368] sm:$0xf]  ;;  %v14146_v43 = vld [vmem:[#allocation2 + $0x760] sm:$0xf0]  ;;  %v11131_v53 = vor.u32 %v14266_v45, %v11130_v44 }
 0x121   : > { %4097 = vmatpush.bf16.msrb.mxu3 %v11607_v54  ;;  %v14063_v54 = vld [vmem:[#allocation2 + $0x4cc] sm:$0xf]  ;;  %v11610_v48 = vld [vmem:[#allocation2 + $0xea8] sm:$0xf]  ;;  %v10651_v52 = vor.u32 %v14146_v43, %v10650_v40 }
 0x122   : > { %4056 = vmatpush.bf16.msrb.mxu0 %v10107_v60  ;;  %v3812_v55 = vpop.f32.mrf.mxu2  ;;  %v9930_v45 = vld [vmem:[#allocation2 + $0x188] sm:$0xf] }
 0x123   : > { %4070 = vmatpush.bf16.msrb.mxu1 %v10587_v61  ;;  %v3813_v60 = vadd.f32 %v3812_v55, %v3799_v46  ;;  %v14303_v61 = vld [vmem:[#allocation2 + $0xc4c] sm:$0xf]  ;;  %v3826_v63 = vpop.f32.mrf.mxu3  ;;  %v10227_v46 = vor.u32 %v14033_v28, %v10224_v29  ;;  %v13981_v28 = vld [vmem:[#allocation2 + $0x238] sm:$0xf0]  ;;  %v10470_v29 = vld [vmem:[#allocation2 + $0x5c0] sm:$0xf] }
 0x124   : > { %4084 = vmatpush.bf16.msrb.mxu2 %v11067_v62  ;;  %v11304_v62 = vld [vmem:[#allocation2 + $0xc84] sm:$0xf0]  ;;  %v14011_v55 = vld [vmem:[#allocation2 + $0x328] sm:$0xf0] }
 0x125   : > { %4098 = vmatpush.bf16.msrb.mxu3 %v11547_v5  ;;  %v15716_v1 = vadd.f32 %v3826_v63, %v3813_v60  ;;  %v10347_v5 = vor.u32 %v14063_v54, %v10344_v57  ;;  %v11307_v13 = vor.u32 %v14303_v61, %v11304_v62  ;;  %v10110_v54 = vld [vmem:[#allocation2 + $0x2f0] sm:$0xf]  ;;  %v14251_v60 = vld [vmem:[#allocation2 + $0xaa8] sm:$0xf0] }
 0x126   : > { %4057 = vmatpush.bf16.msrb.mxu0 %v10047_v14  ;;  %v10284_v14 = vld [vmem:[#allocation2 + $0x48c] sm:$0xf0]  ;;  %v14371_v62 = vld [vmem:[#allocation2 + $0xe68] sm:$0xf0]  ;;  %v10111_v63 = vor.u32 %v14011_v55, %v10110_v54  ;;  %v11370_v55 = vld [vmem:[#allocation2 + $0xcc8] sm:$0xf] }
 0x127   : > { %4071 = vmatpush.bf16.msrb.mxu1 %v10527_v16  ;;  %v14168_v16 = vld [vmem:[#allocation2 + $0x814] sm:$0xf]  ;;  %v10287_v24 = vor.u32 %v14048_v12, %v10284_v14  ;;  %v11550_v61 = vld [vmem:[#allocation2 + $0xe30] sm:$0xf]  ;;  %v15718_v12 = vpop.f32.mrf.mxu0 }
 0x128   : > { %4085 = vmatpush.bf16.msrb.mxu2 %v11007_v17  ;;  %v10764_v17 = vld [vmem:[#allocation2 + $0x84c] sm:$0xf0]  ;;  %v11551_v14 = vor.u32 %v14371_v62, %v11550_v61  ;;  %v13951_v61 = vld [vmem:[#allocation2 + $0x148] sm:$0xf0] }
 0x129   : > { %4099 = vmatpush.bf16.msrb.mxu3 %v11487_v22  ;;  %v13913_v22 = vld [vmem:[#allocation2 + $0x1c] sm:$0xf]  ;;  %v10767_v27 = vor.u32 %v14168_v16, %v10764_v17  ;;  %v14116_v16 = vld [vmem:[#allocation2 + $0x670] sm:$0xf0]  ;;  %v11010_v17 = vld [vmem:[#allocation2 + $0x9f8] sm:$0xf] }
 0x12a   : > { %4058 = vmatpush.bf16.msrb.mxu0 %v9987_v31  ;;  %v14153_v31 = vld [vmem:[#allocation2 + $0x79c] sm:$0xf]  ;;  %v10350_v62 = vld [vmem:[#allocation2 + $0x4d0] sm:$0xf] }
 0x12b   : > { %4072 = vmatpush.bf16.msrb.mxu1 %v10467_v32  ;;  %v11247_v32 = vor.u32 %v14288_v18, %v11244_v19  ;;  %v14236_v18 = vld [vmem:[#allocation2 + $0xa30] sm:$0xf0]  ;;  %v11490_v19 = vld [vmem:[#allocation2 + $0xdb8] sm:$0xf]  ;;  %v15728_v40 = vpop.f32.mrf.mxu3 }
 0x12c   : > { %4086 = vmatpush.bf16.msrb.mxu2 %v10947_v35  ;;  %v10704_v35 = vld [vmem:[#allocation2 + $0x7d4] sm:$0xf0] }
 0x12d   : > { %4100 = vmatpush.bf16.msrb.mxu3 %v11427_v41  ;;  %v9747_v41 = vor.u32 %v13913_v22, %v9744_v23  ;;  %v10707_v47 = vor.u32 %v14153_v31, %v10704_v35  ;;  %v10531_v23 = vor.u32 %v14116_v16, %v10530_v9  ;;  %v15726_v31 = vpop.f32.mrf.mxu2  ;;  %v14101_v35 = vld [vmem:[#allocation2 + $0x5f8] sm:$0xf0]  ;;  %v14311_v16 = vld [vmem:[#allocation2 + $0xc88] sm:$0xf0] }
 0x12e   : > { %4059 = vmatpush.bf16.msrb.mxu0 %v9927_v49  ;;  %v14386_v49 = vld [vmem:[#allocation2 + $0xee0] sm:$0xf0]  ;;  %v10471_v43 = vor.u32 %v14101_v35, %v10470_v29  ;;  %v14056_v29 = vld [vmem:[#allocation2 + $0x490] sm:$0xf0] }
 0x12f   : > { %4073 = vmatpush.bf16.msrb.mxu1 %v10407_v50  ;;  %v11187_v50 = vor.u32 %v14273_v36, %v11184_v37  ;;  %v11611_v57 = vor.u32 %v14386_v49, %v11610_v48  ;;  %v10950_v36 = vld [vmem:[#allocation2 + $0x980] sm:$0xf]  ;;  %v14221_v37 = vld [vmem:[#allocation2 + $0x9b8] sm:$0xf0]  ;;  %v14176_v35 = vld [vmem:[#allocation2 + $0x850] sm:$0xf0] }
 0x130   : > { %4087 = vmatpush.bf16.msrb.mxu2 %v10887_v51  ;;  %v10171_v51 = vor.u32 %v14026_v39, %v10170_v38  ;;  %v11430_v38 = vld [vmem:[#allocation2 + $0xd40] sm:$0xf]  ;;  %v14341_v39 = vld [vmem:[#allocation2 + $0xd78] sm:$0xf0]  ;;  %v10951_v44 = vor.u32 %v14221_v37, %v10950_v36  ;;  %v11250_v36 = vld [vmem:[#allocation2 + $0xbd8] sm:$0xf] }
 0x131   : > { %4101 = vmatpush.bf16.msrb.mxu3 %v11367_v56  ;;  %v10590_v56 = vld [vmem:[#allocation2 + $0x6b0] sm:$0xf]  ;;  %v14296_v37 = vld [vmem:[#allocation2 + $0xc10] sm:$0xf0] }
 0x132   : > { %4060 = vmatpush.bf16.msrb.mxu0 %v9867_v0  ;;  %v10591_v0 = vor.u32 %v14131_v58, %v10590_v56  ;;  %v14326_v56 = vld [vmem:[#allocation2 + $0xd00] sm:$0xf0] }
 0x133   : > { %4074 = vmatpush.bf16.msrb.mxu1 %v10347_v5  ;;  %v11071_v5 = vor.u32 %v14251_v60, %v11070_v59  ;;  %v9870_v60 = vld [vmem:[#allocation2 + $0x110] sm:$0xf] }
 0x134   : > { %4088 = vmatpush.bf16.msrb.mxu2 %v10827_v6  ;;  %v10050_v6 = vld [vmem:[#allocation2 + $0x278] sm:$0xf] }
 0x135   : > { %4102 = vmatpush.bf16.msrb.mxu3 %v11307_v13  ;;  %v15720_v13 = vpop.f32.mrf.mxu1  ;;  %v10051_v22 = vor.u32 %v13996_v7, %v10050_v6  ;;  %v10830_v6 = vld [vmem:[#allocation2 + $0x890] sm:$0xf]  ;;  %v14191_v7 = vld [vmem:[#allocation2 + $0x8c8] sm:$0xf0] }
 0x136   : > { %4061 = vmatpush.bf16.msrb.mxu0 %v9807_v20  ;;  %v14356_v20 = vld [vmem:[#allocation2 + $0xdf0] sm:$0xf0] }
 0x137   : > { %4075 = vmatpush.bf16.msrb.mxu1 %v10287_v24  ;;  %v11011_v24 = vor.u32 %v14236_v18, %v11010_v17  ;;  %v9871_v18 = vor.u32 %v13951_v61, %v9870_v60  ;;  %v14379_v61 = vld [vmem:[#allocation2 + $0xeac] sm:$0xf] }
 0x138   : > { %4089 = vmatpush.bf16.msrb.mxu2 %v10767_v27  ;;  %v9990_v27 = vld [vmem:[#allocation2 + $0x200] sm:$0xf] }
 0x139   : > { %4103 = vmatpush.bf16.msrb.mxu3 %v11247_v32  ;;  %v11491_v32 = vor.u32 %v14356_v20, %v11490_v19 }
 0x13a   : > { %4062 = vmatpush.bf16.msrb.mxu0 %v9747_v41  ;;  %v9991_v41 = vor.u32 %v13981_v28, %v9990_v27  ;;  %v3840_v48 = vpop.f32.mrf.mxu0  ;;  %v10290_v27 = vld [vmem:[#allocation2 + $0x458] sm:$0xf] }
 0x13b   : > { %4076 = vmatpush.bf16.msrb.mxu1 %v10227_v46  ;;  %v13966_v46 = vld [vmem:[#allocation2 + $0x1c0] sm:$0xf0] }
 0x13c   : > { %4090 = vmatpush.bf16.msrb.mxu2 %v10707_v47  ;;  %v10410_v47 = vld [vmem:[#allocation2 + $0x548] sm:$0xf] }
 0x13d   : > { %4104 = vmatpush.bf16.msrb.mxu3 %v11187_v50  ;;  %4063 = vmatmul.bf16.vlgmr.msrb.gmra.mxu0 %v15664_v26  ;;  %v3854_v49 = vpop.f32.mrf.mxu1  ;;  %v11431_v50 = vor.u32 %v14341_v39, %v11430_v38  ;;  %v9750_v39 = vld [vmem:[#allocation2 + $0x20] sm:$0xf] }
 0x13e   : > { %4111 = vmatpush.bf16.msra.mxu0 %v10171_v51  ;;  %4077 = vmatmul.bf16.vlgmr.msrb.gmra.mxu1 %v15668_v33  ;;  %v14086_v51 = vld [vmem:[#allocation2 + $0x580] sm:$0xf0]  ;;  %v3855_v54 = vadd.f32 %v3854_v49, %v3840_v48  ;;  %v11251_v48 = vor.u32 %v14296_v37, %v11250_v36  ;;  %v14161_v49 = vld [vmem:[#allocation2 + $0x7d8] sm:$0xf0] }
 0x13f   : > { %4125 = vmatpush.bf16.msra.mxu1 %v10651_v52  ;;  %4091 = vmatmul.bf16.vlgmr.msrb.gmra.mxu2 %v15654_v8  ;;  %v10890_v52 = vld [vmem:[#allocation2 + $0x908] sm:$0xf]  ;;  %v10411_v58 = vor.u32 %v14086_v51, %v10410_v47  ;;  %v10710_v47 = vld [vmem:[#allocation2 + $0x7a0] sm:$0xf]  ;;  %v14281_v51 = vld [vmem:[#allocation2 + $0xb98] sm:$0xf0] }
 0x140   : > { %4139 = vmatpush.bf16.msra.mxu2 %v11131_v53  ;;  %4105 = vmatmul.bf16.vlgmr.msrb.gmra.mxu3 %v15658_v15  ;;  %v14206_v53 = vld [vmem:[#allocation2 + $0x940] sm:$0xf0]  ;;  %v10711_v60 = vor.u32 %v14161_v49, %v10710_v47  ;;  %v13989_v37 = vld [vmem:[#allocation2 + $0x27c] sm:$0xf] }
 0x141   : > { %4153 = vmatpush.bf16.msra.mxu3 %v11611_v57  ;;  %v9931_v57 = vor.u32 %v13966_v46, %v9930_v45  ;;  %v10891_v59 = vor.u32 %v14206_v53, %v10890_v52  ;;  %v10230_v45 = vld [vmem:[#allocation2 + $0x3e0] sm:$0xf]  ;;  %v14041_v46 = vld [vmem:[#allocation2 + $0x418] sm:$0xf0]  ;;  %v14019_v52 = vld [vmem:[#allocation2 + $0x36c] sm:$0xf] }
 0x142   : > { %4112 = vmatpush.bf16.msra.mxu0 %v10111_v63  ;;  %v3868_v63 = vpop.f32.mrf.mxu2  ;;  %v10172_v53 = vld [vmem:[#allocation2 + $0x3a4] sm:$0xf0] }
 0x143   : > { %4126 = vmatpush.bf16.msra.mxu1 %v10591_v0  ;;  %v11371_v0 = vor.u32 %v14326_v56, %v11370_v55  ;;  %v3869_v9 = vadd.f32 %v3868_v63, %v3855_v54  ;;  %v3882_v17 = vpop.f32.mrf.mxu3  ;;  %v14139_v54 = vld [vmem:[#allocation2 + $0x72c] sm:$0xf]  ;;  %v10652_v56 = vld [vmem:[#allocation2 + $0x764] sm:$0xf0]  ;;  %v3689_v63 = vadd.f32 %v15692_v11, %v15690_v10  ;;  %v11552_v10 = vld [vmem:[#allocation2 + $0xe6c] sm:$0xf0] }
 0x144   : > { %4140 = vmatpush.bf16.msra.mxu2 %v11071_v5  ;;  %v14071_v5 = vld [vmem:[#allocation2 + $0x508] sm:$0xf0] }
 0x145   : > { %4154 = vmatpush.bf16.msra.mxu3 %v11551_v14  ;;  %v11310_v14 = vld [vmem:[#allocation2 + $0xc50] sm:$0xf]  ;;  %v15730_v19 = vadd.f32 %v3882_v17, %v3869_v9  ;;  %v10351_v20 = vor.u32 %v14071_v5, %v10350_v62  ;;  %v11612_v62 = vld [vmem:[#allocation2 + $0xee4] sm:$0xf0]  ;;  %v10175_v5 = vor.u32 %v14019_v52, %v10172_v53  ;;  %v14124_v17 = vld [vmem:[#allocation2 + $0x6b4] sm:$0xf]  ;;  %v15736_v11 = vpop.f32.mrf.mxu1 }
 0x146   : > { %4113 = vmatpush.bf16.msra.mxu0 %v10051_v22  ;;  %v10831_v22 = vor.u32 %v14191_v7, %v10830_v6  ;;  %v11311_v28 = vor.u32 %v14311_v16, %v11310_v14  ;;  %v655_v6 = vlaneseq  ;;  %v10655_v7 = vor.u32 %v14139_v54, %v10652_v56  ;;  %v14004_v14 = vld [vmem:[#allocation2 + $0x2f4] sm:$0xf]  ;;  %v10112_v16 = vld [vmem:[#allocation2 + $0x32c] sm:$0xf0]  ;;  %v13974_v54 = vld [vmem:[#allocation2 + $0x204] sm:$0xf] }
 0x147   : > { %4127 = vmatpush.bf16.msra.mxu1 %v10531_v23  ;;  %v9810_v23 = vld [vmem:[#allocation2 + $0x98] sm:$0xf]  ;;  %v14094_v56 = vld [vmem:[#allocation2 + $0x5c4] sm:$0xf] }
 0x148   : > { %4141 = vmatpush.bf16.msra.mxu2 %v11011_v24  ;;  %v13936_v24 = vld [vmem:[#allocation2 + $0xd0] sm:$0xf0] }
 0x149   : > { %4155 = vmatpush.bf16.msra.mxu3 %v11491_v32  ;;  %v10770_v32 = vld [vmem:[#allocation2 + $0x818] sm:$0xf]  ;;  %v9811_v38 = vor.u32 %v13936_v24, %v9810_v23  ;;  %v11072_v23 = vld [vmem:[#allocation2 + $0xaac] sm:$0xf0]  ;;  %v15734_v24 = vpop.f32.mrf.mxu0 }
 0x14a   : > { %4114 = vmatpush.bf16.msra.mxu0 %v9991_v41  ;;  %v13921_v41 = vld [vmem:[#allocation2 + $0x58] sm:$0xf0]  ;;  %v15744_v47 = vpop.f32.mrf.mxu2 }
 0x14b   : > { %4128 = vmatpush.bf16.msra.mxu1 %v10471_v43  ;;  %v10291_v43 = vor.u32 %v14056_v29, %v10290_v27  ;;  %v9751_v55 = vor.u32 %v13921_v41, %v9750_v39  ;;  %v14364_v27 = vld [vmem:[#allocation2 + $0xe34] sm:$0xf]  ;;  %v10115_v29 = vor.u32 %v14004_v14, %v10112_v16  ;;  %v14109_v39 = vld [vmem:[#allocation2 + $0x63c] sm:$0xf]  ;;  %v13959_v16 = vld [vmem:[#allocation2 + $0x18c] sm:$0xf] }
 0x14c   : > { %4142 = vmatpush.bf16.msra.mxu2 %v10951_v44  ;;  %v10771_v44 = vor.u32 %v14176_v35, %v10770_v32  ;;  %v15739_v32 = vshrl.u32 %v655_v6, 7  ;;  %v11555_v41 = vor.u32 %v14364_v27, %v11552_v10  ;;  %v14199_v27 = vld [vmem:[#allocation2 + $0x90c] sm:$0xf]  ;;  %v10892_v10 = vld [vmem:[#allocation2 + $0x944] sm:$0xf0] }
 0x14d   : > { %4156 = vmatpush.bf16.msra.mxu3 %v11431_v50  ;;  %v11190_v50 = vld [vmem:[#allocation2 + $0xb60] sm:$0xf] }
 0x14e   : > { %4115 = vmatpush.bf16.msra.mxu0 %v9931_v57  ;;  %v14259_v57 = vld [vmem:[#allocation2 + $0xaec] sm:$0xf]  ;;  %vm4512_vm1 = vcmp.lt.s32.totalorder %v15739_v32, 1  ;;  %vm4529_vm3 = vcmp.lt.s32.totalorder %v15739_v32, 7 }
 0x14f   : > { %4129 = vmatpush.bf16.msra.mxu1 %v10411_v58  ;;  %v11132_v58 = vld [vmem:[#allocation2 + $0xb24] sm:$0xf0] }
 0x150   : > { %4143 = vmatpush.bf16.msra.mxu2 %v10891_v59  ;;  %v10231_v59 = vor.u32 %v14041_v46, %v10230_v45  ;;  %v11135_v9 = vor.u32 %v14259_v57, %v11132_v58  ;;  %v11012_v45 = vld [vmem:[#allocation2 + $0xa34] sm:$0xf0]  ;;  %v10472_v58 = vld [vmem:[#allocation2 + $0x5fc] sm:$0xf0] }
 0x151   : > { %4157 = vmatpush.bf16.msra.mxu3 %v11371_v0  ;;  %v11191_v0 = vor.u32 %v14281_v51, %v11190_v50  ;;  %v11492_v46 = vld [vmem:[#allocation2 + $0xdf4] sm:$0xf0]  ;;  %v15750_v50 = vpop.f32.mrf.mxu3  ;;  %v662_v51 = vand.u32 15, %v15739_v32 }
 0x152   : > { %4116 = vmatpush.bf16.msra.mxu0 %v9871_v18  ;;  %v11615_v18 = vor.u32 %v14379_v61, %v11612_v62  ;;  %v14334_v61 = vld [vmem:[#allocation2 + $0xd44] sm:$0xf]  ;;  %v11432_v62 = vld [vmem:[#allocation2 + $0xd7c] sm:$0xf0] }
 0x153   : > { %4130 = vmatpush.bf16.msra.mxu1 %v10351_v20  ;;  %v10592_v20 = vld [vmem:[#allocation2 + $0x6ec] sm:$0xf0]  ;;  %vm15755_vm0 = vcmp.ne.s32.totalorder %v662_v51, 0 }
 0x154   : > { %4144 = vmatpush.bf16.msra.mxu2 %v10831_v22  ;;  %v14244_v22 = vld [vmem:[#allocation2 + $0xa74] sm:$0xf]  ;;  %v10595_v35 = vor.u32 %v14124_v17, %v10592_v20  ;;  %v9932_v17 = vld [vmem:[#allocation2 + $0x1c4] sm:$0xf0]  ;;  %v11435_v20 = vor.u32 %v14334_v61, %v11432_v62  ;;  %v13929_v62 = vld [vmem:[#allocation2 + $0x9c] sm:$0xf] }
 0x155   : > { %4158 = vmatpush.bf16.msra.mxu3 %v11311_v28  ;;  %v3703_v28 = vadd.f32 %v15698_v25, %v3689_v63  ;;  %v11075_v36 = vor.u32 %v14244_v22, %v11072_v23  ;;  %v14349_v25 = vld [vmem:[#allocation2 + $0xdbc] sm:$0xf]  ;;  %v10412_v23 = vld [vmem:[#allocation2 + $0x584] sm:$0xf0] }
 0x156   : > { %4117 = vmatpush.bf16.msra.mxu0 %v9811_v38  ;;  %v10052_v38 = vld [vmem:[#allocation2 + $0x2b4] sm:$0xf0]  ;;  %v11495_v57 = vor.u32 %v14349_v25, %v11492_v46  ;;  %v14064_v25 = vld [vmem:[#allocation2 + $0x4d4] sm:$0xf] }
 0x157   : > { %4131 = vmatpush.bf16.msra.mxu1 %v10291_v43  ;;  %v10532_v43 = vld [vmem:[#allocation2 + $0x674] sm:$0xf0]  ;;  %v10055_v49 = vor.u32 %v13989_v37, %v10052_v38 }
 0x158   : > { %4145 = vmatpush.bf16.msra.mxu2 %v10771_v44  ;;  %v14229_v44 = vld [vmem:[#allocation2 + $0x9fc] sm:$0xf]  ;;  %v10535_v52 = vor.u32 %v14109_v39, %v10532_v43  ;;  %v10895_v39 = vor.u32 %v14199_v27, %v10892_v10 }
 0x159   : > { %4159 = vmatpush.bf16.msra.mxu3 %v11251_v48  ;;  %v15747_v48 = vadd.f32 %v15700_v34, %v3703_v28  ;;  %v11015_v53 = vor.u32 %v14229_v44, %v11012_v45  ;;  %v14214_v34 = vld [vmem:[#allocation2 + $0x984] sm:$0xf]  ;;  %v14319_v28 = vld [vmem:[#allocation2 + $0xccc] sm:$0xf]  ;;  %v13944_v44 = vld [vmem:[#allocation2 + $0x114] sm:$0xf] }
 0x15a   : > { %4118 = vmatpush.bf16.msra.mxu0 %v9751_v55  ;;  %v9992_v55 = vld [vmem:[#allocation2 + $0x23c] sm:$0xf0]  ;;  %v9872_v45 = vld [vmem:[#allocation2 + $0x14c] sm:$0xf0] }
 0x15b   : > { %4132 = vmatpush.bf16.msra.mxu1 %v10231_v59  ;;  %v10952_v59 = vld [vmem:[#allocation2 + $0x9bc] sm:$0xf0]  ;;  %v16397_v63 = vrot.slane %v15747_v48, 7  ;;  %v3910_v14 = vpop.f32.mrf.mxu1 }
 0x15c   : > { %4146 = vmatpush.bf16.msra.mxu2 %v10711_v60  ;;  %v16396_v60 = vrot.slane %v15688_v42, 7 }
 0x15d   : > { %4160 = vmatpush.bf16.msra.mxu3 %v11191_v0  ;;  %4119 = vmatmul.bf16.vlgmr.msra.gmra.mxu0 %v15664_v26  ;;  %v9995_v0 = vor.u32 %v13974_v54, %v9992_v55  ;;  %v10832_v54 = vld [vmem:[#allocation2 + $0x8cc] sm:$0xf0]  ;;  %v14304_v55 = vld [vmem:[#allocation2 + $0xc54] sm:$0xf] }
 0x15e   : > { %4167 = vmatpush.bf16.msrb.mxu0 %v10175_v5  ;;  %4133 = vmatmul.bf16.vlgmr.msra.gmra.mxu1 %v15668_v33  ;;  %v3896_v5 = vpop.f32.mrf.mxu0  ;;  %v4517_v43 = vsel %vm4512_vm1, %v16397_v63, %v16396_v60  ;;  %v14306_v63 = vld [vmem:[#allocation2 + $0xc64] sm:$0xf] }
 0x15f   : > { %4181 = vmatpush.bf16.msrb.mxu1 %v10655_v7  ;;  %4147 = vmatmul.bf16.vlgmr.msra.gmra.mxu2 %v15654_v8  ;;  %v10475_v7 = vor.u32 %v14094_v56, %v10472_v58  ;;  %v3911_v22 = vadd.f32 %v3910_v14, %v3896_v5  ;;  %v11312_v56 = vld [vmem:[#allocation2 + $0xc8c] sm:$0xf0]  ;;  %v14049_v5 = vld [vmem:[#allocation2 + $0x45c] sm:$0xf] }
 0x160   : > { %4195 = vmatpush.bf16.msrb.mxu2 %v11135_v9  ;;  %4161 = vmatmul.bf16.vlgmr.msra.gmra.mxu3 %v15658_v15  ;;  %v10955_v9 = vor.u32 %v14214_v34, %v10952_v59  ;;  %v9875_v34 = vor.u32 %v13944_v44, %v9872_v45  ;;  %v14169_v14 = vld [vmem:[#allocation2 + $0x81c] sm:$0xf]  ;;  %v10178_v44 = vld [vmem:[#allocation2 + $0x370] sm:$0xf]  ;;  %v14027_v45 = vld [vmem:[#allocation2 + $0x3a8] sm:$0xf0] }
 0x161   : > { %4209 = vmatpush.bf16.msrb.mxu3 %v11615_v18  ;;  %v14079_v18 = vld [vmem:[#allocation2 + $0x54c] sm:$0xf] }
 0x162   : > { %4168 = vmatpush.bf16.msrb.mxu0 %v10115_v29  ;;  %v11372_v29 = vld [vmem:[#allocation2 + $0xd04] sm:$0xf0]  ;;  %v10415_v38 = vor.u32 %v14079_v18, %v10412_v23  ;;  %v11252_v18 = vld [vmem:[#allocation2 + $0xc14] sm:$0xf0]  ;;  %v9752_v23 = vld [vmem:[#allocation2 + $0x5c] sm:$0xf0] }
 0x163   : > { %4182 = vmatpush.bf16.msrb.mxu1 %v10595_v35  ;;  %v9935_v35 = vor.u32 %v13959_v16, %v9932_v17  ;;  %v11375_v46 = vor.u32 %v14319_v28, %v11372_v29  ;;  %v3938_v51 = vpop.f32.mrf.mxu3  ;;  %v10772_v16 = vld [vmem:[#allocation2 + $0x854] sm:$0xf0]  ;;  %v14289_v17 = vld [vmem:[#allocation2 + $0xbdc] sm:$0xf]  ;;  %v14034_v28 = vld [vmem:[#allocation2 + $0x3e4] sm:$0xf] }
 0x164   : > { %4196 = vmatpush.bf16.msrb.mxu2 %v11075_v36  ;;  %v16398_v36 = vmov 0.0   ;;  %v10775_v10 = vor.u32 %v14169_v14, %v10772_v16  ;;  %v10232_v29 = vld [vmem:[#allocation2 + $0x41c] sm:$0xf0]  ;;  %v11078_v14 = vld [vmem:[#allocation2 + $0xa78] sm:$0xf] }
 0x165   : > { %4210 = vmatpush.bf16.msrb.mxu3 %v11555_v41  ;;  %v15763_v37 = vsel %vm15755_vm0, 1.0, %v16398_v36  ;;  %v3924_v41 = vpop.f32.mrf.mxu2  ;;  %v14252_v16 = vld [vmem:[#allocation2 + $0xab0] sm:$0xf0]  ;;  %v11328_v36 = vld [vmem:[#allocation2 + $0xc9c] sm:$0xf0] }
 0x166   : > { %4169 = vmatpush.bf16.msrb.mxu0 %v10055_v49  ;;  %16411 = vst [vmem:[#allocation24_spill] sm:$0xff] %v15763_v37  ;;  %v3925_v49 = vadd.f32 %v3924_v41, %v3911_v22  ;;  %v4538_v58 = vmul.f32 %v15763_v37, %v4517_v43  ;;  %v13914_v22 = vld [vmem:[#allocation2 + $0x24] sm:$0xf]  ;;  %v11192_v43 = vld [vmem:[#allocation2 + $0xb9c] sm:$0xf0] }
 0x167   : > { %4183 = vmatpush.bf16.msrb.mxu1 %v10535_v52  ;;  %v10352_v52 = vld [vmem:[#allocation2 + $0x50c] sm:$0xf0]  ;;  %v14274_v41 = vld [vmem:[#allocation2 + $0xb64] sm:$0xf] }
 0x168   : > { %4197 = vmatpush.bf16.msrb.mxu2 %v11015_v53  ;;  %v14184_v53 = vld [vmem:[#allocation2 + $0x894] sm:$0xf]  ;;  %v10355_v59 = vor.u32 %v14064_v25, %v10352_v52  ;;  %v10658_v25 = vld [vmem:[#allocation2 + $0x730] sm:$0xf]  ;;  %v14267_v52 = vld [vmem:[#allocation2 + $0xb28] sm:$0xf0] }
 0x169   : > { %4211 = vmatpush.bf16.msrb.mxu3 %v11495_v57  ;;  %v3939_v57 = vadd.f32 %v3938_v51, %v3925_v49  ;;  %v10835_v61 = vor.u32 %v14184_v53, %v10832_v54  ;;  %v14147_v49 = vld [vmem:[#allocation2 + $0x768] sm:$0xf0]  ;;  %v11138_v51 = vld [vmem:[#allocation2 + $0xaf0] sm:$0xf]  ;;  %v10235_v53 = vor.u32 %v14034_v28, %v10232_v29  ;;  %v13997_v28 = vld [vmem:[#allocation2 + $0x2b8] sm:$0xf0] }
 0x16a   : > { %4170 = vmatpush.bf16.msrb.mxu0 %v9995_v0  ;;  %v9812_v0 = vld [vmem:[#allocation2 + $0xd4] sm:$0xf0]  ;;  %v10538_v29 = vld [vmem:[#allocation2 + $0x640] sm:$0xf] }
 0x16b   : > { %4184 = vmatpush.bf16.msrb.mxu1 %v10475_v7  ;;  %v15772_v6 = vadd.f32 %v4538_v58, %v3939_v57  ;;  %v11315_v7 = vor.u32 %v14304_v55, %v11312_v56  ;;  %v11618_v55 = vld [vmem:[#allocation2 + $0xeb0] sm:$0xf]  ;;  %v14387_v56 = vld [vmem:[#allocation2 + $0xee8] sm:$0xf0]  ;;  %v3745_v57 = vadd.f32 %v15706_v4, %v15704_v2  ;;  %v11195_v58 = vor.u32 %v14274_v41, %v11192_v43  ;;  %v15777_v2 = vpop.f32.mrf.mxu0  ;;  %v11498_v41 = vld [vmem:[#allocation2 + $0xdc0] sm:$0xf] }
 0x16c   : > { %4198 = vmatpush.bf16.msrb.mxu2 %v10955_v9  ;;  %v10292_v9 = vld [vmem:[#allocation2 + $0x494] sm:$0xf0]  ;;  %v14357_v43 = vld [vmem:[#allocation2 + $0xdf8] sm:$0xf0] }
 0x16d   : > { %4212 = vmatpush.bf16.msrb.mxu3 %v11435_v20  ;;  %v9815_v20 = vor.u32 %v13929_v62, %v9812_v0  ;;  %v10295_v27 = vor.u32 %v14049_v5, %v10292_v9  ;;  %v10118_v62 = vld [vmem:[#allocation2 + $0x2f8] sm:$0xf]  ;;  %v14012_v0 = vld [vmem:[#allocation2 + $0x330] sm:$0xf0] }
 0x16e   : > { %4171 = vmatpush.bf16.msrb.mxu0 %v9935_v35  ;;  %v14154_v35 = vld [vmem:[#allocation2 + $0x7a4] sm:$0xf]  ;;  %v10598_v5 = vld [vmem:[#allocation2 + $0x6b8] sm:$0xf]  ;;  %v14132_v9 = vld [vmem:[#allocation2 + $0x6f0] sm:$0xf0]  ;;  %v10119_v4 = vor.u32 %v14012_v0, %v10118_v62 }
 0x16f   : > { %4185 = vmatpush.bf16.msrb.mxu1 %v10415_v38  ;;  %v11255_v38 = vor.u32 %v14289_v17, %v11252_v18  ;;  %v11558_v17 = vld [vmem:[#allocation2 + $0xe38] sm:$0xf]  ;;  %v14372_v18 = vld [vmem:[#allocation2 + $0xe70] sm:$0xf0] }
 0x170   : > { %4199 = vmatpush.bf16.msrb.mxu2 %v10895_v39  ;;  %v10712_v39 = vld [vmem:[#allocation2 + $0x7dc] sm:$0xf0] }
 0x171   : > { %4213 = vmatpush.bf16.msrb.mxu3 %v11375_v46  ;;  %v9755_v46 = vor.u32 %v13914_v22, %v9752_v23  ;;  %v10715_v54 = vor.u32 %v14154_v35, %v10712_v39  ;;  %v15779_v22 = vpop.f32.mrf.mxu1  ;;  %v10599_v23 = vor.u32 %v14132_v9, %v10598_v5  ;;  %v11559_v35 = vor.u32 %v14372_v18, %v11558_v17  ;;  %v14237_v39 = vld [vmem:[#allocation2 + $0xa38] sm:$0xf0]  ;;  %v10418_v17 = vld [vmem:[#allocation2 + $0x550] sm:$0xf] }
 0x172   : > { %4172 = vmatpush.bf16.msrb.mxu0 %v9875_v34  ;;  %v10179_v34 = vor.u32 %v14027_v45, %v10178_v44 }
 0x173   : > { %4186 = vmatpush.bf16.msrb.mxu1 %v10355_v59  ;;  %v10659_v59 = vor.u32 %v14147_v49, %v10658_v25  ;;  %v15788_v25 = vpop.f32.mrf.mxu2 }
 0x174   : > { %4200 = vmatpush.bf16.msrb.mxu2 %v10835_v61  ;;  %v11139_v61 = vor.u32 %v14267_v52, %v11138_v51  ;;  %v9998_v51 = vld [vmem:[#allocation2 + $0x208] sm:$0xf]  ;;  %v13982_v52 = vld [vmem:[#allocation2 + $0x240] sm:$0xf0] }
 0x175   : > { %4214 = vmatpush.bf16.msrb.mxu3 %v11315_v7  ;;  %v11619_v7 = vor.u32 %v14387_v56, %v11618_v55  ;;  %v11499_v55 = vor.u32 %v14357_v43, %v11498_v41  ;;  %v14102_v56 = vld [vmem:[#allocation2 + $0x600] sm:$0xf0]  ;;  %v9999_v62 = vor.u32 %v13982_v52, %v9998_v51  ;;  %v9878_v41 = vld [vmem:[#allocation2 + $0x118] sm:$0xf]  ;;  %v13952_v43 = vld [vmem:[#allocation2 + $0x150] sm:$0xf0] }
 0x176   : > { %4173 = vmatpush.bf16.msrb.mxu0 %v9815_v20  ;;  %v3759_v20 = vadd.f32 %v15712_v21, %v3745_v57  ;;  %v11018_v21 = vld [vmem:[#allocation2 + $0xa00] sm:$0xf]  ;;  %v14222_v57 = vld [vmem:[#allocation2 + $0x9c0] sm:$0xf0]  ;;  %v14072_v52 = vld [vmem:[#allocation2 + $0x510] sm:$0xf0] }
 0x177   : > { %4187 = vmatpush.bf16.msrb.mxu1 %v10295_v27  ;;  %v11079_v27 = vor.u32 %v14252_v16, %v11078_v14  ;;  %v11019_v49 = vor.u32 %v14237_v39, %v11018_v21  ;;  %v9938_v14 = vld [vmem:[#allocation2 + $0x190] sm:$0xf]  ;;  %v13967_v16 = vld [vmem:[#allocation2 + $0x1c8] sm:$0xf0] }
 0x178   : > { %4201 = vmatpush.bf16.msrb.mxu2 %v10775_v10  ;;  %v10058_v10 = vld [vmem:[#allocation2 + $0x280] sm:$0xf]  ;;  %v15785_v44 = vadd.f32 %v15714_v30, %v3759_v20  ;;  %v10958_v30 = vld [vmem:[#allocation2 + $0x988] sm:$0xf] }
 0x179   : > { %4215 = vmatpush.bf16.msrb.mxu3 %v11255_v38  ;;  %v14117_v38 = vld [vmem:[#allocation2 + $0x678] sm:$0xf0]  ;;  %v10059_v45 = vor.u32 %v13997_v28, %v10058_v10  ;;  %v11378_v10 = vld [vmem:[#allocation2 + $0xcd0] sm:$0xf]  ;;  %v14327_v28 = vld [vmem:[#allocation2 + $0xd08] sm:$0xf0] }
 0x17a   : > { %4174 = vmatpush.bf16.msrb.mxu0 %v9755_v46  ;;  %v10539_v46 = vor.u32 %v14117_v38, %v10538_v29  ;;  %v3952_v0 = vpop.f32.mrf.mxu0  ;;  %v9939_v29 = vor.u32 %v13967_v16, %v9938_v14 }
 0x17b   : > { %4188 = vmatpush.bf16.msrb.mxu1 %v10235_v53  ;;  %v10478_v53 = vld [vmem:[#allocation2 + $0x5c8] sm:$0xf]  ;;  %v3966_v9 = vpop.f32.mrf.mxu1 }
 0x17c   : > { %4202 = vmatpush.bf16.msrb.mxu2 %v10715_v54  ;;  %v15790_v54 = vpop.f32.mrf.mxu3  ;;  %v10479_v5 = vor.u32 %v14102_v56, %v10478_v53  ;;  %v3967_v20 = vadd.f32 %v3966_v9, %v3952_v0  ;;  %v10838_v53 = vld [vmem:[#allocation2 + $0x898] sm:$0xf]  ;;  %v10298_v9 = vld [vmem:[#allocation2 + $0x460] sm:$0xf] }
 0x17d   : > { %4216 = vmatpush.bf16.msrb.mxu3 %v11195_v58  ;;  %4175 = vmatmul.bf16.vlgmr.msrb.gmra.mxu0 %v15664_v26  ;;  %v11438_v58 = vld [vmem:[#allocation2 + $0xd48] sm:$0xf]  ;;  %v11318_v56 = vld [vmem:[#allocation2 + $0xc58] sm:$0xf] }
 0x17e   : > { %4223 = vmatpush.bf16.msra.mxu0 %v10179_v34  ;;  %4189 = vmatmul.bf16.vlgmr.msrb.gmra.mxu1 %v15668_v33  ;;  %v14342_v34 = vld [vmem:[#allocation2 + $0xd80] sm:$0xf0] }
 0x17f   : > { %4237 = vmatpush.bf16.msra.mxu1 %v10659_v59  ;;  %4203 = vmatmul.bf16.vlgmr.msrb.gmra.mxu2 %v15654_v8  ;;  %v16394_v59 = vrot.slane %v15702_v3, 7  ;;  %v11439_v18 = vor.u32 %v14342_v34, %v11438_v58  ;;  %v9879_v34 = vor.u32 %v13952_v43, %v9878_v41  ;;  %v14162_v43 = vld [vmem:[#allocation2 + $0x7e0] sm:$0xf0] }
 0x180   : > { %4251 = vmatpush.bf16.msra.mxu2 %v11139_v61  ;;  %4217 = vmatmul.bf16.vlgmr.msrb.gmra.mxu3 %v15658_v15  ;;  %v16395_v61 = vrot.slane %v15785_v44, 7 }
 0x181   : > { %4265 = vmatpush.bf16.msra.mxu3 %v11619_v7  ;;  %v10959_v7 = vor.u32 %v14222_v57, %v10958_v30  ;;  %v14312_v30 = vld [vmem:[#allocation2 + $0xc90] sm:$0xf0] }
 0x182   : > { %4224 = vmatpush.bf16.msra.mxu0 %v10119_v4  ;;  %v14087_v4 = vld [vmem:[#allocation2 + $0x588] sm:$0xf0]  ;;  %v3980_v21 = vpop.f32.mrf.mxu2  ;;  %v4518_v39 = vsel %vm4512_vm1, %v16395_v61, %v16394_v59  ;;  %v11319_v16 = vor.u32 %v14312_v30, %v11318_v56  ;;  %v14260_v56 = vld [vmem:[#allocation2 + $0xaf4] sm:$0xf]  ;;  %v11140_v30 = vld [vmem:[#allocation2 + $0xb2c] sm:$0xf0] }
 0x183   : > { %4238 = vmatpush.bf16.msra.mxu1 %v10599_v23  ;;  %v10898_v23 = vld [vmem:[#allocation2 + $0x910] sm:$0xf]  ;;  %v4539_v58 = vmul.f32 %v15763_v37, %v4518_v39  ;;  %v10718_v39 = vld [vmem:[#allocation2 + $0x7a8] sm:$0xf]  ;;  %v14126_v59 = vld [vmem:[#allocation2 + $0x6c4] sm:$0xf] }
 0x184   : > { %4252 = vmatpush.bf16.msra.mxu2 %v11079_v27  ;;  %v14207_v27 = vld [vmem:[#allocation2 + $0x948] sm:$0xf0]  ;;  %v3994_v51 = vpop.f32.mrf.mxu3  ;;  %v11088_v61 = vld [vmem:[#allocation2 + $0xabc] sm:$0xf0] }
 0x185   : > { %4266 = vmatpush.bf16.msra.mxu3 %v11559_v35  ;;  %v10419_v35 = vor.u32 %v14087_v4, %v10418_v17  ;;  %v10899_v38 = vor.u32 %v14207_v27, %v10898_v23  ;;  %v14057_v17 = vld [vmem:[#allocation2 + $0x498] sm:$0xf0]  ;;  %v11258_v4 = vld [vmem:[#allocation2 + $0xbe0] sm:$0xf] }
 0x186   : > { %4225 = vmatpush.bf16.msra.mxu0 %v10059_v45  ;;  %v10358_v45 = vld [vmem:[#allocation2 + $0x4d8] sm:$0xf]  ;;  %v14297_v23 = vld [vmem:[#allocation2 + $0xc18] sm:$0xf0] }
 0x187   : > { %4239 = vmatpush.bf16.msra.mxu1 %v10539_v46  ;;  %v11379_v46 = vor.u32 %v14327_v28, %v11378_v10  ;;  %v9758_v10 = vld [vmem:[#allocation2 + $0x28] sm:$0xf]  ;;  %v13922_v28 = vld [vmem:[#allocation2 + $0x60] sm:$0xf0]  ;;  %v11259_v41 = vor.u32 %v14297_v23, %v11258_v4  ;;  %v10600_v23 = vld [vmem:[#allocation2 + $0x6f4] sm:$0xf0] }
 0x188   : > { %4253 = vmatpush.bf16.msra.mxu2 %v11019_v49  ;;  %v3981_v49 = vadd.f32 %v3980_v21, %v3967_v20  ;;  %v14177_v20 = vld [vmem:[#allocation2 + $0x858] sm:$0xf0]  ;;  %v14042_v21 = vld [vmem:[#allocation2 + $0x420] sm:$0xf0] }
 0x189   : > { %4267 = vmatpush.bf16.msra.mxu3 %v11499_v55  ;;  %v14192_v55 = vld [vmem:[#allocation2 + $0x8d0] sm:$0xf0] }
 0x18a   : > { %4226 = vmatpush.bf16.msra.mxu0 %v9999_v62  ;;  %v3995_v57 = vadd.f32 %v3994_v51, %v3981_v49  ;;  %v10359_v62 = vor.u32 %v14072_v52, %v10358_v45  ;;  %v10839_v0 = vor.u32 %v14192_v55, %v10838_v53  ;;  %v11198_v45 = vld [vmem:[#allocation2 + $0xb68] sm:$0xf]  ;;  %v14020_v49 = vld [vmem:[#allocation2 + $0x374] sm:$0xf]  ;;  %v10180_v51 = vld [vmem:[#allocation2 + $0x3ac] sm:$0xf0]  ;;  %v9759_v53 = vor.u32 %v13922_v28, %v9758_v10 }
 0x18b   : > { %4240 = vmatpush.bf16.msra.mxu1 %v10479_v5  ;;  %v9818_v5 = vld [vmem:[#allocation2 + $0xa0] sm:$0xf]  ;;  %v14140_v52 = vld [vmem:[#allocation2 + $0x734] sm:$0xf]  ;;  %v10660_v55 = vld [vmem:[#allocation2 + $0x76c] sm:$0xf0] }
 0x18c   : > { %4254 = vmatpush.bf16.msra.mxu2 %v10959_v7  ;;  %v13937_v7 = vld [vmem:[#allocation2 + $0xd8] sm:$0xf0]  ;;  %v15801_v14 = vadd.f32 %v4539_v58, %v3995_v57  ;;  %v10719_v58 = vor.u32 %v14162_v43, %v10718_v39  ;;  %v11080_v10 = vld [vmem:[#allocation2 + $0xab4] sm:$0xf0]  ;;  %v10060_v43 = vld [vmem:[#allocation2 + $0x2bc] sm:$0xf0] }
 0x18d   : > { %4268 = vmatpush.bf16.msra.mxu3 %v11439_v18  ;;  %v10778_v18 = vld [vmem:[#allocation2 + $0x820] sm:$0xf]  ;;  %v9819_v27 = vor.u32 %v13937_v7, %v9818_v5  ;;  %v10183_v7 = vor.u32 %v14020_v49, %v10180_v51  ;;  %v14365_v28 = vld [vmem:[#allocation2 + $0xe3c] sm:$0xf] }
 0x18e   : > { %4227 = vmatpush.bf16.msra.mxu0 %v9939_v29  ;;  %v10299_v29 = vor.u32 %v14057_v17, %v10298_v9  ;;  %v10663_v9 = vor.u32 %v14140_v52, %v10660_v55  ;;  %v14005_v17 = vld [vmem:[#allocation2 + $0x2fc] sm:$0xf]  ;;  %v10540_v49 = vld [vmem:[#allocation2 + $0x67c] sm:$0xf0]  ;;  %v14350_v52 = vld [vmem:[#allocation2 + $0xdc4] sm:$0xf] }
 0x18f   : > { %4241 = vmatpush.bf16.msra.mxu1 %v10419_v35  ;;  %v10779_v35 = vor.u32 %v14177_v20, %v10778_v18  ;;  %v10120_v18 = vld [vmem:[#allocation2 + $0x334] sm:$0xf0]  ;;  %v14125_v20 = vld [vmem:[#allocation2 + $0x6bc] sm:$0xf]  ;;  %v11020_v51 = vld [vmem:[#allocation2 + $0xa3c] sm:$0xf0] }
 0x190   : > { %4255 = vmatpush.bf16.msra.mxu2 %v10899_v38  ;;  %v10238_v38 = vld [vmem:[#allocation2 + $0x3e8] sm:$0xf] }
 0x191   : > { %4269 = vmatpush.bf16.msra.mxu3 %v11379_v46  ;;  %v14282_v46 = vld [vmem:[#allocation2 + $0xba0] sm:$0xf0]  ;;  %v10239_v57 = vor.u32 %v14042_v21, %v10238_v38  ;;  %v15808_v38 = vpop.f32.mrf.mxu1  ;;  %v10603_v21 = vor.u32 %v14125_v20, %v10600_v23  ;;  %v16390_v20 = vrot.slane %v15716_v1, 7 }
 0x192   : > { %4228 = vmatpush.bf16.msra.mxu0 %v9879_v34  ;;  %v14380_v34 = vld [vmem:[#allocation2 + $0xeb4] sm:$0xf]  ;;  %v11199_v5 = vor.u32 %v14282_v46, %v11198_v45  ;;  %v14110_v45 = vld [vmem:[#allocation2 + $0x644] sm:$0xf] }
 0x193   : > { %4242 = vmatpush.bf16.msra.mxu1 %v10359_v62  ;;  %v11620_v62 = vld [vmem:[#allocation2 + $0xeec] sm:$0xf0] }
 0x194   : > { %4256 = vmatpush.bf16.msra.mxu2 %v10839_v0  ;;  %v3801_v0 = vadd.f32 %v15720_v13, %v15718_v12  ;;  %v11623_v4 = vor.u32 %v14380_v34, %v11620_v62  ;;  %v15806_v12 = vpop.f32.mrf.mxu0  ;;  %v10123_v13 = vor.u32 %v14005_v17, %v10120_v18  ;;  %v13975_v34 = vld [vmem:[#allocation2 + $0x20c] sm:$0xf]  ;;  %v10000_v62 = vld [vmem:[#allocation2 + $0x244] sm:$0xf0] }
 0x195   : > { %4270 = vmatpush.bf16.msra.mxu3 %v11319_v16  ;;  %v11143_v16 = vor.u32 %v14260_v56, %v11140_v30  ;;  %v15817_v30 = vpop.f32.mrf.mxu2  ;;  %v14335_v17 = vld [vmem:[#allocation2 + $0xd4c] sm:$0xf]  ;;  %v11440_v18 = vld [vmem:[#allocation2 + $0xd84] sm:$0xf0]  ;;  %v10003_v23 = vor.u32 %v13975_v34, %v10000_v62  ;;  %v9880_v34 = vld [vmem:[#allocation2 + $0x154] sm:$0xf0] }
 0x196   : > { %4229 = vmatpush.bf16.msra.mxu0 %v9819_v27  ;;  %v14245_v27 = vld [vmem:[#allocation2 + $0xa7c] sm:$0xf] }
 0x197   : > { %4243 = vmatpush.bf16.msra.mxu1 %v10299_v29  ;;  %v11560_v29 = vld [vmem:[#allocation2 + $0xe74] sm:$0xf0]  ;;  %v11083_v39 = vor.u32 %v14245_v27, %v11080_v10  ;;  %v14065_v62 = vld [vmem:[#allocation2 + $0x4dc] sm:$0xf] }
 0x198   : > { %4257 = vmatpush.bf16.msra.mxu2 %v10779_v35  ;;  %v3815_v35 = vadd.f32 %v15726_v31, %v3801_v0  ;;  %v11563_v46 = vor.u32 %v14365_v28, %v11560_v29  ;;  %v14230_v31 = vld [vmem:[#allocation2 + $0xa04] sm:$0xf]  ;;  %v14095_v0 = vld [vmem:[#allocation2 + $0x5cc] sm:$0xf] }
 0x199   : > { %4271 = vmatpush.bf16.msra.mxu3 %v11259_v41  ;;  %v13990_v41 = vld [vmem:[#allocation2 + $0x284] sm:$0xf] }
 0x19a   : > { %4230 = vmatpush.bf16.msra.mxu0 %v9759_v53  ;;  %v11500_v53 = vld [vmem:[#allocation2 + $0xdfc] sm:$0xf0]  ;;  %v15814_v55 = vadd.f32 %v15728_v40, %v3815_v35  ;;  %v10063_v56 = vor.u32 %v13990_v41, %v10060_v43  ;;  %v14215_v40 = vld [vmem:[#allocation2 + $0x98c] sm:$0xf]  ;;  %v13960_v35 = vld [vmem:[#allocation2 + $0x194] sm:$0xf] }
 0x19b   : > { %4244 = vmatpush.bf16.msra.mxu1 %v10239_v57  ;;  %v10543_v57 = vor.u32 %v14110_v45, %v10540_v49  ;;  %v4022_v29 = vpop.f32.mrf.mxu1  ;;  %v10420_v43 = vld [vmem:[#allocation2 + $0x58c] sm:$0xf0]  ;;  %v14200_v45 = vld [vmem:[#allocation2 + $0x914] sm:$0xf] }
 0x19c   : > { %4258 = vmatpush.bf16.msra.mxu2 %v10719_v58  ;;  %v11023_v58 = vor.u32 %v14230_v31, %v11020_v51  ;;  %v4008_v27 = vpop.f32.mrf.mxu0  ;;  %v14320_v49 = vld [vmem:[#allocation2 + $0xcd4] sm:$0xf]  ;;  %v11380_v31 = vld [vmem:[#allocation2 + $0xd0c] sm:$0xf0] }
 0x19d   : > { %4272 = vmatpush.bf16.msra.mxu3 %v11199_v5  ;;  %4231 = vmatmul.bf16.vlgmr.msra.gmra.mxu0 %v15664_v26  ;;  %v15819_v5 = vpop.f32.mrf.mxu3  ;;  %v4023_v41 = vadd.f32 %v4022_v29, %v4008_v27 }
 0x19e   : > { %4279 = vmatpush.bf16.msrb.mxu0 %v10183_v7  ;;  %4245 = vmatmul.bf16.vlgmr.msra.gmra.mxu1 %v15668_v33  ;;  %v11503_v7 = vor.u32 %v14350_v52, %v11500_v53 }
 0x19f   : > { %4293 = vmatpush.bf16.msrb.mxu1 %v10663_v9  ;;  %4259 = vmatmul.bf16.vlgmr.msra.gmra.mxu2 %v15654_v8  ;;  %v10480_v9 = vld [vmem:[#allocation2 + $0x604] sm:$0xf0] }
 0x1a0   : > { %4307 = vmatpush.bf16.msrb.mxu2 %v11143_v16  ;;  %4273 = vmatmul.bf16.vlgmr.msra.gmra.mxu3 %v15658_v15  ;;  %v10960_v16 = vld [vmem:[#allocation2 + $0x9c4] sm:$0xf0]  ;;  %v10483_v10 = vor.u32 %v14095_v0, %v10480_v9  ;;  %v11383_v0 = vor.u32 %v14320_v49, %v11380_v31  ;;  %v10780_v49 = vld [vmem:[#allocation2 + $0x85c] sm:$0xf0]  ;;  %v14290_v31 = vld [vmem:[#allocation2 + $0xbe4] sm:$0xf] }
 0x1a1   : > { %4321 = vmatpush.bf16.msrb.mxu3 %v11623_v4  ;;  %v16393_v4 = vrot.slane %v15814_v55, 7  ;;  %v10963_v28 = vor.u32 %v14215_v40, %v10960_v16  ;;  %v10360_v40 = vld [vmem:[#allocation2 + $0x514] sm:$0xf0]  ;;  %v14185_v16 = vld [vmem:[#allocation2 + $0x89c] sm:$0xf] }
 0x1a2   : > { %4280 = vmatpush.bf16.msrb.mxu0 %v10123_v13  ;;  %v9940_v13 = vld [vmem:[#allocation2 + $0x1cc] sm:$0xf0]  ;;  %v10363_v29 = vor.u32 %v14065_v62, %v10360_v40  ;;  %v10240_v62 = vld [vmem:[#allocation2 + $0x424] sm:$0xf0]  ;;  %v14275_v40 = vld [vmem:[#allocation2 + $0xb6c] sm:$0xf] }
 0x1a3   : > { %4294 = vmatpush.bf16.msrb.mxu1 %v10603_v21  ;;  %v14080_v21 = vld [vmem:[#allocation2 + $0x554] sm:$0xf]  ;;  %v9943_v51 = vor.u32 %v13960_v35, %v9940_v13  ;;  %v13930_v13 = vld [vmem:[#allocation2 + $0xa4] sm:$0xf] }
 0x1a4   : > { %4308 = vmatpush.bf16.msrb.mxu2 %v11083_v39  ;;  %v11443_v39 = vor.u32 %v14335_v17, %v11440_v18  ;;  %v10423_v52 = vor.u32 %v14080_v21, %v10420_v43  ;;  %v10840_v17 = vld [vmem:[#allocation2 + $0x8d4] sm:$0xf0]  ;;  %v14305_v18 = vld [vmem:[#allocation2 + $0xc5c] sm:$0xf]  ;;  %v9820_v21 = vld [vmem:[#allocation2 + $0xdc] sm:$0xf0] }
 0x1a5   : > { %4322 = vmatpush.bf16.msrb.mxu3 %v11563_v46  ;;  %v10900_v46 = vld [vmem:[#allocation2 + $0x94c] sm:$0xf0]  ;;  %v4050_v9 = vpop.f32.mrf.mxu3  ;;  %v10843_v35 = vor.u32 %v14185_v16, %v10840_v17  ;;  %v11200_v16 = vld [vmem:[#allocation2 + $0xba4] sm:$0xf0]  ;;  %v10186_v17 = vld [vmem:[#allocation2 + $0x378] sm:$0xf] }
 0x1a6   : > { %4281 = vmatpush.bf16.msrb.mxu0 %v10063_v56  ;;  %v10903_v53 = vor.u32 %v14200_v45, %v10900_v46  ;;  %v4036_v56 = vpop.f32.mrf.mxu2  ;;  %v10300_v45 = vld [vmem:[#allocation2 + $0x49c] sm:$0xf0]  ;;  %v14170_v46 = vld [vmem:[#allocation2 + $0x824] sm:$0xf] }
 0x1a7   : > { %4295 = vmatpush.bf16.msrb.mxu1 %v10543_v57  ;;  %v4519_v57 = vsel %vm4512_vm1, %v16393_v4, %v16390_v20  ;;  %v14133_v20 = vld [vmem:[#allocation2 + $0x6f8] sm:$0xf0]  ;;  %v10128_v4 = vld [vmem:[#allocation2 + $0x33c] sm:$0xf0] }
 0x1a8   : > { %4309 = vmatpush.bf16.msrb.mxu2 %v11023_v58  ;;  %v13945_v58 = vld [vmem:[#allocation2 + $0x11c] sm:$0xf] }
 0x1a9   : > { %4323 = vmatpush.bf16.msrb.mxu3 %v11503_v7  ;;  %v4037_v7 = vadd.f32 %v4036_v56, %v4023_v41  ;;  %v9823_v56 = vor.u32 %v13930_v13, %v9820_v21  ;;  %v14268_v13 = vld [vmem:[#allocation2 + $0xb30] sm:$0xf0]  ;;  %v11626_v21 = vld [vmem:[#allocation2 + $0xeb8] sm:$0xf] }
 0x1aa   : > { %4282 = vmatpush.bf16.msrb.mxu0 %v10003_v23  ;;  %v11320_v23 = vld [vmem:[#allocation2 + $0xc94] sm:$0xf0] }
 0x1ab   : > { %4296 = vmatpush.bf16.msrb.mxu1 %v10483_v10  ;;  %v4051_v27 = vadd.f32 %v4050_v9, %v4037_v7  ;;  %v4540_v10 = vmul.f32 %v15763_v37, %v4519_v57  ;;  %v11323_v43 = vor.u32 %v14305_v18, %v11320_v23  ;;  %v13915_v57 = vld [vmem:[#allocation2 + $0x2c] sm:$0xf]  ;;  %v10720_v9 = vld [vmem:[#allocation2 + $0x7e4] sm:$0xf0]  ;;  %v14028_v18 = vld [vmem:[#allocation2 + $0x3b0] sm:$0xf0] }
 0x1ac   : > { %4310 = vmatpush.bf16.msrb.mxu2 %v10963_v28  ;;  %v9883_v28 = vor.u32 %v13945_v58, %v9880_v34  ;;  %v9760_v58 = vld [vmem:[#allocation2 + $0x64] sm:$0xf0]  ;;  %v14035_v34 = vld [vmem:[#allocation2 + $0x3ec] sm:$0xf]  ;;  %v10666_v23 = vld [vmem:[#allocation2 + $0x738] sm:$0xf] }
 0x1ad   : > { %4324 = vmatpush.bf16.msrb.mxu3 %v11443_v39  ;;  %v14050_v39 = vld [vmem:[#allocation2 + $0x464] sm:$0xf]  ;;  %v15830_v41 = vadd.f32 %v4540_v10, %v4051_v27  ;;  %v14155_v7 = vld [vmem:[#allocation2 + $0x7ac] sm:$0xf]  ;;  %v9763_v27 = vor.u32 %v13915_v57, %v9760_v58  ;;  %v14148_v10 = vld [vmem:[#allocation2 + $0x770] sm:$0xf0] }
 0x1ae   : > { %4283 = vmatpush.bf16.msrb.mxu0 %v9943_v51  ;;  %v11260_v51 = vld [vmem:[#allocation2 + $0xc1c] sm:$0xf0] }
 0x1af   : > { %4297 = vmatpush.bf16.msrb.mxu1 %v10423_v52  ;;  %v10303_v52 = vor.u32 %v14050_v39, %v10300_v45  ;;  %v14388_v39 = vld [vmem:[#allocation2 + $0xef0] sm:$0xf0]  ;;  %v11203_v45 = vor.u32 %v14275_v40, %v11200_v16  ;;  %v10606_v57 = vld [vmem:[#allocation2 + $0x6c0] sm:$0xf]  ;;  %v10066_v16 = vld [vmem:[#allocation2 + $0x288] sm:$0xf] }
 0x1b0   : > { %4311 = vmatpush.bf16.msrb.mxu2 %v10903_v53  ;;  %v10783_v53 = vor.u32 %v14170_v46, %v10780_v49  ;;  %v10187_v46 = vor.u32 %v14028_v18, %v10186_v17  ;;  %v10667_v49 = vor.u32 %v14148_v10, %v10666_v23  ;;  %v11627_v58 = vor.u32 %v14388_v39, %v11626_v21  ;;  %v13998_v17 = vld [vmem:[#allocation2 + $0x2c0] sm:$0xf0]  ;;  %v10546_v18 = vld [vmem:[#allocation2 + $0x648] sm:$0xf] }
 0x1b1   : > { %4325 = vmatpush.bf16.msrb.mxu3 %v11383_v0  ;;  %v11263_v0 = vor.u32 %v14290_v31, %v11260_v51  ;;  %v10126_v51 = vld [vmem:[#allocation2 + $0x300] sm:$0xf]  ;;  %v14238_v10 = vld [vmem:[#allocation2 + $0xa40] sm:$0xf0] }
 0x1b2   : > { %4284 = vmatpush.bf16.msrb.mxu0 %v9883_v28  ;;  %v11146_v28 = vld [vmem:[#allocation2 + $0xaf8] sm:$0xf] }
 0x1b3   : > { %4298 = vmatpush.bf16.msrb.mxu1 %v10363_v29  ;;  %v10243_v29 = vor.u32 %v14035_v34, %v10240_v62  ;;  %v11147_v31 = vor.u32 %v14268_v13, %v11146_v28  ;;  %v11566_v34 = vld [vmem:[#allocation2 + $0xe40] sm:$0xf]  ;;  %v14373_v62 = vld [vmem:[#allocation2 + $0xe78] sm:$0xf0]  ;;  %v11506_v28 = vld [vmem:[#allocation2 + $0xdc8] sm:$0xf] }
 0x1b4   : > { %4312 = vmatpush.bf16.msrb.mxu2 %v10843_v35  ;;  %v10723_v35 = vor.u32 %v14155_v7, %v10720_v9  ;;  %v10607_v9 = vor.u32 %v14133_v20, %v10606_v57  ;;  %v11567_v23 = vor.u32 %v14373_v62, %v11566_v34  ;;  %v14358_v13 = vld [vmem:[#allocation2 + $0xe00] sm:$0xf0]  ;;  %v10067_v20 = vor.u32 %v13998_v17, %v10066_v16  ;;  %v11446_v57 = vld [vmem:[#allocation2 + $0xd50] sm:$0xf]  ;;  %v13968_v16 = vld [vmem:[#allocation2 + $0x1d0] sm:$0xf0] }
 0x1b5   : > { %4326 = vmatpush.bf16.msrb.mxu3 %v11323_v43  ;;  %v3857_v43 = vadd.f32 %v15736_v11, %v15734_v24  ;;  %v15835_v24 = vpop.f32.mrf.mxu0  ;;  %v10426_v17 = vld [vmem:[#allocation2 + $0x558] sm:$0xf] }
 0x1b6   : > { %4285 = vmatpush.bf16.msrb.mxu0 %v9823_v56  ;;  %v14013_v56 = vld [vmem:[#allocation2 + $0x338] sm:$0xf0] }
 0x1b7   : > { %4299 = vmatpush.bf16.msrb.mxu1 %v10303_v52  ;;  %v11086_v52 = vld [vmem:[#allocation2 + $0xa80] sm:$0xf]  ;;  %v3871_v7 = vadd.f32 %v15744_v47, %v3857_v43  ;;  %v10127_v11 = vor.u32 %v14013_v56, %v10126_v51  ;;  %v11026_v47 = vld [vmem:[#allocation2 + $0xa08] sm:$0xf]  ;;  %v10006_v43 = vld [vmem:[#allocation2 + $0x210] sm:$0xf] }
 0x1b8   : > { %4313 = vmatpush.bf16.msrb.mxu2 %v10783_v53  ;;  %v14253_v53 = vld [vmem:[#allocation2 + $0xab8] sm:$0xf0]  ;;  %v11027_v39 = vor.u32 %v14238_v10, %v11026_v47  ;;  %v14103_v51 = vld [vmem:[#allocation2 + $0x608] sm:$0xf0]  ;;  %v10906_v47 = vld [vmem:[#allocation2 + $0x918] sm:$0xf] }
 0x1b9   : > { %4327 = vmatpush.bf16.msrb.mxu3 %v11263_v0  ;;  %v15837_v0 = vpop.f32.mrf.mxu1  ;;  %v11087_v40 = vor.u32 %v14253_v53, %v11086_v52  ;;  %v14223_v56 = vld [vmem:[#allocation2 + $0x9c8] sm:$0xf0]  ;;  %v16391_v52 = vrot.slane %v15730_v19, 7  ;;  %v14208_v10 = vld [vmem:[#allocation2 + $0x950] sm:$0xf0] }
 0x1ba   : > { %4286 = vmatpush.bf16.msrb.mxu0 %v9763_v27  ;;  %v14118_v27 = vld [vmem:[#allocation2 + $0x680] sm:$0xf0] }
 0x1bb   : > { %4300 = vmatpush.bf16.msrb.mxu1 %v10243_v29  ;;  %v15843_v29 = vadd.f32 %v15750_v50, %v3871_v7  ;;  %v10547_v21 = vor.u32 %v14118_v27, %v10546_v18  ;;  %v10966_v50 = vld [vmem:[#allocation2 + $0x990] sm:$0xf]  ;;  %v14088_v27 = vld [vmem:[#allocation2 + $0x590] sm:$0xf0] }
 0x1bc   : > { %4314 = vmatpush.bf16.msrb.mxu2 %v10723_v35  ;;  %v15846_v35 = vpop.f32.mrf.mxu2 }
 0x1bd   : > { %4328 = vmatpush.bf16.msrb.mxu3 %v11203_v45  ;;  %4287 = vmatmul.bf16.vlgmr.msrb.gmra.mxu0 %v15664_v26  ;;  %v13983_v45 = vld [vmem:[#allocation2 + $0x248] sm:$0xf0]  ;;  %v16392_v53 = vrot.slane %v15843_v29, 7  ;;  %v4064_v62 = vpop.f32.mrf.mxu0 }
 0x1be   : > { %4335 = vmatpush.bf16.msra.mxu0 %v10187_v46  ;;  %4301 = vmatmul.bf16.vlgmr.msrb.gmra.mxu1 %v15668_v33  ;;  %v10486_v46 = vld [vmem:[#allocation2 + $0x5d0] sm:$0xf]  ;;  %v10007_v34 = vor.u32 %v13983_v45, %v10006_v43 }
 0x1bf   : > { %4349 = vmatpush.bf16.msra.mxu1 %v10667_v49  ;;  %4315 = vmatmul.bf16.vlgmr.msrb.gmra.mxu2 %v15654_v8  ;;  %v15848_v49 = vpop.f32.mrf.mxu3  ;;  %v10487_v7 = vor.u32 %v14103_v51, %v10486_v46  ;;  %v4520_v45 = vsel %vm4512_vm1, %v16392_v53, %v16391_v52  ;;  %v9886_v46 = vld [vmem:[#allocation2 + $0x120] sm:$0xf]  ;;  %v14178_v52 = vld [vmem:[#allocation2 + $0x860] sm:$0xf0]  ;;  %v11266_v53 = vld [vmem:[#allocation2 + $0xbe8] sm:$0xf] }
 0x1c0   : > { %4363 = vmatpush.bf16.msra.mxu2 %v11147_v31  ;;  %4329 = vmatmul.bf16.vlgmr.msrb.gmra.mxu3 %v15658_v15  ;;  %v11507_v31 = vor.u32 %v14358_v13, %v11506_v28  ;;  %v11386_v28 = vld [vmem:[#allocation2 + $0xcd8] sm:$0xf]  ;;  %v14328_v13 = vld [vmem:[#allocation2 + $0xd10] sm:$0xf0]  ;;  %v10366_v51 = vld [vmem:[#allocation2 + $0x4e0] sm:$0xf] }
 0x1c1   : > { %4377 = vmatpush.bf16.msra.mxu3 %v11627_v58  ;;  %v14343_v58 = vld [vmem:[#allocation2 + $0xd88] sm:$0xf0] }
 0x1c2   : > { %4336 = vmatpush.bf16.msra.mxu0 %v10127_v11  ;;  %v10967_v11 = vor.u32 %v14223_v56, %v10966_v50  ;;  %v11447_v18 = vor.u32 %v14343_v58, %v11446_v57  ;;  %v11387_v50 = vor.u32 %v14328_v13, %v11386_v28  ;;  %v14073_v58 = vld [vmem:[#allocation2 + $0x518] sm:$0xf0]  ;;  %v14058_v13 = vld [vmem:[#allocation2 + $0x4a0] sm:$0xf0] }
 0x1c3   : > { %4350 = vmatpush.bf16.msra.mxu1 %v10607_v9  ;;  %v4078_v9 = vpop.f32.mrf.mxu1 }
 0x1c4   : > { %4364 = vmatpush.bf16.msra.mxu2 %v11087_v40  ;;  %v9946_v40 = vld [vmem:[#allocation2 + $0x198] sm:$0xf]  ;;  %v4092_v43 = vpop.f32.mrf.mxu2 }
 0x1c5   : > { %4378 = vmatpush.bf16.msra.mxu3 %v11567_v23  ;;  %v4079_v23 = vadd.f32 %v4078_v9, %v4064_v62  ;;  %v14193_v62 = vld [vmem:[#allocation2 + $0x8d8] sm:$0xf0] }
 0x1c6   : > { %4337 = vmatpush.bf16.msra.mxu0 %v10067_v20  ;;  %v9947_v20 = vor.u32 %v13968_v16, %v9946_v40  ;;  %v4541_v40 = vmul.f32 %v15763_v37, %v4520_v45  ;;  %v9766_v45 = vld [vmem:[#allocation2 + $0x30] sm:$0xf]  ;;  %v14149_v37 = vld [vmem:[#allocation2 + $0x778] sm:$0xf0] }
 0x1c7   : > { %4351 = vmatpush.bf16.msra.mxu1 %v10547_v21  ;;  %v10427_v21 = vor.u32 %v14088_v27, %v10426_v17  ;;  %v4093_v56 = vadd.f32 %v4092_v43, %v4079_v23  ;;  %v4106_v57 = vpop.f32.mrf.mxu3  ;;  %v10367_v17 = vor.u32 %v14073_v58, %v10366_v51  ;;  %v10786_v43 = vld [vmem:[#allocation2 + $0x828] sm:$0xf]  ;;  %v14043_v51 = vld [vmem:[#allocation2 + $0x428] sm:$0xf0] }
 0x1c8   : > { %4365 = vmatpush.bf16.msra.mxu2 %v11027_v39  ;;  %v10907_v39 = vor.u32 %v14208_v10, %v10906_v47  ;;  %v9826_v47 = vld [vmem:[#allocation2 + $0xa8] sm:$0xf]  ;;  %v13938_v10 = vld [vmem:[#allocation2 + $0xe0] sm:$0xf0]  ;;  %v14163_v58 = vld [vmem:[#allocation2 + $0x7e8] sm:$0xf0] }
 0x1c9   : > { %4379 = vmatpush.bf16.msra.mxu3 %v11507_v31  ;;  %v13953_v31 = vld [vmem:[#allocation2 + $0x158] sm:$0xf0]  ;;  %v4107_v9 = vadd.f32 %v4106_v57, %v4093_v56  ;;  %v9827_v56 = vor.u32 %v13938_v10, %v9826_v47  ;;  %v10726_v57 = vld [vmem:[#allocation2 + $0x7b0] sm:$0xf]  ;;  %v11148_v10 = vld [vmem:[#allocation2 + $0xb34] sm:$0xf0] }
 0x1ca   : > { %4338 = vmatpush.bf16.msra.mxu0 %v10007_v34  ;;  %v10846_v34 = vld [vmem:[#allocation2 + $0x8a0] sm:$0xf]  ;;  %v9887_v16 = vor.u32 %v13953_v31, %v9886_v46  ;;  %v13923_v46 = vld [vmem:[#allocation2 + $0x68] sm:$0xf0]  ;;  %v10246_v31 = vld [vmem:[#allocation2 + $0x3f0] sm:$0xf] }
 0x1cb   : > { %4352 = vmatpush.bf16.msra.mxu1 %v10487_v7  ;;  %v11326_v7 = vld [vmem:[#allocation2 + $0xc60] sm:$0xf]  ;;  %v10847_v27 = vor.u32 %v14193_v62, %v10846_v34  ;;  %v15859_v23 = vadd.f32 %v4541_v40, %v4107_v9  ;;  %v11206_v34 = vld [vmem:[#allocation2 + $0xb70] sm:$0xf]  ;;  %v14283_v62 = vld [vmem:[#allocation2 + $0xba8] sm:$0xf0]  ;;  %v9767_v40 = vor.u32 %v13923_v46, %v9766_v45 }
 0x1cc   : > { %4366 = vmatpush.bf16.msra.mxu2 %v10967_v11  ;;  %v14313_v11 = vld [vmem:[#allocation2 + $0xc98] sm:$0xf0]  ;;  %v10608_v45 = vld [vmem:[#allocation2 + $0x6fc] sm:$0xf0]  ;;  %v14246_v46 = vld [vmem:[#allocation2 + $0xa84] sm:$0xf] }
 0x1cd   : > { %4380 = vmatpush.bf16.msra.mxu3 %v11447_v18  ;;  %v10306_v18 = vld [vmem:[#allocation2 + $0x468] sm:$0xf]  ;;  %v11327_v28 = vor.u32 %v14313_v11, %v11326_v7  ;;  %v14021_v7 = vld [vmem:[#allocation2 + $0x37c] sm:$0xf]  ;;  %v10188_v11 = vld [vmem:[#allocation2 + $0x3b4] sm:$0xf0] }
 0x1ce   : > { %4339 = vmatpush.bf16.msra.mxu0 %v9947_v20  ;;  %v14298_v20 = vld [vmem:[#allocation2 + $0xc20] sm:$0xf0]  ;;  %v14141_v9 = vld [vmem:[#allocation2 + $0x73c] sm:$0xf] }
 0x1cf   : > { %4353 = vmatpush.bf16.msra.mxu1 %v10427_v21  ;;  %v10307_v21 = vor.u32 %v14058_v13, %v10306_v18  ;;  %v14261_v47 = vld [vmem:[#allocation2 + $0xafc] sm:$0xf]  ;;  %v11628_v18 = vld [vmem:[#allocation2 + $0xef4] sm:$0xf0] }
 0x1d0   : > { %4367 = vmatpush.bf16.msra.mxu2 %v10907_v39  ;;  %v10787_v39 = vor.u32 %v14178_v52, %v10786_v43  ;;  %v10727_v52 = vor.u32 %v14163_v58, %v10726_v57  ;;  %v11151_v43 = vor.u32 %v14261_v47, %v11148_v10  ;;  %v15863_v57 = vpop.f32.mrf.mxu1  ;;  %v11091_v58 = vor.u32 %v14246_v46, %v11088_v61  ;;  %v14351_v47 = vld [vmem:[#allocation2 + $0xdcc] sm:$0xf]  ;;  %v11508_v10 = vld [vmem:[#allocation2 + $0xe04] sm:$0xf0] }
 0x1d1   : > { %4381 = vmatpush.bf16.msra.mxu3 %v11387_v50  ;;  %v11267_v50 = vor.u32 %v14298_v20, %v11266_v53  ;;  %v10191_v53 = vor.u32 %v14021_v7, %v10188_v11  ;;  %v14006_v20 = vld [vmem:[#allocation2 + $0x304] sm:$0xf]  ;;  %v14111_v7 = vld [vmem:[#allocation2 + $0x64c] sm:$0xf] }
 0x1d2   : > { %4340 = vmatpush.bf16.msra.mxu0 %v9887_v16  ;;  %v10668_v16 = vld [vmem:[#allocation2 + $0x774] sm:$0xf0] }
 0x1d3   : > { %4354 = vmatpush.bf16.msra.mxu1 %v10367_v17  ;;  %v10247_v17 = vor.u32 %v14043_v51, %v10246_v31  ;;  %v10671_v13 = vor.u32 %v14141_v9, %v10668_v16  ;;  %v15861_v31 = vpop.f32.mrf.mxu0  ;;  %v10131_v51 = vor.u32 %v14006_v20, %v10128_v4  ;;  %v10548_v9 = vld [vmem:[#allocation2 + $0x684] sm:$0xf0]  ;;  %v10968_v20 = vld [vmem:[#allocation2 + $0x9cc] sm:$0xf0] }
 0x1d4   : > { %4368 = vmatpush.bf16.msra.mxu2 %v10847_v27  ;;  %v14381_v27 = vld [vmem:[#allocation2 + $0xebc] sm:$0xf]  ;;  %v11028_v16 = vld [vmem:[#allocation2 + $0xa44] sm:$0xf0]  ;;  %v10551_v61 = vor.u32 %v14111_v7, %v10548_v9  ;;  %v10428_v9 = vld [vmem:[#allocation2 + $0x594] sm:$0xf0] }
 0x1d5   : > { %4382 = vmatpush.bf16.msra.mxu3 %v11327_v28  ;;  %v11207_v28 = vor.u32 %v14283_v62, %v11206_v34  ;;  %v13991_v34 = vld [vmem:[#allocation2 + $0x28c] sm:$0xf]  ;;  %v10068_v62 = vld [vmem:[#allocation2 + $0x2c4] sm:$0xf0] }
 0x1d6   : > { %4341 = vmatpush.bf16.msra.mxu0 %v9827_v56  ;;  %v11631_v56 = vor.u32 %v14381_v27, %v11628_v18  ;;  %v10071_v4 = vor.u32 %v13991_v34, %v10068_v62  ;;  %v10008_v27 = vld [vmem:[#allocation2 + $0x24c] sm:$0xf0]  ;;  %v14096_v18 = vld [vmem:[#allocation2 + $0x5d4] sm:$0xf]  ;;  %v9948_v34 = vld [vmem:[#allocation2 + $0x1d4] sm:$0xf0] }
 0x1d7   : > { %4355 = vmatpush.bf16.msra.mxu1 %v10307_v21  ;;  %v14366_v21 = vld [vmem:[#allocation2 + $0xe44] sm:$0xf]  ;;  %v14081_v62 = vld [vmem:[#allocation2 + $0x55c] sm:$0xf] }
 0x1d8   : > { %4369 = vmatpush.bf16.msra.mxu2 %v10787_v39  ;;  %v11568_v39 = vld [vmem:[#allocation2 + $0xe7c] sm:$0xf0] }
 0x1d9   : > { %4383 = vmatpush.bf16.msra.mxu3 %v11267_v50  ;;  %v10611_v50 = vor.u32 %v14126_v59, %v10608_v45  ;;  %v11571_v11 = vor.u32 %v14366_v21, %v11568_v39  ;;  %v15869_v59 = vpop.f32.mrf.mxu2  ;;  %v11448_v45 = vld [vmem:[#allocation2 + $0xd8c] sm:$0xf0] }
 0x1da   : > { %4342 = vmatpush.bf16.msra.mxu0 %v9767_v40  ;;  %v14231_v40 = vld [vmem:[#allocation2 + $0xa0c] sm:$0xf] }
 0x1db   : > { %4356 = vmatpush.bf16.msra.mxu1 %v10247_v17  ;;  %v11031_v17 = vor.u32 %v14231_v40, %v11028_v16  ;;  %v4120_v21 = vpop.f32.mrf.mxu0  ;;  %v14201_v40 = vld [vmem:[#allocation2 + $0x91c] sm:$0xf]  ;;  %v10908_v16 = vld [vmem:[#allocation2 + $0x954] sm:$0xf0] }
 0x1dc   : > { %4370 = vmatpush.bf16.msra.mxu2 %v10727_v52  ;;  %v13976_v52 = vld [vmem:[#allocation2 + $0x214] sm:$0xf] }
 0x1dd   : > { %4384 = vmatpush.bf16.msra.mxu3 %v11207_v28  ;;  %4343 = vmatmul.bf16.vlgmr.msra.gmra.mxu0 %v15664_v26  ;;  %v15871_v28 = vpop.f32.mrf.mxu3  ;;  %v10011_v46 = vor.u32 %v13976_v52, %v10008_v27 }
 0x1de   : > { %4391 = vmatpush.bf16.msrb.mxu0 %v10191_v53  ;;  %4357 = vmatmul.bf16.vlgmr.msra.gmra.mxu1 %v15668_v33  ;;  %v11511_v53 = vor.u32 %v14351_v47, %v11508_v10  ;;  %v657_v47 = vadd.s32 8, %v15739_v32  ;;  %v14321_v10 = vld [vmem:[#allocation2 + $0xcdc] sm:$0xf] }
 0x1df   : > { %4405 = vmatpush.bf16.msrb.mxu1 %v10671_v13  ;;  %4371 = vmatmul.bf16.vlgmr.msra.gmra.mxu2 %v15654_v8  ;;  %v10488_v13 = vld [vmem:[#allocation2 + $0x60c] sm:$0xf0] }
 0x1e0   : > { %4419 = vmatpush.bf16.msrb.mxu2 %v11151_v43  ;;  %4385 = vmatmul.bf16.vlgmr.msra.gmra.mxu3 %v15658_v15  ;;  %v14216_v43 = vld [vmem:[#allocation2 + $0x994] sm:$0xf]  ;;  %v10491_v39 = vor.u32 %v14096_v18, %v10488_v13  ;;  %v13946_v18 = vld [vmem:[#allocation2 + $0x124] sm:$0xf]  ;;  %v9888_v13 = vld [vmem:[#allocation2 + $0x15c] sm:$0xf0] }
 0x1e1   : > { %4433 = vmatpush.bf16.msrb.mxu3 %v11631_v56  ;;  %v14336_v56 = vld [vmem:[#allocation2 + $0xd54] sm:$0xf]  ;;  %v669_v60 = vand.u32 15, %v657_v47 }
 0x1e2   : > { %4392 = vmatpush.bf16.msrb.mxu0 %v10131_v51  ;;  %v10971_v51 = vor.u32 %v14216_v43, %v10968_v20  ;;  %v11451_v7 = vor.u32 %v14336_v56, %v11448_v45  ;;  %v4148_v27 = vpop.f32.mrf.mxu2  ;;  %v14066_v43 = vld [vmem:[#allocation2 + $0x4e4] sm:$0xf]  ;;  %v10368_v45 = vld [vmem:[#allocation2 + $0x51c] sm:$0xf0] }
 0x1e3   : > { %4406 = vmatpush.bf16.msrb.mxu1 %v10611_v50  ;;  %v4134_v50 = vpop.f32.mrf.mxu1  ;;  %vm15878_vm2 = vcmp.ne.s32.totalorder %v669_v60, 15  ;;  %v10728_v60 = vld [vmem:[#allocation2 + $0x7ec] sm:$0xf0] }
 0x1e4   : > { %4420 = vmatpush.bf16.msrb.mxu2 %v11091_v58  ;;  %v13961_v58 = vld [vmem:[#allocation2 + $0x19c] sm:$0xf] }
 0x1e5   : > { %4434 = vmatpush.bf16.msrb.mxu3 %v11571_v11  ;;  %v4135_v11 = vadd.f32 %v4134_v50, %v4120_v21  ;;  %v9951_v52 = vor.u32 %v13961_v58, %v9948_v34  ;;  %v4162_v56 = vpop.f32.mrf.mxu3  ;;  %v14186_v21 = vld [vmem:[#allocation2 + $0x8a4] sm:$0xf]  ;;  %v10848_v50 = vld [vmem:[#allocation2 + $0x8dc] sm:$0xf0]  ;;  %v3913_v58 = vadd.f32 %v15779_v22, %v15777_v2  ;;  %v10371_v34 = vor.u32 %v14066_v43, %v10368_v45  ;;  %v11268_v2 = vld [vmem:[#allocation2 + $0xc24] sm:$0xf0] }
 0x1e6   : > { %4393 = vmatpush.bf16.msrb.mxu0 %v10071_v4  ;;  %v11388_v4 = vld [vmem:[#allocation2 + $0xd14] sm:$0xf0] }
 0x1e7   : > { %4407 = vmatpush.bf16.msrb.mxu1 %v10551_v61  ;;  %v10431_v61 = vor.u32 %v14081_v62, %v10428_v9  ;;  %v4149_v20 = vadd.f32 %v4148_v27, %v4135_v11  ;;  %v10851_v62 = vor.u32 %v14186_v21, %v10848_v50  ;;  %v13931_v11 = vld [vmem:[#allocation2 + $0xac] sm:$0xf]  ;;  %v9828_v9 = vld [vmem:[#allocation2 + $0xe4] sm:$0xf0]  ;;  %v3927_v43 = vadd.f32 %v15788_v25, %v3913_v58 }
 0x1e8   : > { %4421 = vmatpush.bf16.msrb.mxu2 %v11031_v17  ;;  %v10911_v17 = vor.u32 %v14201_v40, %v10908_v16  ;;  %v14051_v40 = vld [vmem:[#allocation2 + $0x46c] sm:$0xf]  ;;  %v11331_v16 = vor.u32 %v14306_v63, %v11328_v36  ;;  %v9831_v22 = vor.u32 %v13931_v11, %v9828_v9  ;;  %v14029_v11 = vld [vmem:[#allocation2 + $0x3b8] sm:$0xf0]  ;;  %v10674_v9 = vld [vmem:[#allocation2 + $0x740] sm:$0xf] }
 0x1e9   : > { %4435 = vmatpush.bf16.msrb.mxu3 %v11511_v53  ;;  %v11391_v53 = vor.u32 %v14321_v10, %v11388_v4  ;;  %v10308_v10 = vld [vmem:[#allocation2 + $0x4a4] sm:$0xf0]  ;;  %v14171_v4 = vld [vmem:[#allocation2 + $0x82c] sm:$0xf] }
 0x1ea   : > { %4394 = vmatpush.bf16.msrb.mxu0 %v10011_v46  ;;  %v15874_v46 = vadd.f32 %v4162_v56, %v4149_v20  ;;  %v10311_v63 = vor.u32 %v14051_v40, %v10308_v10  ;;  %v10248_v20 = vld [vmem:[#allocation2 + $0x42c] sm:$0xf0]  ;;  %v14156_v56 = vld [vmem:[#allocation2 + $0x7b4] sm:$0xf]  ;;  %v14269_v40 = vld [vmem:[#allocation2 + $0xb38] sm:$0xf0]  ;;  %v3941_v10 = vadd.f32 %v15790_v54, %v3927_v43 }
 0x1eb   : > { %4408 = vmatpush.bf16.msrb.mxu1 %v10491_v39  ;;  %v9891_v39 = vor.u32 %v13946_v18, %v9888_v13  ;;  %v14291_v18 = vld [vmem:[#allocation2 + $0xbec] sm:$0xf]  ;;  %v14036_v13 = vld [vmem:[#allocation2 + $0x3f4] sm:$0xf]  ;;  %v10134_v54 = vld [vmem:[#allocation2 + $0x308] sm:$0xf] }
 0x1ec   : > { %4422 = vmatpush.bf16.msrb.mxu2 %v10971_v51  ;;  %v4122_v51 = vpop.f32.mrf.mxu0  ;;  %v11271_v45 = vor.u32 %v14291_v18, %v11268_v2  ;;  %v4521_v25 = vrot.slane %v15874_v46, 1  ;;  %v16414_v18 = vmov 0.0   ;;  %v14014_v43 = vld [vmem:[#allocation2 + $0x340] sm:$0xf0] }
 0x1ed   : > { %4436 = vmatpush.bf16.msrb.mxu3 %v11451_v7  ;;  %v4136_v7 = vpop.f32.mrf.mxu1  ;;  %v4164_v50 = vpop.f32.mrf.mxu3  ;;  %v15889_v2 = vsel %vm15878_vm2, 1.0, %v16414_v18 }
 0x1ee   : > { %4395 = vmatpush.bf16.msrb.mxu0 %v9951_v52  ;;  %v4137_v47 = vadd.f32 %v4136_v7, %v4122_v51  ;;  %v10788_v52 = vld [vmem:[#allocation2 + $0x864] sm:$0xf0]  ;;  %v14276_v51 = vld [vmem:[#allocation2 + $0xb74] sm:$0xf]  ;;  %v10194_v7 = vld [vmem:[#allocation2 + $0x380] sm:$0xf] }
 0x1ef   : > { %4409 = vmatpush.bf16.msrb.mxu1 %v10431_v61  ;;  %v13916_v61 = vld [vmem:[#allocation2 + $0x34] sm:$0xf]  ;;  %v10791_v36 = vor.u32 %v14171_v4, %v10788_v52  ;;  %v11634_v4 = vld [vmem:[#allocation2 + $0xec0] sm:$0xf]  ;;  %v14389_v52 = vld [vmem:[#allocation2 + $0xef8] sm:$0xf0] }
 0x1f0   : > { %4423 = vmatpush.bf16.msrb.mxu2 %v10911_v17  ;;  %v9768_v17 = vld [vmem:[#allocation2 + $0x6c] sm:$0xf0] }
 0x1f1   : > { %4437 = vmatpush.bf16.msrb.mxu3 %v11391_v53  ;;  %v4150_v53 = vpop.f32.mrf.mxu2 }
 0x1f2   : > { %4396 = vmatpush.bf16.msrb.mxu0 %v9891_v39  ;;  %v4151_v21 = vadd.f32 %v4150_v53, %v4137_v47  ;;  %v11208_v39 = vld [vmem:[#allocation2 + $0xbac] sm:$0xf0]  ;;  %v10731_v47 = vor.u32 %v14156_v56, %v10728_v60  ;;  %v11635_v56 = vor.u32 %v14389_v52, %v11634_v4  ;;  %v14134_v60 = vld [vmem:[#allocation2 + $0x700] sm:$0xf0]  ;;  %v14359_v4 = vld [vmem:[#allocation2 + $0xe08] sm:$0xf0] }
 0x1f3   : > { %4410 = vmatpush.bf16.msrb.mxu1 %v10371_v34  ;;  %v9771_v34 = vor.u32 %v13916_v61, %v9768_v17  ;;  %v10195_v61 = vor.u32 %v14029_v11, %v10194_v7  ;;  %v10675_v17 = vor.u32 %v14149_v37, %v10674_v9  ;;  %v10135_v7 = vor.u32 %v14014_v43, %v10134_v54  ;;  %v14104_v54 = vld [vmem:[#allocation2 + $0x610] sm:$0xf0]  ;;  %v10974_v43 = vld [vmem:[#allocation2 + $0x998] sm:$0xf] }
 0x1f4   : > { %4424 = vmatpush.bf16.msrb.mxu2 %v10851_v62  ;;  %v4165_v58 = vadd.f32 %v4164_v50, %v4151_v21  ;;  %v11154_v62 = vld [vmem:[#allocation2 + $0xb00] sm:$0xf]  ;;  %v14254_v21 = vld [vmem:[#allocation2 + $0xac0] sm:$0xf0] }
 0x1f5   : > { %4438 = vmatpush.bf16.msrb.mxu3 %v11331_v16  ;;  %v10251_v16 = vor.u32 %v14036_v13, %v10248_v20  ;;  %v11155_v53 = vor.u32 %v14269_v40, %v11154_v62  ;;  %v16416_v13 = vrot.slane %v15688_v42, 7  ;;  %v11574_v42 = vld [vmem:[#allocation2 + $0xe48] sm:$0xf] }
 0x1f6   : > { %4397 = vmatpush.bf16.msrb.mxu0 %v9831_v22  ;;  %v4525_v46 = vrot.slane %v4165_v58, 1  ;;  %v11211_v22 = vor.u32 %v14276_v51, %v11208_v39  ;;  %v10074_v58 = vld [vmem:[#allocation2 + $0x290] sm:$0xf] }
 0x1f7   : > { %4411 = vmatpush.bf16.msrb.mxu1 %v10311_v63  ;;  %v10614_v63 = vld [vmem:[#allocation2 + $0x6c8] sm:$0xf] }
 0x1f8   : > { %4425 = vmatpush.bf16.msrb.mxu2 %v10791_v36  ;;  %v16415_v36 = vrot.slane %v15747_v48, 7  ;;  %v4534_v27 = vsel %vm4529_vm3, %v4525_v46, %v4521_v25  ;;  %v4530_v37 = vsel %vm4529_vm3, %v4521_v25, %v4525_v46  ;;  %v14374_v48 = vld [vmem:[#allocation2 + $0xe80] sm:$0xf0]  ;;  %v10615_v11 = vor.u32 %v14134_v60, %v10614_v63  ;;  %v10554_v25 = vld [vmem:[#allocation2 + $0x650] sm:$0xf] }
 0x1f9   : > { %4439 = vmatpush.bf16.msrb.mxu3 %v11271_v45  ;;  %v11094_v45 = vld [vmem:[#allocation2 + $0xa88] sm:$0xf]  ;;  %v4550_v51 = vmul.f32 %v15889_v2, %v4534_v27  ;;  %v15903_v39 = vadd.f32 %v15772_v6, %v4530_v37  ;;  %v11575_v40 = vor.u32 %v14374_v48, %v11574_v42  ;;  %v14239_v6 = vld [vmem:[#allocation2 + $0xa48] sm:$0xf0]  ;;  %v14224_v63 = vld [vmem:[#allocation2 + $0x9d0] sm:$0xf0] }
 0x1fa   : > { %v4513_v20 = vsel %vm4512_vm1, %v16416_v13, %v16415_v36  ;;  %4398 = vmatpush.bf16.msrb.mxu0 %v9771_v34  ;;  %v11095_v9 = vor.u32 %v14254_v21, %v11094_v45  ;;  %v13999_v34 = vld [vmem:[#allocation2 + $0x2c8] sm:$0xf0]  ;;  %v11454_v36 = vld [vmem:[#allocation2 + $0xd58] sm:$0xf]  ;;  %v14344_v13 = vld [vmem:[#allocation2 + $0xd90] sm:$0xf0]  ;;  %v4176_v27 = vpop.f32.mrf.mxu0  ;;  %v10975_v60 = vor.u32 %v14224_v63, %v10974_v43 }
 0x1fb   : > { %v4558_v50 = vadd.f32 %v4513_v20, %v3941_v10  ;;  %4412 = vmatpush.bf16.msrb.mxu1 %v10251_v16  ;;  %v14119_v10 = vld [vmem:[#allocation2 + $0x688] sm:$0xf0]  ;;  %v11034_v16 = vld [vmem:[#allocation2 + $0xa10] sm:$0xf]  ;;  %v10075_v52 = vor.u32 %v13999_v34, %v10074_v58  ;;  %v4190_v45 = vpop.f32.mrf.mxu1  ;;  %v9954_v21 = vld [vmem:[#allocation2 + $0x1a0] sm:$0xf] }
 0x1fc   : > { %4426 = vmatpush.bf16.msrb.mxu2 %v10731_v47  ;;  %v11514_v47 = vld [vmem:[#allocation2 + $0xdd0] sm:$0xf]  ;;  %v10555_v18 = vor.u32 %v14119_v10, %v10554_v25  ;;  %v11035_v46 = vor.u32 %v14239_v6, %v11034_v16  ;;  %v13969_v37 = vld [vmem:[#allocation2 + $0x1d8] sm:$0xf0]  ;;  %v4191_v42 = vadd.f32 %v4190_v45, %v4176_v27  ;;  %v9894_v16 = vld [vmem:[#allocation2 + $0x128] sm:$0xf] }
 0x1fd   : > { %4440 = vmatpush.bf16.msrb.mxu3 %v11211_v22  ;;  %v15905_v62 = vadd.f32 %v4558_v50, %v4550_v51  ;;  %4399 = vmatmul.bf16.vlgmr.msrb.gmra.mxu0 %v15664_v26  ;;  %v10014_v22 = vld [vmem:[#allocation2 + $0x218] sm:$0xf]  ;;  %v10434_v50 = vld [vmem:[#allocation2 + $0x560] sm:$0xf]  ;;  %v11455_v51 = vor.u32 %v14344_v13, %v11454_v36  ;;  %v14089_v48 = vld [vmem:[#allocation2 + $0x598] sm:$0xf0]  ;;  %v9955_v34 = vor.u32 %v13969_v37, %v9954_v21 }
 0x1fe   : > { %4447 = vmatpush.bf16.msra.mxu0 %v10195_v61  ;;  %4413 = vmatmul.bf16.vlgmr.msrb.gmra.mxu1 %v15668_v33  ;;  %v13984_v61 = vld [vmem:[#allocation2 + $0x250] sm:$0xf0]  ;;  %v14329_v58 = vld [vmem:[#allocation2 + $0xd18] sm:$0xf0]  ;;  %v10435_v25 = vor.u32 %v14089_v48, %v10434_v50  ;;  %v13954_v6 = vld [vmem:[#allocation2 + $0x160] sm:$0xf0]  ;;  %v3969_v36 = vadd.f32 %v15808_v38, %v15806_v12 }
 0x1ff   : > { %4461 = vmatpush.bf16.msra.mxu1 %v10675_v17  ;;  %4427 = vmatmul.bf16.vlgmr.msrb.gmra.mxu2 %v15654_v8  ;;  %v10494_v17 = vld [vmem:[#allocation2 + $0x5d8] sm:$0xf]  ;;  %v10015_v20 = vor.u32 %v13984_v61, %v10014_v22  ;;  %v10854_v22 = vld [vmem:[#allocation2 + $0x8a8] sm:$0xf]  ;;  %v14194_v61 = vld [vmem:[#allocation2 + $0x8e0] sm:$0xf0]  ;;  %v9895_v43 = vor.u32 %v13954_v6, %v9894_v16 }
 0x200   : > { %4475 = vmatpush.bf16.msra.mxu2 %v11155_v53  ;;  %4441 = vmatmul.bf16.vlgmr.msrb.gmra.mxu3 %v15658_v15  ;;  %v11515_v53 = vor.u32 %v14359_v4, %v11514_v47  ;;  %v10374_v47 = vld [vmem:[#allocation2 + $0x4e8] sm:$0xf]  ;;  %v10314_v45 = vld [vmem:[#allocation2 + $0x470] sm:$0xf]  ;;  %v14059_v50 = vld [vmem:[#allocation2 + $0x4a8] sm:$0xf0]  ;;  %v3983_v12 = vadd.f32 %v15817_v30, %v3969_v36 }
 0x201   : > { %4489 = vmatpush.bf16.msra.mxu3 %v11635_v56  ;;  %v10495_v56 = vor.u32 %v14104_v54, %v10494_v17  ;;  %v11334_v17 = vld [vmem:[#allocation2 + $0xc68] sm:$0xf]  ;;  %v11274_v48 = vld [vmem:[#allocation2 + $0xbf0] sm:$0xf]  ;;  %v10315_v38 = vor.u32 %v14059_v50, %v10314_v45 }
 0x202   : > { %4448 = vmatpush.bf16.msra.mxu0 %v10135_v7  ;;  %v10914_v7 = vld [vmem:[#allocation2 + $0x920] sm:$0xf]  ;;  %v4204_v10 = vpop.f32.mrf.mxu2  ;;  %v4178_v63 = vpop.f32.mrf.mxu0 }
 0x203   : > { %4462 = vmatpush.bf16.msra.mxu1 %v10615_v11  ;;  %v14209_v11 = vld [vmem:[#allocation2 + $0x958] sm:$0xf0]  ;;  %v4192_v27 = vpop.f32.mrf.mxu1 }
 0x204   : > { %4476 = vmatpush.bf16.msra.mxu2 %v11095_v9  ;;  %v11394_v9 = vld [vmem:[#allocation2 + $0xce0] sm:$0xf]  ;;  %v4193_v37 = vadd.f32 %v4192_v27, %v4178_v63 }
 0x205   : > { %4490 = vmatpush.bf16.msra.mxu3 %v11575_v40  ;;  %v10915_v40 = vor.u32 %v14209_v11, %v10914_v7  ;;  %v11395_v4 = vor.u32 %v14329_v58, %v11394_v9  ;;  %v14299_v7 = vld [vmem:[#allocation2 + $0xc28] sm:$0xf0] }
 0x206   : > { %4449 = vmatpush.bf16.msra.mxu0 %v10075_v52  ;;  %v4205_v52 = vadd.f32 %v4204_v10, %v4191_v42  ;;  %v14179_v42 = vld [vmem:[#allocation2 + $0x868] sm:$0xf0]  ;;  %v11275_v10 = vor.u32 %v14299_v7, %v11274_v48  ;;  %v4025_v7 = vadd.f32 %v15837_v0, %v15835_v24 }
 0x207   : > { %4463 = vmatpush.bf16.msra.mxu1 %v10555_v18  ;;  %v4218_v18 = vpop.f32.mrf.mxu3 }
 0x208   : > { %4477 = vmatpush.bf16.msra.mxu2 %v11035_v46  ;;  %v14074_v46 = vld [vmem:[#allocation2 + $0x520] sm:$0xf0]  ;;  %v4219_v54 = vadd.f32 %v4218_v18, %v4205_v52  ;;  %v14164_v52 = vld [vmem:[#allocation2 + $0x7f0] sm:$0xf0]  ;;  %v11214_v18 = vld [vmem:[#allocation2 + $0xb78] sm:$0xf] }
 0x209   : > { %4491 = vmatpush.bf16.msra.mxu3 %v11515_v53  ;;  %v14314_v53 = vld [vmem:[#allocation2 + $0xca0] sm:$0xf0]  ;;  %v10375_v13 = vor.u32 %v14074_v46, %v10374_v47  ;;  %v14044_v47 = vld [vmem:[#allocation2 + $0x430] sm:$0xf0] }
 0x20a   : > { %4450 = vmatpush.bf16.msra.mxu0 %v10015_v20  ;;  %v10855_v20 = vor.u32 %v14194_v61, %v10854_v22  ;;  %v11335_v21 = vor.u32 %v14314_v53, %v11334_v17  ;;  %v4206_v58 = vpop.f32.mrf.mxu2  ;;  %v14284_v46 = vld [vmem:[#allocation2 + $0xbb0] sm:$0xf0]  ;;  %v4522_v22 = vrot.slane %v4219_v54, 1  ;;  %v3997_v17 = vadd.f32 %v15819_v5, %v3983_v12 }
 0x20b   : > { %4464 = vmatpush.bf16.msra.mxu1 %v10495_v56  ;;  %v9834_v56 = vld [vmem:[#allocation2 + $0xb0] sm:$0xf]  ;;  %v4207_v16 = vadd.f32 %v4206_v58, %v4193_v37  ;;  %v11215_v36 = vor.u32 %v14284_v46, %v11214_v18  ;;  %v4039_v12 = vadd.f32 %v15846_v35, %v4025_v7  ;;  %v11809_v7 = vld [vmem:[#allocation9 + $0x150] sm:$0xf] }
 0x20c   : > { %4478 = vmatpush.bf16.msra.mxu2 %v10975_v60  ;;  %v13939_v60 = vld [vmem:[#allocation2 + $0xe8] sm:$0xf0] }
 0x20d   : > { %4492 = vmatpush.bf16.msra.mxu3 %v11455_v51  ;;  %v10794_v51 = vld [vmem:[#allocation2 + $0x830] sm:$0xf]  ;;  %v9835_v11 = vor.u32 %v13939_v60, %v9834_v56  ;;  %v4053_v58 = vadd.f32 %v15848_v49, %v4039_v12 }
 0x20e   : > { %4451 = vmatpush.bf16.msra.mxu0 %v9955_v34  ;;  %v10795_v9 = vor.u32 %v14179_v42, %v10794_v51  ;;  %v9774_v34 = vld [vmem:[#allocation2 + $0x38] sm:$0xf] }
 0x20f   : > { %4465 = vmatpush.bf16.msra.mxu1 %v10435_v25  ;;  %v13924_v25 = vld [vmem:[#allocation2 + $0x70] sm:$0xf0]  ;;  %v4220_v6 = vpop.f32.mrf.mxu3 }
 0x210   : > { %4479 = vmatpush.bf16.msra.mxu2 %v10915_v40  ;;  %v10254_v40 = vld [vmem:[#allocation2 + $0x3f8] sm:$0xf]  ;;  %v4221_v30 = vadd.f32 %v4220_v6, %v4207_v16  ;;  %v9775_v61 = vor.u32 %v13924_v25, %v9774_v34  ;;  %v16419_v25 = vrot.slane %v15814_v55, 7 }
 0x211   : > { %4493 = vmatpush.bf16.msra.mxu3 %v11395_v4  ;;  %v10734_v4 = vld [vmem:[#allocation2 + $0x7b8] sm:$0xf]  ;;  %v10255_v53 = vor.u32 %v14044_v47, %v10254_v40  ;;  %v16420_v40 = vrot.slane %v15716_v1, 7 }
 0x212   : > { %4452 = vmatpush.bf16.msra.mxu0 %v9895_v43  ;;  %v10735_v43 = vor.u32 %v14164_v52, %v10734_v4  ;;  %v4526_v63 = vrot.slane %v4221_v30, 1  ;;  %v4081_v30 = vadd.f32 %v15863_v57, %v15861_v31 }
 0x213   : > { %4466 = vmatpush.bf16.msra.mxu1 %v10375_v13  ;;  %v16417_v13 = vrot.slane %v15785_v44, 7 }
 0x214   : > { %4480 = vmatpush.bf16.msra.mxu2 %v10855_v20  ;;  %v16418_v20 = vrot.slane %v15702_v3, 7  ;;  %v4535_v54 = vsel %vm4529_vm3, %v4526_v63, %v4522_v22  ;;  %v4531_v5 = vsel %vm4529_vm3, %v4522_v22, %v4526_v63 }
 0x215   : > { %4494 = vmatpush.bf16.msra.mxu3 %v11335_v21  ;;  %v4551_v60 = vmul.f32 %v15889_v2, %v4535_v54  ;;  %v15927_v45 = vadd.f32 %v15801_v14, %v4531_v5  ;;  %v16421_v54 = vrot.slane %v15843_v29, 7  ;;  %v16422_v5 = vrot.slane %v15730_v19, 7 }
 0x216   : > { %4453 = vmatpush.bf16.msra.mxu0 %v9835_v11  ;;  %v4514_v27 = vsel %vm4512_vm1, %v16418_v20, %v16417_v13 }
 0x217   : > { %4467 = vmatpush.bf16.msra.mxu1 %v10315_v38  ;;  %v4559_v56 = vadd.f32 %v4514_v27, %v3997_v17 }
 0x218   : > { %4481 = vmatpush.bf16.msra.mxu2 %v10795_v9 }
 0x219   : > { %4495 = vmatpush.bf16.msra.mxu3 %v11275_v10  ;;  %v15930_v3 = vadd.f32 %v4559_v56, %v4551_v60  ;;  %v4515_v10 = vsel %vm4512_vm1, %v16420_v40, %v16419_v25  ;;  %v4516_v56 = vsel %vm4512_vm1, %v16422_v5, %v16421_v54  ;;  %v11761_v25 = vld [vmem:[#allocation9 + $0xf0] sm:$0xf]  ;;  %v14423_v40 = vld [vmem:[#allocation9 + $0x104] sm:$0xf0] }
 0x21a   : > { %4454 = vmatpush.bf16.msra.mxu0 %v9775_v61  ;;  %v4232_v44 = vpop.f32.mrf.mxu0  ;;  %v4560_v35 = vadd.f32 %v4515_v10, %v4053_v58  ;;  %v14432_v10 = vld [vmem:[#allocation9 + $0x154] sm:$0xf]  ;;  %v11665_v54 = vld [vmem:[#allocation9 + $0x30] sm:$0xf]  ;;  %v14399_v5 = vld [vmem:[#allocation9 + $0x44] sm:$0xf0] }
 0x21b   : > { %4468 = vmatpush.bf16.msra.mxu1 %v10255_v53  ;;  %v4246_v21 = vpop.f32.mrf.mxu1  ;;  %v4095_v53 = vadd.f32 %v15869_v59, %v4081_v30 }
 0x21c   : > { %4482 = vmatpush.bf16.msra.mxu2 %v10735_v43  ;;  %v4247_v37 = vadd.f32 %v4246_v21, %v4232_v44 }
 0x21d   : > { %4496 = vmatpush.bf16.msra.mxu3 %v11215_v36  ;;  %4455 = vmatmul.bf16.vlgmr.msra.gmra.mxu0 %v15664_v26  ;;  %v4109_v20 = vadd.f32 %v15871_v28, %v4095_v53  ;;  %v11689_v53 = vld [vmem:[#allocation9 + $0x60] sm:$0xf] }
 0x21e   : > { %4469 = vmatmul.bf16.vlgmr.msra.gmra.mxu1 %v15668_v33 }
 0x21f   : > { %4483 = vmatmul.bf16.vlgmr.msra.gmra.mxu2 %v15654_v8  ;;  %v4561_v59 = vadd.f32 %v4516_v56, %v4109_v20  ;;  %v14408_v56 = vld [vmem:[#allocation9 + $0x94] sm:$0xf] }
 0x220   : > { %4497 = vmatmul.bf16.vlgmr.msra.gmra.mxu3 %v15658_v15 }
 0x222   : > { %v4260_v50 = vpop.f32.mrf.mxu2  ;;  %v4234_v14 = vpop.f32.mrf.mxu0 }
 0x223   : > { %v4261_v51 = vadd.f32 %v4260_v50, %v4247_v37  ;;  %v4274_v42 = vpop.f32.mrf.mxu3  ;;  %v4248_v26 = vpop.f32.mrf.mxu1 }
 0x224   : > { %v4249_v11 = vadd.f32 %v4248_v26, %v4234_v14  ;;  %v14435_v26 = vld [vmem:[#allocation9 + $0x164] sm:$0xf0] }
 0x225   : > { %v4275_v48 = vadd.f32 %v4274_v42, %v4261_v51 }
 0x227   : > { %v4523_v9 = vrot.slane %v4275_v48, 1 }
 0x22a   : > { %v4262_v33 = vpop.f32.mrf.mxu2 }
 0x22b   : > { %v4263_v38 = vadd.f32 %v4262_v33, %v4249_v11  ;;  %v4276_v8 = vpop.f32.mrf.mxu3  ;;  %v11810_v11 = vor.u32 %v14435_v26, %v11809_v7 }
 0x22d   : > { %v4277_v15 = vadd.f32 %v4276_v8, %v4263_v38  ;;  %4944 = vmatpush.bf16.msrb.mxu3 %v11810_v11  ;;  %v14429_v8 = vld [vmem:[#allocation9 + $0x134] sm:$0xf0] }
 0x22f   : > { %v4527_v34 = vrot.slane %v4277_v15, 1 }
 0x231   : > { %v4536_v24 = vsel %vm4529_vm3, %v4527_v34, %v4523_v9  ;;  %v4532_v0 = vsel %vm4529_vm3, %v4523_v9, %v4527_v34 }
 0x232   : > { %v4552_v16 = vmul.f32 %v15889_v2, %v4536_v24  ;;  %v15951_v6 = vadd.f32 %v15830_v41, %v4532_v0  ;;  %v11762_v24 = vor.u32 %v14423_v40, %v11761_v25  ;;  %v11811_v0 = vld [vmem:[#allocation9 + $0x168] sm:$0xf0] }
 0x234   : > { %v15953_v49 = vadd.f32 %v4560_v35, %v4552_v16  ;;  %v11814_v35 = vor.u32 %v14432_v10, %v11811_v0  ;;  %v11737_v16 = vld [vmem:[#allocation9 + $0xc0] sm:$0xf]  ;;  %v14436_v0 = vld [vmem:[#allocation9 + $0x16c] sm:$0xf0] }
 0x23a   : > { %v4288_v55 = vpop.f32.mrf.mxu0 }
 0x23b   : > { %v4302_v47 = vpop.f32.mrf.mxu1 }
 0x23c   : > { %v4303_v1 = vadd.f32 %v4302_v47, %v4288_v55  ;;  %v14417_v55 = vld [vmem:[#allocation9 + $0xd4] sm:$0xf0]  ;;  %v14426_v47 = vld [vmem:[#allocation9 + $0x124] sm:$0xf] }
 0x242   : > { %v4316_v4 = vpop.f32.mrf.mxu2  ;;  %v4290_v22 = vpop.f32.mrf.mxu0 }
 0x243   : > { %v4317_v52 = vadd.f32 %v4316_v4, %v4303_v1  ;;  %v4330_v18 = vpop.f32.mrf.mxu3  ;;  %v4304_v61 = vpop.f32.mrf.mxu1  ;;  %v11738_v1 = vor.u32 %v14417_v55, %v11737_v16  ;;  %v11787_v4 = vld [vmem:[#allocation9 + $0x138] sm:$0xf0]  ;;  %v14431_v16 = vld [vmem:[#allocation9 + $0x144] sm:$0xf0] }
 0x244   : > { %v4305_v17 = vadd.f32 %v4304_v61, %v4290_v22  ;;  %v14420_v22 = vld [vmem:[#allocation9 + $0xf4] sm:$0xf]  ;;  %v11763_v61 = vld [vmem:[#allocation9 + $0x108] sm:$0xf0] }
 0x245   : > { %v4331_v46 = vadd.f32 %v4330_v18, %v4317_v52  ;;  %v11790_v52 = vor.u32 %v14426_v47, %v11787_v4  ;;  %v11713_v18 = vld [vmem:[#allocation9 + $0x90] sm:$0xf]  ;;  %v11643_v4 = vld [vmem:[#allocation9 + $0x18] sm:$0xf0] }
 0x247   : > { %v4524_v36 = vrot.slane %v4331_v46, 1  ;;  %v14411_v46 = vld [vmem:[#allocation9 + $0xa4] sm:$0xf0] }
 0x248   : > { %v11714_v30 = vor.u32 %v14411_v46, %v11713_v18  ;;  %v11793_v18 = vld [vmem:[#allocation9 + $0x128] sm:$0xf] }
 0x24a   : > { %v4318_v43 = vpop.f32.mrf.mxu2 }
 0x24b   : > { %v4319_v41 = vadd.f32 %v4318_v43, %v4305_v17  ;;  %v4332_v63 = vpop.f32.mrf.mxu3  ;;  %v11766_v17 = vor.u32 %v14420_v22, %v11763_v61  ;;  %v14405_v43 = vld [vmem:[#allocation9 + $0x74] sm:$0xf0]  ;;  %v14434_v61 = vld [vmem:[#allocation9 + $0x164] sm:$0xf] }
 0x24d   : > { %v4333_v13 = vadd.f32 %v4332_v63, %v4319_v41  ;;  %v14414_v41 = vld [vmem:[#allocation9 + $0xc4] sm:$0xf]  ;;  %v11690_v63 = vor.u32 %v14405_v43, %v11689_v53  ;;  %v11777_v43 = vld [vmem:[#allocation9 + $0x100] sm:$0xf] }
 0x24f   : > { %v4528_v27 = vrot.slane %v4333_v13, 1 }
 0x251   : > { %v4537_v31 = vsel %vm4529_vm3, %v4528_v27, %v4524_v36  ;;  %v4533_v57 = vsel %vm4529_vm3, %v4524_v36, %v4528_v27  ;;  %v11739_v36 = vld [vmem:[#allocation9 + $0xd8] sm:$0xf0] }
 0x252   : > { %v4553_v60 = vmul.f32 %v15889_v2, %v4537_v31  ;;  %v15971_v44 = vadd.f32 %v15859_v23, %v4533_v57  ;;  %v11785_v23 = vld [vmem:[#allocation9 + $0x120] sm:$0xf]  ;;  %v11742_v20 = vor.u32 %v14414_v41, %v11739_v36  ;;  %v4597_v57 = vld [vmem:[#allocation6] sm:$0xf]  ;;  %v14425_v41 = vld [vmem:[#allocation9 + $0x114] sm:$0xf0] }
 0x253   : > { %v11786_v15 = vor.u32 %v14429_v8, %v11785_v23  ;;  %v14396_v8 = vld [vmem:[#allocation9 + $0x34] sm:$0xf]  ;;  %v11778_v36 = vor.u32 %v14425_v41, %v11777_v43  ;;  %v11657_v43 = vld [vmem:[#allocation9 + $0x10] sm:$0xf]  ;;  %v14395_v41 = vld [vmem:[#allocation9 + $0x24] sm:$0xf0] }
 0x254   : > { %v15973_v28 = vadd.f32 %v4561_v59, %v4553_v60  ;;  %v11666_v59 = vor.u32 %v14399_v5, %v11665_v54  ;;  %v11769_v54 = vld [vmem:[#allocation9 + $0xf8] sm:$0xf]  ;;  %v14424_v5 = vld [vmem:[#allocation9 + $0x10c] sm:$0xf0] }
 0x255   : > { %4945 = vmatpush.bf16.msrb.mxu3 %v11786_v15 }
 0x259   : > { %4946 = vmatpush.bf16.msrb.mxu3 %v11762_v24  ;;  %v11817_v24 = vld [vmem:[#allocation9 + $0x158] sm:$0xf] }
 0x25a   : > { %v4344_v29 = vpop.f32.mrf.mxu0 }
 0x25b   : > { %v4358_v21 = vpop.f32.mrf.mxu1 }
 0x25c   : > { %v4359_v37 = vadd.f32 %v4358_v21, %v4344_v29  ;;  %v11715_v21 = vld [vmem:[#allocation9 + $0xa8] sm:$0xf0] }
 0x25d   : > { %4947 = vmatpush.bf16.msrb.mxu3 %v11738_v1  ;;  %v14390_v1 = vld [vmem:[#allocation9 + $0x4] sm:$0xf] }
 0x25e   : > { %v11646_v46 = vor.u32 %v14390_v1, %v11643_v4 }
 0x261   : > { %4948 = vmatpush.bf16.msrb.mxu3 %v11714_v30  ;;  %v14430_v30 = vld [vmem:[#allocation9 + $0x13c] sm:$0xf0] }
 0x262   : > { %v4372_v19 = vpop.f32.mrf.mxu2  ;;  %v4346_v51 = vpop.f32.mrf.mxu0 }
 0x263   : > { %v4386_v50 = vpop.f32.mrf.mxu3  ;;  %v4360_v42 = vpop.f32.mrf.mxu1  ;;  %v4373_v48 = vadd.f32 %v4372_v19, %v4359_v37  ;;  %v11718_v19 = vor.u32 %v14408_v56, %v11715_v21  ;;  %v11641_v37 = vld [vmem:[#allocation9] sm:$0xf]  ;;  %v11779_v21 = vld [vmem:[#allocation9 + $0x118] sm:$0xf0] }
 0x264   : > { %v4361_v14 = vadd.f32 %v4360_v42, %v4346_v51  ;;  %v14402_v51 = vld [vmem:[#allocation9 + $0x64] sm:$0xf] }
 0x265   : > { %v4387_v33 = vadd.f32 %v4386_v50, %v4373_v48  ;;  %4949 = vmatpush.bf16.msrb.mxu3 %v11690_v63  ;;  %v14393_v50 = vld [vmem:[#allocation9 + $0x14] sm:$0xf0]  ;;  %v4618_v63 = vld [vmem:[#allocation6 + $0x4] sm:$0xf] }
 0x266   : > { %v11642_v48 = vor.u32 %v14393_v50, %v11641_v37  ;;  %v14418_v37 = vld [vmem:[#allocation9 + $0xdc] sm:$0xf0] }
 0x269   : > { %4950 = vmatpush.bf16.msrb.mxu3 %v11666_v59 }
 0x26a   : > { %v4374_v12 = vpop.f32.mrf.mxu2 }
 0x26b   : > { %v4375_v38 = vadd.f32 %v4374_v12, %v4361_v14  ;;  %v4388_v9 = vpop.f32.mrf.mxu3  ;;  %v11691_v14 = vld [vmem:[#allocation9 + $0x78] sm:$0xf0] }
 0x26c   : > { %v11694_v26 = vor.u32 %v14402_v51, %v11691_v14  ;;  %v11729_v51 = vld [vmem:[#allocation9 + $0xa0] sm:$0xf] }
 0x26d   : > { %v4389_v58 = vadd.f32 %v4388_v9, %v4375_v38  ;;  %4951 = vmatpush.bf16.msrb.mxu3 %v11642_v48  ;;  %v14437_v38 = vld [vmem:[#allocation9 + $0x174] sm:$0xf0]  ;;  %v11667_v9 = vld [vmem:[#allocation9 + $0x48] sm:$0xf0] }
 0x26f   : > { %v4596_v34 = vpack.c.bf16 %v4389_v58, %v4387_v33  ;;  %v11825_v33 = vld [vmem:[#allocation9 + $0x160] sm:$0xf]  ;;  %v15980_v58 = vld [vmem:[%s643_s5] sm:$0xf] }
 0x270   : > { %v11826_v23 = vor.u32 %v14437_v38, %v11825_v33  ;;  %4952 = vmatmul.bf16.vlgmr.msrb.gmra.mxu3 %v15980_v58  ;;  %v11721_v33 = vld [vmem:[#allocation9 + $0x98] sm:$0xf]  ;;  %v14412_v38 = vld [vmem:[#allocation9 + $0xac] sm:$0xf0] }
 0x271   : > { %4609 = vmatpush.bf16.msrb.mxu0 %v4596_v34  ;;  %v11670_v34 = vor.u32 %v14396_v8, %v11667_v9  ;;  %v11705_v8 = vld [vmem:[#allocation9 + $0x70] sm:$0xf]  ;;  %v14407_v9 = vld [vmem:[#allocation9 + $0x84] sm:$0xf0] }
 0x272   : > { %4996 = vmatpush.bf16.msra.mxu3 %v11826_v23 }
 0x274   : > { %11636 = vmatmul.msk.bf16.vlgmr.msrb.gmra.mxu0 %vm4598_vm4, %v4597_v57  ;;  %v14419_v57 = vld [vmem:[#allocation9 + $0xe4] sm:$0xf0] }
 0x275   : > { %4957 = vmatpush.bf16.msra.mxu0 %v11814_v35  ;;  %v11801_v35 = vld [vmem:[#allocation9 + $0x130] sm:$0xf] }
 0x276   : > { %v11802_v47 = vor.u32 %v14431_v16, %v11801_v35  ;;  %v11681_v16 = vld [vmem:[#allocation9 + $0x40] sm:$0xf] }
 0x278   : > { %4997 = vmatpush.bf16.msra.mxu3 %v11802_v47 }
 0x279   : > { %4958 = vmatpush.bf16.msra.mxu0 %v11790_v52  ;;  %v11818_v52 = vor.u32 %v14436_v0, %v11817_v24  ;;  %v14406_v24 = vld [vmem:[#allocation9 + $0x7c] sm:$0xf0] }
 0x27a   : > { %v4400_v13 = vpop.f32.mrf.mxu0 }
 0x27b   : > { %v4414_v27 = vpop.f32.mrf.mxu1 }
 0x27c   : > { %v4415_v60 = vadd.f32 %v4414_v27, %v4400_v13  ;;  %v11794_v13 = vor.u32 %v14430_v30, %v11793_v18  ;;  %v11803_v27 = vld [vmem:[#allocation9 + $0x148] sm:$0xf0]  ;;  %4998 = vmatpush.bf16.msra.mxu3 %v11778_v36  ;;  %v14400_v30 = vld [vmem:[#allocation9 + $0x4c] sm:$0xf0] }
 0x27d   : > { %4959 = vmatpush.bf16.msra.mxu0 %v11766_v17  ;;  %v11827_v17 = vld [vmem:[#allocation9 + $0x178] sm:$0xf0]  ;;  %v11707_v18 = vld [vmem:[#allocation9 + $0x88] sm:$0xf0] }
 0x27e   : > { %v11830_v53 = vor.u32 %v14434_v61, %v11827_v17 }
 0x281   : > { %4960 = vmatpush.bf16.msra.mxu0 %v11742_v20  ;;  %v14428_v20 = vld [vmem:[#allocation9 + $0x134] sm:$0xf] }
 0x282   : > { %v4428_v31 = vpop.f32.mrf.mxu2  ;;  %v4402_v42 = vpop.f32.mrf.mxu0  ;;  %v11806_v56 = vor.u32 %v14428_v20, %v11803_v27  ;;  %v11683_v20 = vld [vmem:[#allocation9 + $0x58] sm:$0xf0] }
 0x283   : > { %v4442_v29 = vpop.f32.mrf.mxu3  ;;  %v4416_v7 = vpop.f32.mrf.mxu1  ;;  %v4429_v11 = vadd.f32 %v4428_v31, %v4415_v60  ;;  %v11753_v31 = vld [vmem:[#allocation9 + $0xd0] sm:$0xf]  ;;  %v11770_v60 = vor.u32 %v14424_v5, %v11769_v54  ;;  %v11649_v5 = vld [vmem:[#allocation9 + $0x8] sm:$0xf] }
 0x284   : > { %v4417_v12 = vadd.f32 %v4416_v7, %v4402_v42  ;;  %v11754_v59 = vor.u32 %v14419_v57, %v11753_v31  ;;  %v14413_v42 = vld [vmem:[#allocation9 + $0xb4] sm:$0xf0] }
 0x285   : > { %4961 = vmatpush.bf16.msra.mxu0 %v11718_v19  ;;  %v4443_v25 = vadd.f32 %v4442_v29, %v4429_v11  ;;  %v14422_v29 = vld [vmem:[#allocation9 + $0x104] sm:$0xf]  ;;  %v11745_v19 = vld [vmem:[#allocation9 + $0xc8] sm:$0xf]  ;;  %v11730_v48 = vor.u32 %v14413_v42, %v11729_v51  ;;  %v14416_v11 = vld [vmem:[#allocation9 + $0xd4] sm:$0xf] }
 0x286   : > { %v11782_v50 = vor.u32 %v14422_v29, %v11779_v21  ;;  %4999 = vmatpush.bf16.msra.mxu3 %v11754_v59  ;;  %v11819_v29 = vld [vmem:[#allocation9 + $0x170] sm:$0xf0] }
 0x289   : > { %4962 = vmatpush.bf16.msra.mxu0 %v11694_v26  ;;  %v11746_v26 = vor.u32 %v14418_v37, %v11745_v19  ;;  %v14392_v37 = vld [vmem:[#allocation9 + $0x14] sm:$0xf] }
 0x28a   : > { %v4430_v15 = vpop.f32.mrf.mxu2  ;;  %5000 = vmatpush.bf16.msra.mxu3 %v11730_v48 }
 0x28b   : > { %v4431_v40 = vadd.f32 %v4430_v15, %v4417_v12  ;;  %v4444_v10 = vpop.f32.mrf.mxu3  ;;  %v11755_v12 = vld [vmem:[#allocation9 + $0xe8] sm:$0xf0]  ;;  %v11706_v15 = vor.u32 %v14407_v9, %v11705_v8  ;;  %v14495_v8 = vld [vmem:[#allocation13 + $0x1c4] sm:$0xf] }
 0x28c   : > { %v11758_v23 = vor.u32 %v14416_v11, %v11755_v12  ;;  %v11795_v11 = vld [vmem:[#allocation9 + $0x140] sm:$0xf0]  ;;  %v4638_v12 = vld [vmem:[#allocation6 + $0x8] sm:$0xf] }
 0x28d   : > { %v4445_v55 = vadd.f32 %v4444_v10, %v4431_v40  ;;  %4963 = vmatpush.bf16.msra.mxu0 %v11670_v34  ;;  %v11722_v34 = vor.u32 %v14412_v38, %v11721_v33  ;;  %v11731_v40 = vld [vmem:[#allocation9 + $0xb8] sm:$0xf0]  ;;  %v11697_v10 = vld [vmem:[#allocation9 + $0x68] sm:$0xf]  ;;  %v12059_v38 = vld [vmem:[#allocation13 + $0x1c0] sm:$0xf] }
 0x28e   : > { %5001 = vmatpush.bf16.msra.mxu3 %v11706_v15  ;;  %v11698_v4 = vor.u32 %v14406_v24, %v11697_v10  ;;  %v14421_v33 = vld [vmem:[#allocation9 + $0xfc] sm:$0xf]  ;;  %v11771_v10 = vld [vmem:[#allocation9 + $0x110] sm:$0xf0] }
 0x28f   : > { %v4616_v22 = vpack.c.bf16 %v4445_v55, %v4443_v25  ;;  %v14410_v25 = vld [vmem:[#allocation9 + $0xa4] sm:$0xf]  ;;  %v14401_v55 = vld [vmem:[#allocation9 + $0x54] sm:$0xf0] }
 0x290   : > { %v11734_v0 = vor.u32 %v14410_v25, %v11731_v40  ;;  %v11682_v1 = vor.u32 %v14401_v55, %v11681_v16  ;;  %v12027_v25 = vld [vmem:[#allocation13 + $0x180] sm:$0xf] }
 0x291   : > { %4629 = vmatpush.bf16.msrb.mxu1 %v4616_v22  ;;  %4964 = vmatpush.bf16.msra.mxu0 %v11646_v46  ;;  %v11673_v22 = vld [vmem:[#allocation9 + $0x38] sm:$0xf]  ;;  %v14491_v40 = vld [vmem:[#allocation13 + $0x19c] sm:$0xf0] }
 0x292   : > { %5002 = vmatpush.bf16.msra.mxu3 %v11682_v1  ;;  %v11674_v36 = vor.u32 %v14400_v30, %v11673_v22  ;;  %v12028_v16 = vor.u32 %v14491_v40, %v12027_v25  ;;  %v14415_v1 = vld [vmem:[#allocation9 + $0xcc] sm:$0xf]  ;;  %v14451_v25 = vld [vmem:[#allocation13 + $0x5c] sm:$0xf0]  ;;  %v14447_v40 = vld [vmem:[#allocation13 + $0x44] sm:$0xf] }
 0x293   : > { %v14403_v30 = vld [vmem:[#allocation9 + $0x6c] sm:$0xf] }
 0x294   : > { %11637 = vmatmul.msk.bf16.vlgmr.msrb.gmra.mxu1 %vm4598_vm4, %v4618_v63  ;;  %4965 = vmatmul.bf16.vlgmr.msra.gmra.mxu0 %v15980_v58  ;;  %v11658_v63 = vor.u32 %v14395_v41, %v11657_v43  ;;  %v11675_v43 = vld [vmem:[#allocation9 + $0x50] sm:$0xf0] }
 0x295   : > { %4970 = vmatpush.bf16.msra.mxu1 %v11818_v52  ;;  %5009 = vmatpush.bf16.msrb.mxu0 %v11830_v53  ;;  %v14404_v52 = vld [vmem:[#allocation9 + $0x74] sm:$0xf] }
 0x296   : > { %v11710_v61 = vor.u32 %v14404_v52, %v11707_v18  ;;  %5003 = vmatpush.bf16.msra.mxu3 %v11658_v63  ;;  %v14409_v18 = vld [vmem:[#allocation9 + $0x9c] sm:$0xf]  ;;  %v14391_v63 = vld [vmem:[#allocation9 + $0xc] sm:$0xf] }
 0x299   : > { %4971 = vmatpush.bf16.msra.mxu1 %v11794_v13  ;;  %5010 = vmatpush.bf16.msrb.mxu0 %v11806_v56  ;;  %v14398_v13 = vld [vmem:[#allocation9 + $0x44] sm:$0xf]  ;;  %v14394_v56 = vld [vmem:[#allocation9 + $0x1c] sm:$0xf0] }
 0x29a   : > { %v4456_v14 = vpop.f32.mrf.mxu0  ;;  %v11686_v31 = vor.u32 %v14398_v13, %v11683_v20  ;;  %v11650_v19 = vor.u32 %v14394_v56, %v11649_v5  ;;  %5004 = vmatmul.bf16.vlgmr.msra.gmra.mxu3 %v15980_v58  ;;  %v11995_v20 = vld [vmem:[#allocation13 + $0x140] sm:$0xf]  ;;  %v11997_v56 = vld [vmem:[#allocation13 + $0x160] sm:$0xf0] }
 0x29b   : > { %v4470_v7 = vpop.f32.mrf.mxu1 }
 0x29c   : > { %v4471_v46 = vadd.f32 %v4470_v7, %v4456_v14 }
 0x29d   : > { %4972 = vmatpush.bf16.msra.mxu1 %v11770_v60  ;;  %5011 = vmatpush.bf16.msrb.mxu0 %v11782_v50  ;;  %v14433_v60 = vld [vmem:[#allocation9 + $0x15c] sm:$0xf]  ;;  %v11659_v50 = vld [vmem:[#allocation9 + $0x28] sm:$0xf0] }
 0x29e   : > { %v11662_v48 = vor.u32 %v14392_v37, %v11659_v50  ;;  %v11822_v14 = vor.u32 %v14433_v60, %v11819_v29  ;;  %v14471_v60 = vld [vmem:[#allocation13 + $0x104] sm:$0xf]  ;;  %v11931_v37 = vld [vmem:[#allocation13 + $0xc0] sm:$0xf] }
 0x29f   : > { %v11965_v29 = vld [vmem:[#allocation13 + $0x120] sm:$0xf0]  ;;  %v14467_v50 = vld [vmem:[#allocation13 + $0xdc] sm:$0xf0] }
 0x2a1   : > { %4973 = vmatpush.bf16.msra.mxu1 %v11746_v26  ;;  %5012 = vmatpush.bf16.msrb.mxu0 %v11758_v23  ;;  %v14427_v26 = vld [vmem:[#allocation9 + $0x12c] sm:$0xf]  ;;  %v14499_v23 = vld [vmem:[#allocation13 + $0x1dc] sm:$0xf0] }
 0x2a2   : > { %v4484_v35 = vpop.f32.mrf.mxu2  ;;  %v4458_v17 = vpop.f32.mrf.mxu0  ;;  %v11798_v9 = vor.u32 %v14427_v26, %v11795_v11  ;;  %v12060_v15 = vor.u32 %v14499_v23, %v12059_v38  ;;  %v14455_v26 = vld [vmem:[#allocation13 + $0x84] sm:$0xf] }
 0x2a3   : > { %v4498_v47 = vpop.f32.mrf.mxu3  ;;  %v4472_v53 = vpop.f32.mrf.mxu1  ;;  %v4485_v27 = vadd.f32 %v4484_v35, %v4471_v46  ;;  %v12029_v35 = vld [vmem:[#allocation13 + $0x1a0] sm:$0xf0]  ;;  %v11723_v46 = vld [vmem:[#allocation9 + $0xb0] sm:$0xf0] }
 0x2a4   : > { %v4473_v54 = vadd.f32 %v4472_v53, %v4458_v17  ;;  %v11726_v22 = vor.u32 %v14409_v18, %v11723_v46  ;;  %v14397_v53 = vld [vmem:[#allocation9 + $0x3c] sm:$0xf]  ;;  %v11901_v11 = vld [vmem:[#allocation13 + $0xa0] sm:$0xf0]  ;;  %v12067_v46 = vld [vmem:[#allocation13 + $0x1c8] sm:$0xf] }
 0x2a5   : > { %4974 = vmatpush.bf16.msra.mxu1 %v11722_v34  ;;  %5013 = vmatpush.bf16.msrb.mxu0 %v11734_v0  ;;  %v4499_v51 = vadd.f32 %v4498_v47, %v4485_v27  ;;  %v12061_v34 = vld [vmem:[#allocation13 + $0x1e0] sm:$0xf0]  ;;  %v11774_v47 = vor.u32 %v14421_v33, %v11771_v10  ;;  %v11678_v41 = vor.u32 %v14397_v53, %v11675_v43  ;;  %v14483_v27 = vld [vmem:[#allocation13 + $0x15c] sm:$0xf0]  ;;  %v12069_v53 = vld [vmem:[#allocation13 + $0x1e8] sm:$0xf0] }
 0x2a6   : > { %v12064_v24 = vor.u32 %v14495_v8, %v12061_v34  ;;  %v14487_v0 = vld [vmem:[#allocation13 + $0x184] sm:$0xf]  ;;  %v11996_v5 = vor.u32 %v14483_v27, %v11995_v20  ;;  %v11904_v33 = vor.u32 %v14455_v26, %v11901_v11  ;;  %v4595_v8 = vld [vmem:[#allocation7] sm:$0xff]  ;;  %v11867_v34 = vld [vmem:[#allocation13 + $0x40] sm:$0xf] }
 0x2a7   : > { %v12032_v55 = vor.u32 %v14487_v0, %v12029_v35  ;;  %v11869_v0 = vld [vmem:[#allocation13 + $0x60] sm:$0xf0]  ;;  %v14488_v20 = vld [vmem:[#allocation13 + $0x18c] sm:$0xf] }
 0x2a8   : > { %5878 = vmatpush.bf16.msrb.mxu3 %v12064_v24  ;;  %v11868_v24 = vor.u32 %v14451_v25, %v11867_v34  ;;  %v11837_v18 = vld [vmem:[#allocation13 + $0x20] sm:$0xf0]  ;;  %v14472_v26 = vld [vmem:[#allocation13 + $0x10c] sm:$0xf]  ;;  %v11939_v34 = vld [vmem:[#allocation13 + $0xc8] sm:$0xf] }
 0x2a9   : > { %4975 = vmatpush.bf16.msra.mxu1 %v11698_v4  ;;  %5014 = vmatpush.bf16.msrb.mxu0 %v11710_v61  ;;  %v11747_v4 = vld [vmem:[#allocation9 + $0xe0] sm:$0xf0]  ;;  %v11973_v11 = vld [vmem:[#allocation13 + $0x128] sm:$0xf0]  ;;  %v14468_v25 = vld [vmem:[#allocation13 + $0xe4] sm:$0xf0] }
 0x2aa   : > { %v4486_v57 = vpop.f32.mrf.mxu2  ;;  %v11750_v52 = vor.u32 %v14415_v1, %v11747_v4  ;;  %v11699_v61 = vld [vmem:[#allocation9 + $0x80] sm:$0xf0]  ;;  %v14439_v4 = vld [vmem:[#allocation13 + $0x4] sm:$0xf] }
 0x2ab   : > { %v4487_v59 = vadd.f32 %v4486_v57, %v4473_v54  ;;  %v4500_v21 = vpop.f32.mrf.mxu3  ;;  %v11702_v17 = vor.u32 %v14403_v30, %v11699_v61  ;;  %v14479_v54 = vld [vmem:[#allocation13 + $0x144] sm:$0xf]  ;;  %v14475_v57 = vld [vmem:[#allocation13 + $0x11c] sm:$0xf0]  ;;  %v11840_v30 = vor.u32 %v14439_v4, %v11837_v18 }
 0x2ac   : > { %5879 = vmatpush.bf16.msrb.mxu3 %v12032_v55  ;;  %v11872_v55 = vor.u32 %v14447_v40, %v11869_v0  ;;  %v14443_v1 = vld [vmem:[#allocation13 + $0x1c] sm:$0xf0]  ;;  %v11941_v0 = vld [vmem:[#allocation13 + $0xe8] sm:$0xf0] }
 0x2ad   : > { %4976 = vmatpush.bf16.msra.mxu1 %v11674_v36  ;;  %v4501_v42 = vadd.f32 %v4500_v21, %v4487_v59  ;;  %5015 = vmatpush.bf16.msrb.mxu0 %v11686_v31  ;;  %v11651_v36 = vld [vmem:[#allocation9 + $0x20] sm:$0xf0]  ;;  %v12000_v59 = vor.u32 %v14479_v54, %v11997_v56  ;;  %v12037_v54 = vld [vmem:[#allocation13 + $0x1a8] sm:$0xf0] }
 0x2ae   : > { %v11654_v13 = vor.u32 %v14391_v63, %v11651_v36  ;;  %v11963_v31 = vld [vmem:[#allocation13 + $0x100] sm:$0xf]  ;;  %v12035_v36 = vld [vmem:[#allocation13 + $0x188] sm:$0xf]  ;;  %v12040_v56 = vor.u32 %v14488_v20, %v12037_v54  ;;  %v14535_v20 = vld [vmem:[#allocation13 + $0x304] sm:$0xf] }
 0x2af   : > { %v4636_v7 = vpack.c.bf16 %v4501_v42, %v4499_v51  ;;  %v11964_v21 = vor.u32 %v14475_v57, %v11963_v31  ;;  %v14463_v51 = vld [vmem:[#allocation13 + $0xc4] sm:$0xf]  ;;  %v12003_v31 = vld [vmem:[#allocation13 + $0x148] sm:$0xf]  ;;  %v14547_v4 = vld [vmem:[#allocation13 + $0x35c] sm:$0xf0] }
 0x2b0   : > { %5880 = vmatpush.bf16.msrb.mxu3 %v12000_v59  ;;  %v11933_v42 = vld [vmem:[#allocation13 + $0xe0] sm:$0xf0]  ;;  %v14484_v57 = vld [vmem:[#allocation13 + $0x164] sm:$0xf0]  ;;  %v14480_v59 = vld [vmem:[#allocation13 + $0x14c] sm:$0xf] }
 0x2b1   : > { %4977 = vmatpush.bf16.msra.mxu1 %v11650_v19  ;;  %4649 = vmatpush.bf16.msrb.mxu2 %v4636_v7  ;;  %v11968_v19 = vor.u32 %v14471_v60, %v11965_v29  ;;  %v11936_v7 = vor.u32 %v14463_v51, %v11933_v42  ;;  %v12004_v60 = vor.u32 %v14484_v57, %v12003_v31  ;;  %v12005_v29 = vld [vmem:[#allocation13 + $0x168] sm:$0xf0]  ;;  %v11971_v42 = vld [vmem:[#allocation13 + $0x108] sm:$0xf] }
 0x2b2   : > { %5016 = vmatpush.bf16.msrb.mxu0 %v11662_v48  ;;  %v11899_v48 = vld [vmem:[#allocation13 + $0x80] sm:$0xf]  ;;  %v11875_v31 = vld [vmem:[#allocation13 + $0x48] sm:$0xf] }
 0x2b3   : > { %v14452_v57 = vld [vmem:[#allocation13 + $0x64] sm:$0xf0] }
 0x2b4   : > { %4978 = vmatmul.bf16.vlgmr.msra.gmra.mxu1 %v15980_v58  ;;  %11638 = vmatmul.msk.bf16.vlgmr.msrb.gmra.mxu2 %vm4598_vm4, %v4638_v12 }
 0x2b5   : > { %4983 = vmatpush.bf16.msra.mxu2 %v11822_v14  ;;  %5017 = vmatmul.bf16.vlgmr.msrb.gmra.mxu0 %v15980_v58  ;;  %v14459_v14 = vld [vmem:[#allocation13 + $0x9c] sm:$0xf0] }
 0x2b6   : > { %5852 = vmatpush.bf16.msrb.mxu1 %v12060_v15  ;;  %5881 = vmatpush.bf16.msrb.mxu3 %v11968_v19  ;;  %v11900_v12 = vor.u32 %v14459_v14, %v11899_v48  ;;  %v12315_v19 = vld [vmem:[#allocation13 + $0x3c0] sm:$0xf]  ;;  %v14476_v48 = vld [vmem:[#allocation13 + $0x124] sm:$0xf0] }
 0x2b9   : > { %4984 = vmatpush.bf16.msra.mxu2 %v11798_v9 }
 0x2ba   : > { %5853 = vmatpush.bf16.msrb.mxu1 %v12028_v16  ;;  %5882 = vmatpush.bf16.msrb.mxu3 %v11936_v7  ;;  %v11972_v7 = vor.u32 %v14476_v48, %v11971_v42  ;;  %v14527_v48 = vld [vmem:[#allocation13 + $0x2c4] sm:$0xf] }
 0x2bd   : > { %4985 = vmatpush.bf16.msra.mxu2 %v11774_v47  ;;  %v11835_v47 = vld [vmem:[#allocation13] sm:$0xf] }
 0x2be   : > { %5854 = vmatpush.bf16.msrb.mxu1 %v11996_v5  ;;  %5883 = vmatpush.bf16.msrb.mxu3 %v11904_v33  ;;  %v12283_v33 = vld [vmem:[#allocation13 + $0x380] sm:$0xf] }
 0x2c1   : > { %4986 = vmatpush.bf16.msra.mxu2 %v11750_v52  ;;  %v11836_v52 = vor.u32 %v14443_v1, %v11835_v47  ;;  %v12251_v1 = vld [vmem:[#allocation13 + $0x340] sm:$0xf] }
 0x2c2   : > { %5855 = vmatpush.bf16.msrb.mxu1 %v11964_v21  ;;  %5884 = vmatpush.bf16.msrb.mxu3 %v11872_v55  ;;  %v12008_v21 = vor.u32 %v14480_v59, %v12005_v29  ;;  %v12252_v18 = vor.u32 %v14547_v4, %v12251_v1 }
 0x2c5   : > { %4987 = vmatpush.bf16.msra.mxu2 %v11726_v22  ;;  %v14500_v22 = vld [vmem:[#allocation13 + $0x1e4] sm:$0xf0] }
 0x2c6   : > { %v12068_v61 = vor.u32 %v14500_v22, %v12067_v46  ;;  %5885 = vmatpush.bf16.msrb.mxu3 %v11840_v30  ;;  %v12253_v46 = vld [vmem:[#allocation13 + $0x360] sm:$0xf0]  ;;  %v11907_v22 = vld [vmem:[#allocation13 + $0x88] sm:$0xf] }
 0x2c7   : > { %v14460_v30 = vld [vmem:[#allocation13 + $0xa4] sm:$0xf0] }
 0x2c9   : > { %4988 = vmatpush.bf16.msra.mxu2 %v11702_v17  ;;  %v14496_v17 = vld [vmem:[#allocation13 + $0x1cc] sm:$0xf] }
 0x2cd   : > { %4989 = vmatpush.bf16.msra.mxu2 %v11678_v41  ;;  %v12072_v41 = vor.u32 %v14496_v17, %v12069_v53  ;;  %v11908_v17 = vor.u32 %v14460_v30, %v11907_v22  ;;  %v14456_v53 = vld [vmem:[#allocation13 + $0x8c] sm:$0xf]  ;;  %v14511_v22 = vld [vmem:[#allocation13 + $0x244] sm:$0xf] }
 0x2cf   : > { %5930 = vmatpush.bf16.msra.mxu3 %v12072_v41 }
 0x2d1   : > { %4990 = vmatpush.bf16.msra.mxu2 %v11654_v13  ;;  %v14492_v13 = vld [vmem:[#allocation13 + $0x1a4] sm:$0xf0] }
 0x2d2   : > { %v12036_v27 = vor.u32 %v14492_v13, %v12035_v36  ;;  %v12219_v36 = vld [vmem:[#allocation13 + $0x300] sm:$0xf] }
 0x2d3   : > { %5931 = vmatpush.bf16.msra.mxu3 %v12040_v56  ;;  %v14539_v13 = vld [vmem:[#allocation13 + $0x31c] sm:$0xf0]  ;;  %v12221_v56 = vld [vmem:[#allocation13 + $0x320] sm:$0xf0] }
 0x2d4   : > { %4991 = vmatmul.bf16.vlgmr.msra.gmra.mxu2 %v15980_v58  ;;  %v11932_v58 = vor.u32 %v14467_v50, %v11931_v37  ;;  %v14563_v37 = vld [vmem:[#allocation13 + $0x3dc] sm:$0xf0]  ;;  %v14559_v50 = vld [vmem:[#allocation13 + $0x3c4] sm:$0xf]  ;;  %v12224_v29 = vor.u32 %v14535_v20, %v12221_v56  ;;  %v12323_v20 = vld [vmem:[#allocation13 + $0x3c8] sm:$0xf] }
 0x2d5   : > { %v12316_v51 = vor.u32 %v14563_v37, %v12315_v19  ;;  %v11877_v19 = vld [vmem:[#allocation13 + $0x68] sm:$0xf0] }
 0x2d6   : > { %5856 = vmatpush.bf16.msrb.mxu1 %v11932_v58  ;;  %v12317_v58 = vld [vmem:[#allocation13 + $0x3e0] sm:$0xf0]  ;;  %v14560_v56 = vld [vmem:[#allocation13 + $0x3cc] sm:$0xf] }
 0x2d7   : > { %5932 = vmatpush.bf16.msra.mxu3 %v12008_v21  ;;  %v12320_v14 = vor.u32 %v14559_v50, %v12317_v58  ;;  %5865 = vmatpush.bf16.msrb.mxu2 %v12316_v51  ;;  %v11876_v21 = vor.u32 %v14452_v57, %v11875_v31  ;;  %v12187_v51 = vld [vmem:[#allocation13 + $0x2c0] sm:$0xf]  ;;  %v12325_v31 = vld [vmem:[#allocation13 + $0x3e8] sm:$0xf0] }
 0x2d8   : > { %v14531_v58 = vld [vmem:[#allocation13 + $0x2dc] sm:$0xf0] }
 0x2d9   : > { %5891 = vmatpush.bf16.msra.mxu0 %v12320_v14  ;;  %v12188_v42 = vor.u32 %v14531_v58, %v12187_v51  ;;  %v12189_v14 = vld [vmem:[#allocation13 + $0x2e0] sm:$0xf0]  ;;  %v12259_v58 = vld [vmem:[#allocation13 + $0x348] sm:$0xf] }
 0x2da   : > { %5857 = vmatpush.bf16.msrb.mxu1 %v11900_v12  ;;  %v11976_v12 = vor.u32 %v14472_v26, %v11973_v11  ;;  %v12192_v11 = vor.u32 %v14527_v48, %v12189_v14  ;;  %v14544_v48 = vld [vmem:[#allocation13 + $0x34c] sm:$0xf] }
 0x2dc   : > { %5933 = vmatpush.bf16.msra.mxu3 %v11976_v12  ;;  %v14444_v12 = vld [vmem:[#allocation13 + $0x24] sm:$0xf0] }
 0x2de   : > { %5858 = vmatpush.bf16.msrb.mxu1 %v11868_v24  ;;  %v14464_v24 = vld [vmem:[#allocation13 + $0xcc] sm:$0xf] }
 0x2df   : > { %v11944_v47 = vor.u32 %v14464_v24, %v11941_v0  ;;  %v14523_v0 = vld [vmem:[#allocation13 + $0x29c] sm:$0xf0] }
 0x2e1   : > { %5934 = vmatpush.bf16.msra.mxu3 %v11944_v47  ;;  %v12157_v47 = vld [vmem:[#allocation13 + $0x2a0] sm:$0xf0] }
 0x2e2   : > { %5859 = vmatpush.bf16.msrb.mxu1 %v11836_v52  ;;  %v14543_v52 = vld [vmem:[#allocation13 + $0x344] sm:$0xf] }
 0x2e6   : > { %5904 = vmatpush.bf16.msra.mxu1 %v12068_v61  ;;  %v12256_v61 = vor.u32 %v14543_v52, %v12253_v46  ;;  %v14515_v46 = vld [vmem:[#allocation13 + $0x25c] sm:$0xf0] }
 0x2ea   : > { %5905 = vmatpush.bf16.msra.mxu1 %v12036_v27 }
 0x2ee   : > { %5906 = vmatpush.bf16.msra.mxu1 %v12004_v60 }
 0x2f1   : > { %v4611_v38 = vpop.f32.mrf.mxu0 }
 0x2f2   : > { %v4615_v9 = vadd.f32 %v4611_v38, %v4595_v8  ;;  %5907 = vmatpush.bf16.msra.mxu1 %v11972_v7  ;;  %v14555_v38 = vld [vmem:[#allocation13 + $0x39c] sm:$0xf0]  ;;  %v11843_v7 = vld [vmem:[#allocation13 + $0x8] sm:$0xf] }
 0x2f3   : > { %v15990_v15 = vpop.f32.mrf.mxu3  ;;  %v12284_v8 = vor.u32 %v14555_v38, %v12283_v33  ;;  %v14440_v33 = vld [vmem:[#allocation13 + $0xc] sm:$0xf] }
 0x2f4   : > { %v5023_v55 = vrot.slane %v15990_v15, 7  ;;  %v11845_v38 = vld [vmem:[#allocation13 + $0x28] sm:$0xf0] }
 0x2f5   : > { %5866 = vmatpush.bf16.msrb.mxu2 %v12284_v8  ;;  %v11848_v8 = vor.u32 %v14440_v33, %v11845_v38 }
 0x2f9   : > { %v4613_v23 = vpop.f32.mrf.mxu0  ;;  %5867 = vmatpush.bf16.msrb.mxu2 %v12252_v18  ;;  %v12123_v18 = vld [vmem:[#allocation13 + $0x240] sm:$0xf] }
 0x2fa   : > { %v14551_v23 = vld [vmem:[#allocation13 + $0x384] sm:$0xf]  ;;  %v12124_v30 = vor.u32 %v14515_v46, %v12123_v18  ;;  %v12077_v18 = vld [vmem:[#allocation13 + $0x1f0] sm:$0xf0]  ;;  %v12195_v46 = vld [vmem:[#allocation13 + $0x2c8] sm:$0xf] }
 0x2fb   : > { %v4955_v43 = vpop.f32.mrf.mxu3 }
 0x2fc   : > { %v11909_v43 = vld [vmem:[#allocation13 + $0xa8] sm:$0xf0] }
 0x2fd   : > { %v11912_v41 = vor.u32 %v14456_v53, %v11909_v43  ;;  %v12091_v43 = vld [vmem:[#allocation13 + $0x200] sm:$0xf] }
 0x2ff   : > { %5935 = vmatpush.bf16.msra.mxu3 %v11912_v41  ;;  %v14507_v41 = vld [vmem:[#allocation13 + $0x21c] sm:$0xf0] }
 0x311   : > { %v4631_v10 = vpop.f32.mrf.mxu1  ;;  %v15994_v16 = vpop.f32.mrf.mxu0 }
 0x312   : > { %v15992_v35 = vadd.f32 %v4631_v10, %v4615_v9  ;;  %v12285_v9 = vld [vmem:[#allocation13 + $0x3a0] sm:$0xf0]  ;;  %v11940_v10 = vor.u32 %v14468_v25, %v11939_v34  ;;  %v5025_v15 = vadd.f32 %v5023_v55, %v15994_v16  ;;  %v14448_v16 = vld [vmem:[#allocation13 + $0x4c] sm:$0xf]  ;;  %v12155_v25 = vld [vmem:[#allocation13 + $0x280] sm:$0xf] }
 0x313   : > { %v12288_v40 = vor.u32 %v14551_v23, %v12285_v9  ;;  %v11880_v37 = vor.u32 %v14448_v16, %v11877_v19  ;;  %v11844_v23 = vor.u32 %v14444_v12, %v11843_v7  ;;  %v14519_v55 = vld [vmem:[#allocation13 + $0x284] sm:$0xf]  ;;  %v12156_v4 = vor.u32 %v14523_v0, %v12155_v25  ;;  %v14552_v19 = vld [vmem:[#allocation13 + $0x38c] sm:$0xf] }
 0x314   : > { %5908 = vmatpush.bf16.msra.mxu1 %v11940_v10  ;;  %v12160_v52 = vor.u32 %v14519_v55, %v12157_v47  ;;  %v12075_v55 = vld [vmem:[#allocation13 + $0x1d0] sm:$0xf] }
 0x315   : > { %5892 = vmatpush.bf16.msra.mxu0 %v12288_v40  ;;  %5936 = vmatpush.bf16.msra.mxu3 %v11880_v37  ;;  %v12293_v37 = vld [vmem:[#allocation13 + $0x3a8] sm:$0xf0]  ;;  %v14501_v47 = vld [vmem:[#allocation13 + $0x1ec] sm:$0xf0] }
 0x318   : > { %5909 = vmatpush.bf16.msra.mxu1 %v11908_v17 }
 0x319   : > { %v4633_v63 = vpop.f32.mrf.mxu1  ;;  %v4968_v5 = vpop.f32.mrf.mxu0  ;;  %5893 = vmatpush.bf16.msra.mxu0 %v12256_v61  ;;  %5937 = vmatpush.bf16.msra.mxu3 %v11848_v8  ;;  %v12125_v61 = vld [vmem:[#allocation13 + $0x260] sm:$0xf0]  ;;  %v14540_v8 = vld [vmem:[#allocation13 + $0x324] sm:$0xf0] }
 0x31a   : > { %v15071_v63 = vld [vmem:[#allocation10] ss:$0 sm:$0xff]  ;;  %v12220_v5 = vor.u32 %v14539_v13, %v12219_v36  ;;  %v12092_v36 = vor.u32 %v14507_v41, %v12091_v43  ;;  %v12093_v13 = vld [vmem:[#allocation13 + $0x220] sm:$0xf0]  ;;  %v12043_v41 = vld [vmem:[#allocation13 + $0x190] sm:$0xf] }
 0x31c   : > { %5868 = vmatpush.bf16.msrb.mxu2 %v12220_v5  ;;  %5910 = vmatpush.bf16.msra.mxu1 %v11876_v21  ;;  %v14564_v5 = vld [vmem:[#allocation13 + $0x3e4] sm:$0xf0] }
 0x31d   : > { %v15998_v54 = vpop.f32.mrf.mxu3  ;;  %5894 = vmatpush.bf16.msra.mxu0 %v12224_v29  ;;  %v12324_v57 = vor.u32 %v14564_v5, %v12323_v20  ;;  %v12291_v29 = vld [vmem:[#allocation13 + $0x388] sm:$0xf] }
 0x31e   : > { %v14556_v21 = vld [vmem:[#allocation13 + $0x3a4] sm:$0xf0] }
 0x31f   : > { %v12292_v16 = vor.u32 %v14556_v21, %v12291_v29  ;;  %v12165_v21 = vld [vmem:[#allocation13 + $0x2a8] sm:$0xf0] }
 0x320   : > { %5869 = vmatpush.bf16.msrb.mxu2 %v12188_v42  ;;  %5911 = vmatpush.bf16.msra.mxu1 %v11844_v23  ;;  %v14548_v42 = vld [vmem:[#allocation13 + $0x364] sm:$0xf0] }
 0x321   : > { %5895 = vmatpush.bf16.msra.mxu0 %v12192_v11  ;;  %v12260_v7 = vor.u32 %v14548_v42, %v12259_v58  ;;  %v12227_v23 = vld [vmem:[#allocation13 + $0x308] sm:$0xf]  ;;  %v14485_v58 = vld [vmem:[#allocation13 + $0x16c] sm:$0xf0]  ;;  %v14481_v42 = vld [vmem:[#allocation13 + $0x154] sm:$0xf] }
 0x322   : > { %v12228_v25 = vor.u32 %v14540_v8, %v12227_v23  ;;  %v11979_v8 = vld [vmem:[#allocation13 + $0x110] sm:$0xf] }
 0x324   : > { %5870 = vmatpush.bf16.msrb.mxu2 %v12156_v4 }
 0x325   : > { %v5007_v24 = vpop.f32.mrf.mxu3  ;;  %5896 = vmatpush.bf16.msra.mxu0 %v12160_v52  ;;  %v14497_v52 = vld [vmem:[#allocation13 + $0x1d4] sm:$0xf] }
 0x326   : > { %v12080_v43 = vor.u32 %v14497_v52, %v12077_v18  ;;  %v12101_v52 = vld [vmem:[#allocation13 + $0x228] sm:$0xf0] }
 0x328   : > { %5871 = vmatpush.bf16.msrb.mxu2 %v12124_v30  ;;  %v14528_v30 = vld [vmem:[#allocation13 + $0x2cc] sm:$0xf] }
 0x32c   : > { %5872 = vmatpush.bf16.msrb.mxu2 %v12092_v36  ;;  %v14489_v36 = vld [vmem:[#allocation13 + $0x194] sm:$0xf] }
 0x330   : > { %5917 = vmatpush.bf16.msra.mxu2 %v12324_v57  ;;  %v14520_v57 = vld [vmem:[#allocation13 + $0x28c] sm:$0xf] }
 0x331   : > { %v4979_v27 = vpop.f32.mrf.mxu1 }
 0x332   : > { %v5024_v59 = vrot.slane %v4979_v27, 1  ;;  %v16000_v60 = vpop.f32.mrf.mxu0 }
 0x334   : > { %v5026_v50 = vadd.f32 %v5025_v15, %v5024_v59  ;;  %v14503_v15 = vld [vmem:[#allocation13 + $0x204] sm:$0xf]  ;;  %v12328_v59 = vor.u32 %v14560_v56, %v12325_v31  ;;  %5918 = vmatpush.bf16.msra.mxu2 %v12292_v16  ;;  %v12163_v56 = vld [vmem:[#allocation13 + $0x288] sm:$0xf]  ;;  %v15072_v16 = vld [vmem:[#allocation12] ss:$0 sm:$0xff] }
 0x335   : > { %v12096_v27 = vor.u32 %v14503_v15, %v12093_v13  ;;  %v12045_v13 = vld [vmem:[#allocation13 + $0x1b0] sm:$0xf0]  ;;  %v14524_v31 = vld [vmem:[#allocation13 + $0x2a4] sm:$0xf0] }
 0x336   : > { %v5030_v26 = vadd.f32 %v15071_v63, %v5026_v50  ;;  %v12296_v50 = vor.u32 %v14552_v19, %v12293_v37  ;;  %v12048_v37 = vor.u32 %v14489_v36, %v12045_v13  ;;  %v11915_v36 = vld [vmem:[#allocation13 + $0x90] sm:$0xf] }
 0x337   : > { %v4651_v34 = vpop.f32.mrf.mxu2  ;;  %v14461_v13 = vld [vmem:[#allocation13 + $0xac] sm:$0xf0] }
 0x338   : > { %v11831_v9 = vmul.f32 -1.442695, %v5030_v26  ;;  %v16003_v40 = vadd.f32 %v4651_v34, %v15992_v35  ;;  %v12128_v35 = vor.u32 %v14511_v22, %v12125_v61  ;;  %v12261_v26 = vld [vmem:[#allocation13 + $0x368] sm:$0xf0]  ;;  %5919 = vmatpush.bf16.msra.mxu2 %v12260_v7  ;;  %v14532_v22 = vld [vmem:[#allocation13 + $0x2e4] sm:$0xf0] }
 0x339   : > { %v4981_v10 = vpop.f32.mrf.mxu1  ;;  %v12264_v12 = vor.u32 %v14544_v48, %v12261_v26  ;;  %v12196_v20 = vor.u32 %v14532_v22, %v12195_v46  ;;  %v12013_v48 = vld [vmem:[#allocation13 + $0x170] sm:$0xf0]  ;;  %v12131_v7 = vld [vmem:[#allocation13 + $0x248] sm:$0xf]  ;;  %v11947_v22 = vld [vmem:[#allocation13 + $0xd0] sm:$0xf] }
 0x33a   : > { %15073 = vpow2.f32 %v11831_v9  ;;  %v5020_v1 = vpop.f32.mrf.mxu0  ;;  %5897 = vmatpush.bf16.msra.mxu0 %v12128_v35  ;;  %v14536_v9 = vld [vmem:[#allocation13 + $0x30c] sm:$0xf]  ;;  %v14516_v26 = vld [vmem:[#allocation13 + $0x264] sm:$0xf0]  ;;  %v12016_v23 = vor.u32 %v14481_v42, %v12013_v48  ;;  %v11853_v42 = vld [vmem:[#allocation13 + $0x30] sm:$0xf0] }
 0x33b   : > { %v12229_v10 = vld [vmem:[#allocation13 + $0x328] sm:$0xf0]  ;;  %v12083_v48 = vld [vmem:[#allocation13 + $0x1d8] sm:$0xf] }
 0x33c   : > { %v12232_v1 = vor.u32 %v14536_v9, %v12229_v10  ;;  %5920 = vmatpush.bf16.msra.mxu2 %v12228_v25  ;;  %v12197_v35 = vld [vmem:[#allocation13 + $0x2e8] sm:$0xf0]  ;;  %v11981_v25 = vld [vmem:[#allocation13 + $0x130] sm:$0xf0]  ;;  %v12132_v10 = vor.u32 %v14516_v26, %v12131_v7  ;;  %v12085_v7 = vld [vmem:[#allocation13 + $0x1f8] sm:$0xf0] }
 0x33e   : > { %5898 = vmatpush.bf16.msra.mxu0 %v12096_v27  ;;  %v12200_v27 = vor.u32 %v14528_v30, %v12197_v35  ;;  %v14469_v30 = vld [vmem:[#allocation13 + $0xec] sm:$0xf0]  ;;  %v14465_v35 = vld [vmem:[#allocation13 + $0xd4] sm:$0xf] }
 0x33f   : > { %v4653_v53 = vpop.f32.mrf.mxu2 }
 0x340   : > { %v15074_v17 = vpop.eup %15073  ;;  %v12076_v53 = vor.u32 %v14501_v47, %v12075_v55  ;;  %5921 = vmatpush.bf16.msra.mxu2 %v12196_v20  ;;  %v12099_v55 = vld [vmem:[#allocation13 + $0x208] sm:$0xf]  ;;  %v14457_v20 = vld [vmem:[#allocation13 + $0x94] sm:$0xf] }
 0x341   : > { %v5034_v63 = vadd.f32 1.0, %v15074_v17  ;;  %v14508_v47 = vld [vmem:[#allocation13 + $0x224] sm:$0xf0] }
 0x342   : > { %5943 = vmatpush.bf16.msrb.mxu0 %v12328_v59  ;;  %v5052_v59 = vrot.slane %v16000_v60, 1  ;;  %v12164_v60 = vor.u32 %v14524_v31, %v12163_v56  ;;  %v11883_v31 = vld [vmem:[#allocation13 + $0x50] sm:$0xf] }
 0x343   : > { %15075 = vrcp.f32 %v5034_v63  ;;  %v5046_v11 = vand.u32 2147483648, %v5034_v63  ;;  %vm5040_vm5 = vweird.f32 %v5034_v63  ;;  %v5044_v38 = vand.u32 2147483647, %v5034_v63 }
 0x344   : > { %5922 = vmatpush.bf16.msra.mxu2 %v12164_v60  ;;  %v14502_v60 = vld [vmem:[#allocation13 + $0x1f4] sm:$0xf0] }
 0x345   : > { %v5047_v0 = vor.u32 1.1754944e-38, %v5046_v11  ;;  %vm5045_vm8 = vcmp.eq.f32.partialorder %v5044_v38, 8.507059e+37  ;;  %v14512_v11 = vld [vmem:[#allocation13 + $0x24c] sm:$0xf] }
 0x346   : > { %5944 = vmatpush.bf16.msrb.mxu0 %v12296_v50  ;;  %v12011_v50 = vld [vmem:[#allocation13 + $0x150] sm:$0xf] }
 0x347   : > { %v12012_v38 = vor.u32 %v14485_v58, %v12011_v50  ;;  %v11851_v50 = vld [vmem:[#allocation13 + $0x10] sm:$0xf]  ;;  %v14441_v58 = vld [vmem:[#allocation13 + $0x14] sm:$0xf] }
 0x348   : > { %5923 = vmatpush.bf16.msra.mxu2 %v12132_v10 }
 0x349   : > { %v15076_v51 = vpop.eup %15075 }
 0x34a   : > { %v5036_v14 = vmul.f32 %v15076_v51, %v5034_v63  ;;  %vm5041_vm6 = vweird.f32 %v15076_v51  ;;  %5945 = vmatpush.bf16.msrb.mxu0 %v12264_v12  ;;  %v14493_v63 = vld [vmem:[#allocation13 + $0x1ac] sm:$0xf0] }
 0x34b   : > { %vm16005_vm7 = vmor %vm5040_vm5, %vm5041_vm6  ;;  %v12044_v19 = vor.u32 %v14493_v63, %v12043_v41  ;;  %v11948_v41 = vor.u32 %v14469_v30, %v11947_v22 }
 0x34c   : > { %v5037_v33 = vsub.f32 1.0, %v5036_v14  ;;  %v12168_v14 = vor.u32 %v14520_v57, %v12165_v21  ;;  %v11885_v21 = vld [vmem:[#allocation13 + $0x70] sm:$0xf0] }
 0x34e   : > { %v5038_v34 = vmul.f32 %v15076_v51, %v5037_v33  ;;  %5946 = vmatpush.bf16.msrb.mxu0 %v12232_v1  ;;  %v12133_v33 = vld [vmem:[#allocation13 + $0x268] sm:$0xf0] }
 0x34f   : > { %v12136_v24 = vor.u32 %v14512_v11, %v12133_v33  ;;  %v14504_v1 = vld [vmem:[#allocation13 + $0x20c] sm:$0xf]  ;;  %v11856_v11 = vor.u32 %v14441_v58, %v11853_v42  ;;  %v14466_v58 = vld [vmem:[#allocation13 + $0xdc] sm:$0xf] }
 0x350   : > { %v5039_v4 = vadd.f32 %v15076_v51, %v5038_v34  ;;  %v14477_v34 = vld [vmem:[#allocation13 + $0x12c] sm:$0xf0]  ;;  %v11957_v42 = vld [vmem:[#allocation13 + $0xf8] sm:$0xf0] }
 0x351   : > { %v11980_v18 = vor.u32 %v14477_v34, %v11979_v8  ;;  %v14494_v8 = vld [vmem:[#allocation13 + $0x1b4] sm:$0xf0]  ;;  %v12053_v34 = vld [vmem:[#allocation13 + $0x1b8] sm:$0xf0] }
 0x352   : > { %v5043_v61 = vsel %vm16005_vm7, %v15076_v51, %v5039_v4  ;;  %5947 = vmatpush.bf16.msrb.mxu0 %v12200_v27  ;;  %v11917_v27 = vld [vmem:[#allocation13 + $0xb0] sm:$0xf0] }
 0x353   : > { %v5048_v17 = vsel %vm5045_vm8, %v5047_v0, %v5043_v61  ;;  %v11920_v56 = vor.u32 %v14457_v20, %v11917_v27  ;;  %v14474_v20 = vld [vmem:[#allocation13 + $0x11c] sm:$0xf] }
 0x354   : > { %v16011_v15 = vpack.c.bf16 %v5048_v17, %v5048_v17  ;;  %v11949_v17 = vld [vmem:[#allocation13 + $0xf0] sm:$0xf0]  ;;  %v11989_v27 = vld [vmem:[#allocation13 + $0x138] sm:$0xf0] }
 0x355   : > { %v11952_v63 = vor.u32 %v14465_v35, %v11949_v17  ;;  %v14565_v17 = vld [vmem:[#allocation13 + $0x3ec] sm:$0xf0] }
 0x356   : > { %5860 = vmatmul.bf16.vlgmr.msrb.gmra.mxu1 %v16011_v15  ;;  %5886 = vmatmul.bf16.vlgmr.msrb.gmra.mxu3 %v16011_v15 }
 0x357   : > { %v4992_v5 = vpop.f32.mrf.mxu2  ;;  %5956 = vmatpush.bf16.msrb.mxu1 %v12076_v53  ;;  %5982 = vmatpush.bf16.msrb.mxu3 %v12080_v43  ;;  %v12100_v53 = vor.u32 %v14508_v47, %v12099_v55  ;;  %v12104_v43 = vor.u32 %v14504_v1, %v12101_v52  ;;  %v14486_v55 = vld [vmem:[#allocation13 + $0x174] sm:$0xf0]  ;;  %v14482_v1 = vld [vmem:[#allocation13 + $0x15c] sm:$0xf] }
 0x358   : > { %v5051_v29 = vrot.slane %v4992_v5, 7  ;;  %5948 = vmatpush.bf16.msrb.mxu0 %v12168_v14  ;;  %v11916_v5 = vor.u32 %v14461_v13, %v11915_v36  ;;  %v14498_v14 = vld [vmem:[#allocation13 + $0x1dc] sm:$0xf]  ;;  %v14478_v13 = vld [vmem:[#allocation13 + $0x134] sm:$0xf0] }
 0x359   : > { %5924 = vmatpush.bf16.msra.mxu2 %v12100_v53  ;;  %v12088_v33 = vor.u32 %v14498_v14, %v12085_v7  ;;  %v14561_v53 = vld [vmem:[#allocation13 + $0x3d4] sm:$0xf]  ;;  %v14549_v14 = vld [vmem:[#allocation13 + $0x36c] sm:$0xf0] }
 0x35a   : > { %v5053_v51 = vadd.f32 %v5051_v29, %v15998_v54  ;;  %v14473_v54 = vld [vmem:[#allocation13 + $0x114] sm:$0xf] }
 0x35b   : > { %5957 = vmatpush.bf16.msrb.mxu1 %v12044_v19  ;;  %5983 = vmatpush.bf16.msrb.mxu3 %v12048_v37  ;;  %v11984_v46 = vor.u32 %v14473_v54, %v11981_v25  ;;  %v14449_v29 = vld [vmem:[#allocation13 + $0x54] sm:$0xf] }
 0x35c   : > { %v5054_v12 = vadd.f32 %v5053_v51, %v5052_v59  ;;  %5949 = vmatpush.bf16.msrb.mxu0 %v12136_v24  ;;  %v14453_v59 = vld [vmem:[#allocation13 + $0x6c] sm:$0xf0]  ;;  %v11888_v37 = vor.u32 %v14449_v29, %v11885_v21 }
 0x35d   : > { %v11884_v19 = vor.u32 %v14453_v59, %v11883_v31  ;;  %v14445_v51 = vld [vmem:[#allocation13 + $0x2c] sm:$0xf0] }
 0x35e   : > { %v5058_v9 = vadd.f32 %v15072_v16, %v5054_v12  ;;  %v11852_v26 = vor.u32 %v14445_v51, %v11851_v50  ;;  %v12084_v12 = vor.u32 %v14502_v60, %v12083_v48  ;;  %v14557_v59 = vld [vmem:[#allocation13 + $0x3ac] sm:$0xf0]  ;;  %v11955_v50 = vld [vmem:[#allocation13 + $0xd8] sm:$0xf] }
 0x35f   : > { %v4994_v0 = vpop.f32.mrf.mxu2  ;;  %5958 = vmatpush.bf16.msrb.mxu1 %v12012_v38  ;;  %5984 = vmatpush.bf16.msrb.mxu3 %v12016_v23  ;;  %v12051_v38 = vld [vmem:[#allocation13 + $0x198] sm:$0xf]  ;;  %v12267_v60 = vld [vmem:[#allocation13 + $0x350] sm:$0xf] }
 0x360   : > { %v5059_v4 = vmax.f32 %v5058_v9, 0.0  ;;  %5950 = vmatpush.bf16.msrb.mxu0 %v12104_v43  ;;  %v14490_v9 = vld [vmem:[#allocation13 + $0x19c] sm:$0xf]  ;;  %v12052_v10 = vor.u32 %v14494_v8, %v12051_v38  ;;  %v12019_v0 = vld [vmem:[#allocation13 + $0x158] sm:$0xf] }
 0x361   : > { %v12056_v24 = vor.u32 %v14490_v9, %v12053_v34  ;;  %v12020_v22 = vor.u32 %v14486_v55, %v12019_v0  ;;  %v14470_v51 = vld [vmem:[#allocation13 + $0xf4] sm:$0xf0]  ;;  %v11925_v8 = vld [vmem:[#allocation13 + $0xb8] sm:$0xf0]  ;;  %v12268_v9 = vor.u32 %v14549_v14, %v12267_v60  ;;  %v14537_v0 = vld [vmem:[#allocation13 + $0x314] sm:$0xf] }
 0x362   : > { %v11832_v61 = vmul.f32 -1.442695, %v5059_v4  ;;  %v12021_v4 = vld [vmem:[#allocation13 + $0x178] sm:$0xf0]  ;;  %v11956_v7 = vor.u32 %v14470_v51, %v11955_v50  ;;  %v14462_v38 = vld [vmem:[#allocation13 + $0xb4] sm:$0xf0] }
 0x363   : > { %5959 = vmatpush.bf16.msrb.mxu1 %v11980_v18  ;;  %5985 = vmatpush.bf16.msrb.mxu3 %v11984_v46  ;;  %v12024_v30 = vor.u32 %v14482_v1, %v12021_v4  ;;  %v12237_v55 = vld [vmem:[#allocation13 + $0x330] sm:$0xf0]  ;;  %v14454_v1 = vld [vmem:[#allocation13 + $0x74] sm:$0xf0]  ;;  %v14450_v4 = vld [vmem:[#allocation13 + $0x5c] sm:$0xf] }
 0x364   : > { %15077 = vpow2.f32 %v11832_v61  ;;  %v12331_v61 = vld [vmem:[#allocation13 + $0x3d0] sm:$0xf]  ;;  %v14513_v50 = vld [vmem:[#allocation13 + $0x254] sm:$0xf] }
 0x365   : > { %v12141_v51 = vld [vmem:[#allocation13 + $0x270] sm:$0xf0] }
 0x366   : > { %5912 = vmatmul.bf16.vlgmr.msra.gmra.mxu1 %v16011_v15  ;;  %5938 = vmatmul.bf16.vlgmr.msra.gmra.mxu3 %v16011_v15  ;;  %v14505_v60 = vld [vmem:[#allocation13 + $0x214] sm:$0xf] }
 0x367   : > { %5960 = vmatpush.bf16.msrb.mxu1 %v11948_v41  ;;  %5986 = vmatpush.bf16.msrb.mxu3 %v11952_v63  ;;  %v12333_v41 = vld [vmem:[#allocation13 + $0x3f0] sm:$0xf0]  ;;  %v11987_v63 = vld [vmem:[#allocation13 + $0x118] sm:$0xf] }
 0x368   : > { %v12336_v31 = vor.u32 %v14561_v53, %v12333_v41  ;;  %v11988_v21 = vor.u32 %v14478_v13, %v11987_v63  ;;  %v12205_v53 = vld [vmem:[#allocation13 + $0x2f0] sm:$0xf0]  ;;  %v14446_v41 = vld [vmem:[#allocation13 + $0x34] sm:$0xf0]  ;;  %v14442_v63 = vld [vmem:[#allocation13 + $0x1c] sm:$0xf] }
 0x369   : > { %v12109_v14 = vld [vmem:[#allocation13 + $0x230] sm:$0xf0] }
 0x36a   : > { %v15078_v57 = vpop.eup %15077 }
 0x36b   : > { %v5063_v16 = vadd.f32 1.0, %v15078_v57  ;;  %5961 = vmatpush.bf16.msrb.mxu1 %v11916_v5  ;;  %5987 = vmatpush.bf16.msrb.mxu3 %v11920_v56  ;;  %v12332_v56 = vor.u32 %v14565_v17, %v12331_v61  ;;  %v12299_v57 = vld [vmem:[#allocation13 + $0x390] sm:$0xf]  ;;  %v14529_v17 = vld [vmem:[#allocation13 + $0x2d4] sm:$0xf] }
 0x36d   : > { %15079 = vrcp.f32 %v5063_v16  ;;  %v5075_v47 = vand.u32 2147483648, %v5063_v16  ;;  %v5073_v18 = vand.u32 2147483647, %v5063_v16  ;;  %vm5069_vm10 = vweird.f32 %v5063_v16 }
 0x36f   : > { %5962 = vmatpush.bf16.msrb.mxu1 %v11884_v19  ;;  %5988 = vmatpush.bf16.msrb.mxu3 %v11888_v37  ;;  %v5076_v35 = vor.u32 1.1754944e-38, %v5075_v47  ;;  %vm5074_vm12 = vcmp.eq.f32.partialorder %v5073_v18, 8.507059e+37  ;;  %v14553_v19 = vld [vmem:[#allocation13 + $0x394] sm:$0xf]  ;;  %v11891_v47 = vld [vmem:[#allocation13 + $0x58] sm:$0xf] }
 0x370   : > { %v12301_v37 = vld [vmem:[#allocation13 + $0x3b0] sm:$0xf0]  ;;  %v11892_v61 = vor.u32 %v14454_v1, %v11891_v47  ;;  %v12277_v47 = vld [vmem:[#allocation13 + $0x378] sm:$0xf0] }
 0x371   : > { %v12304_v48 = vor.u32 %v14553_v19, %v12301_v37  ;;  %v12139_v19 = vld [vmem:[#allocation13 + $0x250] sm:$0xf] }
 0x372   : > { %v14517_v37 = vld [vmem:[#allocation13 + $0x26c] sm:$0xf0] }
 0x373   : > { %v15080_v23 = vpop.eup %15079  ;;  %5963 = vmatpush.bf16.msrb.mxu1 %v11852_v26  ;;  %5989 = vmatpush.bf16.msrb.mxu3 %v11856_v11  ;;  %v11960_v26 = vor.u32 %v14466_v58, %v11957_v42  ;;  %v14545_v11 = vld [vmem:[#allocation13 + $0x354] sm:$0xf]  ;;  %v12140_v58 = vor.u32 %v14517_v37, %v12139_v19  ;;  %v12144_v42 = vor.u32 %v14513_v50, %v12141_v51  ;;  %v12115_v37 = vld [vmem:[#allocation13 + $0x218] sm:$0xf]  ;;  %v14506_v51 = vld [vmem:[#allocation13 + $0x21c] sm:$0xf] }
 0x374   : > { %v5065_v54 = vmul.f32 %v15080_v23, %v5063_v16  ;;  %vm5070_vm9 = vweird.f32 %v15080_v23  ;;  %v11992_v16 = vor.u32 %v14474_v20, %v11989_v27  ;;  %v12208_v20 = vor.u32 %v14529_v17, %v12205_v53  ;;  %v14534_v17 = vld [vmem:[#allocation13 + $0x2f4] sm:$0xf0]  ;;  %v14530_v53 = vld [vmem:[#allocation13 + $0x2dc] sm:$0xf] }
 0x375   : > { %vm5071_vm11 = vmor %vm5069_vm10, %vm5070_vm9  ;;  %v14510_v50 = vld [vmem:[#allocation13 + $0x234] sm:$0xf0] }
 0x376   : > { %v5066_v25 = vsub.f32 1.0, %v5065_v54  ;;  %5964 = vmatmul.bf16.vlgmr.msrb.gmra.mxu1 %v16011_v15  ;;  %5990 = vmatmul.bf16.vlgmr.msrb.gmra.mxu3 %v16011_v15  ;;  %v12235_v54 = vld [vmem:[#allocation13 + $0x310] sm:$0xf] }
 0x377   : > { %6008 = vmatpush.bf16.msra.mxu1 %v12084_v12  ;;  %6034 = vmatpush.bf16.msra.mxu3 %v12088_v33  ;;  %v12269_v12 = vld [vmem:[#allocation13 + $0x370] sm:$0xf0]  ;;  %v11923_v33 = vld [vmem:[#allocation13 + $0x98] sm:$0xf] }
 0x378   : > { %v5067_v52 = vmul.f32 %v15080_v23, %v5066_v25  ;;  %v12272_v34 = vor.u32 %v14545_v11, %v12269_v12  ;;  %v14541_v25 = vld [vmem:[#allocation13 + $0x32c] sm:$0xf0]  ;;  %v14562_v11 = vld [vmem:[#allocation13 + $0x3dc] sm:$0xf] }
 0x379   : > { %v12236_v18 = vor.u32 %v14541_v25, %v12235_v54  ;;  %v12341_v12 = vld [vmem:[#allocation13 + $0x3f8] sm:$0xf0] }
 0x37a   : > { %v5068_v46 = vadd.f32 %v15080_v23, %v5067_v52  ;;  %v11893_v52 = vld [vmem:[#allocation13 + $0x78] sm:$0xf0] }
 0x37b   : > { %6009 = vmatpush.bf16.msra.mxu1 %v12052_v10  ;;  %6035 = vmatpush.bf16.msra.mxu3 %v12056_v24  ;;  %v11924_v10 = vor.u32 %v14462_v38, %v11923_v33  ;;  %v12112_v38 = vor.u32 %v14505_v60, %v12109_v14  ;;  %v12309_v54 = vld [vmem:[#allocation13 + $0x3b8] sm:$0xf0] }
 0x37c   : > { %v5072_v43 = vsel %vm5071_vm11, %v15080_v23, %v5068_v46  ;;  %v14458_v23 = vld [vmem:[#allocation13 + $0x9c] sm:$0xf]  ;;  %v12240_v46 = vor.u32 %v14537_v0, %v12237_v55  ;;  %v14550_v0 = vld [vmem:[#allocation13 + $0x374] sm:$0xf0] }
 0x37d   : > { %v5077_v36 = vsel %vm5074_vm12, %v5076_v35, %v5072_v43  ;;  %v11928_v24 = vor.u32 %v14458_v23, %v11925_v8  ;;  %v11896_v35 = vor.u32 %v14450_v4, %v11893_v52  ;;  %v11859_v43 = vld [vmem:[#allocation13 + $0x18] sm:$0xf]  ;;  %v12344_v8 = vor.u32 %v14562_v11, %v12341_v12  ;;  %v14546_v55 = vld [vmem:[#allocation13 + $0x35c] sm:$0xf] }
 0x37e   : > { %v5079_v5 = vmul.f32 %v5077_v36, %v16003_v40  ;;  %v12300_v40 = vor.u32 %v14557_v59, %v12299_v57  ;;  %v11861_v36 = vld [vmem:[#allocation13 + $0x38] sm:$0xf0]  ;;  %v11860_v27 = vor.u32 %v14446_v41, %v11859_v43  ;;  %v14521_v57 = vld [vmem:[#allocation13 + $0x294] sm:$0xf]  ;;  %v12280_v4 = vor.u32 %v14546_v55, %v12277_v47  ;;  %v12243_v52 = vld [vmem:[#allocation13 + $0x318] sm:$0xf] }
 0x37f   : > { %6010 = vmatpush.bf16.msra.mxu1 %v12020_v22  ;;  %6036 = vmatpush.bf16.msra.mxu3 %v12024_v30  ;;  %v12203_v22 = vld [vmem:[#allocation13 + $0x2d0] sm:$0xf]  ;;  %v12173_v59 = vld [vmem:[#allocation13 + $0x2b0] sm:$0xf0]  ;;  %v12213_v43 = vld [vmem:[#allocation13 + $0x2f8] sm:$0xf0] }
 0x380   : > { %v16022_v29 = vpack.c.bf16 %v5079_v5, %v5079_v5  ;;  %v14533_v30 = vld [vmem:[#allocation13 + $0x2ec] sm:$0xf0]  ;;  %v11864_v5 = vor.u32 %v14442_v63, %v11861_v36  ;;  %v12216_v63 = vor.u32 %v14530_v53, %v12213_v43  ;;  %v12179_v36 = vld [vmem:[#allocation13 + $0x298] sm:$0xf] }
 0x381   : > { %v12204_v13 = vor.u32 %v14533_v30, %v12203_v22  ;;  %v12245_v22 = vld [vmem:[#allocation13 + $0x338] sm:$0xf0] }
 0x382   : > { %5873 = vmatmul.bf16.vlgmr.msrb.gmra.mxu2 %v16022_v29  ;;  %5899 = vmatmul.bf16.vlgmr.msra.gmra.mxu0 %v16022_v29 }
 0x383   : > { %5969 = vmatpush.bf16.msrb.mxu2 %v12332_v56  ;;  %5995 = vmatpush.bf16.msra.mxu0 %v12336_v31  ;;  %v12171_v56 = vld [vmem:[#allocation13 + $0x290] sm:$0xf] }
 0x384   : > { %6011 = vmatpush.bf16.msra.mxu1 %v11988_v21  ;;  %6037 = vmatpush.bf16.msra.mxu3 %v11992_v16  ;;  %v14525_v31 = vld [vmem:[#allocation13 + $0x2ac] sm:$0xf0]  ;;  %v12176_v16 = vor.u32 %v14521_v57, %v12173_v59  ;;  %v14518_v57 = vld [vmem:[#allocation13 + $0x274] sm:$0xf0]  ;;  %v14514_v59 = vld [vmem:[#allocation13 + $0x25c] sm:$0xf] }
 0x385   : > { %v12172_v21 = vor.u32 %v14525_v31, %v12171_v56  ;;  %v12147_v31 = vld [vmem:[#allocation13 + $0x258] sm:$0xf] }
 0x387   : > { %5970 = vmatpush.bf16.msrb.mxu2 %v12300_v40  ;;  %5996 = vmatpush.bf16.msra.mxu0 %v12304_v48  ;;  %v12107_v40 = vld [vmem:[#allocation13 + $0x210] sm:$0xf] }
 0x388   : > { %6012 = vmatpush.bf16.msra.mxu1 %v11956_v7  ;;  %6038 = vmatpush.bf16.msra.mxu3 %v11960_v26  ;;  %v14509_v48 = vld [vmem:[#allocation13 + $0x22c] sm:$0xf0]  ;;  %v12339_v7 = vld [vmem:[#allocation13 + $0x3d8] sm:$0xf] }
 0x389   : > { %v14566_v26 = vld [vmem:[#allocation13 + $0x3f4] sm:$0xf0]  ;;  %v12108_v33 = vor.u32 %v14509_v48, %v12107_v40 }
 0x38a   : > { %v12340_v23 = vor.u32 %v14566_v26, %v12339_v7 }
 0x38b   : > { %5971 = vmatpush.bf16.msrb.mxu2 %v12268_v9  ;;  %5997 = vmatpush.bf16.msra.mxu0 %v12272_v34  ;;  %v12307_v9 = vld [vmem:[#allocation13 + $0x398] sm:$0xf]  ;;  %v14554_v34 = vld [vmem:[#allocation13 + $0x39c] sm:$0xf] }
 0x38c   : > { %6013 = vmatpush.bf16.msra.mxu1 %v11924_v10  ;;  %6039 = vmatpush.bf16.msra.mxu3 %v11928_v24  ;;  %v12312_v10 = vor.u32 %v14554_v34, %v12309_v54  ;;  %v12275_v24 = vld [vmem:[#allocation13 + $0x358] sm:$0xf] }
 0x38d   : > { %v12276_v1 = vor.u32 %v14550_v0, %v12275_v24 }
 0x38f   : > { %5972 = vmatpush.bf16.msrb.mxu2 %v12236_v18  ;;  %5998 = vmatpush.bf16.msra.mxu0 %v12240_v46  ;;  %v14542_v18 = vld [vmem:[#allocation13 + $0x334] sm:$0xf0]  ;;  %v14538_v46 = vld [vmem:[#allocation13 + $0x31c] sm:$0xf] }
 0x390   : > { %6014 = vmatpush.bf16.msra.mxu1 %v11892_v61  ;;  %6040 = vmatpush.bf16.msra.mxu3 %v11896_v35  ;;  %v12244_v30 = vor.u32 %v14542_v18, %v12243_v52  ;;  %v12248_v61 = vor.u32 %v14538_v46, %v12245_v22  ;;  %v12211_v35 = vld [vmem:[#allocation13 + $0x2d8] sm:$0xf] }
 0x391   : > { %v12212_v41 = vor.u32 %v14534_v17, %v12211_v35 }
 0x392   : > { %5925 = vmatmul.bf16.vlgmr.msra.gmra.mxu2 %v16022_v29  ;;  %5951 = vmatmul.bf16.vlgmr.msrb.gmra.mxu0 %v16022_v29 }
 0x393   : > { %5973 = vmatpush.bf16.msrb.mxu2 %v12204_v13  ;;  %5999 = vmatpush.bf16.msra.mxu0 %v12208_v20  ;;  %v14526_v13 = vld [vmem:[#allocation13 + $0x2b4] sm:$0xf0]  ;;  %v14522_v20 = vld [vmem:[#allocation13 + $0x29c] sm:$0xf] }
 0x394   : > { %6015 = vmatpush.bf16.msra.mxu1 %v11860_v27  ;;  %6041 = vmatpush.bf16.msra.mxu3 %v11864_v5  ;;  %v12181_v27 = vld [vmem:[#allocation13 + $0x2b8] sm:$0xf0]  ;;  %v12180_v5 = vor.u32 %v14526_v13, %v12179_v36 }
 0x395   : > { %v12184_v56 = vor.u32 %v14522_v20, %v12181_v27 }
 0x397   : > { %6016 = vmatmul.bf16.vlgmr.msra.gmra.mxu1 %v16011_v15  ;;  %6042 = vmatmul.bf16.vlgmr.msra.gmra.mxu3 %v16011_v15  ;;  %v14558_v15 = vld [vmem:[#allocation13 + $0x3b4] sm:$0xf0] }
 0x398   : > { %5974 = vmatpush.bf16.msrb.mxu2 %v12172_v21  ;;  %6000 = vmatpush.bf16.msra.mxu0 %v12176_v16  ;;  %v12308_v25 = vor.u32 %v14558_v15, %v12307_v9  ;;  %v12149_v21 = vld [vmem:[#allocation13 + $0x278] sm:$0xf0]  ;;  %v12148_v16 = vor.u32 %v14518_v57, %v12147_v31 }
 0x399   : > { %v12152_v19 = vor.u32 %v14514_v59, %v12149_v21 }
 0x39c   : > { %5975 = vmatpush.bf16.msrb.mxu2 %v12140_v58  ;;  %6001 = vmatpush.bf16.msra.mxu0 %v12144_v42  ;;  %v12117_v58 = vld [vmem:[#allocation13 + $0x238] sm:$0xf0]  ;;  %v12116_v42 = vor.u32 %v14510_v50, %v12115_v37  ;;  %v13031_v37 = vld [vmem:[#allocation15 + $0x540] sm:$0xf] }
 0x39d   : > { %v12120_v40 = vor.u32 %v14506_v51, %v12117_v58  ;;  %v14741_v51 = vld [vmem:[#allocation15 + $0x56c] sm:$0xf0] }
 0x3a0   : > { %5976 = vmatpush.bf16.msrb.mxu2 %v12108_v33  ;;  %6002 = vmatpush.bf16.msra.mxu0 %v12112_v38 }
 0x3a3   : > { %5977 = vmatmul.bf16.vlgmr.msrb.gmra.mxu2 %v16022_v29  ;;  %6003 = vmatmul.bf16.vlgmr.msra.gmra.mxu0 %v16022_v29 }
 0x3a4   : > { %6021 = vmatpush.bf16.msra.mxu2 %v12340_v23  ;;  %6047 = vmatpush.bf16.msrb.mxu0 %v12344_v8 }
 0x3a8   : > { %6022 = vmatpush.bf16.msra.mxu2 %v12308_v25  ;;  %6048 = vmatpush.bf16.msrb.mxu0 %v12312_v10 }
 0x3ac   : > { %6023 = vmatpush.bf16.msra.mxu2 %v12276_v1  ;;  %6049 = vmatpush.bf16.msrb.mxu0 %v12280_v4 }
 0x3b0   : > { %6024 = vmatpush.bf16.msra.mxu2 %v12244_v30  ;;  %6050 = vmatpush.bf16.msrb.mxu0 %v12248_v61 }
 0x3b4   : > { %6025 = vmatpush.bf16.msra.mxu2 %v12212_v41  ;;  %6051 = vmatpush.bf16.msrb.mxu0 %v12216_v63 }
 0x3b8   : > { %6026 = vmatpush.bf16.msra.mxu2 %v12180_v5  ;;  %6052 = vmatpush.bf16.msrb.mxu0 %v12184_v56 }
 0x3bc   : > { %6027 = vmatpush.bf16.msra.mxu2 %v12148_v16  ;;  %6053 = vmatpush.bf16.msrb.mxu0 %v12152_v19  ;;  %v13079_v16 = vld [vmem:[#allocation15 + $0x5a0] sm:$0xf]  ;;  %v14753_v19 = vld [vmem:[#allocation15 + $0x5cc] sm:$0xf0] }
 0x3bd   : > { %v13080_v50 = vor.u32 %v14753_v19, %v13079_v16  ;;  %v14597_v16 = vld [vmem:[#allocation15 + $0xec] sm:$0xf0]  ;;  %v14735_v19 = vld [vmem:[#allocation15 + $0x544] sm:$0xf] }
 0x3c0   : > { %6028 = vmatpush.bf16.msra.mxu2 %v12116_v42  ;;  %6054 = vmatpush.bf16.msrb.mxu0 %v12120_v40  ;;  %v12695_v42 = vld [vmem:[#allocation15 + $0x2a0] sm:$0xf]  ;;  %v14657_v40 = vld [vmem:[#allocation15 + $0x2cc] sm:$0xf0] }
 0x3c3   : > { %6029 = vmatmul.bf16.vlgmr.msra.gmra.mxu2 %v16022_v29  ;;  %6055 = vmatmul.bf16.vlgmr.msrb.gmra.mxu0 %v16022_v29  ;;  %v16038_v29 = vld [vmem:[%s16384_s9] sm:$0xff] }
 0x3d3   : > { %v5861_v48 = vpop.f32.mrf.mxu1 }
 0x3d9   : > { %v5887_v60 = vpop.f32.mrf.mxu3 }
 0x3db   : > { %v5863_v14 = vpop.f32.mrf.mxu1 }
 0x3dc   : > { %v12647_v14 = vld [vmem:[#allocation15 + $0x240] sm:$0xf] }
 0x3e1   : > { %v5889_v7 = vpop.f32.mrf.mxu3 }
 0x3e2   : > { %v14645_v7 = vld [vmem:[#allocation15 + $0x26c] sm:$0xf0] }
 0x3e3   : > { %v5913_v26 = vpop.f32.mrf.mxu1 }
 0x3e9   : > { %v5939_v11 = vpop.f32.mrf.mxu3 }
 0x3eb   : > { %v5915_v12 = vpop.f32.mrf.mxu1 }
 0x3ec   : > { %v12648_v12 = vor.u32 %v14645_v7, %v12647_v14  ;;  %v12407_v7 = vld [vmem:[#allocation15 + $0x60] sm:$0xf] }
 0x3f1   : > { %v5941_v33 = vpop.f32.mrf.mxu3 }
 0x3f3   : > { %v5965_v38 = vpop.f32.mrf.mxu1 }
 0x3f9   : > { %v5991_v23 = vpop.f32.mrf.mxu3 }
 0x3fb   : > { %v5967_v8 = vpop.f32.mrf.mxu1 }
 0x3ff   : > { %v5900_v9 = vpop.f32.mrf.mxu0 }
 0x400   : > { %v5901_v15 = vadd.f32 %v5900_v9, %v5887_v60  ;;  %v12696_v60 = vor.u32 %v14657_v40, %v12695_v42  ;;  %v12887_v9 = vld [vmem:[#allocation15 + $0x420] sm:$0xf] }
 0x401   : > { %v5993_v54 = vpop.f32.mrf.mxu3 }
 0x402   : > { %v6061_v34 = vpack.c.bf16 %v5901_v15, %v5901_v15  ;;  %v14705_v15 = vld [vmem:[#allocation15 + $0x44c] sm:$0xf0] }
 0x404   : > { %v6082_v25 = vsel %vm6077_vm13, %v6061_v34, 0  ;;  %v12888_v34 = vor.u32 %v14705_v15, %v12887_v9  ;;  %v13799_v9 = vld [vmem:[#allocation15 + $0xb40] sm:$0xf]  ;;  %v16063_v15 = vld [vmem:[#allocation4] sm:$0xf] }
 0x405   : > { %v5874_v10 = vpop.f32.mrf.mxu2  ;;  %6123 = vmatpush.bf16.msrb.mxu2 %v6082_v25 }
 0x406   : > { %v5875_v24 = vadd.f32 %v5874_v10, %v5861_v48  ;;  %v13032_v48 = vor.u32 %v14741_v51, %v13031_v37  ;;  %v13463_v51 = vld [vmem:[#allocation15 + $0x8a0] sm:$0xf] }
 0x407   : > { %v5902_v0 = vpop.f32.mrf.mxu0 }
 0x408   : > { %v6060_v55 = vpack.c.bf16 %v5875_v24, %v5875_v24  ;;  %12350 = vmatmul.msk.bf16.vlgmr.msrb.gmra.mxu2 %vm6073_vm14, %v16038_v29 }
 0x40a   : > { %v6079_v47 = vsel %vm6077_vm13, %v6060_v55, 0 }
 0x40b   : > { %6109 = vmatpush.bf16.msrb.mxu1 %v6079_v47 }
 0x40d   : > { %v5876_v1 = vpop.f32.mrf.mxu2 }
 0x40e   : > { %12349 = vmatmul.msk.bf16.vlgmr.msrb.gmra.mxu1 %vm6073_vm14, %v16038_v29 }
 0x40f   : > { %v5952_v4 = vpop.f32.mrf.mxu0 }
 0x410   : > { %v5953_v52 = vadd.f32 %v5952_v4, %v5939_v11  ;;  %v14729_v11 = vld [vmem:[#allocation15 + $0x50c] sm:$0xf0] }
 0x412   : > { %v6063_v18 = vpack.c.bf16 %v5953_v52, %v5953_v52 }
 0x414   : > { %v6088_v46 = vsel %vm6077_vm13, %v6063_v18, 0  ;;  %v6017_v22 = vpop.f32.mrf.mxu1  ;;  %v12599_v18 = vld [vmem:[#allocation15 + $0x1e0] sm:$0xf] }
 0x415   : > { %v5926_v30 = vpop.f32.mrf.mxu2  ;;  %6151 = vmatpush.bf16.msra.mxu2 %v6088_v46  ;;  %v14633_v46 = vld [vmem:[#allocation15 + $0x20c] sm:$0xf0] }
 0x416   : > { %v5927_v61 = vadd.f32 %v5926_v30, %v5913_v26  ;;  %v12983_v26 = vld [vmem:[#allocation15 + $0x4e0] sm:$0xf] }
 0x417   : > { %v5954_v35 = vpop.f32.mrf.mxu0  ;;  %v12984_v33 = vor.u32 %v14729_v11, %v12983_v26  ;;  %v12839_v30 = vld [vmem:[#allocation15 + $0x3c0] sm:$0xf]  ;;  %v14585_v26 = vld [vmem:[#allocation15 + $0x8c] sm:$0xf0] }
 0x418   : > { %v6062_v17 = vpack.c.bf16 %v5927_v61, %v5927_v61  ;;  %12352 = vmatmul.msk.bf16.vlgmr.msra.gmra.mxu2 %vm6073_vm14, %v16038_v29  ;;  %v12600_v61 = vor.u32 %v14633_v46, %v12599_v18  ;;  %v14693_v35 = vld [vmem:[#allocation15 + $0x3ec] sm:$0xf0]  ;;  %v12408_v11 = vor.u32 %v14585_v26, %v12407_v7  ;;  %v13367_v46 = vld [vmem:[#allocation15 + $0x7e0] sm:$0xf] }
 0x41a   : > { %v6085_v53 = vsel %vm6077_vm13, %v6062_v17, 0  ;;  %v6043_v43 = vpop.f32.mrf.mxu3  ;;  %v12840_v17 = vor.u32 %v14693_v35, %v12839_v30  ;;  %v14825_v30 = vld [vmem:[#allocation15 + $0x80c] sm:$0xf0]  ;;  %v4571_v35 = vperm.slane %v16063_v15, 0 }
 0x41b   : > { %6137 = vmatpush.bf16.msra.mxu1 %v6085_v53  ;;  %v14621_v53 = vld [vmem:[#allocation15 + $0x1ac] sm:$0xf0] }
 0x41c   : > { %v6019_v41 = vpop.f32.mrf.mxu1 }
 0x41d   : > { %v5928_v63 = vpop.f32.mrf.mxu2 }
 0x41e   : > { %12351 = vmatmul.msk.bf16.vlgmr.msra.gmra.mxu1 %vm6073_vm14, %v16038_v29  ;;  %v14681_v63 = vld [vmem:[#allocation15 + $0x38c] sm:$0xf0] }
 0x420   : > { %v6004_v36 = vpop.f32.mrf.mxu0 }
 0x421   : > { %v6005_v13 = vadd.f32 %v6004_v36, %v5991_v23  ;;  %v14717_v23 = vld [vmem:[#allocation15 + $0x4ac] sm:$0xf0] }
 0x422   : > { %v6045_v20 = vpop.f32.mrf.mxu3 }
 0x423   : > { %v6065_v27 = vpack.c.bf16 %v6005_v13, %v6005_v13  ;;  %v12503_v13 = vld [vmem:[#allocation15 + $0x120] sm:$0xf]  ;;  %v14609_v20 = vld [vmem:[#allocation15 + $0x14c] sm:$0xf0] }
 0x425   : > { %v6094_v5 = vsel %vm6077_vm13, %v6065_v27, 0  ;;  %v12743_v27 = vld [vmem:[#allocation15 + $0x300] sm:$0xf] }
 0x426   : > { %v5978_v56 = vpop.f32.mrf.mxu2  ;;  %6179 = vmatpush.bf16.msra.mxu0 %v6094_v5  ;;  %v14669_v5 = vld [vmem:[#allocation15 + $0x32c] sm:$0xf0] }
 0x427   : > { %v5979_v31 = vadd.f32 %v5978_v56, %v5965_v38  ;;  %v12935_v38 = vld [vmem:[#allocation15 + $0x480] sm:$0xf]  ;;  %v14747_v56 = vld [vmem:[#allocation15 + $0x5a4] sm:$0xf] }
 0x428   : > { %v6006_v57 = vpop.f32.mrf.mxu0  ;;  %v12936_v8 = vor.u32 %v14717_v23, %v12935_v38  ;;  %v13415_v23 = vld [vmem:[#allocation15 + $0x840] sm:$0xf] }
 0x429   : > { %v6064_v59 = vpack.c.bf16 %v5979_v31, %v5979_v31  ;;  %12354 = vmatmul.msk.bf16.vlgmr.msra.gmra.mxu0 %vm6073_vm14, %v16038_v29  ;;  %v13081_v31 = vld [vmem:[#allocation15 + $0x5d0] sm:$0xf0]  ;;  %v12744_v57 = vor.u32 %v14669_v5, %v12743_v27  ;;  %v13319_v27 = vld [vmem:[#allocation15 + $0x780] sm:$0xf]  ;;  %v4579_v5 = vadd.f32 %v4571_v35, %v15903_v39 }
 0x42a   : > { %8552 = vmatpush.bf16.msrb.mxu0 %v13080_v50  ;;  %v13033_v50 = vld [vmem:[#allocation15 + $0x570] sm:$0xf0] }
 0x42b   : > { %v6091_v21 = vsel %vm6077_vm13, %v6064_v59, 0  ;;  %v13084_v59 = vor.u32 %v14747_v56, %v13081_v31  ;;  %v13036_v42 = vor.u32 %v14735_v19, %v13033_v50  ;;  %v14627_v19 = vld [vmem:[#allocation15 + $0x1e4] sm:$0xf] }
 0x42c   : > { %6165 = vmatpush.bf16.msrb.mxu3 %v6091_v21  ;;  %v12455_v21 = vld [vmem:[#allocation15 + $0xc0] sm:$0xf]  ;;  %v14687_v50 = vld [vmem:[#allocation15 + $0x3c4] sm:$0xf] }
 0x42d   : > { %v12456_v37 = vor.u32 %v14597_v16, %v12455_v21  ;;  %v14909_v21 = vld [vmem:[#allocation15 + $0xaac] sm:$0xf0] }
 0x42e   : > { %v5980_v58 = vpop.f32.mrf.mxu2  ;;  %8553 = vmatpush.bf16.msrb.mxu0 %v13032_v48  ;;  %v13847_v48 = vld [vmem:[#allocation15 + $0xba0] sm:$0xf] }
 0x42f   : > { %12353 = vmatmul.msk.bf16.vlgmr.msrb.gmra.mxu3 %vm6073_vm14, %v16038_v29  ;;  %v14849_v58 = vld [vmem:[#allocation15 + $0x8cc] sm:$0xf0] }
 0x430   : > { %8538 = vmatpush.bf16.msra.mxu3 %v12696_v60  ;;  %v13464_v40 = vor.u32 %v14849_v58, %v13463_v51  ;;  %v14945_v60 = vld [vmem:[#allocation15 + $0xbcc] sm:$0xf0]  ;;  %v12841_v58 = vld [vmem:[#allocation15 + $0x3f0] sm:$0xf0] }
 0x431   : > { %v13848_v14 = vor.u32 %v14945_v60, %v13847_v48  ;;  %v12844_v39 = vor.u32 %v14687_v50, %v12841_v58  ;;  %v14897_v60 = vld [vmem:[#allocation15 + $0xa4c] sm:$0xf0]  ;;  %v13511_v50 = vld [vmem:[#allocation15 + $0x900] sm:$0xf] }
 0x432   : > { %8554 = vmatpush.bf16.msrb.mxu0 %v12984_v33  ;;  %v12985_v33 = vld [vmem:[#allocation15 + $0x510] sm:$0xf0] }
 0x434   : > { %8539 = vmatpush.bf16.msra.mxu3 %v12648_v12  ;;  %v14723_v12 = vld [vmem:[#allocation15 + $0x4e4] sm:$0xf] }
 0x435   : > { %v12988_v38 = vor.u32 %v14723_v12, %v12985_v33 }
 0x436   : > { %8555 = vmatpush.bf16.msrb.mxu0 %v12936_v8  ;;  %v14837_v8 = vld [vmem:[#allocation15 + $0x86c] sm:$0xf0] }
 0x438   : > { %8540 = vmatpush.bf16.msra.mxu3 %v12600_v61  ;;  %v13751_v61 = vld [vmem:[#allocation15 + $0xae0] sm:$0xf] }
 0x43a   : > { %8556 = vmatpush.bf16.msrb.mxu0 %v12888_v34  ;;  %v13416_v34 = vor.u32 %v14837_v8, %v13415_v23  ;;  %v14615_v23 = vld [vmem:[#allocation15 + $0x184] sm:$0xf]  ;;  %v12553_v8 = vld [vmem:[#allocation15 + $0x1b0] sm:$0xf0] }
 0x43e   : > { %8557 = vmatpush.bf16.msrb.mxu0 %v12840_v17  ;;  %v4572_v17 = vperm.slane %v16063_v15, 1 }
 0x440   : > { %v6056_v54 = vpop.f32.mrf.mxu0  ;;  %v4580_v56 = vadd.f32 %v4572_v17, %v15927_v45  ;;  %v13655_v45 = vld [vmem:[#allocation15 + $0xa20] sm:$0xf] }
 0x441   : > { %v6057_v25 = vadd.f32 %v6056_v54, %v6043_v43  ;;  %v12791_v43 = vld [vmem:[#allocation15 + $0x360] sm:$0xf]  ;;  %v14933_v54 = vld [vmem:[#allocation15 + $0xb6c] sm:$0xf0]  ;;  %v13656_v26 = vor.u32 %v14897_v60, %v13655_v45  ;;  %v13849_v45 = vld [vmem:[#allocation15 + $0xbd0] sm:$0xf0] }
 0x442   : > { %v12792_v36 = vor.u32 %v14681_v63, %v12791_v43  ;;  %v12649_v63 = vld [vmem:[#allocation15 + $0x270] sm:$0xf0]  ;;  %v4588_v7 = vmax.f32 %v4580_v56, 0.0  ;;  %v14579_v60 = vld [vmem:[#allocation15 + $0x64] sm:$0xf] }
 0x443   : > { %v6067_v10 = vpack.c.bf16 %v6057_v25, %v6057_v25  ;;  %v13800_v25 = vor.u32 %v14933_v54, %v13799_v9  ;;  %v14675_v9 = vld [vmem:[#allocation15 + $0x364] sm:$0xf]  ;;  %v12793_v54 = vld [vmem:[#allocation15 + $0x390] sm:$0xf0] }
 0x444   : > { %8558 = vmatpush.bf16.msrb.mxu0 %v12792_v36  ;;  %v14699_v36 = vld [vmem:[#allocation15 + $0x424] sm:$0xf] }
 0x445   : > { %v6100_v24 = vsel %vm6077_vm13, %v6067_v10, 0  ;;  %v12359_v10 = vld [vmem:[#allocation15] sm:$0xf] }
 0x446   : > { %v6030_v0 = vpop.f32.mrf.mxu2  ;;  %6207 = vmatpush.bf16.msrb.mxu2 %v6100_v24  ;;  %v14573_v24 = vld [vmem:[#allocation15 + $0x2c] sm:$0xf0] }
 0x447   : > { %v6031_v55 = vadd.f32 %v6030_v0, %v6017_v22  ;;  %v12551_v22 = vld [vmem:[#allocation15 + $0x180] sm:$0xf]  ;;  %v14651_v0 = vld [vmem:[#allocation15 + $0x2a4] sm:$0xf] }
 0x448   : > { %v6058_v47 = vpop.f32.mrf.mxu0  ;;  %v12552_v41 = vor.u32 %v14621_v53, %v12551_v22  ;;  %8559 = vmatpush.bf16.msrb.mxu0 %v12744_v57  ;;  %v13368_v22 = vor.u32 %v14825_v30, %v13367_v46  ;;  %v14921_v53 = vld [vmem:[#allocation15 + $0xb0c] sm:$0xf0]  ;;  %v14603_v30 = vld [vmem:[#allocation15 + $0x124] sm:$0xf] }
 0x449   : > { %v6066_v1 = vpack.c.bf16 %v6031_v55, %v6031_v55  ;;  %12356 = vmatmul.msk.bf16.vlgmr.msrb.gmra.mxu2 %vm6073_vm14, %v16038_v29  ;;  %v12360_v55 = vor.u32 %v14573_v24, %v12359_v10  ;;  %v12697_v47 = vld [vmem:[#allocation15 + $0x2d0] sm:$0xf0]  ;;  %v13752_v43 = vor.u32 %v14921_v53, %v13751_v61  ;;  %v14789_v10 = vld [vmem:[#allocation15 + $0x6ec] sm:$0xf0]  ;;  %v4583_v24 = vadd.f32 %v4571_v35, %v15905_v62  ;;  %v13175_v35 = vld [vmem:[#allocation15 + $0x660] sm:$0xf] }
 0x44a   : > { %8541 = vmatpush.bf16.msra.mxu3 %v12552_v41  ;;  %8580 = vmatpush.bf16.msra.mxu2 %v13848_v14  ;;  %v14639_v41 = vld [vmem:[#allocation15 + $0x244] sm:$0xf]  ;;  %v4587_v14 = vmax.f32 %v4579_v5, 0.0  ;;  %v12505_v61 = vld [vmem:[#allocation15 + $0x150] sm:$0xf0] }
 0x44b   : > { %v6097_v4 = vsel %vm6077_vm13, %v6066_v1, 0  ;;  %v14711_v1 = vld [vmem:[#allocation15 + $0x484] sm:$0xf]  ;;  %v12508_v62 = vor.u32 %v14603_v30, %v12505_v61  ;;  %v4591_v53 = vmax.f32 %v4583_v24, 0.0  ;;  %v13369_v61 = vld [vmem:[#allocation15 + $0x810] sm:$0xf0] }
 0x44c   : > { %6193 = vmatpush.bf16.msrb.mxu1 %v6097_v4  ;;  %8608 = vmatpush.bf16.msra.mxu0 %v13084_v59  ;;  %v12937_v4 = vld [vmem:[#allocation15 + $0x4b0] sm:$0xf0]  ;;  %v13703_v59 = vld [vmem:[#allocation15 + $0xa80] sm:$0xf]  ;;  %v14819_v30 = vld [vmem:[#allocation15 + $0x7e4] sm:$0xf] }
 0x44d   : > { %v12940_v18 = vor.u32 %v14711_v1, %v12937_v4  ;;  %v13704_v16 = vor.u32 %v14909_v21, %v13703_v59  ;;  %v13607_v1 = vld [vmem:[#allocation15 + $0x9c0] sm:$0xf]  ;;  %v14885_v4 = vld [vmem:[#allocation15 + $0x9ec] sm:$0xf0] }
 0x44e   : > { %v6032_v52 = vpop.f32.mrf.mxu2  ;;  %8581 = vmatpush.bf16.msra.mxu2 %v13800_v25  ;;  %v13223_v25 = vld [vmem:[#allocation15 + $0x6c0] sm:$0xf]  ;;  %v13608_v46 = vor.u32 %v14885_v4, %v13607_v1 }
 0x44f   : > { %12355 = vmatmul.msk.bf16.vlgmr.msrb.gmra.mxu1 %vm6073_vm14, %v16038_v29  ;;  %v12504_v29 = vor.u32 %v14609_v20, %v12503_v13  ;;  %v12700_v52 = vor.u32 %v14651_v0, %v12697_v47  ;;  %v12652_v13 = vor.u32 %v14639_v41, %v12649_v63  ;;  %v12889_v20 = vld [vmem:[#allocation15 + $0x450] sm:$0xf0]  ;;  %v4584_v0 = vadd.f32 %v4572_v17, %v15930_v3  ;;  %v14777_v17 = vld [vmem:[#allocation15 + $0x68c] sm:$0xf0]  ;;  %v13127_v59 = vld [vmem:[#allocation15 + $0x600] sm:$0xf] }
 0x450   : > { %8566 = vmatpush.bf16.msra.mxu1 %v13464_v40  ;;  %8609 = vmatpush.bf16.msra.mxu0 %v13036_v42  ;;  %v12892_v31 = vor.u32 %v14699_v36, %v12889_v20  ;;  %v13271_v42 = vld [vmem:[#allocation15 + $0x720] sm:$0xf]  ;;  %v14801_v40 = vld [vmem:[#allocation15 + $0x74c] sm:$0xf0]  ;;  %v13224_v47 = vor.u32 %v14789_v10, %v13223_v25  ;;  %v12745_v3 = vld [vmem:[#allocation15 + $0x330] sm:$0xf0]  ;;  %v13176_v63 = vor.u32 %v14777_v17, %v13175_v35 }
 0x451   : > { %8542 = vmatpush.bf16.msra.mxu3 %v12504_v29  ;;  %v14813_v29 = vld [vmem:[#allocation15 + $0x7ac] sm:$0xf0]  ;;  %v13272_v48 = vor.u32 %v14801_v40, %v13271_v42  ;;  %v13559_v36 = vld [vmem:[#allocation15 + $0x960] sm:$0xf]  ;;  %v14843_v40 = vld [vmem:[#allocation15 + $0x8a4] sm:$0xf] }
 0x452   : > { %8582 = vmatpush.bf16.msra.mxu2 %v13752_v43  ;;  %v13320_v57 = vor.u32 %v14813_v29, %v13319_v27  ;;  %v4592_v43 = vmax.f32 %v4584_v0, 0.0  ;;  %v13801_v25 = vld [vmem:[#allocation15 + $0xb70] sm:$0xf0] }
 0x454   : > { %8610 = vmatpush.bf16.msra.mxu0 %v12988_v38  ;;  %8567 = vmatpush.bf16.msra.mxu1 %v13416_v34  ;;  %v12556_v34 = vor.u32 %v14615_v23, %v12553_v8  ;;  %v13417_v23 = vld [vmem:[#allocation15 + $0x870] sm:$0xf0]  ;;  %v14927_v8 = vld [vmem:[#allocation15 + $0xb44] sm:$0xf] }
 0x455   : > { %8543 = vmatpush.bf16.msra.mxu3 %v12456_v37  ;;  %v12601_v37 = vld [vmem:[#allocation15 + $0x210] sm:$0xf0]  ;;  %v13804_v0 = vor.u32 %v14927_v8, %v13801_v25  ;;  %v14742_v8 = vld [vmem:[#allocation15 + $0x574] sm:$0xf0]  ;;  %v14855_v25 = vld [vmem:[#allocation15 + $0x904] sm:$0xf] }
 0x456   : > { %v12604_v51 = vor.u32 %v14627_v19, %v12601_v37  ;;  %8583 = vmatpush.bf16.msra.mxu2 %v13704_v16  ;;  %v14765_v37 = vld [vmem:[#allocation15 + $0x62c] sm:$0xf0] }
 0x457   : > { %v13128_v58 = vor.u32 %v14765_v37, %v13127_v59  ;;  %v13657_v59 = vld [vmem:[#allocation15 + $0xa50] sm:$0xf0] }
 0x458   : > { %8611 = vmatpush.bf16.msra.mxu0 %v12940_v18  ;;  %8568 = vmatpush.bf16.msra.mxu1 %v13368_v22  ;;  %v4574_v18 = vperm.slane %v16063_v15, 3  ;;  %v14663_v22 = vld [vmem:[#allocation15 + $0x304] sm:$0xf] }
 0x459   : > { %8544 = vmatpush.bf16.msra.mxu3 %v12408_v11  ;;  %v12748_v41 = vor.u32 %v14663_v22, %v12745_v3  ;;  %v14915_v22 = vld [vmem:[#allocation15 + $0xae4] sm:$0xf]  ;;  %v13753_v3 = vld [vmem:[#allocation15 + $0xb10] sm:$0xf0] }
 0x45a   : > { %8584 = vmatpush.bf16.msra.mxu2 %v13656_v26  ;;  %v4582_v16 = vadd.f32 %v4574_v18, %v15971_v44  ;;  %v12409_v26 = vld [vmem:[#allocation15 + $0x90] sm:$0xf0]  ;;  %v13756_v35 = vor.u32 %v14915_v22, %v13753_v3  ;;  %v14718_v22 = vld [vmem:[#allocation15 + $0x4b4] sm:$0xf0] }
 0x45c   : > { %8612 = vmatpush.bf16.msra.mxu0 %v12892_v31  ;;  %8569 = vmatpush.bf16.msra.mxu1 %v13320_v57  ;;  %v14591_v31 = vld [vmem:[#allocation15 + $0xc4] sm:$0xf]  ;;  %v12457_v57 = vld [vmem:[#allocation15 + $0xf0] sm:$0xf0] }
 0x45d   : > { %8545 = vmatpush.bf16.msra.mxu3 %v12360_v55  ;;  %v12796_v55 = vor.u32 %v14675_v9, %v12793_v54  ;;  %v12460_v19 = vor.u32 %v14591_v31, %v12457_v57  ;;  %v14891_v57 = vld [vmem:[#allocation15 + $0xa24] sm:$0xf] }
 0x45e   : > { %8585 = vmatpush.bf16.msra.mxu2 %v13608_v46  ;;  %v4586_v46 = vadd.f32 %v4574_v18, %v15973_v28 }
 0x460   : > { %8613 = vmatpush.bf16.msra.mxu0 %v12844_v39  ;;  %8570 = vmatpush.bf16.msra.mxu1 %v13272_v48  ;;  %v13465_v39 = vld [vmem:[#allocation15 + $0x8d0] sm:$0xf0]  ;;  %v14939_v48 = vld [vmem:[#allocation15 + $0xba4] sm:$0xf] }
 0x461   : > { %8594 = vmatpush.bf16.msrb.mxu3 %v12700_v52  ;;  %v4573_v52 = vperm.slane %v16063_v15, 2 }
 0x463   : > { %v4581_v21 = vadd.f32 %v4573_v52, %v15951_v6  ;;  %v13468_v6 = vor.u32 %v14843_v40, %v13465_v39  ;;  %v4585_v4 = vadd.f32 %v4573_v52, %v15953_v49  ;;  %v14807_v49 = vld [vmem:[#allocation15 + $0x784] sm:$0xf]  ;;  %v13321_v52 = vld [vmem:[#allocation15 + $0x7b0] sm:$0xf0]  ;;  %v14754_v40 = vld [vmem:[#allocation15 + $0x5d4] sm:$0xf0] }
 0x464   : > { %8614 = vmatpush.bf16.msra.mxu0 %v12796_v55  ;;  %8571 = vmatpush.bf16.msra.mxu1 %v13224_v47  ;;  %v14567_v55 = vld [vmem:[#allocation15 + $0x4] sm:$0xf]  ;;  %v12361_v47 = vld [vmem:[#allocation15 + $0x30] sm:$0xf0]  ;;  %v13324_v18 = vor.u32 %v14807_v49, %v13321_v52  ;;  %v12655_v49 = vld [vmem:[#allocation15 + $0x248] sm:$0xf] }
 0x465   : > { %8595 = vmatpush.bf16.msrb.mxu3 %v12652_v13  ;;  %v14873_v13 = vld [vmem:[#allocation15 + $0x98c] sm:$0xf0]  ;;  %v4589_v44 = vmax.f32 %v4581_v21, 0.0  ;;  %v12364_v1 = vor.u32 %v14567_v55, %v12361_v47  ;;  %v4593_v17 = vmax.f32 %v4585_v4, 0.0  ;;  %v13660_v21 = vor.u32 %v14891_v57, %v13657_v59  ;;  %v12991_v47 = vld [vmem:[#allocation15 + $0x4e8] sm:$0xf] }
 0x466   : > { %v13560_v29 = vor.u32 %v14873_v13, %v13559_v36  ;;  %v14622_v57 = vld [vmem:[#allocation15 + $0x1b4] sm:$0xf0]  ;;  %v12799_v59 = vld [vmem:[#allocation15 + $0x368] sm:$0xf] }
 0x468   : > { %8615 = vmatpush.bf16.msra.mxu0 %v12748_v41  ;;  %8572 = vmatpush.bf16.msra.mxu1 %v13176_v63  ;;  %v13705_v41 = vld [vmem:[#allocation15 + $0xab0] sm:$0xf0] }
 0x469   : > { %8596 = vmatpush.bf16.msrb.mxu3 %v12604_v51  ;;  %8586 = vmatpush.bf16.msra.mxu2 %v13560_v29  ;;  %v14861_v51 = vld [vmem:[#allocation15 + $0x92c] sm:$0xf0]  ;;  %v13273_v29 = vld [vmem:[#allocation15 + $0x750] sm:$0xf0] }
 0x46a   : > { %v13512_v42 = vor.u32 %v14861_v51, %v13511_v50  ;;  %v14879_v50 = vld [vmem:[#allocation15 + $0x9c4] sm:$0xf]  ;;  %v13609_v51 = vld [vmem:[#allocation15 + $0x9f0] sm:$0xf0] }
 0x46c   : > { %8573 = vmatpush.bf16.msra.mxu1 %v13128_v58  ;;  %v13612_v58 = vor.u32 %v14879_v50, %v13609_v51 }
 0x46d   : > { %8597 = vmatpush.bf16.msrb.mxu3 %v12556_v34  ;;  %8587 = vmatpush.bf16.msra.mxu2 %v13512_v42  ;;  %v13087_v42 = vld [vmem:[#allocation15 + $0x5a8] sm:$0xf] }
 0x470   : > { %8622 = vmatpush.bf16.msrb.mxu1 %v13468_v6  ;;  %v14771_v6 = vld [vmem:[#allocation15 + $0x664] sm:$0xf] }
 0x471   : > { %8598 = vmatpush.bf16.msrb.mxu3 %v12508_v62  ;;  %v13372_v62 = vor.u32 %v14819_v30, %v13369_v61  ;;  %v14658_v30 = vld [vmem:[#allocation15 + $0x2d4] sm:$0xf0]  ;;  %v12943_v61 = vld [vmem:[#allocation15 + $0x488] sm:$0xf] }
 0x475   : > { %8599 = vmatpush.bf16.msrb.mxu3 %v12460_v19  ;;  %v13225_v19 = vld [vmem:[#allocation15 + $0x6f0] sm:$0xf0] }
 0x48b   : > { %v6111_v11 = vpop.f32.mrf.mxu1  ;;  %v6125_v12 = vpop.f32.mrf.mxu2 }
 0x48c   : > { %v16077_v33 = vmul.f32 %v6111_v11, %v4587_v14  ;;  %v16079_v38 = vmul.f32 %v6125_v12, %v4588_v7  ;;  %v4590_v14 = vmax.f32 %v4582_v16, 0.0  ;;  %v13852_v7 = vor.u32 %v14939_v48, %v13849_v45  ;;  %v14831_v12 = vld [vmem:[#allocation15 + $0x844] sm:$0xf]  ;;  %v13177_v48 = vld [vmem:[#allocation15 + $0x690] sm:$0xf0] }
 0x48d   : > { %v12412_v11 = vor.u32 %v14579_v60, %v12409_v26  ;;  %v13420_v54 = vor.u32 %v14831_v12, %v13417_v23  ;;  %v14783_v16 = vld [vmem:[#allocation15 + $0x6c4] sm:$0xf]  ;;  %v13088_v26 = vor.u32 %v14754_v40, %v13087_v42  ;;  %v13039_v23 = vld [vmem:[#allocation15 + $0x548] sm:$0xf]  ;;  %v14670_v40 = vld [vmem:[#allocation15 + $0x334] sm:$0xf0] }
 0x48e   : > { %9460 = vst [vmem:[%s16075_s15] sm:$0xff] %v16077_v33  ;;  %8636 = vmatpush.bf16.msrb.mxu2 %v13852_v7  ;;  %v13228_v37 = vor.u32 %v14783_v16, %v13225_v19  ;;  %v13561_v7 = vld [vmem:[#allocation15 + $0x990] sm:$0xf0]  ;;  %v12751_v42 = vld [vmem:[#allocation15 + $0x308] sm:$0xf] }
 0x48f   : > { %9461 = vst [vmem:[%s16075_s15 + $0x8] sm:$0xff] %v16079_v38  ;;  %8600 = vmatpush.bf16.msrb.mxu3 %v12412_v11  ;;  %8623 = vmatpush.bf16.msrb.mxu1 %v13420_v54  ;;  %v13129_v54 = vld [vmem:[#allocation15 + $0x630] sm:$0xf0] }
 0x492   : > { %8637 = vmatpush.bf16.msrb.mxu2 %v13804_v0  ;;  %v13040_v0 = vor.u32 %v14742_v8, %v13039_v23  ;;  %v14850_v8 = vld [vmem:[#allocation15 + $0x8d4] sm:$0xf0] }
 0x493   : > { %v6113_v20 = vpop.f32.mrf.mxu1  ;;  %v6127_v27 = vpop.f32.mrf.mxu2  ;;  %8601 = vmatpush.bf16.msrb.mxu3 %v12364_v1  ;;  %8624 = vmatpush.bf16.msrb.mxu1 %v13372_v62  ;;  %v14730_v1 = vld [vmem:[#allocation15 + $0x514] sm:$0xf0] }
 0x494   : > { %v16089_v5 = vmul.f32 %v6113_v20, %v4591_v53  ;;  %v16091_v56 = vmul.f32 %v6127_v27, %v4592_v43  ;;  %v4594_v53 = vmax.f32 %v4586_v46, 0.0  ;;  %v14903_v43 = vld [vmem:[#allocation15 + $0xa84] sm:$0xf]  ;;  %v12992_v4 = vor.u32 %v14730_v1, %v12991_v47  ;;  %v12703_v46 = vld [vmem:[#allocation15 + $0x2a8] sm:$0xf] }
 0x495   : > { %v13708_v13 = vor.u32 %v14903_v43, %v13705_v41  ;;  %v14795_v27 = vld [vmem:[#allocation15 + $0x724] sm:$0xf] }
 0x496   : > { %9464 = vst [vmem:[%s16075_s15 + $0x20] sm:$0xff] %v16089_v5  ;;  %8638 = vmatpush.bf16.msrb.mxu2 %v13756_v35  ;;  %v13276_v31 = vor.u32 %v14795_v27, %v13273_v29  ;;  %v14694_v27 = vld [vmem:[#allocation15 + $0x3f4] sm:$0xf0] }
 0x497   : > { %9465 = vst [vmem:[%s16075_s15 + $0x28] sm:$0xff] %v16091_v56  ;;  %8625 = vmatpush.bf16.msrb.mxu1 %v13324_v18  ;;  %v14706_v18 = vld [vmem:[#allocation15 + $0x454] sm:$0xf0] }
 0x49a   : > { %8639 = vmatpush.bf16.msrb.mxu2 %v13708_v13  ;;  %v12607_v13 = vld [vmem:[#allocation15 + $0x1e8] sm:$0xf] }
 0x49b   : > { %v6139_v9 = vpop.f32.mrf.mxu1  ;;  %v6153_v34 = vpop.f32.mrf.mxu2  ;;  %8626 = vmatpush.bf16.msrb.mxu1 %v13276_v31  ;;  %v12559_v31 = vld [vmem:[#allocation15 + $0x188] sm:$0xf] }
 0x49c   : > { %v16103_v10 = vmul.f32 %v6139_v9, %v4589_v44  ;;  %v16105_v24 = vmul.f32 %v6153_v34, %v4590_v14  ;;  %v13180_v44 = vor.u32 %v14771_v6, %v13177_v48  ;;  %v14867_v14 = vld [vmem:[#allocation15 + $0x964] sm:$0xf]  ;;  %v12560_v16 = vor.u32 %v14622_v57, %v12559_v31  ;;  %v13089_v6 = vld [vmem:[#allocation15 + $0x5d8] sm:$0xf0] }
 0x49d   : > { %v13564_v11 = vor.u32 %v14867_v14, %v13561_v7  ;;  %v14759_v34 = vld [vmem:[#allocation15 + $0x604] sm:$0xf]  ;;  %v14598_v14 = vld [vmem:[#allocation15 + $0xf4] sm:$0xf0]  ;;  %v14736_v7 = vld [vmem:[#allocation15 + $0x54c] sm:$0xf] }
 0x49e   : > { %9462 = vst [vmem:[%s16075_s15 + $0x10] sm:$0xff] %v16103_v10  ;;  %8640 = vmatpush.bf16.msrb.mxu2 %v13660_v21  ;;  %v14682_v21 = vld [vmem:[#allocation15 + $0x394] sm:$0xf0] }
 0x49f   : > { %9463 = vst [vmem:[%s16075_s15 + $0x18] sm:$0xff] %v16105_v24  ;;  %8627 = vmatpush.bf16.msrb.mxu1 %v13228_v37  ;;  %v12800_v19 = vor.u32 %v14682_v21, %v12799_v59  ;;  %v12511_v37 = vld [vmem:[#allocation15 + $0x128] sm:$0xf]  ;;  %v14640_v59 = vld [vmem:[#allocation15 + $0x24c] sm:$0xf] }
 0x4a0   : > { %v12657_v21 = vld [vmem:[#allocation15 + $0x278] sm:$0xf0] }
 0x4a2   : > { %8641 = vmatpush.bf16.msrb.mxu2 %v13612_v58  ;;  %v14610_v58 = vld [vmem:[#allocation15 + $0x154] sm:$0xf0] }
 0x4a3   : > { %v6141_v15 = vpop.f32.mrf.mxu1  ;;  %v6155_v28 = vpop.f32.mrf.mxu2  ;;  %8628 = vmatpush.bf16.msrb.mxu1 %v13180_v44  ;;  %v12512_v48 = vor.u32 %v14610_v58, %v12511_v37  ;;  %v12463_v44 = vld [vmem:[#allocation15 + $0xc8] sm:$0xf]  ;;  %v14814_v58 = vld [vmem:[#allocation15 + $0x7b4] sm:$0xf0] }
 0x4a4   : > { %v16117_v63 = vmul.f32 %v6141_v15, %v4593_v17  ;;  %v16119_v36 = vmul.f32 %v6155_v28, %v4594_v53  ;;  %v12704_v17 = vor.u32 %v14658_v30, %v12703_v46  ;;  %v12944_v53 = vor.u32 %v14718_v22, %v12943_v61  ;;  %v14646_v15 = vld [vmem:[#allocation15 + $0x274] sm:$0xf0]  ;;  %v12895_v28 = vld [vmem:[#allocation15 + $0x428] sm:$0xf]  ;;  %v14724_v46 = vld [vmem:[#allocation15 + $0x4ec] sm:$0xf] }
 0x4a5   : > { %v12656_v43 = vor.u32 %v14646_v15, %v12655_v49  ;;  %v12896_v41 = vor.u32 %v14706_v18, %v12895_v28  ;;  %v12464_v23 = vor.u32 %v14598_v14, %v12463_v44  ;;  %v12993_v30 = vld [vmem:[#allocation15 + $0x518] sm:$0xf0]  ;;  %v12367_v49 = vld [vmem:[#allocation15 + $0x8] sm:$0xf]  ;;  %v14652_v15 = vld [vmem:[#allocation15 + $0x2ac] sm:$0xf] }
 0x4a6   : > { %9466 = vst [vmem:[%s16075_s15 + $0x30] sm:$0xff] %v16117_v63  ;;  %v6181_v20 = vpop.f32.mrf.mxu0  ;;  %8642 = vmatpush.bf16.msrb.mxu2 %v13564_v11  ;;  %v13471_v11 = vld [vmem:[#allocation15 + $0x8a8] sm:$0xf]  ;;  %v12705_v28 = vld [vmem:[#allocation15 + $0x2d8] sm:$0xf0] }
 0x4a7   : > { %9467 = vst [vmem:[%s16075_s15 + $0x38] sm:$0xff] %v16119_v36  ;;  %v6223_v45 = vadd.f32 %v16079_v38, %v6181_v20  ;;  %v13132_v38 = vor.u32 %v14759_v34, %v13129_v54  ;;  %v14634_v20 = vld [vmem:[#allocation15 + $0x214] sm:$0xf0]  ;;  %v13472_v61 = vor.u32 %v14850_v8, %v13471_v11  ;;  %v14712_v18 = vld [vmem:[#allocation15 + $0x48c] sm:$0xf]  ;;  %v12708_v31 = vor.u32 %v14652_v15, %v12705_v28 }
 0x4a8   : > { %v14946_v34 = vld [vmem:[#allocation15 + $0xbd4] sm:$0xf0]  ;;  %v12849_v44 = vld [vmem:[#allocation15 + $0x3f8] sm:$0xf0]  ;;  %v13567_v28 = vld [vmem:[#allocation15 + $0x968] sm:$0xf] }
 0x4a9   : > { %8629 = vmatpush.bf16.msrb.mxu1 %v13132_v38  ;;  %v14802_v11 = vld [vmem:[#allocation15 + $0x754] sm:$0xf0] }
 0x4aa   : > { %v14898_v8 = vld [vmem:[#allocation15 + $0xa54] sm:$0xf0] }
 0x4ab   : > { %v14778_v15 = vld [vmem:[#allocation15 + $0x694] sm:$0xf0] }
 0x4ae   : > { %v6183_v39 = vpop.f32.mrf.mxu0 }
 0x4af   : > { %v6227_v60 = vadd.f32 %v16091_v56, %v6183_v39  ;;  %v13513_v56 = vld [vmem:[#allocation15 + $0x930] sm:$0xf0]  ;;  %v14748_v39 = vld [vmem:[#allocation15 + $0x5ac] sm:$0xf] }
 0x4b0   : > { %v13516_v55 = vor.u32 %v14855_v25, %v13513_v56  ;;  %v12415_v56 = vld [vmem:[#allocation15 + $0x68] sm:$0xf] }
 0x4b1   : > { %v16127_v12 = vpack.c.bf16 %v6227_v60, %v6223_v45  ;;  %v12752_v45 = vor.u32 %v14670_v40, %v12751_v42  ;;  %v13092_v60 = vor.u32 %v14748_v39, %v13089_v6  ;;  %v13711_v42 = vld [vmem:[#allocation15 + $0xa88] sm:$0xf]  ;;  %v14910_v40 = vld [vmem:[#allocation15 + $0xab4] sm:$0xf0]  ;;  %v12660_v39 = vor.u32 %v14640_v59, %v12657_v21  ;;  %v14743_v59 = vld [vmem:[#allocation15 + $0x57c] sm:$0xf0] }
 0x4b2   : > { %v6167_v9 = vpop.f32.mrf.mxu3  ;;  %8643 = vmatpush.bf16.msrb.mxu2 %v13516_v55  ;;  %v13519_v21 = vld [vmem:[#allocation15 + $0x908] sm:$0xf] }
 0x4b3   : > { %8560 = vmatmul.bf16.vlgmr.msrb.gmra.mxu0 %v16127_v12  ;;  %v6222_v3 = vadd.f32 %v16077_v33, %v6167_v9  ;;  %v12847_v33 = vld [vmem:[#allocation15 + $0x3c8] sm:$0xf] }
 0x4b4   : > { %8664 = vmatpush.bf16.msrb.mxu0 %v13088_v26  ;;  %v12848_v29 = vor.u32 %v14694_v27, %v12847_v33  ;;  %v13041_v26 = vld [vmem:[#allocation15 + $0x578] sm:$0xf0]  ;;  %v13855_v9 = vld [vmem:[#allocation15 + $0xba8] sm:$0xf]  ;;  %v14826_v27 = vld [vmem:[#allocation15 + $0x814] sm:$0xf0] }
 0x4b5   : > { %v13044_v38 = vor.u32 %v14736_v7, %v13041_v26  ;;  %v13856_v22 = vor.u32 %v14946_v34, %v13855_v9  ;;  %v13712_v7 = vor.u32 %v14910_v40, %v13711_v42  ;;  %v13279_v26 = vld [vmem:[#allocation15 + $0x728] sm:$0xf]  ;;  %v14580_v40 = vld [vmem:[#allocation15 + $0x6c] sm:$0xf] }
 0x4b8   : > { %8665 = vmatpush.bf16.msrb.mxu0 %v13040_v0  ;;  %v14586_v0 = vld [vmem:[#allocation15 + $0x94] sm:$0xf0] }
 0x4ba   : > { %v6169_v62 = vpop.f32.mrf.mxu3 }
 0x4bb   : > { %v6226_v35 = vadd.f32 %v16089_v5, %v6169_v62  ;;  %v12608_v5 = vor.u32 %v14634_v20, %v12607_v13  ;;  %v13423_v62 = vld [vmem:[#allocation15 + $0x848] sm:$0xf] }
 0x4bc   : > { %8666 = vmatpush.bf16.msrb.mxu0 %v12992_v4  ;;  %v13375_v20 = vld [vmem:[#allocation15 + $0x7e8] sm:$0xf] }
 0x4bd   : > { %v16132_v52 = vpack.c.bf16 %v6226_v35, %v6222_v3  ;;  %v13376_v37 = vor.u32 %v14826_v27, %v13375_v20  ;;  %v14592_v20 = vld [vmem:[#allocation15 + $0xcc] sm:$0xf]  ;;  %v13135_v27 = vld [vmem:[#allocation15 + $0x608] sm:$0xf] }
 0x4bf   : > { %8546 = vmatmul.bf16.vlgmr.msra.gmra.mxu3 %v16132_v52 }
 0x4c0   : > { %8650 = vmatpush.bf16.msra.mxu3 %v12704_v17  ;;  %8667 = vmatpush.bf16.msrb.mxu0 %v12944_v53  ;;  %v12416_v17 = vor.u32 %v14586_v0, %v12415_v56  ;;  %v13807_v53 = vld [vmem:[#allocation15 + $0xb48] sm:$0xf]  ;;  %v12801_v56 = vld [vmem:[#allocation15 + $0x398] sm:$0xf0]  ;;  %v13280_v0 = vor.u32 %v14802_v11, %v13279_v26 }
 0x4c1   : > { %v13425_v11 = vld [vmem:[#allocation15 + $0x878] sm:$0xf0] }
 0x4c3   : > { %8616 = vmatmul.bf16.vlgmr.msra.gmra.mxu0 %v16127_v12 }
 0x4c4   : > { %8651 = vmatpush.bf16.msra.mxu3 %v12656_v43  ;;  %8668 = vmatpush.bf16.msrb.mxu0 %v12896_v41  ;;  %v12945_v43 = vld [vmem:[#allocation15 + $0x4b8] sm:$0xf0] }
 0x4c5   : > { %v12948_v57 = vor.u32 %v14712_v18, %v12945_v43  ;;  %v14874_v18 = vld [vmem:[#allocation15 + $0x994] sm:$0xf0] }
 0x4c8   : > { %8652 = vmatpush.bf16.msra.mxu3 %v12608_v5  ;;  %8669 = vmatpush.bf16.msrb.mxu0 %v12848_v29  ;;  %v13759_v5 = vld [vmem:[#allocation15 + $0xae8] sm:$0xf]  ;;  %v14922_v29 = vld [vmem:[#allocation15 + $0xb14] sm:$0xf0] }
 0x4cc   : > { %v6195_v50 = vpop.f32.mrf.mxu1  ;;  %v6209_v51 = vpop.f32.mrf.mxu2  ;;  %8653 = vmatpush.bf16.msra.mxu3 %v12560_v16  ;;  %8670 = vmatpush.bf16.msrb.mxu0 %v12800_v19  ;;  %v14700_v16 = vld [vmem:[#allocation15 + $0x42c] sm:$0xf]  ;;  %v12897_v19 = vld [vmem:[#allocation15 + $0x458] sm:$0xf0] }
 0x4cd   : > { %v6224_v55 = vadd.f32 %v16103_v10, %v6195_v50  ;;  %v6225_v47 = vadd.f32 %v16105_v24, %v6209_v51  ;;  %v14838_v10 = vld [vmem:[#allocation15 + $0x874] sm:$0xf0]  ;;  %v13760_v50 = vor.u32 %v14922_v29, %v13759_v5  ;;  %v13327_v51 = vld [vmem:[#allocation15 + $0x788] sm:$0xf]  ;;  %v12900_v6 = vor.u32 %v14700_v16, %v12897_v19  ;;  %v14844_v19 = vld [vmem:[#allocation15 + $0x8ac] sm:$0xf] }
 0x4ce   : > { %v14934_v24 = vld [vmem:[#allocation15 + $0xb74] sm:$0xf0]  ;;  %v13424_v41 = vor.u32 %v14838_v10, %v13423_v62  ;;  %v13328_v14 = vor.u32 %v14814_v58, %v13327_v51  ;;  %v12513_v62 = vld [vmem:[#allocation15 + $0x158] sm:$0xf0]  ;;  %v13568_v29 = vor.u32 %v14874_v18, %v13567_v28  ;;  %v14940_v51 = vld [vmem:[#allocation15 + $0xbac] sm:$0xf] }
 0x4cf   : > { %8602 = vmatmul.bf16.vlgmr.msrb.gmra.mxu3 %v16132_v52  ;;  %v13808_v13 = vor.u32 %v14934_v24, %v13807_v53  ;;  %v12753_v10 = vld [vmem:[#allocation15 + $0x338] sm:$0xf0]  ;;  %v14862_v16 = vld [vmem:[#allocation15 + $0x934] sm:$0xf0]  ;;  %v14904_v28 = vld [vmem:[#allocation15 + $0xa8c] sm:$0xf] }
 0x4d0   : > { %8654 = vmatpush.bf16.msra.mxu3 %v12512_v48  ;;  %8671 = vmatpush.bf16.msrb.mxu0 %v12752_v45  ;;  %v14628_v48 = vld [vmem:[#allocation15 + $0x1ec] sm:$0xf]  ;;  %v12609_v45 = vld [vmem:[#allocation15 + $0x218] sm:$0xf0] }
 0x4d1   : > { %v12612_v9 = vor.u32 %v14628_v48, %v12609_v45  ;;  %v13857_v58 = vld [vmem:[#allocation15 + $0xbd8] sm:$0xf0]  ;;  %v13520_v48 = vor.u32 %v14862_v16, %v13519_v21 }
 0x4d2   : > { %v13713_v18 = vld [vmem:[#allocation15 + $0xab8] sm:$0xf0] }
 0x4d3   : > { %8672 = vmatmul.bf16.vlgmr.msrb.gmra.mxu0 %v16127_v12  ;;  %v13665_v21 = vld [vmem:[#allocation15 + $0xa58] sm:$0xf0] }
 0x4d4   : > { %v6197_v54 = vpop.f32.mrf.mxu1  ;;  %v6211_v25 = vpop.f32.mrf.mxu2  ;;  %8720 = vmatpush.bf16.msra.mxu0 %v13092_v60  ;;  %8655 = vmatpush.bf16.msra.mxu3 %v12464_v23  ;;  %v14688_v60 = vld [vmem:[#allocation15 + $0x3cc] sm:$0xf]  ;;  %v13663_v23 = vld [vmem:[#allocation15 + $0xa28] sm:$0xf] }
 0x4d5   : > { %v6228_v1 = vadd.f32 %v16117_v63, %v6197_v54  ;;  %v6229_v4 = vadd.f32 %v16119_v36, %v6211_v25  ;;  %v12996_v63 = vor.u32 %v14724_v46, %v12993_v30  ;;  %v14574_v36 = vld [vmem:[#allocation15 + $0x34] sm:$0xf0]  ;;  %v12852_v34 = vor.u32 %v14688_v60, %v12849_v44  ;;  %v14616_v54 = vld [vmem:[#allocation15 + $0x18c] sm:$0xf]  ;;  %v12561_v25 = vld [vmem:[#allocation15 + $0x1b8] sm:$0xf0] }
 0x4d6   : > { %v12368_v33 = vor.u32 %v14574_v36, %v12367_v49  ;;  %v14886_v46 = vld [vmem:[#allocation15 + $0x9f4] sm:$0xf0]  ;;  %v12564_v30 = vor.u32 %v14616_v54, %v12561_v25  ;;  %v13095_v49 = vld [vmem:[#allocation15 + $0x5b0] sm:$0xf]  ;;  %v14755_v36 = vld [vmem:[#allocation15 + $0x5dc] sm:$0xf0]  ;;  %v13860_v60 = vor.u32 %v14940_v51, %v13857_v58 }
 0x4d7   : > { %v16142_v3 = vpack.c.bf16 %v6228_v1, %v6224_v55  ;;  %v16144_v35 = vpack.c.bf16 %v6229_v4, %v6225_v47  ;;  %v13664_v55 = vor.u32 %v14898_v8, %v13663_v23  ;;  %v13231_v47 = vld [vmem:[#allocation15 + $0x6c8] sm:$0xf]  ;;  %v14790_v1 = vld [vmem:[#allocation15 + $0x6f4] sm:$0xf0]  ;;  %v12999_v44 = vld [vmem:[#allocation15 + $0x4f0] sm:$0xf] }
 0x4d8   : > { %8721 = vmatpush.bf16.msra.mxu0 %v13044_v38  ;;  %8656 = vmatpush.bf16.msra.mxu3 %v12416_v17  ;;  %v14676_v38 = vld [vmem:[#allocation15 + $0x36c] sm:$0xf]  ;;  %v13615_v4 = vld [vmem:[#allocation15 + $0x9c8] sm:$0xf]  ;;  %v13232_v53 = vor.u32 %v14790_v1, %v13231_v47  ;;  %v13809_v8 = vld [vmem:[#allocation15 + $0xb78] sm:$0xf0] }
 0x4d9   : > { %8574 = vmatmul.bf16.vlgmr.msra.gmra.mxu1 %v16142_v3  ;;  %8588 = vmatmul.bf16.vlgmr.msra.gmra.mxu2 %v16144_v35  ;;  %v14664_v17 = vld [vmem:[#allocation15 + $0x30c] sm:$0xf]  ;;  %v13616_v24 = vor.u32 %v14886_v46, %v13615_v4  ;;  %v12711_v25 = vld [vmem:[#allocation15 + $0x2b0] sm:$0xf]  ;;  %v14719_v47 = vld [vmem:[#allocation15 + $0x4bc] sm:$0xf0] }
 0x4da   : > { %8678 = vmatpush.bf16.msra.mxu1 %v13472_v61  ;;  %8692 = vmatpush.bf16.msra.mxu2 %v13856_v22  ;;  %v12804_v61 = vor.u32 %v14676_v38, %v12801_v56  ;;  %v14604_v22 = vld [vmem:[#allocation15 + $0x12c] sm:$0xf]  ;;  %v14659_v38 = vld [vmem:[#allocation15 + $0x2dc] sm:$0xf0]  ;;  %v13377_v46 = vld [vmem:[#allocation15 + $0x818] sm:$0xf0] }
 0x4db   : > { %v12516_v43 = vor.u32 %v14604_v22, %v12513_v62  ;;  %v14928_v23 = vld [vmem:[#allocation15 + $0xb4c] sm:$0xf]  ;;  %v12712_v22 = vor.u32 %v14659_v38, %v12711_v25  ;;  %v13569_v25 = vld [vmem:[#allocation15 + $0x998] sm:$0xf0] }
 0x4dc   : > { %8722 = vmatpush.bf16.msra.mxu0 %v12996_v63  ;;  %8657 = vmatpush.bf16.msra.mxu3 %v12368_v33  ;;  %v13183_v63 = vld [vmem:[#allocation15 + $0x668] sm:$0xf]  ;;  %v12465_v33 = vld [vmem:[#allocation15 + $0xf8] sm:$0xf0]  ;;  %v14820_v1 = vld [vmem:[#allocation15 + $0x7ec] sm:$0xf] }
 0x4dd   : > { %v13184_v5 = vor.u32 %v14778_v15, %v13183_v63  ;;  %v12903_v63 = vld [vmem:[#allocation15 + $0x430] sm:$0xf]  ;;  %v13329_v15 = vld [vmem:[#allocation15 + $0x7b8] sm:$0xf0] }
 0x4de   : > { %8679 = vmatpush.bf16.msra.mxu1 %v13424_v41  ;;  %8693 = vmatpush.bf16.msra.mxu2 %v13808_v13  ;;  %v12756_v41 = vor.u32 %v14664_v17, %v12753_v10  ;;  %v13096_v13 = vor.u32 %v14755_v36, %v13095_v49  ;;  %v12663_v17 = vld [vmem:[#allocation15 + $0x250] sm:$0xf]  ;;  %v14647_v10 = vld [vmem:[#allocation15 + $0x27c] sm:$0xf0]  ;;  %v14808_v36 = vld [vmem:[#allocation15 + $0x78c] sm:$0xf] }
 0x4df   : > { %8658 = vmatmul.bf16.vlgmr.msra.gmra.mxu3 %v16132_v52  ;;  %v14707_v49 = vld [vmem:[#allocation15 + $0x45c] sm:$0xf0] }
 0x4e0   : > { %8706 = vmatpush.bf16.msrb.mxu3 %v12708_v31  ;;  %8723 = vmatpush.bf16.msra.mxu0 %v12948_v57  ;;  %v14766_v31 = vld [vmem:[#allocation15 + $0x634] sm:$0xf0]  ;;  %v13047_v57 = vld [vmem:[#allocation15 + $0x550] sm:$0xf] }
 0x4e1   : > { %v13048_v42 = vor.u32 %v14743_v59, %v13047_v57  ;;  %v13281_v57 = vld [vmem:[#allocation15 + $0x758] sm:$0xf0]  ;;  %v14892_v59 = vld [vmem:[#allocation15 + $0xa2c] sm:$0xf] }
 0x4e2   : > { %8680 = vmatpush.bf16.msra.mxu1 %v13376_v37  ;;  %8694 = vmatpush.bf16.msra.mxu2 %v13760_v50  ;;  %v12468_v37 = vor.u32 %v14592_v20, %v12465_v33  ;;  %v13473_v50 = vld [vmem:[#allocation15 + $0x8d8] sm:$0xf0]  ;;  %v14635_v20 = vld [vmem:[#allocation15 + $0x21c] sm:$0xf0]  ;;  %v13332_v33 = vor.u32 %v14808_v36, %v13329_v15  ;;  %v13668_v58 = vor.u32 %v14892_v59, %v13665_v21  ;;  %v13863_v36 = vld [vmem:[#allocation15 + $0xbb0] sm:$0xf] }
 0x4e3   : > { %v13476_v45 = vor.u32 %v14844_v19, %v13473_v50  ;;  %v14623_v50 = vld [vmem:[#allocation15 + $0x1bc] sm:$0xf0]  ;;  %v13815_v59 = vld [vmem:[#allocation15 + $0xb50] sm:$0xf] }
 0x4e4   : > { %8707 = vmatpush.bf16.msrb.mxu3 %v12660_v39  ;;  %8724 = vmatpush.bf16.msra.mxu0 %v12900_v6  ;;  %v12417_v39 = vld [vmem:[#allocation15 + $0x98] sm:$0xf0]  ;;  %v13136_v6 = vor.u32 %v14766_v31, %v13135_v27  ;;  %v13716_v27 = vor.u32 %v14904_v28, %v13713_v18  ;;  %v14796_v31 = vld [vmem:[#allocation15 + $0x72c] sm:$0xf]  ;;  %v14947_v15 = vld [vmem:[#allocation15 + $0xbdc] sm:$0xf0] }
 0x4e5   : > { %v12420_v26 = vor.u32 %v14580_v40, %v12417_v39  ;;  %v13284_v51 = vor.u32 %v14796_v31, %v13281_v57  ;;  %v14683_v40 = vld [vmem:[#allocation15 + $0x39c] sm:$0xf0]  ;;  %v14784_v39 = vld [vmem:[#allocation15 + $0x6cc] sm:$0xf]  ;;  %v12423_v28 = vld [vmem:[#allocation15 + $0x70] sm:$0xf] }
 0x4e6   : > { %8681 = vmatpush.bf16.msra.mxu1 %v13328_v14  ;;  %8695 = vmatpush.bf16.msra.mxu2 %v13712_v7  ;;  %v14731_v14 = vld [vmem:[#allocation15 + $0x51c] sm:$0xf0]  ;;  %v14832_v7 = vld [vmem:[#allocation15 + $0x84c] sm:$0xf]  ;;  %v13431_v31 = vld [vmem:[#allocation15 + $0x850] sm:$0xf] }
 0x4e7   : > { %v13000_v54 = vor.u32 %v14731_v14, %v12999_v44  ;;  %v13428_v56 = vor.u32 %v14832_v7, %v13425_v11  ;;  %v12519_v14 = vld [vmem:[#allocation15 + $0x130] sm:$0xf]  ;;  %v14611_v7 = vld [vmem:[#allocation15 + $0x15c] sm:$0xf0] }
 0x4e8   : > { %8708 = vmatpush.bf16.msrb.mxu3 %v12612_v9  ;;  %8725 = vmatpush.bf16.msra.mxu0 %v12852_v34  ;;  %v14568_v9 = vld [vmem:[#allocation15 + $0xc] sm:$0xf]  ;;  %v12369_v34 = vld [vmem:[#allocation15 + $0x38] sm:$0xf0]  ;;  %v12520_v38 = vor.u32 %v14611_v7, %v12519_v14  ;;  %v14587_v18 = vld [vmem:[#allocation15 + $0x9c] sm:$0xf0] }
 0x4e9   : > { %8630 = vmatmul.bf16.vlgmr.msrb.gmra.mxu1 %v16142_v3  ;;  %8644 = vmatmul.bf16.vlgmr.msrb.gmra.mxu2 %v16144_v35  ;;  %v12372_v4 = vor.u32 %v14568_v9, %v12369_v34  ;;  %v14772_v9 = vld [vmem:[#allocation15 + $0x66c] sm:$0xf]  ;;  %v13185_v34 = vld [vmem:[#allocation15 + $0x698] sm:$0xf0]  ;;  %v14839_v57 = vld [vmem:[#allocation15 + $0x87c] sm:$0xf0] }
 0x4ea   : > { %8682 = vmatpush.bf16.msra.mxu1 %v13280_v0  ;;  %8696 = vmatpush.bf16.msra.mxu2 %v13664_v55  ;;  %v13812_v0 = vor.u32 %v14928_v23, %v13809_v8  ;;  %v12951_v55 = vld [vmem:[#allocation15 + $0x490] sm:$0xf]  ;;  %v14671_v8 = vld [vmem:[#allocation15 + $0x33c] sm:$0xf0]  ;;  %v14641_v7 = vld [vmem:[#allocation15 + $0x254] sm:$0xf] }
 0x4eb   : > { %v12952_v62 = vor.u32 %v14719_v47, %v12951_v55  ;;  %v12759_v23 = vld [vmem:[#allocation15 + $0x310] sm:$0xf]  ;;  %v14935_v21 = vld [vmem:[#allocation15 + $0xb7c] sm:$0xf0] }
 0x4ec   : > { %8709 = vmatpush.bf16.msrb.mxu3 %v12564_v30  ;;  %8726 = vmatpush.bf16.msra.mxu0 %v12804_v61  ;;  %v14916_v30 = vld [vmem:[#allocation15 + $0xaec] sm:$0xf]  ;;  %v13761_v61 = vld [vmem:[#allocation15 + $0xb18] sm:$0xf0]  ;;  %v12760_v55 = vor.u32 %v14671_v8, %v12759_v23  ;;  %v12471_v47 = vld [vmem:[#allocation15 + $0xd0] sm:$0xf] }
 0x4ed   : > { %v14923_v14 = vld [vmem:[#allocation15 + $0xb1c] sm:$0xf0]  ;;  %v14701_v8 = vld [vmem:[#allocation15 + $0x434] sm:$0xf] }
 0x4ee   : > { %8683 = vmatpush.bf16.msra.mxu1 %v13232_v53  ;;  %8697 = vmatpush.bf16.msra.mxu2 %v13616_v24  ;;  %v13380_v53 = vor.u32 %v14820_v1, %v13377_v46  ;;  %v13764_v24 = vor.u32 %v14916_v30, %v13761_v61  ;;  %v14599_v1 = vld [vmem:[#allocation15 + $0xfc] sm:$0xf0]  ;;  %v14760_v30 = vld [vmem:[#allocation15 + $0x60c] sm:$0xf]  ;;  %v13137_v61 = vld [vmem:[#allocation15 + $0x638] sm:$0xf0] }
 0x4f0   : > { %8710 = vmatpush.bf16.msrb.mxu3 %v12516_v43  ;;  %8727 = vmatpush.bf16.msra.mxu0 %v12756_v41  ;;  %v12664_v43 = vor.u32 %v14647_v10, %v12663_v17  ;;  %v12904_v41 = vor.u32 %v14707_v49, %v12903_v63  ;;  %v13521_v17 = vld [vmem:[#allocation15 + $0x938] sm:$0xf0]  ;;  %v14737_v10 = vld [vmem:[#allocation15 + $0x554] sm:$0xf]  ;;  %v13479_v63 = vld [vmem:[#allocation15 + $0x8b0] sm:$0xf] }
 0x4f1   : > { %v14851_v49 = vld [vmem:[#allocation15 + $0x8dc] sm:$0xf0] }
 0x4f2   : > { %8684 = vmatpush.bf16.msra.mxu1 %v13184_v5  ;;  %8698 = vmatpush.bf16.msra.mxu2 %v13568_v29  ;;  %v12855_v5 = vld [vmem:[#allocation15 + $0x3d0] sm:$0xf]  ;;  %v14695_v29 = vld [vmem:[#allocation15 + $0x3fc] sm:$0xf0] }
 0x4f3   : > { %8728 = vmatmul.bf16.vlgmr.msra.gmra.mxu0 %v16127_v12  ;;  %v12856_v19 = vor.u32 %v14695_v29, %v12855_v5  ;;  %v13864_v5 = vor.u32 %v14947_v15, %v13863_v36  ;;  %v12424_v29 = vor.u32 %v14587_v18, %v12423_v28  ;;  %v14677_v15 = vld [vmem:[#allocation15 + $0x374] sm:$0xf]  ;;  %v12809_v18 = vld [vmem:[#allocation15 + $0x3a0] sm:$0xf0] }
 0x4f4   : > { %8776 = vmatpush.bf16.msrb.mxu0 %v13096_v13  ;;  %8711 = vmatpush.bf16.msrb.mxu3 %v12468_v37  ;;  %v12615_v13 = vld [vmem:[#allocation15 + $0x1f0] sm:$0xf] }
 0x4f5   : > { %v12616_v16 = vor.u32 %v14635_v20, %v12615_v13  ;;  %v12567_v37 = vld [vmem:[#allocation15 + $0x190] sm:$0xf]  ;;  %v13480_v20 = vor.u32 %v14851_v49, %v13479_v63  ;;  %v12569_v63 = vld [vmem:[#allocation15 + $0x1c0] sm:$0xf0] }
 0x4f6   : > { %8685 = vmatpush.bf16.msra.mxu1 %v13136_v6  ;;  %8699 = vmatpush.bf16.msra.mxu2 %v13520_v48  ;;  %v13233_v6 = vld [vmem:[#allocation15 + $0x6f8] sm:$0xf0]  ;;  %v14880_v48 = vld [vmem:[#allocation15 + $0x9cc] sm:$0xf] }
 0x4f8   : > { %8777 = vmatpush.bf16.msrb.mxu0 %v13048_v42  ;;  %8712 = vmatpush.bf16.msrb.mxu3 %v12420_v26  ;;  %v12807_v42 = vld [vmem:[#allocation15 + $0x370] sm:$0xf]  ;;  %v13236_v26 = vor.u32 %v14784_v39, %v13233_v6  ;;  %v12953_v6 = vld [vmem:[#allocation15 + $0x4c0] sm:$0xf0] }
 0x4f9   : > { %8686 = vmatmul.bf16.vlgmr.msra.gmra.mxu1 %v16142_v3  ;;  %8700 = vmatmul.bf16.vlgmr.msra.gmra.mxu2 %v16144_v35  ;;  %v12808_v44 = vor.u32 %v14683_v40, %v12807_v42  ;;  %v14713_v42 = vld [vmem:[#allocation15 + $0x494] sm:$0xf]  ;;  %v13816_v40 = vor.u32 %v14935_v21, %v13815_v59  ;;  %v12761_v59 = vld [vmem:[#allocation15 + $0x340] sm:$0xf0] }
 0x4fa   : > { %8734 = vmatpush.bf16.msrb.mxu1 %v13476_v45  ;;  %8748 = vmatpush.bf16.msrb.mxu2 %v13860_v60  ;;  %v13617_v45 = vld [vmem:[#allocation15 + $0x9f8] sm:$0xf0]  ;;  %v12568_v60 = vor.u32 %v14623_v50, %v12567_v37  ;;  %v14653_v37 = vld [vmem:[#allocation15 + $0x2b4] sm:$0xf]  ;;  %v12713_v50 = vld [vmem:[#allocation15 + $0x2e0] sm:$0xf0] }
 0x4fb   : > { %v13620_v11 = vor.u32 %v14880_v48, %v13617_v45  ;;  %v13383_v48 = vld [vmem:[#allocation15 + $0x7f0] sm:$0xf]  ;;  %v14827_v45 = vld [vmem:[#allocation15 + $0x81c] sm:$0xf0] }
 0x4fc   : > { %8778 = vmatpush.bf16.msrb.mxu0 %v13000_v54  ;;  %8713 = vmatpush.bf16.msrb.mxu3 %v12372_v4  ;;  %v14868_v54 = vld [vmem:[#allocation15 + $0x96c] sm:$0xf]  ;;  %v13188_v4 = vor.u32 %v14772_v9, %v13185_v34  ;;  %v13384_v23 = vor.u32 %v14827_v45, %v13383_v48  ;;  %v12905_v34 = vld [vmem:[#allocation15 + $0x460] sm:$0xf0]  ;;  %v13143_v45 = vld [vmem:[#allocation15 + $0x610] sm:$0xf] }
 0x4fd   : > { %v13572_v46 = vor.u32 %v14868_v54, %v13569_v25  ;;  %v13335_v54 = vld [vmem:[#allocation15 + $0x790] sm:$0xf]  ;;  %v14815_v25 = vld [vmem:[#allocation15 + $0x7bc] sm:$0xf0] }
 0x4fe   : > { %8735 = vmatpush.bf16.msrb.mxu1 %v13428_v56  ;;  %8749 = vmatpush.bf16.msrb.mxu2 %v13812_v0  ;;  %v14749_v56 = vld [vmem:[#allocation15 + $0x5b4] sm:$0xf]  ;;  %v13097_v0 = vld [vmem:[#allocation15 + $0x5e0] sm:$0xf0] }
 0x4ff   : > { %8714 = vmatmul.bf16.vlgmr.msrb.gmra.mxu3 %v16132_v52 }
 0x500   : > { %8762 = vmatpush.bf16.msra.mxu3 %v12712_v22  ;;  %8779 = vmatpush.bf16.msrb.mxu0 %v12952_v62  ;;  %v14856_v22 = vld [vmem:[#allocation15 + $0x90c] sm:$0xf]  ;;  %v13100_v62 = vor.u32 %v14749_v56, %v13097_v0  ;;  %v13719_v56 = vld [vmem:[#allocation15 + $0xa90] sm:$0xf]  ;;  %v14911_v0 = vld [vmem:[#allocation15 + $0xabc] sm:$0xf0] }
 0x502   : > { %8736 = vmatpush.bf16.msrb.mxu1 %v13380_v53  ;;  %8750 = vmatpush.bf16.msrb.mxu2 %v13764_v24  ;;  %v13049_v53 = vld [vmem:[#allocation15 + $0x580] sm:$0xf0]  ;;  %v12472_v24 = vor.u32 %v14599_v1, %v12471_v47  ;;  %v12908_v1 = vor.u32 %v14701_v8, %v12905_v34  ;;  %v14744_v8 = vld [vmem:[#allocation15 + $0x584] sm:$0xf0] }
 0x503   : > { %v13052_v13 = vor.u32 %v14737_v10, %v13049_v53  ;;  %v12617_v47 = vld [vmem:[#allocation15 + $0x220] sm:$0xf0]  ;;  %v13671_v10 = vld [vmem:[#allocation15 + $0xa30] sm:$0xf]  ;;  %v14899_v53 = vld [vmem:[#allocation15 + $0xa5c] sm:$0xf0] }
 0x504   : > { %8763 = vmatpush.bf16.msra.mxu3 %v12664_v43  ;;  %8780 = vmatpush.bf16.msrb.mxu0 %v12904_v41  ;;  %v13140_v43 = vor.u32 %v14760_v30, %v13137_v61  ;;  %v13524_v41 = vor.u32 %v14856_v22, %v13521_v17  ;;  %v13720_v30 = vor.u32 %v14911_v0, %v13719_v56  ;;  %v12857_v61 = vld [vmem:[#allocation15 + $0x400] sm:$0xf0]  ;;  %v13287_v22 = vld [vmem:[#allocation15 + $0x730] sm:$0xf]  ;;  %v14581_v56 = vld [vmem:[#allocation15 + $0x74] sm:$0xf] }
 0x505   : > { %v13672_v28 = vor.u32 %v14899_v53, %v13671_v10  ;;  %v13481_v34 = vld [vmem:[#allocation15 + $0x8e0] sm:$0xf0]  ;;  %v14569_v53 = vld [vmem:[#allocation15 + $0x14] sm:$0xf] }
 0x506   : > { %8737 = vmatpush.bf16.msrb.mxu1 %v13332_v33  ;;  %8751 = vmatpush.bf16.msrb.mxu2 %v13716_v27  ;;  %v14725_v33 = vld [vmem:[#allocation15 + $0x4f4] sm:$0xf]  ;;  %v13001_v27 = vld [vmem:[#allocation15 + $0x520] sm:$0xf0] }
 0x507   : > { %v12425_v0 = vld [vmem:[#allocation15 + $0xa0] sm:$0xf0] }
 0x508   : > { %8764 = vmatpush.bf16.msra.mxu3 %v12616_v16  ;;  %8781 = vmatpush.bf16.msrb.mxu0 %v12856_v19  ;;  %v12375_v16 = vld [vmem:[#allocation15 + $0x10] sm:$0xf]  ;;  %v14575_v19 = vld [vmem:[#allocation15 + $0x3c] sm:$0xf0]  ;;  %v13817_v10 = vld [vmem:[#allocation15 + $0xb80] sm:$0xf0] }
 0x509   : > { %v12376_v39 = vor.u32 %v14575_v19, %v12375_v16  ;;  %v13191_v16 = vld [vmem:[#allocation15 + $0x670] sm:$0xf]  ;;  %v14779_v19 = vld [vmem:[#allocation15 + $0x69c] sm:$0xf0] }
 0x50a   : > { %8738 = vmatpush.bf16.msrb.mxu1 %v13284_v51  ;;  %8752 = vmatpush.bf16.msrb.mxu2 %v13668_v58  ;;  %v13004_v51 = vor.u32 %v14725_v33, %v13001_v27  ;;  %v13432_v58 = vor.u32 %v14839_v57, %v13431_v31  ;;  %v14887_v33 = vld [vmem:[#allocation15 + $0x9fc] sm:$0xf0]  ;;  %v14605_v27 = vld [vmem:[#allocation15 + $0x134] sm:$0xf]  ;;  %v13192_v48 = vor.u32 %v14779_v19, %v13191_v16  ;;  %v12911_v16 = vld [vmem:[#allocation15 + $0x438] sm:$0xf] }
 0x50b   : > { %v14665_v57 = vld [vmem:[#allocation15 + $0x314] sm:$0xf]  ;;  %v14708_v19 = vld [vmem:[#allocation15 + $0x464] sm:$0xf0] }
 0x50c   : > { %8765 = vmatpush.bf16.msra.mxu3 %v12568_v60  ;;  %8782 = vmatpush.bf16.msrb.mxu0 %v12808_v44  ;;  %v12716_v60 = vor.u32 %v14653_v37, %v12713_v50  ;;  %v13767_v44 = vld [vmem:[#allocation15 + $0xaf0] sm:$0xf] }
 0x50d   : > { %v13768_v9 = vor.u32 %v14923_v14, %v13767_v44  ;;  %v13575_v37 = vld [vmem:[#allocation15 + $0x970] sm:$0xf]  ;;  %v14767_v14 = vld [vmem:[#allocation15 + $0x63c] sm:$0xf0] }
 0x50e   : > { %8739 = vmatpush.bf16.msrb.mxu1 %v13236_v26  ;;  %8753 = vmatpush.bf16.msrb.mxu2 %v13620_v11  ;;  %v12665_v26 = vld [vmem:[#allocation15 + $0x280] sm:$0xf0]  ;;  %v12956_v11 = vor.u32 %v14713_v42, %v12953_v6  ;;  %v14756_v42 = vld [vmem:[#allocation15 + $0x5e4] sm:$0xf0]  ;;  %v12764_v6 = vor.u32 %v14665_v57, %v12761_v59 }
 0x50f   : > { %v14648_v57 = vld [vmem:[#allocation15 + $0x284] sm:$0xf0] }
 0x510   : > { %8766 = vmatpush.bf16.msra.mxu3 %v12520_v38  ;;  %8783 = vmatpush.bf16.msrb.mxu0 %v12760_v55  ;;  %v12668_v38 = vor.u32 %v14641_v7, %v12665_v26  ;;  %v14629_v55 = vld [vmem:[#allocation15 + $0x1f4] sm:$0xf]  ;;  %v13527_v7 = vld [vmem:[#allocation15 + $0x910] sm:$0xf]  ;;  %v14863_v26 = vld [vmem:[#allocation15 + $0x93c] sm:$0xf0] }
 0x511   : > { %v12620_v17 = vor.u32 %v14629_v55, %v12617_v47  ;;  %v13528_v55 = vor.u32 %v14863_v26, %v13527_v7  ;;  %v13289_v26 = vld [vmem:[#allocation15 + $0x760] sm:$0xf0] }
 0x512   : > { %8740 = vmatpush.bf16.msrb.mxu1 %v13188_v4  ;;  %8754 = vmatpush.bf16.msrb.mxu2 %v13572_v46  ;;  %v13336_v4 = vor.u32 %v14815_v25, %v13335_v54  ;;  %v14689_v46 = vld [vmem:[#allocation15 + $0x3d4] sm:$0xf]  ;;  %v13865_v25 = vld [vmem:[#allocation15 + $0xbe0] sm:$0xf0] }
 0x513   : > { %8784 = vmatmul.bf16.vlgmr.msrb.gmra.mxu0 %v16127_v12  ;;  %v12860_v49 = vor.u32 %v14689_v46, %v12857_v61  ;;  %v14941_v54 = vld [vmem:[#allocation15 + $0xbb4] sm:$0xf]  ;;  %v13007_v46 = vld [vmem:[#allocation15 + $0x4f8] sm:$0xf] }
 0x514   : > { %8832 = vmatpush.bf16.msra.mxu0 %v13100_v62  ;;  %8767 = vmatpush.bf16.msra.mxu3 %v12472_v24  ;;  %v14803_v62 = vld [vmem:[#allocation15 + $0x75c] sm:$0xf0]  ;;  %v14617_v24 = vld [vmem:[#allocation15 + $0x194] sm:$0xf] }
 0x515   : > { %v13288_v36 = vor.u32 %v14803_v62, %v13287_v22  ;;  %v14833_v61 = vld [vmem:[#allocation15 + $0x854] sm:$0xf]  ;;  %v12428_v22 = vor.u32 %v14581_v56, %v12425_v0  ;;  %v13433_v62 = vld [vmem:[#allocation15 + $0x880] sm:$0xf0]  ;;  %v12815_v56 = vld [vmem:[#allocation15 + $0x378] sm:$0xf] }
 0x516   : > { %8741 = vmatpush.bf16.msrb.mxu1 %v13140_v43  ;;  %8755 = vmatpush.bf16.msrb.mxu2 %v13524_v41  ;;  %v13239_v43 = vld [vmem:[#allocation15 + $0x6d0] sm:$0xf]  ;;  %v14791_v41 = vld [vmem:[#allocation15 + $0x6fc] sm:$0xf0]  ;;  %v14684_v0 = vld [vmem:[#allocation15 + $0x3a4] sm:$0xf0] }
 0x517   : > { %v13240_v31 = vor.u32 %v14791_v41, %v13239_v43  ;;  %v14720_v43 = vld [vmem:[#allocation15 + $0x4c4] sm:$0xf0]  ;;  %v14821_v41 = vld [vmem:[#allocation15 + $0x7f4] sm:$0xf] }
 0x518   : > { %8833 = vmatpush.bf16.msra.mxu0 %v13052_v13  ;;  %8768 = vmatpush.bf16.msra.mxu3 %v12424_v29  ;;  %v12572_v13 = vor.u32 %v14617_v24, %v12569_v63  ;;  %v12812_v29 = vor.u32 %v14677_v15, %v12809_v18  ;;  %v12377_v24 = vld [vmem:[#allocation15 + $0x40] sm:$0xf0]  ;;  %v13436_v15 = vor.u32 %v14833_v61, %v13433_v62  ;;  %v12959_v18 = vld [vmem:[#allocation15 + $0x498] sm:$0xf] }
 0x519   : > { %8742 = vmatmul.bf16.vlgmr.msrb.gmra.mxu1 %v16142_v3  ;;  %8756 = vmatmul.bf16.vlgmr.msrb.gmra.mxu2 %v16144_v35  ;;  %v12527_v61 = vld [vmem:[#allocation15 + $0x138] sm:$0xf] }
 0x51a   : > { %8790 = vmatpush.bf16.msra.mxu1 %v13480_v20  ;;  %8804 = vmatpush.bf16.msra.mxu2 %v13864_v5  ;;  %v13623_v20 = vld [vmem:[#allocation15 + $0x9d0] sm:$0xf]  ;;  %v12521_v5 = vld [vmem:[#allocation15 + $0x160] sm:$0xf0] }
 0x51b   : > { %v13624_v21 = vor.u32 %v14887_v33, %v13623_v20  ;;  %v12524_v50 = vor.u32 %v14605_v27, %v12521_v5  ;;  %v13385_v20 = vld [vmem:[#allocation15 + $0x820] sm:$0xf0]  ;;  %v14917_v33 = vld [vmem:[#allocation15 + $0xaf4] sm:$0xf] }
 0x51c   : > { %8834 = vmatpush.bf16.msra.mxu0 %v13004_v51  ;;  %8769 = vmatpush.bf16.msra.mxu3 %v12376_v39  ;;  %v14875_v51 = vld [vmem:[#allocation15 + $0x99c] sm:$0xf0]  ;;  %v12473_v39 = vld [vmem:[#allocation15 + $0x100] sm:$0xf0]  ;;  %v13388_v59 = vor.u32 %v14821_v41, %v13385_v20  ;;  %v12479_v20 = vld [vmem:[#allocation15 + $0xd8] sm:$0xf] }
 0x51d   : > { %v13769_v27 = vld [vmem:[#allocation15 + $0xb20] sm:$0xf0] }
 0x51e   : > { %8791 = vmatpush.bf16.msra.mxu1 %v13432_v58  ;;  %8805 = vmatpush.bf16.msra.mxu2 %v13816_v40  ;;  %v13103_v58 = vld [vmem:[#allocation15 + $0x5b8] sm:$0xf]  ;;  %v14593_v40 = vld [vmem:[#allocation15 + $0xd4] sm:$0xf] }
 0x51f   : > { %8770 = vmatmul.bf16.vlgmr.msra.gmra.mxu3 %v16132_v52  ;;  %v13104_v44 = vor.u32 %v14756_v42, %v13103_v58  ;;  %v13721_v58 = vld [vmem:[#allocation15 + $0xac0] sm:$0xf0] }
 0x520   : > { %8818 = vmatpush.bf16.msrb.mxu3 %v12716_v60  ;;  %8835 = vmatpush.bf16.msra.mxu0 %v12956_v11  ;;  %v13576_v60 = vor.u32 %v14875_v51, %v13575_v37  ;;  %v12476_v11 = vor.u32 %v14593_v40, %v12473_v39  ;;  %v14809_v37 = vld [vmem:[#allocation15 + $0x794] sm:$0xf]  ;;  %v12912_v40 = vor.u32 %v14708_v19, %v12911_v16  ;;  %v12623_v39 = vld [vmem:[#allocation15 + $0x1f8] sm:$0xf]  ;;  %v13529_v16 = vld [vmem:[#allocation15 + $0x940] sm:$0xf0] }
 0x521   : > { %v14905_v51 = vld [vmem:[#allocation15 + $0xa94] sm:$0xf]  ;;  %v14738_v19 = vld [vmem:[#allocation15 + $0x55c] sm:$0xf] }
 0x522   : > { %8792 = vmatpush.bf16.msra.mxu1 %v13384_v23  ;;  %8806 = vmatpush.bf16.msra.mxu2 %v13768_v9  ;;  %v13055_v23 = vld [vmem:[#allocation15 + $0x558] sm:$0xf]  ;;  %v14845_v9 = vld [vmem:[#allocation15 + $0x8b4] sm:$0xf] }
 0x523   : > { %v13056_v47 = vor.u32 %v14744_v8, %v13055_v23  ;;  %v13673_v23 = vld [vmem:[#allocation15 + $0xa60] sm:$0xf0] }
 0x524   : > { %8819 = vmatpush.bf16.msrb.mxu3 %v12668_v38  ;;  %8836 = vmatpush.bf16.msra.mxu0 %v12908_v1  ;;  %v13144_v38 = vor.u32 %v14767_v14, %v13143_v45  ;;  %v13484_v1 = vor.u32 %v14845_v9, %v13481_v34  ;;  %v13724_v45 = vor.u32 %v14905_v51, %v13721_v58  ;;  %v14797_v14 = vld [vmem:[#allocation15 + $0x734] sm:$0xf]  ;;  %v12575_v34 = vld [vmem:[#allocation15 + $0x198] sm:$0xf]  ;;  %v14852_v58 = vld [vmem:[#allocation15 + $0x8e4] sm:$0xf0] }
 0x525   : > { %v13487_v51 = vld [vmem:[#allocation15 + $0x8b8] sm:$0xf] }
 0x526   : > { %8793 = vmatpush.bf16.msra.mxu1 %v13336_v4  ;;  %8807 = vmatpush.bf16.msra.mxu2 %v13720_v30  ;;  %v13868_v4 = vor.u32 %v14941_v54, %v13865_v25  ;;  %v14732_v30 = vld [vmem:[#allocation15 + $0x524] sm:$0xf0]  ;;  %v13292_v25 = vor.u32 %v14797_v14, %v13289_v26  ;;  %v14726_v14 = vld [vmem:[#allocation15 + $0x4fc] sm:$0xf] }
 0x527   : > { %v13008_v63 = vor.u32 %v14732_v30, %v13007_v46  ;;  %v14624_v54 = vld [vmem:[#allocation15 + $0x1c4] sm:$0xf0]  ;;  %v12816_v30 = vor.u32 %v14684_v0, %v12815_v56  ;;  %v14654_v0 = vld [vmem:[#allocation15 + $0x2bc] sm:$0xf] }
 0x528   : > { %8820 = vmatpush.bf16.msrb.mxu3 %v12620_v17  ;;  %8837 = vmatpush.bf16.msra.mxu0 %v12860_v49  ;;  %v14929_v17 = vld [vmem:[#allocation15 + $0xb54] sm:$0xf]  ;;  %v12719_v49 = vld [vmem:[#allocation15 + $0x2b8] sm:$0xf]  ;;  %v12576_v46 = vor.u32 %v14624_v54, %v12575_v34  ;;  %v14936_v54 = vld [vmem:[#allocation15 + $0xb84] sm:$0xf0] }
 0x52a   : > { %8794 = vmatpush.bf16.msra.mxu1 %v13288_v36  ;;  %8808 = vmatpush.bf16.msra.mxu2 %v13672_v28  ;;  %v14660_v36 = vld [vmem:[#allocation15 + $0x2e4] sm:$0xf0]  ;;  %v13820_v28 = vor.u32 %v14929_v17, %v13817_v10  ;;  %v12767_v10 = vld [vmem:[#allocation15 + $0x318] sm:$0xf] }
 0x52b   : > { %v12720_v5 = vor.u32 %v14660_v36, %v12719_v49  ;;  %v14869_v49 = vld [vmem:[#allocation15 + $0x974] sm:$0xf]  ;;  %v13577_v36 = vld [vmem:[#allocation15 + $0x9a0] sm:$0xf0] }
 0x52c   : > { %8821 = vmatpush.bf16.msrb.mxu3 %v12572_v13  ;;  %8838 = vmatpush.bf16.msra.mxu0 %v12812_v29  ;;  %v12380_v13 = vor.u32 %v14569_v53, %v12377_v24  ;;  %v12960_v29 = vor.u32 %v14720_v43, %v12959_v18  ;;  %v14672_v53 = vld [vmem:[#allocation15 + $0x344] sm:$0xf0]  ;;  %v14773_v24 = vld [vmem:[#allocation15 + $0x674] sm:$0xf]  ;;  %v13105_v18 = vld [vmem:[#allocation15 + $0x5e8] sm:$0xf0] }
 0x52e   : > { %8795 = vmatpush.bf16.msra.mxu1 %v13240_v31  ;;  %8809 = vmatpush.bf16.msra.mxu2 %v13624_v21  ;;  %v12671_v31 = vld [vmem:[#allocation15 + $0x258] sm:$0xf]  ;;  %v13772_v21 = vor.u32 %v14917_v33, %v13769_v27  ;;  %v14600_v33 = vld [vmem:[#allocation15 + $0x104] sm:$0xf0] }
 0x52f   : > { %v12672_v42 = vor.u32 %v14648_v57, %v12671_v31  ;;  %v14761_v31 = vld [vmem:[#allocation15 + $0x614] sm:$0xf]  ;;  %v13145_v57 = vld [vmem:[#allocation15 + $0x640] sm:$0xf0] }
 0x530   : > { %8822 = vmatpush.bf16.msrb.mxu3 %v12524_v50  ;;  %8839 = vmatpush.bf16.msra.mxu0 %v12764_v6  ;;  %v13337_v50 = vld [vmem:[#allocation15 + $0x7c0] sm:$0xf0]  ;;  %v14636_v6 = vld [vmem:[#allocation15 + $0x224] sm:$0xf0]  ;;  %v8561_v7 = vpop.f32.mrf.mxu0 }
 0x531   : > { %v12624_v8 = vor.u32 %v14636_v6, %v12623_v39  ;;  %v12431_v39 = vld [vmem:[#allocation15 + $0x78] sm:$0xf]  ;;  %v14588_v6 = vld [vmem:[#allocation15 + $0xa4] sm:$0xf0] }
 0x532   : > { %8796 = vmatpush.bf16.msra.mxu1 %v13192_v48  ;;  %8810 = vmatpush.bf16.msra.mxu2 %v13576_v60  ;;  %v13340_v48 = vor.u32 %v14809_v37, %v13337_v50  ;;  %v12863_v60 = vld [vmem:[#allocation15 + $0x3d8] sm:$0xf]  ;;  %v13057_v37 = vld [vmem:[#allocation15 + $0x588] sm:$0xf0]  ;;  %v12480_v50 = vor.u32 %v14600_v33, %v12479_v20 }
 0x533   : > { %8840 = vmatmul.bf16.vlgmr.msra.gmra.mxu0 %v16127_v12 }
 0x534   : > { %8888 = vmatpush.bf16.msrb.mxu0 %v13104_v44  ;;  %8823 = vmatpush.bf16.msrb.mxu3 %v12476_v11  ;;  %v14696_v44 = vld [vmem:[#allocation15 + $0x404] sm:$0xf0]  ;;  %v14893_v11 = vld [vmem:[#allocation15 + $0xa34] sm:$0xf] }
 0x535   : > { %v12864_v9 = vor.u32 %v14696_v44, %v12863_v60  ;;  %v13060_v60 = vor.u32 %v14738_v19, %v13057_v37  ;;  %v13488_v44 = vor.u32 %v14852_v58, %v13487_v51  ;;  %v12865_v58 = vld [vmem:[#allocation15 + $0x408] sm:$0xf0] }
 0x536   : > { %8797 = vmatpush.bf16.msra.mxu1 %v13144_v38  ;;  %8811 = vmatpush.bf16.msra.mxu2 %v13528_v55  ;;  %v13676_v38 = vor.u32 %v14893_v11, %v13673_v23  ;;  %v14785_v55 = vld [vmem:[#allocation15 + $0x6d4] sm:$0xf]  ;;  %v12432_v11 = vor.u32 %v14588_v6, %v12431_v39  ;;  %v13439_v23 = vld [vmem:[#allocation15 + $0x858] sm:$0xf] }
 0x538   : > { %8889 = vmatpush.bf16.msrb.mxu0 %v13056_v47  ;;  %8824 = vmatpush.bf16.msrb.mxu3 %v12428_v22  ;;  %v13241_v47 = vld [vmem:[#allocation15 + $0x700] sm:$0xf0]  ;;  %v14612_v22 = vld [vmem:[#allocation15 + $0x164] sm:$0xf0]  ;;  %v8563_v43 = vpop.f32.mrf.mxu0 }
 0x539   : > { %8798 = vmatmul.bf16.vlgmr.msra.gmra.mxu1 %v16142_v3  ;;  %8812 = vmatmul.bf16.vlgmr.msra.gmra.mxu2 %v16144_v35  ;;  %v13244_v62 = vor.u32 %v14785_v55, %v13241_v47  ;;  %v12721_v55 = vld [vmem:[#allocation15 + $0x2e8] sm:$0xf0] }
 0x53a   : > { %8846 = vmatpush.bf16.msrb.mxu1 %v13484_v1  ;;  %8860 = vmatpush.bf16.msrb.mxu2 %v13868_v4  ;;  %v14881_v1 = vld [vmem:[#allocation15 + $0x9d4] sm:$0xf]  ;;  %v13625_v4 = vld [vmem:[#allocation15 + $0xa00] sm:$0xf0] }
 0x53b   : > { %v13628_v17 = vor.u32 %v14881_v1, %v13625_v4 }
 0x53c   : > { %8890 = vmatpush.bf16.msrb.mxu0 %v13008_v63  ;;  %8825 = vmatpush.bf16.msrb.mxu3 %v12380_v13  ;;  %v13193_v63 = vld [vmem:[#allocation15 + $0x6a0] sm:$0xf0]  ;;  %v12768_v13 = vor.u32 %v14672_v53, %v12767_v10  ;;  %v12724_v10 = vor.u32 %v14654_v0, %v12721_v55  ;;  %v13775_v53 = vld [vmem:[#allocation15 + $0xaf8] sm:$0xf]  ;;  %v14888_v0 = vld [vmem:[#allocation15 + $0xa04] sm:$0xf0] }
 0x53e   : > { %8847 = vmatpush.bf16.msrb.mxu1 %v13436_v15  ;;  %8861 = vmatpush.bf16.msrb.mxu2 %v13820_v28  ;;  %v12528_v15 = vor.u32 %v14612_v22, %v12527_v61  ;;  %v14750_v28 = vld [vmem:[#allocation15 + $0x5bc] sm:$0xf]  ;;  %v12961_v22 = vld [vmem:[#allocation15 + $0x4c8] sm:$0xf0] }
 0x53f   : > { %8826 = vmatmul.bf16.vlgmr.msrb.gmra.mxu3 %v16132_v52 }
 0x540   : > { %8874 = vmatpush.bf16.msra.mxu3 %v12720_v5  ;;  %8891 = vmatpush.bf16.msrb.mxu0 %v12960_v29  ;;  %v13196_v5 = vor.u32 %v14773_v24, %v13193_v63  ;;  %v13580_v29 = vor.u32 %v14869_v49, %v13577_v36  ;;  %v8617_v47 = vpop.f32.mrf.mxu0  ;;  %v14924_v24 = vld [vmem:[#allocation15 + $0xb24] sm:$0xf0]  ;;  %v14642_v63 = vld [vmem:[#allocation15 + $0x25c] sm:$0xf]  ;;  %v12673_v49 = vld [vmem:[#allocation15 + $0x288] sm:$0xf0] }
 0x541   : > { %v12676_v33 = vor.u32 %v14642_v63, %v12673_v49  ;;  %v14876_v49 = vld [vmem:[#allocation15 + $0x9a4] sm:$0xf0] }
 0x542   : > { %8848 = vmatpush.bf16.msrb.mxu1 %v13388_v59  ;;  %8862 = vmatpush.bf16.msrb.mxu2 %v13772_v21  ;;  %v8547_v41 = vpop.f32.mrf.mxu3  ;;  %v14857_v59 = vld [vmem:[#allocation15 + $0x914] sm:$0xf]  ;;  %v13108_v21 = vor.u32 %v14750_v28, %v13105_v18  ;;  %v14702_v28 = vld [vmem:[#allocation15 + $0x43c] sm:$0xf]  ;;  %v13776_v18 = vor.u32 %v14924_v24, %v13775_v53  ;;  %v14780_v53 = vld [vmem:[#allocation15 + $0x6a4] sm:$0xf0] }
 0x543   : > { %v16163_v27 = vadd.f32 %v8561_v7, %v8547_v41  ;;  %v13009_v7 = vld [vmem:[#allocation15 + $0x528] sm:$0xf0]  ;;  %v13343_v41 = vld [vmem:[#allocation15 + $0x798] sm:$0xf] }
 0x544   : > { %8875 = vmatpush.bf16.msra.mxu3 %v12672_v42  ;;  %8892 = vmatpush.bf16.msrb.mxu0 %v12912_v40  ;;  %v13871_v42 = vld [vmem:[#allocation15 + $0xbb8] sm:$0xf]  ;;  %v14948_v40 = vld [vmem:[#allocation15 + $0xbe4] sm:$0xf0]  ;;  %v13012_v1 = vor.u32 %v14726_v14, %v13009_v7  ;;  %v14678_v7 = vld [vmem:[#allocation15 + $0x37c] sm:$0xf] }
 0x545   : > { %v13872_v26 = vor.u32 %v14948_v40, %v13871_v42  ;;  %v13295_v42 = vld [vmem:[#allocation15 + $0x738] sm:$0xf]  ;;  %v14804_v40 = vld [vmem:[#allocation15 + $0x764] sm:$0xf0] }
 0x546   : > { %8849 = vmatpush.bf16.msrb.mxu1 %v13340_v48  ;;  %8863 = vmatpush.bf16.msrb.mxu2 %v13724_v45  ;;  %v13148_v48 = vor.u32 %v14761_v31, %v13145_v57  ;;  %v13532_v45 = vor.u32 %v14857_v59, %v13529_v16  ;;  %v14630_v59 = vld [vmem:[#allocation15 + $0x1fc] sm:$0xf]  ;;  %v13296_v14 = vor.u32 %v14804_v40, %v13295_v42  ;;  %v13583_v24 = vld [vmem:[#allocation15 + $0x978] sm:$0xf]  ;;  %v13489_v40 = vld [vmem:[#allocation15 + $0x8e8] sm:$0xf0] }
 0x548   : > { %8876 = vmatpush.bf16.msra.mxu3 %v12624_v8  ;;  %8893 = vmatpush.bf16.msrb.mxu0 %v12864_v9  ;;  %v14840_v8 = vld [vmem:[#allocation15 + $0x884] sm:$0xf0]  ;;  %v13823_v9 = vld [vmem:[#allocation15 + $0xb58] sm:$0xf]  ;;  %v8619_v39 = vpop.f32.mrf.mxu0 }
 0x549   : > { %v13440_v4 = vor.u32 %v14840_v8, %v13439_v23  ;;  %v12817_v23 = vld [vmem:[#allocation15 + $0x3a8] sm:$0xf0]  ;;  %v13247_v8 = vld [vmem:[#allocation15 + $0x6d8] sm:$0xf] }
 0x54a   : > { %8850 = vmatpush.bf16.msrb.mxu1 %v13292_v25  ;;  %8864 = vmatpush.bf16.msrb.mxu2 %v13676_v38  ;;  %v8549_v34 = vpop.f32.mrf.mxu3  ;;  %v12383_v25 = vld [vmem:[#allocation15 + $0x18] sm:$0xf]  ;;  %v14576_v38 = vld [vmem:[#allocation15 + $0x44] sm:$0xf0] }
 0x54b   : > { %v16166_v56 = vadd.f32 %v8563_v43, %v8549_v34  ;;  %v12384_v61 = vor.u32 %v14576_v38, %v12383_v25  ;;  %v12913_v43 = vld [vmem:[#allocation15 + $0x468] sm:$0xf0]  ;;  %v13631_v38 = vld [vmem:[#allocation15 + $0x9d8] sm:$0xf] }
 0x54c   : > { %8877 = vmatpush.bf16.msra.mxu3 %v12576_v46  ;;  %8894 = vmatpush.bf16.msrb.mxu0 %v12816_v30  ;;  %v14714_v46 = vld [vmem:[#allocation15 + $0x49c] sm:$0xf]  ;;  %v13824_v30 = vor.u32 %v14936_v54, %v13823_v9  ;;  %v12916_v19 = vor.u32 %v14702_v28, %v12913_v43  ;;  %v14792_v9 = vld [vmem:[#allocation15 + $0x704] sm:$0xf0] }
 0x54d   : > { %v12964_v36 = vor.u32 %v14714_v46, %v12961_v22  ;;  %v14666_v22 = vld [vmem:[#allocation15 + $0x31c] sm:$0xf] }
 0x54e   : > { %8851 = vmatpush.bf16.msrb.mxu1 %v13244_v62  ;;  %8865 = vmatpush.bf16.msrb.mxu2 %v13628_v17  ;;  %v13391_v62 = vld [vmem:[#allocation15 + $0x7f8] sm:$0xf]  ;;  %v14828_v17 = vld [vmem:[#allocation15 + $0x824] sm:$0xf0]  ;;  %v14594_v28 = vld [vmem:[#allocation15 + $0xdc] sm:$0xf] }
 0x550   : > { %8878 = vmatpush.bf16.msra.mxu3 %v12528_v15  ;;  %8895 = vmatpush.bf16.msrb.mxu0 %v12768_v13  ;;  %v13392_v15 = vor.u32 %v14828_v17, %v13391_v62  ;;  %v14816_v13 = vld [vmem:[#allocation15 + $0x7c4] sm:$0xf0]  ;;  %v12769_v62 = vld [vmem:[#allocation15 + $0x348] sm:$0xf0]  ;;  %v13632_v17 = vor.u32 %v14888_v0, %v13631_v38  ;;  %v8673_v43 = vpop.f32.mrf.mxu0  ;;  %v14930_v0 = vld [vmem:[#allocation15 + $0xb5c] sm:$0xf] }
 0x551   : > { %v13344_v37 = vor.u32 %v14816_v13, %v13343_v41  ;;  %v13151_v13 = vld [vmem:[#allocation15 + $0x618] sm:$0xf]  ;;  %v13441_v38 = vld [vmem:[#allocation15 + $0x888] sm:$0xf0] }
 0x552   : > { %8852 = vmatpush.bf16.msrb.mxu1 %v13196_v5  ;;  %8866 = vmatpush.bf16.msrb.mxu2 %v13580_v29  ;;  %v8603_v20 = vpop.f32.mrf.mxu3  ;;  %v13727_v5 = vld [vmem:[#allocation15 + $0xa98] sm:$0xf]  ;;  %v14912_v29 = vld [vmem:[#allocation15 + $0xac4] sm:$0xf0] }
 0x553   : > { %8896 = vmatmul.bf16.vlgmr.msrb.gmra.mxu0 %v16127_v12  ;;  %v16170_v57 = vadd.f32 %v8617_v47, %v8603_v20  ;;  %v13728_v51 = vor.u32 %v14912_v29, %v13727_v5  ;;  %v14768_v20 = vld [vmem:[#allocation15 + $0x644] sm:$0xf0]  ;;  %v13584_v5 = vor.u32 %v14876_v49, %v13583_v24  ;;  %v12967_v24 = vld [vmem:[#allocation15 + $0x4a0] sm:$0xf]  ;;  %v14822_v49 = vld [vmem:[#allocation15 + $0x7fc] sm:$0xf] }
 0x554   : > { %8944 = vmatpush.bf16.msra.mxu0 %v13108_v21  ;;  %8879 = vmatpush.bf16.msra.mxu3 %v12480_v50  ;;  %v12625_v21 = vld [vmem:[#allocation15 + $0x228] sm:$0xf0]  ;;  %v14690_v50 = vld [vmem:[#allocation15 + $0x3dc] sm:$0xf]  ;;  %v13152_v42 = vor.u32 %v14768_v20, %v13151_v13 }
 0x555   : > { %v12628_v6 = vor.u32 %v14630_v59, %v12625_v21  ;;  %v14864_v59 = vld [vmem:[#allocation15 + $0x944] sm:$0xf0] }
 0x556   : > { %8853 = vmatpush.bf16.msrb.mxu1 %v13148_v48  ;;  %8867 = vmatpush.bf16.msrb.mxu2 %v13532_v45  ;;  %v8575_v31 = vpop.f32.mrf.mxu1  ;;  %v13679_v48 = vld [vmem:[#allocation15 + $0xa38] sm:$0xf]  ;;  %v14900_v45 = vld [vmem:[#allocation15 + $0xa64] sm:$0xf0] }
 0x557   : > { %v8576_v16 = vadd.f32 %v8575_v31, %v16163_v27  ;;  %v12868_v27 = vor.u32 %v14690_v50, %v12865_v58  ;;  %v13535_v31 = vld [vmem:[#allocation15 + $0x918] sm:$0xf]  ;;  %v14846_v50 = vld [vmem:[#allocation15 + $0x8bc] sm:$0xf] }
 0x558   : > { %8945 = vmatpush.bf16.msra.mxu0 %v13060_v60  ;;  %8880 = vmatpush.bf16.msra.mxu3 %v12432_v11  ;;  %v14618_v60 = vld [vmem:[#allocation15 + $0x19c] sm:$0xf]  ;;  %v13680_v11 = vor.u32 %v14900_v45, %v13679_v48 }
 0x559   : > { %8854 = vmatmul.bf16.vlgmr.msrb.gmra.mxu1 %v16142_v3  ;;  %8868 = vmatmul.bf16.vlgmr.msrb.gmra.mxu2 %v16144_v35 }
 0x55a   : > { %8902 = vmatpush.bf16.msra.mxu1 %v13488_v44  ;;  %8916 = vmatpush.bf16.msra.mxu2 %v13872_v26  ;;  %v12577_v44 = vld [vmem:[#allocation15 + $0x1c8] sm:$0xf0]  ;;  %v8605_v54 = vpop.f32.mrf.mxu3 }
 0x55b   : > { %v12580_v25 = vor.u32 %v14618_v60, %v12577_v44  ;;  %v16176_v47 = vadd.f32 %v8619_v39, %v8605_v54  ;;  %v14942_v39 = vld [vmem:[#allocation15 + $0xbbc] sm:$0xf] }
 0x55c   : > { %8946 = vmatpush.bf16.msra.mxu0 %v13012_v1  ;;  %8881 = vmatpush.bf16.msra.mxu3 %v12384_v61  ;;  %v8589_v26 = vpop.f32.mrf.mxu2  ;;  %v14606_v1 = vld [vmem:[#allocation15 + $0x13c] sm:$0xf]  ;;  %v13248_v61 = vor.u32 %v14792_v9, %v13247_v8  ;;  %v13015_v8 = vld [vmem:[#allocation15 + $0x500] sm:$0xf]  ;;  %v14733_v9 = vld [vmem:[#allocation15 + $0x52c] sm:$0xf0] }
 0x55d   : > { %v16174_v34 = vadd.f32 %v8589_v26, %v8576_v16  ;;  %v14834_v54 = vld [vmem:[#allocation15 + $0x85c] sm:$0xf] }
 0x55e   : > { %8903 = vmatpush.bf16.msra.mxu1 %v13440_v4  ;;  %8917 = vmatpush.bf16.msra.mxu2 %v13824_v30  ;;  %v8577_v55 = vpop.f32.mrf.mxu1  ;;  %v12529_v4 = vld [vmem:[#allocation15 + $0x168] sm:$0xf0]  ;;  %v12820_v30 = vor.u32 %v14678_v7, %v12817_v23  ;;  %v13536_v7 = vor.u32 %v14864_v59, %v13535_v31 }
 0x55f   : > { %8882 = vmatmul.bf16.vlgmr.msra.gmra.mxu3 %v16132_v52  ;;  %v8578_v46 = vadd.f32 %v8577_v55, %v16166_v56  ;;  %v12532_v63 = vor.u32 %v14606_v1, %v12529_v4  ;;  %v12772_v56 = vor.u32 %v14666_v22, %v12769_v62  ;;  %v9211_v48 = vrot.slane %v16174_v34, 7  ;;  %v13825_v55 = vld [vmem:[#allocation15 + $0xb88] sm:$0xf0]  ;;  %v14570_v1 = vld [vmem:[#allocation15 + $0x1c] sm:$0xf]  ;;  %v8675_v62 = vpop.f32.mrf.mxu0 }
 0x560   : > { %8930 = vmatpush.bf16.msrb.mxu3 %v12724_v10  ;;  %8947 = vmatpush.bf16.msra.mxu0 %v12964_v36  ;;  %v13199_v10 = vld [vmem:[#allocation15 + $0x678] sm:$0xf]  ;;  %v13111_v36 = vld [vmem:[#allocation15 + $0x5c0] sm:$0xf]  ;;  %v12385_v4 = vld [vmem:[#allocation15 + $0x48] sm:$0xf0] }
 0x561   : > { %v13200_v41 = vor.u32 %v14780_v53, %v13199_v10  ;;  %v14661_v22 = vld [vmem:[#allocation15 + $0x2ec] sm:$0xf0]  ;;  %v13444_v10 = vor.u32 %v14834_v54, %v13441_v38  ;;  %v13828_v53 = vor.u32 %v14930_v0, %v13825_v55  ;;  %v12583_v55 = vld [vmem:[#allocation15 + $0x1a0] sm:$0xf] }
 0x562   : > { %8904 = vmatpush.bf16.msra.mxu1 %v13392_v15  ;;  %8918 = vmatpush.bf16.msra.mxu2 %v13776_v18  ;;  %v14757_v15 = vld [vmem:[#allocation15 + $0x5ec] sm:$0xf0]  ;;  %v12481_v18 = vld [vmem:[#allocation15 + $0x108] sm:$0xf0]  ;;  %v8659_v58 = vpop.f32.mrf.mxu3 }
 0x563   : > { %v13112_v29 = vor.u32 %v14757_v15, %v13111_v36  ;;  %v12484_v16 = vor.u32 %v14594_v28, %v12481_v18  ;;  %v16181_v44 = vadd.f32 %v8673_v43, %v8659_v58  ;;  %v12388_v28 = vor.u32 %v14570_v1, %v12385_v4  ;;  %v13393_v18 = vld [vmem:[#allocation15 + $0x828] sm:$0xf0]  ;;  %v14918_v43 = vld [vmem:[#allocation15 + $0xafc] sm:$0xf]  ;;  %v14625_v1 = vld [vmem:[#allocation15 + $0x1cc] sm:$0xf0] }
 0x564   : > { %8931 = vmatpush.bf16.msrb.mxu3 %v12676_v33  ;;  %8948 = vmatpush.bf16.msra.mxu0 %v12916_v19  ;;  %v8591_v33 = vpop.f32.mrf.mxu2  ;;  %v13063_v19 = vld [vmem:[#allocation15 + $0x560] sm:$0xf]  ;;  %v13396_v31 = vor.u32 %v14822_v49, %v13393_v18 }
 0x565   : > { %v8592_v21 = vadd.f32 %v8591_v33, %v8578_v46  ;;  %v12535_v49 = vld [vmem:[#allocation15 + $0x140] sm:$0xf] }
 0x566   : > { %8905 = vmatpush.bf16.msra.mxu1 %v13344_v37  ;;  %8919 = vmatpush.bf16.msra.mxu2 %v13728_v51  ;;  %v14745_v37 = vld [vmem:[#allocation15 + $0x58c] sm:$0xf0]  ;;  %v8631_v51 = vpop.f32.mrf.mxu1 }
 0x567   : > { %v9215_v45 = vrot.slane %v8592_v21, 7  ;;  %v8632_v60 = vadd.f32 %v8631_v51, %v16170_v57  ;;  %v13064_v26 = vor.u32 %v14745_v37, %v13063_v19  ;;  %v12919_v21 = vld [vmem:[#allocation15 + $0x440] sm:$0xf]  ;;  %v14810_v19 = vld [vmem:[#allocation15 + $0x79c] sm:$0xf] }
 0x568   : > { %8932 = vmatpush.bf16.msrb.mxu3 %v12628_v6  ;;  %8949 = vmatpush.bf16.msra.mxu0 %v12868_v27  ;;  %v13873_v6 = vld [vmem:[#allocation15 + $0xbe8] sm:$0xf0]  ;;  %v14582_v27 = vld [vmem:[#allocation15 + $0x7c] sm:$0xf] }
 0x569   : > { %v13876_v23 = vor.u32 %v14942_v39, %v13873_v6  ;;  %v16185_v34 = vsel %vm4512_vm1, %v9215_v45, %v9211_v48  ;;  %v16189_v57 = vsel %vm4512_vm1, %v9211_v48, %v9215_v45  ;;  %v13345_v37 = vld [vmem:[#allocation15 + $0x7c8] sm:$0xf0]  ;;  %v14637_v39 = vld [vmem:[#allocation15 + $0x22c] sm:$0xf0]  ;;  %v12871_v6 = vld [vmem:[#allocation15 + $0x3e0] sm:$0xf] }
 0x56a   : > { %8906 = vmatpush.bf16.msra.mxu1 %v13296_v14  ;;  %8920 = vmatpush.bf16.msra.mxu2 %v13680_v11  ;;  %v12433_v14 = vld [vmem:[#allocation15 + $0xa8] sm:$0xf0]  ;;  %v13492_v11 = vor.u32 %v14846_v50, %v13489_v40  ;;  %v8661_v15 = vpop.f32.mrf.mxu3  ;;  %v14906_v50 = vld [vmem:[#allocation15 + $0xa9c] sm:$0xf]  ;;  %v12631_v40 = vld [vmem:[#allocation15 + $0x200] sm:$0xf]  ;;  %v13348_v45 = vor.u32 %v14810_v19, %v13345_v37 }
 0x56b   : > { %v16197_v13 = vadd.f32 %v8675_v62, %v8661_v15  ;;  %v13729_v51 = vld [vmem:[#allocation15 + $0xac8] sm:$0xf0]  ;;  %v12487_v37 = vld [vmem:[#allocation15 + $0xe0] sm:$0xf] }
 0x56c   : > { %8933 = vmatpush.bf16.msrb.mxu3 %v12580_v25  ;;  %8950 = vmatpush.bf16.msra.mxu0 %v12820_v30  ;;  %v12436_v25 = vor.u32 %v14582_v27, %v12433_v14  ;;  %v8645_v46 = vpop.f32.mrf.mxu2  ;;  %v13016_v30 = vor.u32 %v14733_v9, %v13015_v8  ;;  %v14697_v27 = vld [vmem:[#allocation15 + $0x40c] sm:$0xf0]  ;;  %v14798_v14 = vld [vmem:[#allocation15 + $0x73c] sm:$0xf] }
 0x56d   : > { %v12872_v38 = vor.u32 %v14697_v27, %v12871_v6 }
 0x56e   : > { %8907 = vmatpush.bf16.msra.mxu1 %v13248_v61  ;;  %8921 = vmatpush.bf16.msra.mxu2 %v13632_v17  ;;  %v12727_v61 = vld [vmem:[#allocation15 + $0x2c0] sm:$0xf]  ;;  %v16192_v17 = vadd.f32 %v8645_v46, %v8632_v60  ;;  %v8633_v36 = vpop.f32.mrf.mxu1  ;;  %v13732_v60 = vor.u32 %v14906_v50, %v13729_v51  ;;  %v14601_v50 = vld [vmem:[#allocation15 + $0x10c] sm:$0xf0] }
 0x56f   : > { %v12728_v20 = vor.u32 %v14661_v22, %v12727_v61  ;;  %v12823_v46 = vld [vmem:[#allocation15 + $0x380] sm:$0xf]  ;;  %v14786_v61 = vld [vmem:[#allocation15 + $0x6dc] sm:$0xf]  ;;  %v12488_v27 = vor.u32 %v14601_v50, %v12487_v37 }
 0x570   : > { %8934 = vmatpush.bf16.msrb.mxu3 %v12532_v63  ;;  %8951 = vmatpush.bf16.msra.mxu0 %v12772_v56  ;;  %v14721_v63 = vld [vmem:[#allocation15 + $0x4cc] sm:$0xf0]  ;;  %v13777_v56 = vld [vmem:[#allocation15 + $0xb28] sm:$0xf0]  ;;  %v9212_v8 = vrot.slane %v16192_v17, 7  ;;  %v8729_v51 = vpop.f32.mrf.mxu0 }
 0x571   : > { %v12968_v33 = vor.u32 %v14721_v63, %v12967_v24  ;;  %v13780_v59 = vor.u32 %v14918_v43, %v13777_v56  ;;  %v14882_v17 = vld [vmem:[#allocation15 + $0x9dc] sm:$0xf]  ;;  %v12775_v43 = vld [vmem:[#allocation15 + $0x320] sm:$0xf]  ;;  %v14673_v56 = vld [vmem:[#allocation15 + $0x34c] sm:$0xf0] }
 0x572   : > { %8908 = vmatpush.bf16.msra.mxu1 %v13200_v41  ;;  %8922 = vmatpush.bf16.msra.mxu2 %v13584_v5  ;;  %v8634_v41 = vadd.f32 %v8633_v36, %v16176_v47  ;;  %v12679_v5 = vld [vmem:[#allocation15 + $0x260] sm:$0xf]  ;;  %v14613_v36 = vld [vmem:[#allocation15 + $0x16c] sm:$0xf0]  ;;  %v12776_v19 = vor.u32 %v14673_v56, %v12775_v43 }
 0x573   : > { %8952 = vmatmul.bf16.vlgmr.msra.gmra.mxu0 %v16127_v12  ;;  %v13783_v50 = vld [vmem:[#allocation15 + $0xb00] sm:$0xf] }
 0x574   : > { %9000 = vmatpush.bf16.msrb.mxu0 %v13112_v29  ;;  %8935 = vmatpush.bf16.msrb.mxu3 %v12484_v16  ;;  %v14649_v29 = vld [vmem:[#allocation15 + $0x28c] sm:$0xf0]  ;;  %v8647_v58 = vpop.f32.mrf.mxu2 }
 0x575   : > { %v14709_v16 = vld [vmem:[#allocation15 + $0x46c] sm:$0xf0]  ;;  %v12680_v47 = vor.u32 %v14649_v29, %v12679_v5  ;;  %v8648_v48 = vadd.f32 %v8647_v58, %v8634_v41  ;;  %v14774_v41 = vld [vmem:[#allocation15 + $0x67c] sm:$0xf]  ;;  %v13585_v29 = vld [vmem:[#allocation15 + $0x9a8] sm:$0xf0] }
 0x576   : > { %8909 = vmatpush.bf16.msra.mxu1 %v13152_v42  ;;  %8923 = vmatpush.bf16.msra.mxu2 %v13536_v7  ;;  %v12920_v42 = vor.u32 %v14709_v16, %v12919_v21  ;;  %v13297_v7 = vld [vmem:[#allocation15 + $0x768] sm:$0xf0]  ;;  %v14870_v5 = vld [vmem:[#allocation15 + $0x97c] sm:$0xf]  ;;  %v14751_v21 = vld [vmem:[#allocation15 + $0x5c4] sm:$0xf] }
 0x577   : > { %v9216_v9 = vrot.slane %v8648_v48, 7  ;;  %v13300_v0 = vor.u32 %v14798_v14, %v13297_v7  ;;  %v13113_v16 = vld [vmem:[#allocation15 + $0x5f0] sm:$0xf0]  ;;  %v13588_v58 = vor.u32 %v14870_v5, %v13585_v29  ;;  %v13537_v48 = vld [vmem:[#allocation15 + $0x948] sm:$0xf0] }
 0x578   : > { %9001 = vmatpush.bf16.msrb.mxu0 %v13064_v26  ;;  %8936 = vmatpush.bf16.msrb.mxu3 %v12436_v25  ;;  %v8687_v26 = vpop.f32.mrf.mxu1  ;;  %v12632_v25 = vor.u32 %v14637_v39, %v12631_v40  ;;  %v13153_v40 = vld [vmem:[#allocation15 + $0x648] sm:$0xf0]  ;;  %v14858_v39 = vld [vmem:[#allocation15 + $0x91c] sm:$0xf]  ;;  %v13116_v6 = vor.u32 %v14751_v21, %v13113_v16  ;;  %v13495_v14 = vld [vmem:[#allocation15 + $0x8c0] sm:$0xf] }
 0x579   : > { %8910 = vmatmul.bf16.vlgmr.msra.gmra.mxu1 %v16142_v3  ;;  %8924 = vmatmul.bf16.vlgmr.msra.gmra.mxu2 %v16144_v35  ;;  %v8688_v54 = vadd.f32 %v8687_v26, %v16181_v44  ;;  %v16204_v22 = vsel %vm4512_vm1, %v9216_v9, %v9212_v8  ;;  %v16208_v62 = vsel %vm4512_vm1, %v9212_v8, %v9216_v9  ;;  %v13249_v44 = vld [vmem:[#allocation15 + $0x708] sm:$0xf0]  ;;  %v14853_v7 = vld [vmem:[#allocation15 + $0x8ec] sm:$0xf0]  ;;  %v13879_v26 = vld [vmem:[#allocation15 + $0xbc0] sm:$0xf] }
 0x57a   : > { %8958 = vmatpush.bf16.msrb.mxu1 %v13492_v11  ;;  %8972 = vmatpush.bf16.msrb.mxu2 %v13876_v23  ;;  %v14894_v11 = vld [vmem:[#allocation15 + $0xa3c] sm:$0xf]  ;;  %v13681_v23 = vld [vmem:[#allocation15 + $0xa68] sm:$0xf0]  ;;  %v14949_v8 = vld [vmem:[#allocation15 + $0xbec] sm:$0xf0] }
 0x57b   : > { %v13684_v4 = vor.u32 %v14894_v11, %v13681_v23  ;;  %v12439_v9 = vld [vmem:[#allocation15 + $0x80] sm:$0xf]  ;;  %v14829_v16 = vld [vmem:[#allocation15 + $0x82c] sm:$0xf0] }
 0x57c   : > { %9002 = vmatpush.bf16.msrb.mxu0 %v13016_v30  ;;  %8937 = vmatpush.bf16.msrb.mxu3 %v12388_v28  ;;  %v14685_v30 = vld [vmem:[#allocation15 + $0x3ac] sm:$0xf0]  ;;  %v8701_v24 = vpop.f32.mrf.mxu2  ;;  %v13252_v28 = vor.u32 %v14786_v61, %v13249_v44  ;;  %v13399_v21 = vld [vmem:[#allocation15 + $0x800] sm:$0xf] }
 0x57d   : > { %v12824_v63 = vor.u32 %v14685_v30, %v12823_v46  ;;  %v16210_v15 = vadd.f32 %v8701_v24, %v8688_v54  ;;  %v14589_v54 = vld [vmem:[#allocation15 + $0xac] sm:$0xf0]  ;;  %v13017_v46 = vld [vmem:[#allocation15 + $0x530] sm:$0xf0]  ;;  %v13447_v30 = vld [vmem:[#allocation15 + $0x860] sm:$0xf] }
 0x57e   : > { %8959 = vmatpush.bf16.msrb.mxu1 %v13444_v10  ;;  %8973 = vmatpush.bf16.msrb.mxu2 %v13828_v53  ;;  %v13633_v10 = vld [vmem:[#allocation15 + $0xa08] sm:$0xf0]  ;;  %v12584_v53 = vor.u32 %v14625_v1, %v12583_v55  ;;  %v13496_v1 = vor.u32 %v14853_v7, %v13495_v14  ;;  %v13831_v24 = vld [vmem:[#allocation15 + $0xb60] sm:$0xf]  ;;  %v14913_v14 = vld [vmem:[#allocation15 + $0xacc] sm:$0xf0] }
 0x57f   : > { %8938 = vmatmul.bf16.vlgmr.msrb.gmra.mxu3 %v16132_v52  ;;  %v13636_v18 = vor.u32 %v14882_v17, %v13633_v10  ;;  %v9213_v61 = vrot.slane %v16210_v15, 7  ;;  %v13880_v17 = vor.u32 %v14949_v8, %v13879_v26  ;;  %v12440_v10 = vor.u32 %v14589_v54, %v12439_v9  ;;  %v14631_v7 = vld [vmem:[#allocation15 + $0x204] sm:$0xf]  ;;  %v12633_v26 = vld [vmem:[#allocation15 + $0x230] sm:$0xf0] }
 0x580   : > { %8986 = vmatpush.bf16.msra.mxu3 %v12728_v20  ;;  %9003 = vmatpush.bf16.msrb.mxu0 %v12968_v33  ;;  %v8689_v20 = vpop.f32.mrf.mxu1  ;;  %v13201_v33 = vld [vmem:[#allocation15 + $0x6a8] sm:$0xf0]  ;;  %v14691_v9 = vld [vmem:[#allocation15 + $0x3e4] sm:$0xf] }
 0x582   : > { %8960 = vmatpush.bf16.msrb.mxu1 %v13396_v31  ;;  %8974 = vmatpush.bf16.msrb.mxu2 %v13780_v59  ;;  %v8690_v31 = vadd.f32 %v8689_v20, %v16197_v13  ;;  %v12536_v59 = vor.u32 %v14613_v36, %v12535_v49  ;;  %v8715_v13 = vpop.f32.mrf.mxu3  ;;  %v12391_v49 = vld [vmem:[#allocation15 + $0x20] sm:$0xf]  ;;  %v14577_v36 = vld [vmem:[#allocation15 + $0x4c] sm:$0xf0] }
 0x583   : > { %v16213_v11 = vadd.f32 %v8729_v51, %v8715_v13  ;;  %v14925_v51 = vld [vmem:[#allocation15 + $0xb2c] sm:$0xf0] }
 0x584   : > { %8987 = vmatpush.bf16.msra.mxu3 %v12680_v47  ;;  %9004 = vmatpush.bf16.msrb.mxu0 %v12920_v42  ;;  %v13204_v47 = vor.u32 %v14774_v41, %v13201_v33  ;;  %v14762_v42 = vld [vmem:[#allocation15 + $0x61c] sm:$0xf]  ;;  %v8703_v23 = vpop.f32.mrf.mxu2  ;;  %v14715_v41 = vld [vmem:[#allocation15 + $0x4a4] sm:$0xf]  ;;  %v8731_v33 = vpop.f32.mrf.mxu0 }
 0x586   : > { %8961 = vmatpush.bf16.msrb.mxu1 %v13348_v45  ;;  %8975 = vmatpush.bf16.msrb.mxu2 %v13732_v60  ;;  %v14739_v45 = vld [vmem:[#allocation15 + $0x564] sm:$0xf]  ;;  %v13065_v60 = vld [vmem:[#allocation15 + $0x590] sm:$0xf0] }
 0x587   : > { %v13068_v55 = vor.u32 %v14739_v45, %v13065_v60  ;;  %v13351_v45 = vld [vmem:[#allocation15 + $0x7a0] sm:$0xf]  ;;  %v14817_v60 = vld [vmem:[#allocation15 + $0x7cc] sm:$0xf0] }
 0x588   : > { %8988 = vmatpush.bf16.msra.mxu3 %v12632_v25  ;;  %9005 = vmatpush.bf16.msrb.mxu0 %v12872_v38  ;;  %v8704_v25 = vadd.f32 %v8703_v23, %v8690_v31  ;;  %v13156_v38 = vor.u32 %v14762_v42, %v13153_v40  ;;  %v12392_v31 = vor.u32 %v14577_v36, %v12391_v49  ;;  %v13255_v49 = vld [vmem:[#allocation15 + $0x6e0] sm:$0xf]  ;;  %v14793_v36 = vld [vmem:[#allocation15 + $0x70c] sm:$0xf0] }
 0x589   : > { %v13400_v40 = vor.u32 %v14829_v16, %v13399_v21  ;;  %v13352_v8 = vor.u32 %v14817_v60, %v13351_v45 }
 0x58a   : > { %8962 = vmatpush.bf16.msrb.mxu1 %v13300_v0  ;;  %8976 = vmatpush.bf16.msrb.mxu2 %v13684_v4  ;;  %v13540_v0 = vor.u32 %v14858_v39, %v13537_v48  ;;  %v14727_v4 = vld [vmem:[#allocation15 + $0x504] sm:$0xf]  ;;  %v9217_v44 = vrot.slane %v8704_v25, 7  ;;  %v8717_v5 = vpop.f32.mrf.mxu3  ;;  %v12921_v48 = vld [vmem:[#allocation15 + $0x470] sm:$0xf0] }
 0x58b   : > { %v13020_v15 = vor.u32 %v14727_v4, %v13017_v46  ;;  %v14703_v39 = vld [vmem:[#allocation15 + $0x444] sm:$0xf]  ;;  %v12636_v4 = vor.u32 %v14631_v7, %v12633_v26  ;;  %v13687_v46 = vld [vmem:[#allocation15 + $0xa40] sm:$0xf]  ;;  %v14769_v26 = vld [vmem:[#allocation15 + $0x64c] sm:$0xf0] }
 0x58c   : > { %8989 = vmatpush.bf16.msra.mxu3 %v12584_v53  ;;  %9006 = vmatpush.bf16.msrb.mxu0 %v12824_v63  ;;  %v14841_v53 = vld [vmem:[#allocation15 + $0x88c] sm:$0xf0]  ;;  %v16219_v43 = vsel %vm4512_vm1, %v9217_v44, %v9213_v61  ;;  %v16223_v20 = vsel %vm4512_vm1, %v9213_v61, %v9217_v44  ;;  %v12924_v23 = vor.u32 %v14703_v39, %v12921_v48  ;;  %v14619_v61 = vld [vmem:[#allocation15 + $0x1a4] sm:$0xf]  ;;  %v12585_v44 = vld [vmem:[#allocation15 + $0x1d0] sm:$0xf0] }
 0x58d   : > { %v14937_v63 = vld [vmem:[#allocation15 + $0xb8c] sm:$0xf0]  ;;  %v13448_v56 = vor.u32 %v14841_v53, %v13447_v30  ;;  %v14679_v53 = vld [vmem:[#allocation15 + $0x384] sm:$0xf]  ;;  %v14758_v39 = vld [vmem:[#allocation15 + $0x5f4] sm:$0xf0] }
 0x58e   : > { %8963 = vmatpush.bf16.msrb.mxu1 %v13252_v28  ;;  %8977 = vmatpush.bf16.msrb.mxu2 %v13636_v18  ;;  %v14655_v28 = vld [vmem:[#allocation15 + $0x2c4] sm:$0xf]  ;;  %v12729_v18 = vld [vmem:[#allocation15 + $0x2f0] sm:$0xf0]  ;;  %v13832_v29 = vor.u32 %v14937_v63, %v13831_v24  ;;  %v14901_v30 = vld [vmem:[#allocation15 + $0xa6c] sm:$0xf0] }
 0x58f   : > { %v12732_v37 = vor.u32 %v14655_v28, %v12729_v18  ;;  %v13688_v24 = vor.u32 %v14901_v30, %v13687_v46  ;;  %v12825_v63 = vld [vmem:[#allocation15 + $0x3b0] sm:$0xf0]  ;;  %v12588_v28 = vor.u32 %v14619_v61, %v12585_v44  ;;  %v13639_v18 = vld [vmem:[#allocation15 + $0x9e0] sm:$0xf]  ;;  %v14583_v44 = vld [vmem:[#allocation15 + $0x84] sm:$0xf] }
 0x590   : > { %8990 = vmatpush.bf16.msra.mxu3 %v12536_v59  ;;  %9007 = vmatpush.bf16.msrb.mxu0 %v12776_v19  ;;  %v12969_v59 = vld [vmem:[#allocation15 + $0x4d0] sm:$0xf0]  ;;  %v16227_v19 = vadd.f32 %v8731_v33, %v8717_v5  ;;  %v12828_v5 = vor.u32 %v14679_v53, %v12825_v63  ;;  %v8785_v45 = vpop.f32.mrf.mxu0 }
 0x591   : > { %v12972_v42 = vor.u32 %v14715_v41, %v12969_v59  ;;  %v12537_v41 = vld [vmem:[#allocation15 + $0x170] sm:$0xf0] }
 0x592   : > { %8964 = vmatpush.bf16.msrb.mxu1 %v13204_v47  ;;  %8978 = vmatpush.bf16.msrb.mxu2 %v13588_v58  ;;  %v14643_v47 = vld [vmem:[#allocation15 + $0x264] sm:$0xf]  ;;  %v12681_v58 = vld [vmem:[#allocation15 + $0x290] sm:$0xf0] }
 0x593   : > { %9008 = vmatmul.bf16.vlgmr.msrb.gmra.mxu0 %v16127_v12  ;;  %v12684_v13 = vor.u32 %v14643_v47, %v12681_v58  ;;  %v12777_v59 = vld [vmem:[#allocation15 + $0x350] sm:$0xf0] }
 0x594   : > { %9056 = vmatpush.bf16.msra.mxu0 %v13116_v6  ;;  %8991 = vmatpush.bf16.msra.mxu3 %v12488_v27  ;;  %v13784_v6 = vor.u32 %v14925_v51, %v13783_v50  ;;  %v13735_v27 = vld [vmem:[#allocation15 + $0xaa0] sm:$0xf]  ;;  %v14781_v50 = vld [vmem:[#allocation15 + $0x6ac] sm:$0xf0]  ;;  %v12489_v48 = vld [vmem:[#allocation15 + $0x110] sm:$0xf0] }
 0x595   : > { %v13736_v25 = vor.u32 %v14913_v14, %v13735_v27  ;;  %v13591_v51 = vld [vmem:[#allocation15 + $0x980] sm:$0xf]  ;;  %v13881_v46 = vld [vmem:[#allocation15 + $0xbf0] sm:$0xf0] }
 0x596   : > { %8965 = vmatpush.bf16.msrb.mxu1 %v13156_v38  ;;  %8979 = vmatpush.bf16.msrb.mxu2 %v13540_v0  ;;  %v8743_v54 = vpop.f32.mrf.mxu1  ;;  %v12873_v38 = vld [vmem:[#allocation15 + $0x410] sm:$0xf0]  ;;  %v13303_v0 = vld [vmem:[#allocation15 + $0x740] sm:$0xf] }
 0x597   : > { %v13159_v27 = vld [vmem:[#allocation15 + $0x620] sm:$0xf] }
 0x598   : > { %9057 = vmatpush.bf16.msra.mxu0 %v13068_v55  ;;  %8992 = vmatpush.bf16.msra.mxu3 %v12440_v10  ;;  %v14805_v55 = vld [vmem:[#allocation15 + $0x76c] sm:$0xf0]  ;;  %v13160_v61 = vor.u32 %v14769_v26, %v13159_v27  ;;  %v14650_v26 = vld [vmem:[#allocation15 + $0x294] sm:$0xf0] }
 0x599   : > { %8966 = vmatmul.bf16.vlgmr.msrb.gmra.mxu1 %v16142_v3  ;;  %8980 = vmatmul.bf16.vlgmr.msrb.gmra.mxu2 %v16144_v35  ;;  %v13304_v10 = vor.u32 %v14805_v55, %v13303_v0 }
 0x59a   : > { %9014 = vmatpush.bf16.msra.mxu1 %v13496_v1  ;;  %9028 = vmatpush.bf16.msra.mxu2 %v13880_v17  ;;  %v8744_v1 = vadd.f32 %v8743_v54, %v16213_v11  ;;  %v12876_v17 = vor.u32 %v14691_v9, %v12873_v38  ;;  %v14889_v11 = vld [vmem:[#allocation15 + $0xa0c] sm:$0xf0]  ;;  %v13071_v54 = vld [vmem:[#allocation15 + $0x568] sm:$0xf]  ;;  %v14847_v38 = vld [vmem:[#allocation15 + $0x8c4] sm:$0xf] }
 0x59b   : > { %v13640_v16 = vor.u32 %v14889_v11, %v13639_v18  ;;  %v14734_v18 = vld [vmem:[#allocation15 + $0x534] sm:$0xf0]  ;;  %v14835_v11 = vld [vmem:[#allocation15 + $0x864] sm:$0xf] }
 0x59c   : > { %9058 = vmatpush.bf16.msra.mxu0 %v13020_v15  ;;  %8993 = vmatpush.bf16.msra.mxu3 %v12392_v31  ;;  %v8757_v15 = vpop.f32.mrf.mxu2  ;;  %v14667_v31 = vld [vmem:[#allocation15 + $0x324] sm:$0xf] }
 0x59d   : > { %v16231_v33 = vadd.f32 %v8757_v15, %v8744_v1  ;;  %v12780_v60 = vor.u32 %v14667_v31, %v12777_v59  ;;  %v13497_v1 = vld [vmem:[#allocation15 + $0x8f0] sm:$0xf0] }
 0x59e   : > { %9015 = vmatpush.bf16.msra.mxu1 %v13448_v56  ;;  %9029 = vmatpush.bf16.msra.mxu2 %v13832_v29  ;;  %v14607_v56 = vld [vmem:[#allocation15 + $0x144] sm:$0xf]  ;;  %v13256_v29 = vor.u32 %v14793_v36, %v13255_v49  ;;  %v8745_v21 = vpop.f32.mrf.mxu1  ;;  %v13500_v36 = vor.u32 %v14847_v38, %v13497_v1  ;;  %v12393_v31 = vld [vmem:[#allocation15 + $0x50] sm:$0xf0] }
 0x59f   : > { %8994 = vmatmul.bf16.vlgmr.msra.gmra.mxu3 %v16132_v52  ;;  %v8746_v47 = vadd.f32 %v8745_v21, %v16227_v19  ;;  %v12540_v58 = vor.u32 %v14607_v56, %v12537_v41  ;;  %v9214_v63 = vrot.slane %v16231_v33, 7  ;;  %v13449_v56 = vld [vmem:[#allocation15 + $0x890] sm:$0xf0]  ;;  %v14931_v41 = vld [vmem:[#allocation15 + $0xb64] sm:$0xf] }
 0x5a0   : > { %9042 = vmatpush.bf16.msrb.mxu3 %v12732_v37  ;;  %9059 = vmatpush.bf16.msra.mxu0 %v12972_v42  ;;  %v13207_v37 = vld [vmem:[#allocation15 + $0x680] sm:$0xf]  ;;  %v14877_v42 = vld [vmem:[#allocation15 + $0x9ac] sm:$0xf0]  ;;  %v14907_v38 = vld [vmem:[#allocation15 + $0xaa4] sm:$0xf] }
 0x5a1   : > { %v13592_v14 = vor.u32 %v14877_v42, %v13591_v51  ;;  %v12975_v42 = vld [vmem:[#allocation15 + $0x4a8] sm:$0xf] }
 0x5a2   : > { %9016 = vmatpush.bf16.msra.mxu1 %v13400_v40  ;;  %9030 = vmatpush.bf16.msra.mxu2 %v13784_v6  ;;  %v13119_v40 = vld [vmem:[#allocation15 + $0x5c8] sm:$0xf]  ;;  %v14595_v6 = vld [vmem:[#allocation15 + $0xe4] sm:$0xf]  ;;  %v8771_v19 = vpop.f32.mrf.mxu3 }
 0x5a3   : > { %v13120_v7 = vor.u32 %v14758_v39, %v13119_v40  ;;  %v12492_v9 = vor.u32 %v14595_v6, %v12489_v48  ;;  %v16234_v0 = vadd.f32 %v8785_v45, %v8771_v19  ;;  %v14722_v40 = vld [vmem:[#allocation15 + $0x4d4] sm:$0xf0]  ;;  %v14823_v39 = vld [vmem:[#allocation15 + $0x804] sm:$0xf]  ;;  %v13401_v45 = vld [vmem:[#allocation15 + $0x830] sm:$0xf0] }
 0x5a4   : > { %9043 = vmatpush.bf16.msrb.mxu3 %v12684_v13  ;;  %9060 = vmatpush.bf16.msra.mxu0 %v12924_v23  ;;  %v13208_v13 = vor.u32 %v14781_v50, %v13207_v37  ;;  %v13543_v23 = vld [vmem:[#allocation15 + $0x920] sm:$0xf]  ;;  %v8759_v55 = vpop.f32.mrf.mxu2  ;;  %v14662_v37 = vld [vmem:[#allocation15 + $0x2f4] sm:$0xf0]  ;;  %v8787_v50 = vpop.f32.mrf.mxu0  ;;  %v12927_v19 = vld [vmem:[#allocation15 + $0x448] sm:$0xf] }
 0x5a5   : > { %v8760_v30 = vadd.f32 %v8759_v55, %v8746_v47  ;;  %v13452_v47 = vor.u32 %v14835_v11, %v13449_v56  ;;  %v13737_v55 = vld [vmem:[#allocation15 + $0xad0] sm:$0xf0]  ;;  %v14626_v56 = vld [vmem:[#allocation15 + $0x1d4] sm:$0xf0] }
 0x5a6   : > { %9017 = vmatpush.bf16.msra.mxu1 %v13352_v8  ;;  %9031 = vmatpush.bf16.msra.mxu2 %v13736_v25  ;;  %v14865_v8 = vld [vmem:[#allocation15 + $0x94c] sm:$0xf0]  ;;  %v14746_v25 = vld [vmem:[#allocation15 + $0x594] sm:$0xf0] }
 0x5a7   : > { %v13072_v53 = vor.u32 %v14746_v25, %v13071_v54  ;;  %v9218_v49 = vrot.slane %v8760_v30, 7  ;;  %v14811_v54 = vld [vmem:[#allocation15 + $0x7a4] sm:$0xf]  ;;  %v13353_v25 = vld [vmem:[#allocation15 + $0x7d0] sm:$0xf0] }
 0x5a8   : > { %9044 = vmatpush.bf16.msrb.mxu3 %v12636_v4  ;;  %9061 = vmatpush.bf16.msra.mxu0 %v12876_v17  ;;  %v14943_v4 = vld [vmem:[#allocation15 + $0xbc4] sm:$0xf]  ;;  %v12441_v17 = vld [vmem:[#allocation15 + $0xb0] sm:$0xf0]  ;;  %v14638_v30 = vld [vmem:[#allocation15 + $0x234] sm:$0xf0] }
 0x5a9   : > { %v12444_v15 = vor.u32 %v14583_v44, %v12441_v17  ;;  %v16240_v59 = vsel %vm4512_vm1, %v9218_v49, %v9214_v63  ;;  %v16244_v33 = vsel %vm4512_vm1, %v9214_v63, %v9218_v49  ;;  %v13356_v44 = vor.u32 %v14811_v54, %v13353_v25  ;;  %v13305_v49 = vld [vmem:[#allocation15 + $0x770] sm:$0xf0]  ;;  %v14752_v54 = vld [vmem:[#allocation15 + $0x5cc] sm:$0xf]  ;;  %v13121_v25 = vld [vmem:[#allocation15 + $0x5f8] sm:$0xf0] }
 0x5aa   : > { %9018 = vmatpush.bf16.msra.mxu1 %v13304_v10  ;;  %9032 = vmatpush.bf16.msra.mxu2 %v13688_v24  ;;  %v13544_v10 = vor.u32 %v14865_v8, %v13543_v23  ;;  %v13023_v24 = vld [vmem:[#allocation15 + $0x508] sm:$0xf]  ;;  %v8773_v51 = vpop.f32.mrf.mxu3  ;;  %v13404_v23 = vor.u32 %v14823_v39, %v13401_v45  ;;  %v13740_v17 = vor.u32 %v14907_v38, %v13737_v55  ;;  %v14614_v39 = vld [vmem:[#allocation15 + $0x174] sm:$0xf0] }
 0x5ab   : > { %v13024_v21 = vor.u32 %v14734_v18, %v13023_v24  ;;  %v16247_v6 = vadd.f32 %v8787_v50, %v8773_v51  ;;  %v14799_v24 = vld [vmem:[#allocation15 + $0x744] sm:$0xf]  ;;  %v13641_v50 = vld [vmem:[#allocation15 + $0xa10] sm:$0xf0]  ;;  %v12495_v55 = vld [vmem:[#allocation15 + $0xe8] sm:$0xf] }
 0x5ac   : > { %9045 = vmatpush.bf16.msrb.mxu3 %v12588_v28  ;;  %9062 = vmatpush.bf16.msra.mxu0 %v12828_v5  ;;  %v13884_v28 = vor.u32 %v14943_v4, %v13881_v46  ;;  %v13833_v5 = vld [vmem:[#allocation15 + $0xb90] sm:$0xf0]  ;;  %v12639_v46 = vld [vmem:[#allocation15 + $0x208] sm:$0xf] }
 0x5ad   : > { %v12640_v18 = vor.u32 %v14638_v30, %v12639_v46 }
 0x5ae   : > { %9019 = vmatpush.bf16.msra.mxu1 %v13256_v29  ;;  %9033 = vmatpush.bf16.msra.mxu2 %v13640_v16  ;;  %v14571_v29 = vld [vmem:[#allocation15 + $0x24] sm:$0xf]  ;;  %v12735_v16 = vld [vmem:[#allocation15 + $0x2c8] sm:$0xf] }
 0x5af   : > { %v12396_v48 = vor.u32 %v14571_v29, %v12393_v31  ;;  %v12736_v27 = vor.u32 %v14662_v37, %v12735_v16  ;;  %v12831_v29 = vld [vmem:[#allocation15 + $0x388] sm:$0xf]  ;;  %v14686_v31 = vld [vmem:[#allocation15 + $0x3b4] sm:$0xf0]  ;;  %v13257_v16 = vld [vmem:[#allocation15 + $0x710] sm:$0xf0] }
 0x5b0   : > { %9046 = vmatpush.bf16.msrb.mxu3 %v12540_v58  ;;  %9063 = vmatpush.bf16.msra.mxu0 %v12780_v60  ;;  %v13836_v58 = vor.u32 %v14931_v41, %v13833_v5  ;;  %v14919_v60 = vld [vmem:[#allocation15 + $0xb04] sm:$0xf]  ;;  %v13308_v41 = vor.u32 %v14799_v24, %v13305_v49  ;;  %v13073_v24 = vld [vmem:[#allocation15 + $0x598] sm:$0xf0] }
 0x5b1   : > { %v14883_v37 = vld [vmem:[#allocation15 + $0x9e4] sm:$0xf] }
 0x5b2   : > { %9020 = vmatpush.bf16.msra.mxu1 %v13208_v13  ;;  %9034 = vmatpush.bf16.msra.mxu2 %v13592_v14  ;;  %v13785_v13 = vld [vmem:[#allocation15 + $0xb30] sm:$0xf0]  ;;  %v12976_v14 = vor.u32 %v14722_v40, %v12975_v42  ;;  %v12832_v42 = vor.u32 %v14686_v31, %v12831_v29  ;;  %v12543_v40 = vld [vmem:[#allocation15 + $0x148] sm:$0xf] }
 0x5b3   : > { %9064 = vmatmul.bf16.vlgmr.msra.gmra.mxu0 %v16127_v12  ;;  %v13788_v8 = vor.u32 %v14919_v60, %v13785_v13  ;;  %v13644_v13 = vor.u32 %v14883_v37, %v13641_v50  ;;  %v14728_v50 = vld [vmem:[#allocation15 + $0x50c] sm:$0xf] }
 0x5b4   : > { %9112 = vmatpush.bf16.msrb.mxu0 %v13120_v7  ;;  %9047 = vmatpush.bf16.msrb.mxu3 %v12492_v9  ;;  %v12687_v7 = vld [vmem:[#allocation15 + $0x268] sm:$0xf]  ;;  %v14710_v9 = vld [vmem:[#allocation15 + $0x474] sm:$0xf0] }
 0x5b5   : > { %v12688_v1 = vor.u32 %v14650_v26, %v12687_v7  ;;  %v12928_v4 = vor.u32 %v14710_v9, %v12927_v19  ;;  %v14775_v7 = vld [vmem:[#allocation15 + $0x684] sm:$0xf]  ;;  %v13593_v19 = vld [vmem:[#allocation15 + $0x9b0] sm:$0xf0] }
 0x5b6   : > { %9021 = vmatpush.bf16.msra.mxu1 %v13160_v61  ;;  %9035 = vmatpush.bf16.msra.mxu2 %v13544_v10  ;;  %v8799_v61 = vpop.f32.mrf.mxu1  ;;  %v12879_v10 = vld [vmem:[#allocation15 + $0x3e8] sm:$0xf] }
 0x5b7   : > { %v8800_v63 = vadd.f32 %v8799_v61, %v16234_v0  ;;  %v14763_v61 = vld [vmem:[#allocation15 + $0x624] sm:$0xf] }
 0x5b8   : > { %9113 = vmatpush.bf16.msrb.mxu0 %v13072_v53  ;;  %9048 = vmatpush.bf16.msrb.mxu3 %v12444_v15  ;;  %v14698_v53 = vld [vmem:[#allocation15 + $0x414] sm:$0xf0]  ;;  %v12591_v15 = vld [vmem:[#allocation15 + $0x1a8] sm:$0xf] }
 0x5b9   : > { %9022 = vmatmul.bf16.vlgmr.msra.gmra.mxu1 %v16142_v3  ;;  %9036 = vmatmul.bf16.vlgmr.msra.gmra.mxu2 %v16144_v35  ;;  %v12880_v11 = vor.u32 %v14698_v53, %v12879_v10  ;;  %v12592_v0 = vor.u32 %v14626_v56, %v12591_v15  ;;  %v13545_v10 = vld [vmem:[#allocation15 + $0x950] sm:$0xf0]  ;;  %v14740_v53 = vld [vmem:[#allocation15 + $0x56c] sm:$0xf]  ;;  %v14950_v56 = vld [vmem:[#allocation15 + $0xbf4] sm:$0xf0] }
 0x5ba   : > { %9070 = vmatpush.bf16.msrb.mxu1 %v13500_v36  ;;  %9084 = vmatpush.bf16.msrb.mxu2 %v13884_v28  ;;  %v14895_v36 = vld [vmem:[#allocation15 + $0xa44] sm:$0xf]  ;;  %v13689_v28 = vld [vmem:[#allocation15 + $0xa70] sm:$0xf0] }
 0x5bb   : > { %v13692_v5 = vor.u32 %v14895_v36, %v13689_v28  ;;  %v13503_v36 = vld [vmem:[#allocation15 + $0x8c8] sm:$0xf]  ;;  %v14854_v28 = vld [vmem:[#allocation15 + $0x8f4] sm:$0xf0] }
 0x5bc   : > { %9114 = vmatpush.bf16.msrb.mxu0 %v13024_v21  ;;  %9049 = vmatpush.bf16.msrb.mxu3 %v12396_v48  ;;  %v14787_v21 = vld [vmem:[#allocation15 + $0x6e4] sm:$0xf]  ;;  %v8813_v51 = vpop.f32.mrf.mxu2  ;;  %v13504_v37 = vor.u32 %v14854_v28, %v13503_v36  ;;  %v13743_v36 = vld [vmem:[#allocation15 + $0xaa8] sm:$0xf]  ;;  %v14914_v28 = vld [vmem:[#allocation15 + $0xad4] sm:$0xf0] }
 0x5bd   : > { %v8814_v48 = vadd.f32 %v8813_v51, %v8800_v63  ;;  %v13260_v60 = vor.u32 %v14787_v21, %v13257_v16  ;;  %v13076_v16 = vor.u32 %v14740_v53, %v13073_v24  ;;  %v12929_v53 = vld [vmem:[#allocation15 + $0x478] sm:$0xf0]  ;;  %v13359_v24 = vld [vmem:[#allocation15 + $0x7a8] sm:$0xf] }
 0x5be   : > { %9071 = vmatpush.bf16.msrb.mxu1 %v13452_v47  ;;  %9085 = vmatpush.bf16.msrb.mxu2 %v13836_v58  ;;  %v16425_v47 = vld [vmem:[#allocation24_spill] sm:$0xff]  ;;  %v8801_v45 = vpop.f32.mrf.mxu1 }
 0x5bf   : > { %9050 = vmatmul.bf16.vlgmr.msrb.gmra.mxu3 %v16132_v52  ;;  %v9243_v58 = vmul.f32 %v16425_v47, %v16185_v34  ;;  %v8802_v26 = vadd.f32 %v8801_v45, %v16247_v6  ;;  %v12544_v34 = vor.u32 %v14614_v39, %v12543_v40  ;;  %v13161_v6 = vld [vmem:[#allocation15 + $0x650] sm:$0xf0]  ;;  %v13455_v40 = vld [vmem:[#allocation15 + $0x868] sm:$0xf]  ;;  %v14842_v39 = vld [vmem:[#allocation15 + $0x894] sm:$0xf0] }
 0x5c0   : > { %9098 = vmatpush.bf16.msra.mxu3 %v12736_v27  ;;  %9115 = vmatpush.bf16.msrb.mxu0 %v12976_v14  ;;  %v12783_v27 = vld [vmem:[#allocation15 + $0x328] sm:$0xf]  ;;  %v14674_v14 = vld [vmem:[#allocation15 + $0x354] sm:$0xf0]  ;;  %v13164_v31 = vor.u32 %v14763_v61, %v13161_v6  ;;  %v12689_v61 = vld [vmem:[#allocation15 + $0x298] sm:$0xf0] }
 0x5c1   : > { %v16255_v9 = vadd.f32 %v9243_v58, %v8814_v48  ;;  %v12784_v38 = vor.u32 %v14674_v14, %v12783_v27  ;;  %v13839_v48 = vld [vmem:[#allocation15 + $0xb68] sm:$0xf]  ;;  %v14938_v45 = vld [vmem:[#allocation15 + $0xb94] sm:$0xf0]  ;;  %v14656_v27 = vld [vmem:[#allocation15 + $0x2cc] sm:$0xf] }
 0x5c2   : > { %9072 = vmatpush.bf16.msrb.mxu1 %v13404_v23  ;;  %9086 = vmatpush.bf16.msrb.mxu2 %v13788_v8  ;;  %v13209_v23 = vld [vmem:[#allocation15 + $0x6b0] sm:$0xf0]  ;;  %v14871_v8 = vld [vmem:[#allocation15 + $0x984] sm:$0xf]  ;;  %v8827_v63 = vpop.f32.mrf.mxu3  ;;  %v12737_v14 = vld [vmem:[#allocation15 + $0x2f8] sm:$0xf0] }
 0x5c3   : > { %v13212_v46 = vor.u32 %v14775_v7, %v13209_v23  ;;  %v13596_v30 = vor.u32 %v14871_v8, %v13593_v19  ;;  %v13840_v19 = vor.u32 %v14938_v45, %v13839_v48 }
 0x5c4   : > { %9099 = vmatpush.bf16.msra.mxu3 %v12688_v1  ;;  %9116 = vmatpush.bf16.msrb.mxu0 %v12928_v4  ;;  %v14602_v1 = vld [vmem:[#allocation15 + $0x114] sm:$0xf0]  ;;  %v8841_v4 = vpop.f32.mrf.mxu0  ;;  %v8815_v15 = vpop.f32.mrf.mxu2 }
 0x5c5   : > { %v12496_v49 = vor.u32 %v14602_v1, %v12495_v55  ;;  %v8816_v29 = vadd.f32 %v8815_v15, %v8802_v26  ;;  %v14716_v26 = vld [vmem:[#allocation15 + $0x4ac] sm:$0xf]  ;;  %v12740_v1 = vor.u32 %v14656_v27, %v12737_v14  ;;  %v12641_v15 = vld [vmem:[#allocation15 + $0x238] sm:$0xf0]  ;;  %v13263_v14 = vld [vmem:[#allocation15 + $0x6e8] sm:$0xf] }
 0x5c6   : > { %9073 = vmatpush.bf16.msrb.mxu1 %v13356_v44  ;;  %9087 = vmatpush.bf16.msrb.mxu2 %v13740_v17  ;;  %v14859_v44 = vld [vmem:[#allocation15 + $0x924] sm:$0xf]  ;;  %v13124_v17 = vor.u32 %v14752_v54, %v13121_v25  ;;  %v12977_v54 = vld [vmem:[#allocation15 + $0x4d8] sm:$0xf0]  ;;  %v13407_v25 = vld [vmem:[#allocation15 + $0x808] sm:$0xf] }
 0x5c7   : > { %v13548_v21 = vor.u32 %v14859_v44, %v13545_v10  ;;  %v16260_v51 = vadd.f32 %v16189_v57, %v8816_v29  ;;  %v13456_v57 = vor.u32 %v14842_v39, %v13455_v40  ;;  %v12980_v6 = vor.u32 %v14716_v26, %v12977_v54  ;;  %v14620_v40 = vld [vmem:[#allocation15 + $0x1ac] sm:$0xf]  ;;  %v12593_v39 = vld [vmem:[#allocation15 + $0x1d8] sm:$0xf0]  ;;  %v13647_v26 = vld [vmem:[#allocation15 + $0x9e8] sm:$0xf] }
 0x5c8   : > { %9100 = vmatpush.bf16.msra.mxu3 %v12640_v18  ;;  %9117 = vmatpush.bf16.msrb.mxu0 %v12880_v11  ;;  %v13887_v18 = vld [vmem:[#allocation15 + $0xbc8] sm:$0xf]  ;;  %v16257_v11 = vadd.f32 %v8841_v4, %v8827_v63  ;;  %v14818_v63 = vld [vmem:[#allocation15 + $0x7d4] sm:$0xf0]  ;;  %v12833_v27 = vld [vmem:[#allocation15 + $0x3b8] sm:$0xf0] }
 0x5c9   : > { %v13888_v58 = vor.u32 %v14950_v56, %v13887_v18  ;;  %v13791_v4 = vld [vmem:[#allocation15 + $0xb08] sm:$0xf]  ;;  %v14632_v18 = vld [vmem:[#allocation15 + $0x20c] sm:$0xf] }
 0x5ca   : > { %9074 = vmatpush.bf16.msrb.mxu1 %v13308_v41  ;;  %9088 = vmatpush.bf16.msrb.mxu2 %v13692_v5  ;;  %v12447_v41 = vld [vmem:[#allocation15 + $0x88] sm:$0xf]  ;;  %v14590_v5 = vld [vmem:[#allocation15 + $0xb4] sm:$0xf0]  ;;  %v8829_v8 = vpop.f32.mrf.mxu3 }
 0x5cc   : > { %9101 = vmatpush.bf16.msra.mxu3 %v12592_v0  ;;  %9118 = vmatpush.bf16.msrb.mxu0 %v12832_v42  ;;  %v13025_v0 = vld [vmem:[#allocation15 + $0x538] sm:$0xf0]  ;;  %v12448_v42 = vor.u32 %v14590_v5, %v12447_v41  ;;  %v8843_v23 = vpop.f32.mrf.mxu0  ;;  %v13360_v41 = vor.u32 %v14818_v63, %v13359_v24  ;;  %v14692_v5 = vld [vmem:[#allocation15 + $0x3ec] sm:$0xf] }
 0x5cd   : > { %v13028_v7 = vor.u32 %v14728_v50, %v13025_v0  ;;  %v16265_v55 = vadd.f32 %v8843_v23, %v8829_v8  ;;  %v12644_v0 = vor.u32 %v14632_v18, %v12641_v15  ;;  %v9244_v8 = vmul.f32 %v16425_v47, %v16204_v22  ;;  %v14596_v24 = vld [vmem:[#allocation15 + $0xec] sm:$0xf]  ;;  %v12497_v63 = vld [vmem:[#allocation15 + $0x118] sm:$0xf0]  ;;  %v13167_v18 = vld [vmem:[#allocation15 + $0x628] sm:$0xf] }
 0x5ce   : > { %9075 = vmatpush.bf16.msrb.mxu1 %v13260_v60  ;;  %9089 = vmatpush.bf16.msrb.mxu2 %v13644_v13  ;;  %v12399_v60 = vld [vmem:[#allocation15 + $0x28] sm:$0xf]  ;;  %v14578_v13 = vld [vmem:[#allocation15 + $0x54] sm:$0xf0] }
 0x5d0   : > { %9102 = vmatpush.bf16.msra.mxu3 %v12544_v34  ;;  %9119 = vmatpush.bf16.msrb.mxu0 %v12784_v38  ;;  %v12400_v34 = vor.u32 %v14578_v13, %v12399_v60  ;;  %v14830_v38 = vld [vmem:[#allocation15 + $0x834] sm:$0xf0]  ;;  %v14680_v60 = vld [vmem:[#allocation15 + $0x38c] sm:$0xf] }
 0x5d1   : > { %v13408_v44 = vor.u32 %v14830_v38, %v13407_v25  ;;  %v12836_v25 = vor.u32 %v14680_v60, %v12833_v27 }
 0x5d2   : > { %9076 = vmatpush.bf16.msrb.mxu1 %v13212_v46  ;;  %9090 = vmatpush.bf16.msrb.mxu2 %v13596_v30  ;;  %v14926_v46 = vld [vmem:[#allocation15 + $0xb34] sm:$0xf0]  ;;  %v14644_v30 = vld [vmem:[#allocation15 + $0x26c] sm:$0xf] }
 0x5d3   : > { %9120 = vmatmul.bf16.vlgmr.msrb.gmra.mxu0 %v16127_v12  ;;  %v13792_v10 = vor.u32 %v14926_v46, %v13791_v4 }
 0x5d4   : > { %9168 = vmatpush.bf16.msra.mxu0 %v13124_v17  ;;  %9103 = vmatpush.bf16.msra.mxu3 %v12496_v49  ;;  %v14704_v17 = vld [vmem:[#allocation15 + $0x44c] sm:$0xf]  ;;  %v12692_v49 = vor.u32 %v14644_v30, %v12689_v61  ;;  %v12785_v30 = vld [vmem:[#allocation15 + $0x358] sm:$0xf0]  ;;  %v13215_v61 = vld [vmem:[#allocation15 + $0x688] sm:$0xf] }
 0x5d5   : > { %v12932_v56 = vor.u32 %v14704_v17, %v12929_v53  ;;  %v14878_v53 = vld [vmem:[#allocation15 + $0x9b4] sm:$0xf0] }
 0x5d6   : > { %9077 = vmatpush.bf16.msrb.mxu1 %v13164_v31  ;;  %9091 = vmatpush.bf16.msrb.mxu2 %v13548_v21  ;;  %v8855_v29 = vpop.f32.mrf.mxu1  ;;  %v13744_v31 = vor.u32 %v14914_v28, %v13743_v36  ;;  %v12881_v21 = vld [vmem:[#allocation15 + $0x418] sm:$0xf0] }
 0x5d7   : > { %v8856_v50 = vadd.f32 %v8855_v29, %v16257_v11  ;;  %v12884_v48 = vor.u32 %v14692_v5, %v12881_v21  ;;  %v14890_v11 = vld [vmem:[#allocation15 + $0xa14] sm:$0xf0]  ;;  %v13505_v21 = vld [vmem:[#allocation15 + $0x8f8] sm:$0xf0] }
 0x5d8   : > { %9169 = vmatpush.bf16.msra.mxu0 %v13076_v16  ;;  %9104 = vmatpush.bf16.msra.mxu3 %v12448_v42  ;;  %v13311_v16 = vld [vmem:[#allocation15 + $0x748] sm:$0xf]  ;;  %v14902_v42 = vld [vmem:[#allocation15 + $0xa74] sm:$0xf0]  ;;  %v13648_v46 = vor.u32 %v14890_v11, %v13647_v26  ;;  %v13841_v26 = vld [vmem:[#allocation15 + $0xb98] sm:$0xf0] }
 0x5d9   : > { %9078 = vmatmul.bf16.vlgmr.msrb.gmra.mxu1 %v16142_v3  ;;  %9092 = vmatmul.bf16.vlgmr.msrb.gmra.mxu2 %v16144_v35  ;;  %v14866_v5 = vld [vmem:[#allocation15 + $0x954] sm:$0xf0]  ;;  %v14572_v11 = vld [vmem:[#allocation15 + $0x2c] sm:$0xf] }
 0x5da   : > { %9126 = vmatpush.bf16.msra.mxu1 %v13504_v37  ;;  %9140 = vmatpush.bf16.msra.mxu2 %v13888_v58  ;;  %v14806_v37 = vld [vmem:[#allocation15 + $0x774] sm:$0xf0]  ;;  %v13695_v58 = vld [vmem:[#allocation15 + $0xa48] sm:$0xf] }
 0x5db   : > { %v13312_v45 = vor.u32 %v14806_v37, %v13311_v16  ;;  %v13696_v13 = vor.u32 %v14902_v42, %v13695_v58  ;;  %v14944_v16 = vld [vmem:[#allocation15 + $0xbcc] sm:$0xf]  ;;  %v12449_v42 = vld [vmem:[#allocation15 + $0xb8] sm:$0xf0] }
 0x5dc   : > { %9170 = vmatpush.bf16.msra.mxu0 %v13028_v7  ;;  %9105 = vmatpush.bf16.msra.mxu3 %v12400_v34  ;;  %v14794_v7 = vld [vmem:[#allocation15 + $0x714] sm:$0xf0]  ;;  %v8869_v23 = vpop.f32.mrf.mxu2  ;;  %v12545_v34 = vld [vmem:[#allocation15 + $0x178] sm:$0xf0]  ;;  %v14584_v58 = vld [vmem:[#allocation15 + $0x8c] sm:$0xf] }
 0x5dd   : > { %v8870_v54 = vadd.f32 %v8869_v23, %v8856_v50  ;;  %v13264_v38 = vor.u32 %v14794_v7, %v13263_v14  ;;  %v12452_v27 = vor.u32 %v14584_v58, %v12449_v42  ;;  %v14836_v14 = vld [vmem:[#allocation15 + $0x86c] sm:$0xf]  ;;  %v13457_v7 = vld [vmem:[#allocation15 + $0x898] sm:$0xf0] }
 0x5de   : > { %9127 = vmatpush.bf16.msra.mxu1 %v13456_v57  ;;  %9141 = vmatpush.bf16.msra.mxu2 %v13840_v19  ;;  %v12596_v57 = vor.u32 %v14620_v40, %v12593_v39  ;;  %v14608_v19 = vld [vmem:[#allocation15 + $0x14c] sm:$0xf]  ;;  %v8857_v4 = vpop.f32.mrf.mxu1  ;;  %v12401_v23 = vld [vmem:[#allocation15 + $0x58] sm:$0xf0] }
 0x5df   : > { %9106 = vmatmul.bf16.vlgmr.msra.gmra.mxu3 %v16132_v52  ;;  %v8858_v17 = vadd.f32 %v8857_v4, %v16265_v55  ;;  %v12548_v22 = vor.u32 %v14608_v19, %v12545_v34  ;;  %v12500_v55 = vor.u32 %v14596_v24, %v12497_v63  ;;  %v14920_v4 = vld [vmem:[#allocation15 + $0xb0c] sm:$0xf]  ;;  %v13217_v58 = vld [vmem:[#allocation15 + $0x6b8] sm:$0xf0] }
 0x5e0   : > { %9154 = vmatpush.bf16.msrb.mxu3 %v12740_v1  ;;  %9171 = vmatpush.bf16.msra.mxu0 %v12980_v6  ;;  %v14668_v1 = vld [vmem:[#allocation15 + $0x32c] sm:$0xf]  ;;  %v14782_v6 = vld [vmem:[#allocation15 + $0x6b4] sm:$0xf0] }
 0x5e1   : > { %v12788_v36 = vor.u32 %v14668_v1, %v12785_v30  ;;  %v13216_v28 = vor.u32 %v14782_v6, %v13215_v61  ;;  %v14812_v61 = vld [vmem:[#allocation15 + $0x7ac] sm:$0xf]  ;;  %v13361_v6 = vld [vmem:[#allocation15 + $0x7d8] sm:$0xf0] }
 0x5e2   : > { %9128 = vmatpush.bf16.msra.mxu1 %v13408_v44  ;;  %9142 = vmatpush.bf16.msra.mxu2 %v13792_v10  ;;  %v16271_v44 = vadd.f32 %v9244_v8, %v8870_v54  ;;  %v13599_v10 = vld [vmem:[#allocation15 + $0x988] sm:$0xf]  ;;  %v8883_v29 = vpop.f32.mrf.mxu3  ;;  %v13460_v8 = vor.u32 %v14836_v14, %v13457_v7  ;;  %v12404_v54 = vor.u32 %v14572_v11, %v12401_v23  ;;  %v14800_v63 = vld [vmem:[#allocation15 + $0x74c] sm:$0xf]  ;;  %v13169_v7 = vld [vmem:[#allocation15 + $0x658] sm:$0xf0] }
 0x5e3   : > { %v13600_v15 = vor.u32 %v14878_v53, %v13599_v10  ;;  %v13364_v10 = vor.u32 %v14812_v61, %v13361_v6  ;;  %v14764_v14 = vld [vmem:[#allocation15 + $0x62c] sm:$0xf] }
 0x5e4   : > { %9155 = vmatpush.bf16.msrb.mxu3 %v12692_v49  ;;  %9172 = vmatpush.bf16.msra.mxu0 %v12932_v56  ;;  %v8897_v49 = vpop.f32.mrf.mxu0  ;;  %v14770_v56 = vld [vmem:[#allocation15 + $0x654] sm:$0xf0]  ;;  %v8871_v50 = vpop.f32.mrf.mxu2 }
 0x5e5   : > { %v8898_v37 = vadd.f32 %v8897_v49, %v8883_v29  ;;  %v8872_v40 = vadd.f32 %v8871_v50, %v8858_v17  ;;  %v13168_v39 = vor.u32 %v14770_v56, %v13167_v18  ;;  %v14908_v17 = vld [vmem:[#allocation15 + $0xaac] sm:$0xf]  ;;  %v13313_v49 = vld [vmem:[#allocation15 + $0x778] sm:$0xf0] }
 0x5e6   : > { %9129 = vmatpush.bf16.msra.mxu1 %v13360_v41  ;;  %9143 = vmatpush.bf16.msra.mxu2 %v13744_v31  ;;  %v13551_v41 = vld [vmem:[#allocation15 + $0x928] sm:$0xf]  ;;  %v14848_v31 = vld [vmem:[#allocation15 + $0x8cc] sm:$0xf]  ;;  %v13697_v18 = vld [vmem:[#allocation15 + $0xa78] sm:$0xf0] }
 0x5e7   : > { %v16275_v60 = vadd.f32 %v16208_v62, %v8872_v40  ;;  %v14884_v29 = vld [vmem:[#allocation15 + $0x9ec] sm:$0xf] }
 0x5e8   : > { %9156 = vmatpush.bf16.msrb.mxu3 %v12644_v0  ;;  %9173 = vmatpush.bf16.msra.mxu0 %v12884_v48  ;;  %v13889_v0 = vld [vmem:[#allocation15 + $0xbf8] sm:$0xf0]  ;;  %v13552_v48 = vor.u32 %v14866_v5, %v13551_v41  ;;  %v14788_v41 = vld [vmem:[#allocation15 + $0x6ec] sm:$0xf] }
 0x5e9   : > { %v13265_v5 = vld [vmem:[#allocation15 + $0x718] sm:$0xf0]  ;;  %v14872_v40 = vld [vmem:[#allocation15 + $0x98c] sm:$0xf] }
 0x5ea   : > { %9130 = vmatpush.bf16.msra.mxu1 %v13312_v45  ;;  %9144 = vmatpush.bf16.msra.mxu2 %v13696_v13  ;;  %v13508_v45 = vor.u32 %v14848_v31, %v13505_v21  ;;  %v13892_v13 = vor.u32 %v14944_v16, %v13889_v0  ;;  %v8885_v62 = vpop.f32.mrf.mxu3  ;;  %v9245_v16 = vmul.f32 %v16425_v47, %v16219_v43  ;;  %v14776_v0 = vld [vmem:[#allocation15 + $0x68c] sm:$0xf] }
 0x5ec   : > { %9157 = vmatpush.bf16.msrb.mxu3 %v12596_v57  ;;  %9174 = vmatpush.bf16.msra.mxu0 %v12836_v25  ;;  %v14932_v57 = vld [vmem:[#allocation15 + $0xb6c] sm:$0xf]  ;;  %v8899_v19 = vpop.f32.mrf.mxu0 }
 0x5ed   : > { %v13844_v34 = vor.u32 %v14932_v57, %v13841_v26  ;;  %v14824_v25 = vld [vmem:[#allocation15 + $0x80c] sm:$0xf]  ;;  %v8900_v1 = vadd.f32 %v8899_v19, %v8885_v62  ;;  %v13553_v26 = vld [vmem:[#allocation15 + $0x958] sm:$0xf0] }
 0x5ee   : > { %9131 = vmatpush.bf16.msra.mxu1 %v13264_v38  ;;  %9145 = vmatpush.bf16.msra.mxu2 %v13648_v46  ;;  %v13409_v38 = vld [vmem:[#allocation15 + $0x838] sm:$0xf0]  ;;  %v14860_v57 = vld [vmem:[#allocation15 + $0x92c] sm:$0xf] }
 0x5ef   : > { %v13412_v46 = vor.u32 %v14824_v25, %v13409_v38  ;;  %v13556_v62 = vor.u32 %v14860_v57, %v13553_v26 }
 0x5f0   : > { %9158 = vmatpush.bf16.msrb.mxu3 %v12548_v22  ;;  %9175 = vmatpush.bf16.msra.mxu0 %v12788_v36  ;;  %v13745_v22 = vld [vmem:[#allocation15 + $0xad8] sm:$0xf0] }
 0x5f1   : > { %v13748_v24 = vor.u32 %v14908_v17, %v13745_v22 }
 0x5f2   : > { %9132 = vmatpush.bf16.msra.mxu1 %v13216_v28  ;;  %9146 = vmatpush.bf16.msra.mxu2 %v13600_v15  ;;  %v14896_v28 = vld [vmem:[#allocation15 + $0xa4c] sm:$0xf]  ;;  %v13316_v15 = vor.u32 %v14800_v63, %v13313_v49 }
 0x5f3   : > { %9176 = vmatmul.bf16.vlgmr.msra.gmra.mxu0 %v16127_v12  ;;  %v13793_v12 = vld [vmem:[#allocation15 + $0xb38] sm:$0xf0]  ;;  %v13700_v56 = vor.u32 %v14896_v28, %v13697_v18 }
 0x5f4   : > { %9159 = vmatpush.bf16.msrb.mxu3 %v12500_v55  ;;  %v13796_v30 = vor.u32 %v14920_v4, %v13793_v12  ;;  %v13649_v55 = vld [vmem:[#allocation15 + $0xa18] sm:$0xf0] }
 0x5f6   : > { %9133 = vmatpush.bf16.msra.mxu1 %v13168_v39  ;;  %9147 = vmatpush.bf16.msra.mxu2 %v13552_v48  ;;  %v8911_v53 = vpop.f32.mrf.mxu1  ;;  %v13601_v39 = vld [vmem:[#allocation15 + $0x9b8] sm:$0xf0] }
 0x5f7   : > { %v8912_v36 = vadd.f32 %v8911_v53, %v8898_v37  ;;  %v13652_v37 = vor.u32 %v14884_v29, %v13649_v55 }
 0x5f8   : > { %9160 = vmatpush.bf16.msrb.mxu3 %v12452_v27  ;;  %v13604_v27 = vor.u32 %v14872_v40, %v13601_v39 }
 0x5f9   : > { %9134 = vmatmul.bf16.vlgmr.msra.gmra.mxu1 %v16142_v3  ;;  %9148 = vmatmul.bf16.vlgmr.msra.gmra.mxu2 %v16144_v35 }
 0x5fa   : > { %9182 = vmatpush.bf16.msrb.mxu1 %v13508_v45  ;;  %9196 = vmatpush.bf16.msrb.mxu2 %v13892_v13  ;;  %v13220_v45 = vor.u32 %v14776_v0, %v13217_v58  ;;  %v8953_v13 = vpop.f32.mrf.mxu0 }
 0x5fc   : > { %9161 = vmatpush.bf16.msrb.mxu3 %v12404_v54  ;;  %v8925_v31 = vpop.f32.mrf.mxu2 }
 0x5fd   : > { %v8926_v21 = vadd.f32 %v8925_v31, %v8912_v36 }
 0x5fe   : > { %9183 = vmatpush.bf16.msrb.mxu1 %v13460_v8  ;;  %9197 = vmatpush.bf16.msrb.mxu2 %v13844_v34  ;;  %v8913_v50 = vpop.f32.mrf.mxu1  ;;  %v13172_v8 = vor.u32 %v14764_v14, %v13169_v7 }
 0x5ff   : > { %9162 = vmatmul.bf16.vlgmr.msrb.gmra.mxu3 %v16132_v52  ;;  %v13268_v52 = vor.u32 %v14788_v41, %v13265_v5  ;;  %v8914_v42 = vadd.f32 %v8913_v50, %v8900_v1  ;;  %v16283_v48 = vadd.f32 %v9245_v16, %v8926_v21  ;;  %v16297_v5 = vld [vmem:[#allocation16] sm:$0xf] }
 0x602   : > { %9184 = vmatpush.bf16.msrb.mxu1 %v13412_v46  ;;  %9198 = vmatpush.bf16.msrb.mxu2 %v13796_v30  ;;  %v8939_v11 = vpop.f32.mrf.mxu3  ;;  %v8955_v54 = vpop.f32.mrf.mxu0  ;;  %v9246_v30 = vmul.f32 %v16425_v47, %v16240_v59 }
 0x603   : > { %v8954_v43 = vadd.f32 %v8953_v13, %v8939_v11 }
 0x604   : > { %v8927_v23 = vpop.f32.mrf.mxu2 }
 0x605   : > { %v8928_v19 = vadd.f32 %v8927_v23, %v8914_v42 }
 0x606   : > { %9185 = vmatpush.bf16.msrb.mxu1 %v13364_v10  ;;  %9199 = vmatpush.bf16.msrb.mxu2 %v13748_v24 }
 0x607   : > { %v16286_v34 = vadd.f32 %v16223_v20, %v8928_v19 }
 0x60a   : > { %9186 = vmatpush.bf16.msrb.mxu1 %v13316_v15  ;;  %9200 = vmatpush.bf16.msrb.mxu2 %v13700_v56  ;;  %v8941_v25 = vpop.f32.mrf.mxu3 }
 0x60b   : > { %v8956_v38 = vadd.f32 %v8955_v54, %v8941_v25 }
 0x60e   : > { %9187 = vmatpush.bf16.msrb.mxu1 %v13268_v52  ;;  %9201 = vmatpush.bf16.msrb.mxu2 %v13652_v37 }
 0x610   : > { %v9009_v53 = vpop.f32.mrf.mxu0 }
 0x612   : > { %9188 = vmatpush.bf16.msrb.mxu1 %v13220_v45  ;;  %9202 = vmatpush.bf16.msrb.mxu2 %v13604_v27 }
 0x616   : > { %9189 = vmatpush.bf16.msrb.mxu1 %v13172_v8  ;;  %9203 = vmatpush.bf16.msrb.mxu2 %v13556_v62  ;;  %v8967_v1 = vpop.f32.mrf.mxu1 }
 0x617   : > { %v8968_v4 = vadd.f32 %v8967_v1, %v8954_v43 }
 0x618   : > { %v9011_v36 = vpop.f32.mrf.mxu0 }
 0x619   : > { %9190 = vmatmul.bf16.vlgmr.msrb.gmra.mxu1 %v16142_v3  ;;  %9204 = vmatmul.bf16.vlgmr.msrb.gmra.mxu2 %v16144_v35 }
 0x61c   : > { %v8981_v12 = vpop.f32.mrf.mxu2 }
 0x61d   : > { %v8982_v46 = vadd.f32 %v8981_v12, %v8968_v4 }
 0x61e   : > { %v8969_v61 = vpop.f32.mrf.mxu1 }
 0x61f   : > { %v16292_v6 = vadd.f32 %v9246_v30, %v8982_v46  ;;  %v8970_v20 = vadd.f32 %v8969_v61, %v8956_v38 }
 0x622   : > { %v8995_v3 = vpop.f32.mrf.mxu3 }
 0x623   : > { %v9010_v49 = vadd.f32 %v9009_v53, %v8995_v3 }
 0x624   : > { %v8983_v17 = vpop.f32.mrf.mxu2 }
 0x625   : > { %v8984_v22 = vadd.f32 %v8983_v17, %v8970_v20  ;;  %v9277_v20 = vperm.slane %v16297_v5, 1 }
 0x627   : > { %v16295_v10 = vadd.f32 %v16244_v33, %v8984_v22  ;;  %v9276_v33 = vperm.slane %v16297_v5, 0 }
 0x62a   : > { %v8997_v63 = vpop.f32.mrf.mxu3 }
 0x62b   : > { %v9012_v18 = vadd.f32 %v9011_v36, %v8997_v63 }
 0x630   : > { %v9065_v39 = vpop.f32.mrf.mxu0 }
 0x636   : > { %v9023_v35 = vpop.f32.mrf.mxu1 }
 0x637   : > { %v9024_v15 = vadd.f32 %v9023_v35, %v9010_v49 }
 0x638   : > { %v9067_v26 = vpop.f32.mrf.mxu0 }
 0x63c   : > { %v9037_v24 = vpop.f32.mrf.mxu2 }
 0x63d   : > { %v9038_v59 = vadd.f32 %v9037_v24, %v9024_v15 }
 0x63e   : > { %v9025_v28 = vpop.f32.mrf.mxu1 }
 0x63f   : > { %v9026_v47 = vadd.f32 %v9025_v28, %v9012_v18  ;;  %v9227_v29 = vrot.slane %v9038_v59, 1 }
 0x642   : > { %v9051_v40 = vpop.f32.mrf.mxu3 }
 0x644   : > { %v9039_v56 = vpop.f32.mrf.mxu2 }
 0x645   : > { %v9040_v41 = vadd.f32 %v9039_v56, %v9026_v47 }
 0x647   : > { %v9231_v55 = vrot.slane %v9040_v41, 1 }
 0x649   : > { %v9235_v31 = vsel %vm4529_vm3, %v9227_v29, %v9231_v55  ;;  %v9239_v52 = vsel %vm4529_vm3, %v9231_v55, %v9227_v29 }
 0x64a   : > { %v9255_v21 = vmul.f32 %v15889_v2, %v9239_v52  ;;  %v9267_v16 = vadd.f32 %v16255_v9, %v9235_v31  ;;  %v9053_v57 = vpop.f32.mrf.mxu3 }
 0x64b   : > { %v9068_v23 = vadd.f32 %v9067_v26, %v9053_v57 }
 0x64c   : > { %v9271_v50 = vadd.f32 %v16260_v51, %v9255_v21  ;;  %v16307_v37 = vadd.f32 %v9276_v33, %v9267_v16  ;;  %v9066_v51 = vadd.f32 %v9065_v39, %v9051_v40 }
 0x64e   : > { %v16309_v0 = vadd.f32 %v9276_v33, %v9271_v50  ;;  %v13893_v58 = vmul.f32 -1.442695, %v16307_v37 }
 0x650   : > { %15081 = vpow2.f32 %v13893_v58  ;;  %v13897_v42 = vmul.f32 -1.442695, %v16309_v0 }
 0x652   : > { %15083 = vpow2.f32 %v13897_v42 }
 0x656   : > { %v9079_v45 = vpop.f32.mrf.mxu1  ;;  %v15082_v13 = vpop.eup %15081 }
 0x657   : > { %v9316_v27 = vadd.f32 1.0, %v15082_v13  ;;  %v9080_v11 = vadd.f32 %v9079_v45, %v9066_v51 }
 0x658   : > { %v15084_v14 = vpop.eup %15083 }
 0x659   : > { %v9320_v7 = vadd.f32 1.0, %v15084_v14  ;;  %15085 = vrcp.f32 %v9316_v27  ;;  %v9333_v46 = vand.u32 2147483647, %v9316_v27  ;;  %v9335_v30 = vand.u32 2147483648, %v9316_v27 }
 0x65a   : > { %vm9329_vm0 = vweird.f32 %v9316_v27 }
 0x65b   : > { %15087 = vrcp.f32 %v9320_v7  ;;  %v9393_v53 = vand.u32 2147483647, %v9320_v7  ;;  %v9395_v35 = vand.u32 2147483648, %v9320_v7  ;;  %v9336_v28 = vor.u32 1.1754944e-38, %v9335_v30 }
 0x65c   : > { %v9093_v9 = vpop.f32.mrf.mxu2  ;;  %vm9334_vm4 = vcmp.eq.f32.partialorder %v9333_v46, 8.507059e+37  ;;  %vm9389_vm5 = vweird.f32 %v9320_v7 }
 0x65d   : > { %v9094_v19 = vadd.f32 %v9093_v9, %v9080_v11  ;;  %v9396_v41 = vor.u32 1.1754944e-38, %v9395_v35  ;;  %vm9394_vm7 = vcmp.eq.f32.partialorder %v9393_v53, 8.507059e+37 }
 0x65e   : > { %v9081_v43 = vpop.f32.mrf.mxu1 }
 0x65f   : > { %v15086_v8 = vpop.eup %15085  ;;  %v9082_v54 = vadd.f32 %v9081_v43, %v9068_v23  ;;  %v9228_v61 = vrot.slane %v9094_v19, 1 }
 0x660   : > { %v9325_v62 = vmul.f32 %v15086_v8, %v9316_v27  ;;  %vm9330_vm15 = vweird.f32 %v15086_v8 }
 0x661   : > { %v15088_v25 = vpop.eup %15087  ;;  %vm9331_vm2 = vmor %vm9329_vm0, %vm9330_vm15 }
 0x662   : > { %v9326_v1 = vsub.f32 1.0, %v9325_v62  ;;  %v9385_v4 = vmul.f32 %v15088_v25, %v9320_v7  ;;  %vm9390_vm1 = vweird.f32 %v15088_v25  ;;  %v9107_v58 = vpop.f32.mrf.mxu3 }
 0x663   : > { %vm9391_vm6 = vmor %vm9389_vm5, %vm9390_vm1 }
 0x664   : > { %v9095_v38 = vpop.f32.mrf.mxu2  ;;  %v9327_v17 = vmul.f32 %v15086_v8, %v9326_v1  ;;  %v9386_v22 = vsub.f32 1.0, %v9385_v4  ;;  %v9278_v1 = vperm.slane %v16297_v5, 2 }
 0x665   : > { %v9096_v12 = vadd.f32 %v9095_v38, %v9082_v54 }
 0x666   : > { %v9328_v24 = vadd.f32 %v15086_v8, %v9327_v17  ;;  %v9387_v63 = vmul.f32 %v15088_v25, %v9386_v22 }
 0x667   : > { %v9232_v3 = vrot.slane %v9096_v12, 1 }
 0x668   : > { %v9332_v59 = vsel %vm9331_vm2, %v15086_v8, %v9328_v24  ;;  %v9388_v47 = vadd.f32 %v15088_v25, %v9387_v63 }
 0x669   : > { %v9236_v49 = vsel %vm4529_vm3, %v9228_v61, %v9232_v3  ;;  %v9240_v36 = vsel %vm4529_vm3, %v9232_v3, %v9228_v61  ;;  %v9337_v56 = vsel %vm9334_vm4, %v9336_v28, %v9332_v59 }
 0x66a   : > { %v9256_v18 = vmul.f32 %v15889_v2, %v9240_v36  ;;  %v9268_v15 = vadd.f32 %v16271_v44, %v9236_v49  ;;  %v9392_v44 = vsel %vm9391_vm6, %v15088_v25, %v9388_v47  ;;  %v9444_v33 = vmul.f32 %v9337_v56, %v16307_v37  ;;  %v9109_v27 = vpop.f32.mrf.mxu3 }
 0x66b   : > { %v9397_v31 = vsel %vm9394_vm7, %v9396_v41, %v9392_v44 }
 0x66c   : > { %v9272_v29 = vadd.f32 %v16275_v60, %v9256_v18  ;;  %v16329_v55 = vadd.f32 %v9277_v20, %v9268_v15  ;;  %v9448_v16 = vmul.f32 %v9397_v31, %v16309_v0  ;;  %9452 = vst [vmem:[%s16325_s26] sm:$0xff] %v9444_v33  ;;  %v9121_v60 = vpop.f32.mrf.mxu0 }
 0x66d   : > { %v9122_v14 = vadd.f32 %v9121_v60, %v9107_v58 }
 0x66e   : > { %v16332_v52 = vadd.f32 %v9277_v20, %v9272_v29  ;;  %v13894_v21 = vmul.f32 -1.442695, %v16329_v55  ;;  %9456 = vst [vmem:[%s16325_s26 + $0x20] sm:$0xff] %v9448_v16 }
 0x670   : > { %15089 = vpow2.f32 %v13894_v21  ;;  %v13898_v50 = vmul.f32 -1.442695, %v16332_v52 }
 0x672   : > { %15091 = vpow2.f32 %v13898_v50 }
 0x674   : > { %v9123_v7 = vpop.f32.mrf.mxu0 }
 0x675   : > { %v9124_v51 = vadd.f32 %v9123_v7, %v9109_v27 }
 0x676   : > { %v9135_v42 = vpop.f32.mrf.mxu1  ;;  %v15090_v40 = vpop.eup %15089 }
 0x677   : > { %v9317_v39 = vadd.f32 1.0, %v15090_v40  ;;  %v9136_v57 = vadd.f32 %v9135_v42, %v9122_v14 }
 0x678   : > { %v15092_v45 = vpop.eup %15091 }
 0x679   : > { %v9321_v37 = vadd.f32 1.0, %v15092_v45  ;;  %15093 = vrcp.f32 %v9317_v39  ;;  %v9348_v19 = vand.u32 2147483647, %v9317_v39  ;;  %v9350_v25 = vand.u32 2147483648, %v9317_v39 }
 0x67a   : > { %vm9344_vm8 = vweird.f32 %v9317_v39 }
 0x67b   : > { %15095 = vrcp.f32 %v9321_v37  ;;  %v9408_v46 = vand.u32 2147483647, %v9321_v37  ;;  %v9410_v30 = vand.u32 2147483648, %v9321_v37  ;;  %vm9349_vm10 = vcmp.eq.f32.partialorder %v9348_v19, 8.507059e+37 }
 0x67c   : > { %v9149_v13 = vpop.f32.mrf.mxu2  ;;  %v9351_v3 = vor.u32 1.1754944e-38, %v9350_v25  ;;  %vm9404_vm13 = vweird.f32 %v9321_v37  ;;  %v9177_v21 = vpop.f32.mrf.mxu0 }
 0x67d   : > { %v9150_v43 = vadd.f32 %v9149_v13, %v9136_v57  ;;  %vm9409_vm15 = vcmp.eq.f32.partialorder %v9408_v46, 8.507059e+37  ;;  %v9411_v18 = vor.u32 1.1754944e-38, %v9410_v30 }
 0x67e   : > { %v9137_v0 = vpop.f32.mrf.mxu1 }
 0x67f   : > { %v15094_v9 = vpop.eup %15093  ;;  %v9138_v23 = vadd.f32 %v9137_v0, %v9124_v51  ;;  %v9229_v61 = vrot.slane %v9150_v43, 1 }
 0x680   : > { %v9340_v26 = vmul.f32 %v15094_v9, %v9317_v39  ;;  %vm9345_vm9 = vweird.f32 %v15094_v9 }
 0x681   : > { %v15096_v11 = vpop.eup %15095  ;;  %vm9346_vm12 = vmor %vm9344_vm8, %vm9345_vm9 }
 0x682   : > { %v9341_v8 = vsub.f32 1.0, %v9340_v26  ;;  %v9400_v62 = vmul.f32 %v15096_v11, %v9321_v37  ;;  %vm9405_vm11 = vweird.f32 %v15096_v11  ;;  %v9163_v31 = vpop.f32.mrf.mxu3 }
 0x683   : > { %vm9406_vm14 = vmor %vm9404_vm13, %vm9405_vm11 }
 0x684   : > { %v9151_v54 = vpop.f32.mrf.mxu2  ;;  %v9342_v4 = vmul.f32 %v15094_v9, %v9341_v8  ;;  %v9401_v12 = vsub.f32 1.0, %v9400_v62  ;;  %v9179_v40 = vpop.f32.mrf.mxu0  ;;  %v9279_v8 = vperm.slane %v16297_v5, 3 }
 0x685   : > { %v9152_v38 = vadd.f32 %v9151_v54, %v9138_v23 }
 0x686   : > { %v9343_v17 = vadd.f32 %v15094_v9, %v9342_v4  ;;  %v9402_v22 = vmul.f32 %v15096_v11, %v9401_v12 }
 0x687   : > { %v9233_v20 = vrot.slane %v9152_v38, 1 }
 0x688   : > { %v9347_v24 = vsel %vm9346_vm12, %v15094_v9, %v9343_v17  ;;  %v9403_v63 = vadd.f32 %v15096_v11, %v9402_v22 }
 0x689   : > { %v9237_v53 = vsel %vm4529_vm3, %v9229_v61, %v9233_v20  ;;  %v9241_v35 = vsel %vm4529_vm3, %v9233_v20, %v9229_v61  ;;  %v9352_v28 = vsel %vm9349_vm10, %v9351_v3, %v9347_v24 }
 0x68a   : > { %v9257_v49 = vmul.f32 %v15889_v2, %v9241_v35  ;;  %v9269_v36 = vadd.f32 %v16283_v48, %v9237_v53  ;;  %v9407_v15 = vsel %vm9406_vm14, %v15096_v11, %v9403_v63  ;;  %v9445_v59 = vmul.f32 %v9352_v28, %v16329_v55  ;;  %v9165_v42 = vpop.f32.mrf.mxu3 }
 0x68b   : > { %v9412_v41 = vsel %vm9409_vm15, %v9411_v18, %v9407_v15  ;;  %v9180_v37 = vadd.f32 %v9179_v40, %v9165_v42 }
 0x68c   : > { %v9273_v47 = vadd.f32 %v16286_v34, %v9257_v49  ;;  %v16348_v56 = vadd.f32 %v9278_v1, %v9269_v36  ;;  %v9449_v29 = vmul.f32 %v9412_v41, %v16332_v52  ;;  %9453 = vst [vmem:[%s16325_s26 + $0x8] sm:$0xff] %v9445_v59  ;;  %v9178_v52 = vadd.f32 %v9177_v21, %v9163_v31 }
 0x68e   : > { %v16352_v44 = vadd.f32 %v9278_v1, %v9273_v47  ;;  %v13895_v33 = vmul.f32 -1.442695, %v16348_v56  ;;  %9457 = vst [vmem:[%s16325_s26 + $0x28] sm:$0xff] %v9449_v29 }
 0x690   : > { %15097 = vpow2.f32 %v13895_v33  ;;  %v13899_v48 = vmul.f32 -1.442695, %v16352_v44 }
 0x692   : > { %15099 = vpow2.f32 %v13899_v48 }
 0x696   : > { %v9191_v55 = vpop.f32.mrf.mxu1  ;;  %v15098_v16 = vpop.eup %15097 }
 0x697   : > { %v9318_v34 = vadd.f32 1.0, %v15098_v16  ;;  %v9192_v39 = vadd.f32 %v9191_v55, %v9178_v52 }
 0x698   : > { %v15100_v50 = vpop.eup %15099 }
 0x699   : > { %v9322_v58 = vadd.f32 1.0, %v15100_v50  ;;  %15101 = vrcp.f32 %v9318_v34  ;;  %v9363_v11 = vand.u32 2147483647, %v9318_v34  ;;  %v9365_v43 = vand.u32 2147483648, %v9318_v34 }
 0x69a   : > { %vm9359_vm1 = vweird.f32 %v9318_v34 }
 0x69b   : > { %15103 = vrcp.f32 %v9322_v58  ;;  %v9423_v25 = vand.u32 2147483647, %v9322_v58  ;;  %v9425_v38 = vand.u32 2147483648, %v9322_v58  ;;  %v9366_v30 = vor.u32 1.1754944e-38, %v9365_v43 }
 0x69c   : > { %v9205_v60 = vpop.f32.mrf.mxu2  ;;  %vm9364_vm5 = vcmp.eq.f32.partialorder %v9363_v11, 8.507059e+37  ;;  %vm9419_vm6 = vweird.f32 %v9322_v58 }
 0x69d   : > { %v9206_v27 = vadd.f32 %v9205_v60, %v9192_v39  ;;  %v9426_v3 = vor.u32 1.1754944e-38, %v9425_v38 }
 0x69e   : > { %v9193_v45 = vpop.f32.mrf.mxu1 }
 0x69f   : > { %v15102_v13 = vpop.eup %15101  ;;  %v9194_v7 = vadd.f32 %v9193_v45, %v9180_v37  ;;  %v9230_v23 = vrot.slane %v9206_v27, 1 }
 0x6a0   : > { %v9355_v14 = vmul.f32 %v15102_v13, %v9318_v34  ;;  %vm9360_vm0 = vweird.f32 %v15102_v13 }
 0x6a1   : > { %v15104_v0 = vpop.eup %15103  ;;  %vm9361_vm4 = vmor %vm9359_vm1, %vm9360_vm0 }
 0x6a2   : > { %v9356_v51 = vsub.f32 1.0, %v9355_v14  ;;  %v9415_v57 = vmul.f32 %v15104_v0, %v9322_v58  ;;  %vm9420_vm2 = vweird.f32 %v15104_v0 }
 0x6a3   : > { %vm9421_vm7 = vmor %vm9419_vm6, %vm9420_vm2 }
 0x6a4   : > { %v9207_v9 = vpop.f32.mrf.mxu2  ;;  %v9357_v19 = vmul.f32 %v15102_v13, %v9356_v51  ;;  %v9416_v62 = vsub.f32 1.0, %v9415_v57 }
 0x6a5   : > { %v9208_v26 = vadd.f32 %v9207_v9, %v9194_v7 }
 0x6a6   : > { %v9358_v1 = vadd.f32 %v15102_v13, %v9357_v19  ;;  %v9417_v4 = vmul.f32 %v15104_v0, %v9416_v62 }
 0x6a7   : > { %v9234_v54 = vrot.slane %v9208_v26, 1 }
 0x6a8   : > { %v9362_v20 = vsel %vm9361_vm4, %v15102_v13, %v9358_v1  ;;  %v9418_v17 = vadd.f32 %v15104_v0, %v9417_v4 }
 0x6a9   : > { %v9238_v12 = vsel %vm4529_vm3, %v9230_v23, %v9234_v54  ;;  %v9242_v46 = vsel %vm4529_vm3, %v9234_v54, %v9230_v23  ;;  %v9367_v22 = vsel %vm9364_vm5, %v9366_v30, %v9362_v20  ;;  %vm9424_vm3 = vcmp.eq.f32.partialorder %v9423_v25, 8.507059e+37 }
 0x6aa   : > { %v9258_v5 = vmul.f32 %v15889_v2, %v9242_v46  ;;  %v9270_v61 = vadd.f32 %v16292_v6, %v9238_v12  ;;  %v9422_v35 = vsel %vm9421_vm7, %v15104_v0, %v9418_v17  ;;  %v9446_v24 = vmul.f32 %v9367_v22, %v16348_v56 }
 0x6ab   : > { %v9427_v2 = vsel %vm9424_vm3, %v9426_v3, %v9422_v35 }
 0x6ac   : > { %v9274_v53 = vadd.f32 %v16295_v10, %v9258_v5  ;;  %v9287_v32 = vadd.f32 %v9279_v8, %v9270_v61  ;;  %v9450_v49 = vmul.f32 %v9427_v2, %v16352_v44  ;;  %9454 = vst [vmem:[%s16325_s26 + $0x10] sm:$0xff] %v9446_v24 }
 0x6ae   : > { %v9291_v63 = vadd.f32 %v9279_v8, %v9274_v53  ;;  %v13896_v6 = vmul.f32 -1.442695, %v9287_v32  ;;  %9458 = vst [vmem:[%s16325_s26 + $0x30] sm:$0xff] %v9450_v49 }
 0x6b0   : > { %15105 = vpow2.f32 %v13896_v6  ;;  %v13900_v36 = vmul.f32 -1.442695, %v9291_v63 }
 0x6b2   : > { %15107 = vpow2.f32 %v13900_v36 }
 0x6b6   : > { %v15106_v28 = vpop.eup %15105 }
 0x6b7   : > { %v9319_v18 = vadd.f32 1.0, %v15106_v28 }
 0x6b8   : > { %v15108_v15 = vpop.eup %15107 }
 0x6b9   : > { %v9323_v59 = vadd.f32 1.0, %v15108_v15  ;;  %15109 = vrcp.f32 %v9319_v18  ;;  %v9380_v33 = vand.u32 2147483648, %v9319_v18  ;;  %v9378_v44 = vand.u32 2147483647, %v9319_v18 }
 0x6ba   : > { %vm9374_vm9 = vweird.f32 %v9319_v18 }
 0x6bb   : > { %15111 = vrcp.f32 %v9323_v59  ;;  %v9440_v21 = vand.u32 2147483648, %v9323_v59  ;;  %v9438_v34 = vand.u32 2147483647, %v9323_v59  ;;  %v9381_v50 = vor.u32 1.1754944e-38, %v9380_v33 }
 0x6bc   : > { %vm9379_vm12 = vcmp.eq.f32.partialorder %v9378_v44, 8.507059e+37  ;;  %vm9434_vm13 = vweird.f32 %v9323_v59 }
 0x6bd   : > { %v9441_v42 = vor.u32 1.1754944e-38, %v9440_v21  ;;  %vm9439_vm15 = vcmp.eq.f32.partialorder %v9438_v34, 8.507059e+37 }
 0x6bf   : > { %v15110_v10 = vpop.eup %15109 }
 0x6c0   : > { %v9370_v47 = vmul.f32 %v15110_v10, %v9319_v18  ;;  %vm9375_vm8 = vweird.f32 %v15110_v10 }
 0x6c1   : > { %v15112_v41 = vpop.eup %15111  ;;  %vm9376_vm11 = vmor %vm9374_vm9, %vm9375_vm8 }
 0x6c2   : > { %v9371_v56 = vsub.f32 1.0, %v9370_v47  ;;  %v9430_v29 = vmul.f32 %v15112_v41, %v9323_v59  ;;  %vm9435_vm10 = vweird.f32 %v15112_v41 }
 0x6c3   : > { %vm9436_vm14 = vmor %vm9434_vm13, %vm9435_vm10 }
 0x6c4   : > { %v9372_v48 = vmul.f32 %v15110_v10, %v9371_v56  ;;  %v9431_v31 = vsub.f32 1.0, %v9430_v29 }
 0x6c6   : > { %v9373_v55 = vadd.f32 %v15110_v10, %v9372_v48  ;;  %v9432_v16 = vmul.f32 %v15112_v41, %v9431_v31 }
 0x6c8   : > { %v9377_v58 = vsel %vm9376_vm11, %v15110_v10, %v9373_v55  ;;  %v9433_v60 = vadd.f32 %v15112_v41, %v9432_v16 }
 0x6c9   : > { %v9382_v52 = vsel %vm9379_vm12, %v9381_v50, %v9377_v58 }
 0x6ca   : > { %v9437_v40 = vsel %vm9436_vm14, %v15112_v41, %v9433_v60  ;;  %v9447_v39 = vmul.f32 %v9382_v52, %v9287_v32 }
 0x6cb   : > { %v9442_v45 = vsel %vm9439_vm15, %v9441_v42, %v9437_v40 }
 0x6cc   : > { %v9451_v37 = vmul.f32 %v9442_v45, %v9291_v63  ;;  %9455 = vst [vmem:[%s16325_s26 + $0x18] sm:$0xff] %v9447_v39 }
 0x6ce   : > { %9459 = vst [vmem:[%s16325_s26 + $0x38] sm:$0xff] %v9451_v37 }
 0x6cf PF: > { %s31_s29 = sadd.s32 1, %s15443_s29  }
 0x6d0   : > { %p28_p7 = scmp.ge.s32.totalorder %s31_s29, 4  }
 0x6d2   :  { %30 = sbr.rel (!%p28_p7) target bundleno = 10 (0xa), region = 160 }
 0x6d7   :  { %9505 = vsyncpa [#allocation3], 1 }
 0x6d8   :  { %9507 = vsyncpa [#allocation3 + $0x1], 1 }
 0x6d9   :  { %9508 = vsyncpa [#allocation5], 1 }
 0x6da   :  { %9509 = vsyncpa [#allocation8], 1 }
 0x6db   :  { %9510 = vsyncpa [#allocation11], 1 }
 0x6dc   :  { %9511 = vsyncpa [#allocation14], 1 }
 0x6dd   :  { %9512 = vsyncpa [#allocation17], 1 }

</bundles_post_ra>
